<compile_context>
chip_gen: v7x
topology: tpu7x:2x2x1
jax: 0.10.0
libtpu: 0.0.40
codegen_flags: <defaults>
</compile_context>

<pallas_src>
import jax
import jax.numpy as jnp
import numpy as np
from jax.experimental import pallas as pl
from jax.experimental.pallas import tpu as pltpu

EPS = 1e-5
LEFT = 8    # sublane-aligned left halo on the W axis (f32 tile = (8, 128))
RIGHT = 8   # right halo band rounded up so its zero-fill store is aligned too


def elan_kernel(x_ref, w1_ref, w2_ref, w3_ref, w5a_ref, w5b_ref, w5c_ref,
                out_ref, pad_ref):
    # x_ref   : (B, H, W, Cin)  f32  unpadded NHWC input
    # wN_ref  : (9, Cin, Cin)   bf16 3x3 weights, leading index = ky*3 + kx
    # w5*_ref : (Cin, Cout)     bf16 1x1 weight, split per concatenated branch
    # out_ref : (B*H*W, Cout)   f32  output slab (wrapper reshapes to NHWC)
    # pad_ref : (B, H+2, LEFT+W+RIGHT, Cin) f32 shared halo scratch (x->c1->c2)
    B, H, W, Cin = x_ref.shape
    Hp, Wp = H + 2, pad_ref.shape[2]
    N = B * H * W
    f32, bf16 = jnp.float32, jnp.bfloat16

    # --- zero the halo once with aligned stores (top/bottom rows + 8-wide
    #     column bands); the interior is fully overwritten before every conv.
    zrow = jnp.zeros((B, 1, Wp, Cin), f32)
    zcol = jnp.zeros((B, Hp, LEFT, Cin), f32)
    pad_ref[:, 0:1, :, :] = zrow
    pad_ref[:, Hp - 1:Hp, :, :] = zrow
    pad_ref[:, :, 0:LEFT, :] = zcol
    pad_ref[:, :, LEFT + W:LEFT + W + RIGHT, :] = zcol

    def bn_relu(y):  # (N, C) f32 -> training-mode BatchNorm2d + ReLU (f32)
        mean = jnp.mean(y, axis=0, keepdims=True)
        msq = jnp.mean(y * y, axis=0, keepdims=True)
        var = jnp.maximum(msq - mean * mean, 0.0)   # clamp: no NaN on cancellation
        return jnp.maximum((y - mean) * jax.lax.rsqrt(var + EPS), 0.0)

    def conv3x3(w_ref):
        # 9 accumulated bf16 MXU dots straight off the padded scratch
        # (no materialized im2col patch, no lane-concat relayout).
        acc = None
        for k in range(9):
            ky, kx = divmod(k, 3)
            tap = pad_ref[:, ky:ky + H, LEFT - 1 + kx:LEFT - 1 + kx + W, :]
            d = jnp.dot(tap.reshape(N, Cin).astype(bf16), w_ref[k],
                        preferred_element_type=f32)
            acc = d if acc is None else acc + d
        return acc

    def stage(act):  # write an activation into the (8,128)-aligned interior
        pad_ref[:, 1:H + 1, LEFT:LEFT + W, :] = act.reshape(B, H, W, Cin)

    stage(x_ref[...])

    # c1 = ConvBlock(x); fold its 1x1-conv contribution immediately
    c1 = bn_relu(conv3x3(w1_ref))
    acc5 = jnp.dot(c1.astype(bf16), w5a_ref[...], preferred_element_type=f32)
    stage(c1)

    # c2 = ConvBlock(c1)
    c2 = bn_relu(conv3x3(w2_ref))
    acc5 = acc5 + jnp.dot(c2.astype(bf16), w5b_ref[...],
                          preferred_element_type=f32)
    stage(c2)

    # c3 = ConvBlock(c2)
    c3 = bn_relu(conv3x3(w3_ref))
    acc5 = acc5 + jnp.dot(c3.astype(bf16), w5c_ref[...],
                          preferred_element_type=f32)

    # c5 = ConvBlock1x1(concat([c1, c2, c3]))  (concat realised as the 3 dots)
    out_ref[...] = bn_relu(acc5)


def elan_block(x_nchw, params):
    """ELanBlock forward. x_nchw: (B, Cin, H, W) -> (B, Cout, H, W)."""
    B, Cin, H, W = x_nchw.shape
    Cout = params["w5"].shape[-1]
    bf16 = jnp.bfloat16

    x = jnp.transpose(x_nchw, (0, 2, 3, 1)).astype(jnp.float32)      # NHWC
    # 3x3 weights staged as (9, Cin, Cin) bf16; leading index = ky*3 + kx,
    # matching the HWIO reference layout.
    w1 = params["w1"].reshape(9, Cin, Cin).astype(bf16)
    w2 = params["w2"].reshape(9, Cin, Cin).astype(bf16)
    w3 = params["w3"].reshape(9, Cin, Cin).astype(bf16)
    # 1x1 conv weight split per concatenated branch (bf16).
    w5a = params["w5"][0 * Cin:1 * Cin].astype(bf16)
    w5b = params["w5"][1 * Cin:2 * Cin].astype(bf16)
    w5c = params["w5"][2 * Cin:3 * Cin].astype(bf16)
    # biases b1/b2/b3/b5 are NOT passed: exactly cancelled by training-mode BN.

    N = B * H * W
    pad_shape = (B, H + 2, LEFT + W + RIGHT, Cin)
    # explicit VMEM budget (resident set x headroom), capped at v7x physical.
    resident_bytes = (x.size * 4 + N * Cout * 4
                      + int(np.prod(pad_shape)) * 4
                      + (w1.size + w2.size + w3.size) * 2
                      + (w5a.size + w5b.size + w5c.size) * 2)
    vmem_limit = int(min(max(4 * resident_bytes, 16 << 20), 64 << 20))

    out2d = pl.pallas_call(
        elan_kernel,
        out_shape=jax.ShapeDtypeStruct((N, Cout), jnp.float32),
        in_specs=[pl.BlockSpec(memory_space=pltpu.MemorySpace.VMEM)] * 7,
        out_specs=pl.BlockSpec(memory_space=pltpu.MemorySpace.VMEM),
        scratch_shapes=[pltpu.VMEM(pad_shape, jnp.float32)],
        compiler_params=pltpu.CompilerParams(vmem_limit_bytes=vmem_limit),
    )(x, w1, w2, w3, w5a, w5b, w5c)

    out_nhwc = out2d.reshape(B, H, W, Cout)         # free metadata reshape
    return jnp.transpose(out_nhwc, (0, 3, 1, 2))    # back to NCHW


# ----------------------------- pure-JAX references ----------------------------
def _ref_bn_relu(y):
    mean = y.mean(axis=(0, 1, 2), keepdims=True)
    var = jnp.square(y - mean).mean(axis=(0, 1, 2), keepdims=True)
    return jnp.maximum((y - mean) / jnp.sqrt(var + EPS), 0.0)


def _ref_conv3x3(x, w, b, dt):  # x NHWC, w (3,3,Ci,Co), b (1,Co)
    y = jax.lax.conv_general_dilated(
        x.astype(dt), w.astype(dt), window_strides=(1, 1), padding="SAME",
        dimension_numbers=("NHWC", "HWIO", "NHWC"),
        preferred_element_type=jnp.float32) + b.reshape(1, 1, 1, -1)
    return _ref_bn_relu(y)


def elan_block_ref(x_nchw, p, matmul_dtype=jnp.float32):
    """Reference forward.  matmul_dtype=bfloat16 mirrors the kernel's bf16 MXU
    feeds (f32 accumulation / f32 BN); matmul_dtype=float32 is the module's
    plain f32 semantics."""
    dt = matmul_dtype
    x = jnp.transpose(x_nchw, (0, 2, 3, 1)).astype(jnp.float32)
    c1 = _ref_conv3x3(x, p["w1"], p["b1"], dt)
    c2 = _ref_conv3x3(c1, p["w2"], p["b2"], dt)
    c3 = _ref_conv3x3(c2, p["w3"], p["b3"], dt)
    cat = jnp.concatenate([c1, c2, c3], axis=-1)
    y = jnp.einsum("bhwc,co->bhwo", cat.astype(dt), p["w5"].astype(dt),
                   preferred_element_type=jnp.float32) + p["b5"].reshape(1, 1, 1, -1)
    return jnp.transpose(_ref_bn_relu(y), (0, 3, 1, 2))


# ------------------------------------ main ------------------------------------
if __name__ == "__main__":
    B, Cin, H, W = 2, 4, 16, 16
    Cout = 8

    key = jax.random.PRNGKey(0)
    ks = jax.random.split(key, 9)
    params = {
        "w1": 0.1 * jax.random.normal(ks[0], (3, 3, Cin, Cin), jnp.float32),
        "b1": 0.1 * jax.random.normal(ks[1], (1, Cin), jnp.float32),
        "w2": 0.1 * jax.random.normal(ks[2], (3, 3, Cin, Cin), jnp.float32),
        "b2": 0.1 * jax.random.normal(ks[3], (1, Cin), jnp.float32),
        "w3": 0.1 * jax.random.normal(ks[4], (3, 3, Cin, Cin), jnp.float32),
        "b3": 0.1 * jax.random.normal(ks[5], (1, Cin), jnp.float32),
        "w5": 0.1 * jax.random.normal(ks[6], (3 * Cin, Cout), jnp.float32),
        "b5": 0.1 * jax.random.normal(ks[7], (1, Cout), jnp.float32),
    }
    x = jax.random.normal(ks[8], (B, Cin, H, W), jnp.float32)

    out = jax.block_until_ready(elan_block(x, params))
    assert out.shape == (B, Cout, H, W), out.shape

    # matched-precision reference: bf16 matmul operands, f32 accumulation/BN.
    ref_bf16 = jax.block_until_ready(
        elan_block_ref(x, params, matmul_dtype=jnp.bfloat16))
    np.testing.assert_allclose(np.asarray(out), np.asarray(ref_bf16),
                               rtol=2e-2, atol=2e-2)

    # plain-f32 module semantics (bf16 MXU feed -> ~1e-2-level deviation).
    ref_f32 = jax.block_until_ready(
        elan_block_ref(x, params, matmul_dtype=jnp.float32))
    np.testing.assert_allclose(np.asarray(out), np.asarray(ref_f32),
                               rtol=1e-1, atol=1e-1)

    print("KERNEL_OK")
</pallas_src>

<mosaic_0001>
module attributes {stable_mosaic.version = 11 : i64} {
  func.func @elan_kernel(%arg0: memref<2x16x16x4xf32, #tpu.memory_space<vmem>>, %arg1: memref<9x4x4xbf16, #tpu.memory_space<vmem>>, %arg2: memref<9x4x4xbf16, #tpu.memory_space<vmem>>, %arg3: memref<9x4x4xbf16, #tpu.memory_space<vmem>>, %arg4: memref<4x8xbf16, #tpu.memory_space<vmem>>, %arg5: memref<4x8xbf16, #tpu.memory_space<vmem>>, %arg6: memref<4x8xbf16, #tpu.memory_space<vmem>>, %arg7: memref<512x8xf32, #tpu.memory_space<vmem>>, %arg8: memref<2x18x32x4xf32, #tpu.memory_space<vmem>>) attributes {dimension_semantics = [], scalar_prefetch = 0 : i64, scratch_operands = 1 : i64, tpu.core_type = #tpu.core_type<tc>} {
    %cst = arith.constant 0.000000e+00 : f32
    %0 = vector.broadcast %cst : f32 to vector<2x1x32x4xf32>
    %cst_0 = arith.constant 0.000000e+00 : f32
    %1 = vector.broadcast %cst_0 : f32 to vector<2x18x8x4xf32>
    %c0 = arith.constant 0 : index
    %c0_1 = arith.constant 0 : index
    %c0_2 = arith.constant 0 : index
    %c0_3 = arith.constant 0 : index
    %2 = vector.load %arg8[%c0, %c0_1, %c0_2, %c0_3] : memref<2x18x32x4xf32, #tpu.memory_space<vmem>>, vector<2x1x32x4xf32>
    tpu.vector_store %arg8[%c0, %c0_1, %c0_2, %c0_3], %0 {strides = array<i32>} : memref<2x18x32x4xf32, #tpu.memory_space<vmem>>, vector<2x1x32x4xf32>,
    %c0_4 = arith.constant 0 : index
    %c17 = arith.constant 17 : index
    %c0_5 = arith.constant 0 : index
    %c0_6 = arith.constant 0 : index
    %3 = vector.load %arg8[%c0_4, %c17, %c0_5, %c0_6] : memref<2x18x32x4xf32, #tpu.memory_space<vmem>>, vector<2x1x32x4xf32>
    tpu.vector_store %arg8[%c0_4, %c17, %c0_5, %c0_6], %0 {strides = array<i32>} : memref<2x18x32x4xf32, #tpu.memory_space<vmem>>, vector<2x1x32x4xf32>,
    %c0_7 = arith.constant 0 : index
    %c0_8 = arith.constant 0 : index
    %c0_9 = arith.constant 0 : index
    %c0_10 = arith.constant 0 : index
    %4 = vector.load %arg8[%c0_7, %c0_8, %c0_9, %c0_10] : memref<2x18x32x4xf32, #tpu.memory_space<vmem>>, vector<2x18x8x4xf32>
    tpu.vector_store %arg8[%c0_7, %c0_8, %c0_9, %c0_10], %1 {strides = array<i32>} : memref<2x18x32x4xf32, #tpu.memory_space<vmem>>, vector<2x18x8x4xf32>,
    %c0_11 = arith.constant 0 : index
    %c0_12 = arith.constant 0 : index
    %c24 = arith.constant 24 : index
    %c0_13 = arith.constant 0 : index
    %5 = vector.load %arg8[%c0_11, %c0_12, %c24, %c0_13] : memref<2x18x32x4xf32, #tpu.memory_space<vmem>>, vector<2x18x8x4xf32>
    tpu.vector_store %arg8[%c0_11, %c0_12, %c24, %c0_13], %1 {strides = array<i32>} : memref<2x18x32x4xf32, #tpu.memory_space<vmem>>, vector<2x18x8x4xf32>,
    %c0_14 = arith.constant 0 : index
    %c0_15 = arith.constant 0 : index
    %c0_16 = arith.constant 0 : index
    %c0_17 = arith.constant 0 : index
    %6 = vector.load %arg0[%c0_14, %c0_15, %c0_16, %c0_17] : memref<2x16x16x4xf32, #tpu.memory_space<vmem>>, vector<2x16x16x4xf32>
    %c0_18 = arith.constant 0 : index
    %c1 = arith.constant 1 : index
    %c8 = arith.constant 8 : index
    %c0_19 = arith.constant 0 : index
    %7 = vector.load %arg8[%c0_18, %c1, %c8, %c0_19] : memref<2x18x32x4xf32, #tpu.memory_space<vmem>>, vector<2x16x16x4xf32>
    tpu.vector_store %arg8[%c0_18, %c1, %c8, %c0_19], %6 {strides = array<i32>} : memref<2x18x32x4xf32, #tpu.memory_space<vmem>>, vector<2x16x16x4xf32>,
    %c0_20 = arith.constant 0 : index
    %c0_21 = arith.constant 0 : index
    %c7 = arith.constant 7 : index
    %c0_22 = arith.constant 0 : index
    %8 = vector.load %arg8[%c0_20, %c0_21, %c7, %c0_22] : memref<2x18x32x4xf32, #tpu.memory_space<vmem>>, vector<2x16x16x4xf32>
    %9 = vector.shape_cast %8 : vector<2x16x16x4xf32> to vector<512x4xf32>
    %10 = arith.truncf %9 : vector<512x4xf32> to vector<512x4xbf16>
    %c0_23 = arith.constant 0 : index
    %c0_24 = arith.constant 0 : index
    %c0_25 = arith.constant 0 : index
    %11 = vector.load %arg1[%c0_23, %c0_24, %c0_25] : memref<9x4x4xbf16, #tpu.memory_space<vmem>>, vector<1x4x4xbf16>
    %12 = vector.shape_cast %11 : vector<1x4x4xbf16> to vector<4x4xbf16>
    %cst_26 = arith.constant dense<0.000000e+00> : vector<512x4xf32>
    %13 = tpu.matmul %10, %12, %cst_26 {dimension_numbers = #tpu.dot_dimension_numbers<[1], [0], [0], [1], [0, 0, 1, 1], [], []>} : vector<512x4xbf16>, vector<4x4xbf16>, vector<512x4xf32> -> vector<512x4xf32>
    %c0_27 = arith.constant 0 : index
    %c0_28 = arith.constant 0 : index
    %c8_29 = arith.constant 8 : index
    %c0_30 = arith.constant 0 : index
    %14 = vector.load %arg8[%c0_27, %c0_28, %c8_29, %c0_30] : memref<2x18x32x4xf32, #tpu.memory_space<vmem>>, vector<2x16x16x4xf32>
    %15 = vector.shape_cast %14 : vector<2x16x16x4xf32> to vector<512x4xf32>
    %16 = arith.truncf %15 : vector<512x4xf32> to vector<512x4xbf16>
    %c1_31 = arith.constant 1 : index
    %c0_32 = arith.constant 0 : index
    %c0_33 = arith.constant 0 : index
    %17 = vector.load %arg1[%c1_31, %c0_32, %c0_33] : memref<9x4x4xbf16, #tpu.memory_space<vmem>>, vector<1x4x4xbf16>
    %18 = vector.shape_cast %17 : vector<1x4x4xbf16> to vector<4x4xbf16>
    %cst_34 = arith.constant dense<0.000000e+00> : vector<512x4xf32>
    %19 = tpu.matmul %16, %18, %cst_34 {dimension_numbers = #tpu.dot_dimension_numbers<[1], [0], [0], [1], [0, 0, 1, 1], [], []>} : vector<512x4xbf16>, vector<4x4xbf16>, vector<512x4xf32> -> vector<512x4xf32>
    %20 = arith.addf %13, %19 : vector<512x4xf32>
    %c0_35 = arith.constant 0 : index
    %c0_36 = arith.constant 0 : index
    %c9 = arith.constant 9 : index
    %c0_37 = arith.constant 0 : index
    %21 = vector.load %arg8[%c0_35, %c0_36, %c9, %c0_37] : memref<2x18x32x4xf32, #tpu.memory_space<vmem>>, vector<2x16x16x4xf32>
    %22 = vector.shape_cast %21 : vector<2x16x16x4xf32> to vector<512x4xf32>
    %23 = arith.truncf %22 : vector<512x4xf32> to vector<512x4xbf16>
    %c2 = arith.constant 2 : index
    %c0_38 = arith.constant 0 : index
    %c0_39 = arith.constant 0 : index
    %24 = vector.load %arg1[%c2, %c0_38, %c0_39] : memref<9x4x4xbf16, #tpu.memory_space<vmem>>, vector<1x4x4xbf16>
    %25 = vector.shape_cast %24 : vector<1x4x4xbf16> to vector<4x4xbf16>
    %cst_40 = arith.constant dense<0.000000e+00> : vector<512x4xf32>
    %26 = tpu.matmul %23, %25, %cst_40 {dimension_numbers = #tpu.dot_dimension_numbers<[1], [0], [0], [1], [0, 0, 1, 1], [], []>} : vector<512x4xbf16>, vector<4x4xbf16>, vector<512x4xf32> -> vector<512x4xf32>
    %27 = arith.addf %20, %26 : vector<512x4xf32>
    %c0_41 = arith.constant 0 : index
    %c1_42 = arith.constant 1 : index
    %c7_43 = arith.constant 7 : index
    %c0_44 = arith.constant 0 : index
    %28 = vector.load %arg8[%c0_41, %c1_42, %c7_43, %c0_44] : memref<2x18x32x4xf32, #tpu.memory_space<vmem>>, vector<2x16x16x4xf32>
    %29 = vector.shape_cast %28 : vector<2x16x16x4xf32> to vector<512x4xf32>
    %30 = arith.truncf %29 : vector<512x4xf32> to vector<512x4xbf16>
    %c3 = arith.constant 3 : index
    %c0_45 = arith.constant 0 : index
    %c0_46 = arith.constant 0 : index
    %31 = vector.load %arg1[%c3, %c0_45, %c0_46] : memref<9x4x4xbf16, #tpu.memory_space<vmem>>, vector<1x4x4xbf16>
    %32 = vector.shape_cast %31 : vector<1x4x4xbf16> to vector<4x4xbf16>
    %cst_47 = arith.constant dense<0.000000e+00> : vector<512x4xf32>
    %33 = tpu.matmul %30, %32, %cst_47 {dimension_numbers = #tpu.dot_dimension_numbers<[1], [0], [0], [1], [0, 0, 1, 1], [], []>} : vector<512x4xbf16>, vector<4x4xbf16>, vector<512x4xf32> -> vector<512x4xf32>
    %34 = arith.addf %27, %33 : vector<512x4xf32>
    %c0_48 = arith.constant 0 : index
    %c1_49 = arith.constant 1 : index
    %c8_50 = arith.constant 8 : index
    %c0_51 = arith.constant 0 : index
    %35 = vector.load %arg8[%c0_48, %c1_49, %c8_50, %c0_51] : memref<2x18x32x4xf32, #tpu.memory_space<vmem>>, vector<2x16x16x4xf32>
    %36 = vector.shape_cast %35 : vector<2x16x16x4xf32> to vector<512x4xf32>
    %37 = arith.truncf %36 : vector<512x4xf32> to vector<512x4xbf16>
    %c4 = arith.constant 4 : index
    %c0_52 = arith.constant 0 : index
    %c0_53 = arith.constant 0 : index
    %38 = vector.load %arg1[%c4, %c0_52, %c0_53] : memref<9x4x4xbf16, #tpu.memory_space<vmem>>, vector<1x4x4xbf16>
    %39 = vector.shape_cast %38 : vector<1x4x4xbf16> to vector<4x4xbf16>
    %cst_54 = arith.constant dense<0.000000e+00> : vector<512x4xf32>
    %40 = tpu.matmul %37, %39, %cst_54 {dimension_numbers = #tpu.dot_dimension_numbers<[1], [0], [0], [1], [0, 0, 1, 1], [], []>} : vector<512x4xbf16>, vector<4x4xbf16>, vector<512x4xf32> -> vector<512x4xf32>
    %41 = arith.addf %34, %40 : vector<512x4xf32>
    %c0_55 = arith.constant 0 : index
    %c1_56 = arith.constant 1 : index
    %c9_57 = arith.constant 9 : index
    %c0_58 = arith.constant 0 : index
    %42 = vector.load %arg8[%c0_55, %c1_56, %c9_57, %c0_58] : memref<2x18x32x4xf32, #tpu.memory_space<vmem>>, vector<2x16x16x4xf32>
    %43 = vector.shape_cast %42 : vector<2x16x16x4xf32> to vector<512x4xf32>
    %44 = arith.truncf %43 : vector<512x4xf32> to vector<512x4xbf16>
    %c5 = arith.constant 5 : index
    %c0_59 = arith.constant 0 : index
    %c0_60 = arith.constant 0 : index
    %45 = vector.load %arg1[%c5, %c0_59, %c0_60] : memref<9x4x4xbf16, #tpu.memory_space<vmem>>, vector<1x4x4xbf16>
    %46 = vector.shape_cast %45 : vector<1x4x4xbf16> to vector<4x4xbf16>
    %cst_61 = arith.constant dense<0.000000e+00> : vector<512x4xf32>
    %47 = tpu.matmul %44, %46, %cst_61 {dimension_numbers = #tpu.dot_dimension_numbers<[1], [0], [0], [1], [0, 0, 1, 1], [], []>} : vector<512x4xbf16>, vector<4x4xbf16>, vector<512x4xf32> -> vector<512x4xf32>
    %48 = arith.addf %41, %47 : vector<512x4xf32>
    %c0_62 = arith.constant 0 : index
    %c2_63 = arith.constant 2 : index
    %c7_64 = arith.constant 7 : index
    %c0_65 = arith.constant 0 : index
    %49 = vector.load %arg8[%c0_62, %c2_63, %c7_64, %c0_65] : memref<2x18x32x4xf32, #tpu.memory_space<vmem>>, vector<2x16x16x4xf32>
    %50 = vector.shape_cast %49 : vector<2x16x16x4xf32> to vector<512x4xf32>
    %51 = arith.truncf %50 : vector<512x4xf32> to vector<512x4xbf16>
    %c6 = arith.constant 6 : index
    %c0_66 = arith.constant 0 : index
    %c0_67 = arith.constant 0 : index
    %52 = vector.load %arg1[%c6, %c0_66, %c0_67] : memref<9x4x4xbf16, #tpu.memory_space<vmem>>, vector<1x4x4xbf16>
    %53 = vector.shape_cast %52 : vector<1x4x4xbf16> to vector<4x4xbf16>
    %cst_68 = arith.constant dense<0.000000e+00> : vector<512x4xf32>
    %54 = tpu.matmul %51, %53, %cst_68 {dimension_numbers = #tpu.dot_dimension_numbers<[1], [0], [0], [1], [0, 0, 1, 1], [], []>} : vector<512x4xbf16>, vector<4x4xbf16>, vector<512x4xf32> -> vector<512x4xf32>
    %55 = arith.addf %48, %54 : vector<512x4xf32>
    %c0_69 = arith.constant 0 : index
    %c2_70 = arith.constant 2 : index
    %c8_71 = arith.constant 8 : index
    %c0_72 = arith.constant 0 : index
    %56 = vector.load %arg8[%c0_69, %c2_70, %c8_71, %c0_72] : memref<2x18x32x4xf32, #tpu.memory_space<vmem>>, vector<2x16x16x4xf32>
    %57 = vector.shape_cast %56 : vector<2x16x16x4xf32> to vector<512x4xf32>
    %58 = arith.truncf %57 : vector<512x4xf32> to vector<512x4xbf16>
    %c7_73 = arith.constant 7 : index
    %c0_74 = arith.constant 0 : index
    %c0_75 = arith.constant 0 : index
    %59 = vector.load %arg1[%c7_73, %c0_74, %c0_75] : memref<9x4x4xbf16, #tpu.memory_space<vmem>>, vector<1x4x4xbf16>
    %60 = vector.shape_cast %59 : vector<1x4x4xbf16> to vector<4x4xbf16>
    %cst_76 = arith.constant dense<0.000000e+00> : vector<512x4xf32>
    %61 = tpu.matmul %58, %60, %cst_76 {dimension_numbers = #tpu.dot_dimension_numbers<[1], [0], [0], [1], [0, 0, 1, 1], [], []>} : vector<512x4xbf16>, vector<4x4xbf16>, vector<512x4xf32> -> vector<512x4xf32>
    %62 = arith.addf %55, %61 : vector<512x4xf32>
    %c0_77 = arith.constant 0 : index
    %c2_78 = arith.constant 2 : index
    %c9_79 = arith.constant 9 : index
    %c0_80 = arith.constant 0 : index
    %63 = vector.load %arg8[%c0_77, %c2_78, %c9_79, %c0_80] : memref<2x18x32x4xf32, #tpu.memory_space<vmem>>, vector<2x16x16x4xf32>
    %64 = vector.shape_cast %63 : vector<2x16x16x4xf32> to vector<512x4xf32>
    %65 = arith.truncf %64 : vector<512x4xf32> to vector<512x4xbf16>
    %c8_81 = arith.constant 8 : index
    %c0_82 = arith.constant 0 : index
    %c0_83 = arith.constant 0 : index
    %66 = vector.load %arg1[%c8_81, %c0_82, %c0_83] : memref<9x4x4xbf16, #tpu.memory_space<vmem>>, vector<1x4x4xbf16>
    %67 = vector.shape_cast %66 : vector<1x4x4xbf16> to vector<4x4xbf16>
    %cst_84 = arith.constant dense<0.000000e+00> : vector<512x4xf32>
    %68 = tpu.matmul %65, %67, %cst_84 {dimension_numbers = #tpu.dot_dimension_numbers<[1], [0], [0], [1], [0, 0, 1, 1], [], []>} : vector<512x4xbf16>, vector<4x4xbf16>, vector<512x4xf32> -> vector<512x4xf32>
    %69 = arith.addf %62, %68 : vector<512x4xf32>
    %cst_85 = arith.constant dense<0.000000e+00> : vector<4xf32>
    %70 = vector.multi_reduction <add>, %69, %cst_85 [0] : vector<512x4xf32> to vector<4xf32>
    %71 = vector.shape_cast %70 : vector<4xf32> to vector<1x4xf32>
    %cst_86 = arith.constant 5.120000e+02 : f32
    %72 = vector.broadcast %cst_86 : f32 to vector<1x4xf32>
    %73 = arith.divf %71, %72 : vector<1x4xf32>
    %74 = arith.mulf %69, %69 : vector<512x4xf32>
    %cst_87 = arith.constant dense<0.000000e+00> : vector<4xf32>
    %75 = vector.multi_reduction <add>, %74, %cst_87 [0] : vector<512x4xf32> to vector<4xf32>
    %76 = vector.shape_cast %75 : vector<4xf32> to vector<1x4xf32>
    %cst_88 = arith.constant 5.120000e+02 : f32
    %77 = vector.broadcast %cst_88 : f32 to vector<1x4xf32>
    %78 = arith.divf %76, %77 : vector<1x4xf32>
    %79 = arith.mulf %73, %73 : vector<1x4xf32>
    %80 = arith.subf %78, %79 : vector<1x4xf32>
    %cst_89 = arith.constant 0.000000e+00 : f32
    %81 = vector.broadcast %cst_89 : f32 to vector<1x4xf32>
    %82 = arith.maximumf %80, %81 : vector<1x4xf32>
    %83 = vector.broadcast %73 : vector<1x4xf32> to vector<512x4xf32>
    %84 = arith.subf %69, %83 : vector<512x4xf32>
    %cst_90 = arith.constant 9.99999974E-6 : f32
    %85 = vector.broadcast %cst_90 : f32 to vector<1x4xf32>
    %86 = arith.addf %82, %85 : vector<1x4xf32>
    %87 = math.rsqrt %86 : vector<1x4xf32>
    %88 = vector.broadcast %87 : vector<1x4xf32> to vector<512x4xf32>
    %89 = arith.mulf %84, %88 : vector<512x4xf32>
    %cst_91 = arith.constant 0.000000e+00 : f32
    %90 = vector.broadcast %cst_91 : f32 to vector<512x4xf32>
    %91 = arith.maximumf %89, %90 : vector<512x4xf32>
    %92 = arith.truncf %91 : vector<512x4xf32> to vector<512x4xbf16>
    %c0_92 = arith.constant 0 : index
    %c0_93 = arith.constant 0 : index
    %93 = vector.load %arg4[%c0_92, %c0_93] : memref<4x8xbf16, #tpu.memory_space<vmem>>, vector<4x8xbf16>
    %cst_94 = arith.constant dense<0.000000e+00> : vector<512x8xf32>
    %94 = tpu.matmul %92, %93, %cst_94 {dimension_numbers = #tpu.dot_dimension_numbers<[1], [0], [0], [1], [0, 0, 1, 1], [], []>} : vector<512x4xbf16>, vector<4x8xbf16>, vector<512x8xf32> -> vector<512x8xf32>
    %95 = vector.shape_cast %91 : vector<512x4xf32> to vector<2x16x16x4xf32>
    %c0_95 = arith.constant 0 : index
    %c1_96 = arith.constant 1 : index
    %c8_97 = arith.constant 8 : index
    %c0_98 = arith.constant 0 : index
    %96 = vector.load %arg8[%c0_95, %c1_96, %c8_97, %c0_98] : memref<2x18x32x4xf32, #tpu.memory_space<vmem>>, vector<2x16x16x4xf32>
    tpu.vector_store %arg8[%c0_95, %c1_96, %c8_97, %c0_98], %95 {strides = array<i32>} : memref<2x18x32x4xf32, #tpu.memory_space<vmem>>, vector<2x16x16x4xf32>,
    %c0_99 = arith.constant 0 : index
    %c0_100 = arith.constant 0 : index
    %c7_101 = arith.constant 7 : index
    %c0_102 = arith.constant 0 : index
    %97 = vector.load %arg8[%c0_99, %c0_100, %c7_101, %c0_102] : memref<2x18x32x4xf32, #tpu.memory_space<vmem>>, vector<2x16x16x4xf32>
    %98 = vector.shape_cast %97 : vector<2x16x16x4xf32> to vector<512x4xf32>
    %99 = arith.truncf %98 : vector<512x4xf32> to vector<512x4xbf16>
    %c0_103 = arith.constant 0 : index
    %c0_104 = arith.constant 0 : index
    %c0_105 = arith.constant 0 : index
    %100 = vector.load %arg2[%c0_103, %c0_104, %c0_105] : memref<9x4x4xbf16, #tpu.memory_space<vmem>>, vector<1x4x4xbf16>
    %101 = vector.shape_cast %100 : vector<1x4x4xbf16> to vector<4x4xbf16>
    %cst_106 = arith.constant dense<0.000000e+00> : vector<512x4xf32>
    %102 = tpu.matmul %99, %101, %cst_106 {dimension_numbers = #tpu.dot_dimension_numbers<[1], [0], [0], [1], [0, 0, 1, 1], [], []>} : vector<512x4xbf16>, vector<4x4xbf16>, vector<512x4xf32> -> vector<512x4xf32>
    %c0_107 = arith.constant 0 : index
    %c0_108 = arith.constant 0 : index
    %c8_109 = arith.constant 8 : index
    %c0_110 = arith.constant 0 : index
    %103 = vector.load %arg8[%c0_107, %c0_108, %c8_109, %c0_110] : memref<2x18x32x4xf32, #tpu.memory_space<vmem>>, vector<2x16x16x4xf32>
    %104 = vector.shape_cast %103 : vector<2x16x16x4xf32> to vector<512x4xf32>
    %105 = arith.truncf %104 : vector<512x4xf32> to vector<512x4xbf16>
    %c1_111 = arith.constant 1 : index
    %c0_112 = arith.constant 0 : index
    %c0_113 = arith.constant 0 : index
    %106 = vector.load %arg2[%c1_111, %c0_112, %c0_113] : memref<9x4x4xbf16, #tpu.memory_space<vmem>>, vector<1x4x4xbf16>
    %107 = vector.shape_cast %106 : vector<1x4x4xbf16> to vector<4x4xbf16>
    %cst_114 = arith.constant dense<0.000000e+00> : vector<512x4xf32>
    %108 = tpu.matmul %105, %107, %cst_114 {dimension_numbers = #tpu.dot_dimension_numbers<[1], [0], [0], [1], [0, 0, 1, 1], [], []>} : vector<512x4xbf16>, vector<4x4xbf16>, vector<512x4xf32> -> vector<512x4xf32>
    %109 = arith.addf %102, %108 : vector<512x4xf32>
    %c0_115 = arith.constant 0 : index
    %c0_116 = arith.constant 0 : index
    %c9_117 = arith.constant 9 : index
    %c0_118 = arith.constant 0 : index
    %110 = vector.load %arg8[%c0_115, %c0_116, %c9_117, %c0_118] : memref<2x18x32x4xf32, #tpu.memory_space<vmem>>, vector<2x16x16x4xf32>
    %111 = vector.shape_cast %110 : vector<2x16x16x4xf32> to vector<512x4xf32>
    %112 = arith.truncf %111 : vector<512x4xf32> to vector<512x4xbf16>
    %c2_119 = arith.constant 2 : index
    %c0_120 = arith.constant 0 : index
    %c0_121 = arith.constant 0 : index
    %113 = vector.load %arg2[%c2_119, %c0_120, %c0_121] : memref<9x4x4xbf16, #tpu.memory_space<vmem>>, vector<1x4x4xbf16>
    %114 = vector.shape_cast %113 : vector<1x4x4xbf16> to vector<4x4xbf16>
    %cst_122 = arith.constant dense<0.000000e+00> : vector<512x4xf32>
    %115 = tpu.matmul %112, %114, %cst_122 {dimension_numbers = #tpu.dot_dimension_numbers<[1], [0], [0], [1], [0, 0, 1, 1], [], []>} : vector<512x4xbf16>, vector<4x4xbf16>, vector<512x4xf32> -> vector<512x4xf32>
    %116 = arith.addf %109, %115 : vector<512x4xf32>
    %c0_123 = arith.constant 0 : index
    %c1_124 = arith.constant 1 : index
    %c7_125 = arith.constant 7 : index
    %c0_126 = arith.constant 0 : index
    %117 = vector.load %arg8[%c0_123, %c1_124, %c7_125, %c0_126] : memref<2x18x32x4xf32, #tpu.memory_space<vmem>>, vector<2x16x16x4xf32>
    %118 = vector.shape_cast %117 : vector<2x16x16x4xf32> to vector<512x4xf32>
    %119 = arith.truncf %118 : vector<512x4xf32> to vector<512x4xbf16>
    %c3_127 = arith.constant 3 : index
    %c0_128 = arith.constant 0 : index
    %c0_129 = arith.constant 0 : index
    %120 = vector.load %arg2[%c3_127, %c0_128, %c0_129] : memref<9x4x4xbf16, #tpu.memory_space<vmem>>, vector<1x4x4xbf16>
    %121 = vector.shape_cast %120 : vector<1x4x4xbf16> to vector<4x4xbf16>
    %cst_130 = arith.constant dense<0.000000e+00> : vector<512x4xf32>
    %122 = tpu.matmul %119, %121, %cst_130 {dimension_numbers = #tpu.dot_dimension_numbers<[1], [0], [0], [1], [0, 0, 1, 1], [], []>} : vector<512x4xbf16>, vector<4x4xbf16>, vector<512x4xf32> -> vector<512x4xf32>
    %123 = arith.addf %116, %122 : vector<512x4xf32>
    %c0_131 = arith.constant 0 : index
    %c1_132 = arith.constant 1 : index
    %c8_133 = arith.constant 8 : index
    %c0_134 = arith.constant 0 : index
    %124 = vector.load %arg8[%c0_131, %c1_132, %c8_133, %c0_134] : memref<2x18x32x4xf32, #tpu.memory_space<vmem>>, vector<2x16x16x4xf32>
    %125 = vector.shape_cast %124 : vector<2x16x16x4xf32> to vector<512x4xf32>
    %126 = arith.truncf %125 : vector<512x4xf32> to vector<512x4xbf16>
    %c4_135 = arith.constant 4 : index
    %c0_136 = arith.constant 0 : index
    %c0_137 = arith.constant 0 : index
    %127 = vector.load %arg2[%c4_135, %c0_136, %c0_137] : memref<9x4x4xbf16, #tpu.memory_space<vmem>>, vector<1x4x4xbf16>
    %128 = vector.shape_cast %127 : vector<1x4x4xbf16> to vector<4x4xbf16>
    %cst_138 = arith.constant dense<0.000000e+00> : vector<512x4xf32>
    %129 = tpu.matmul %126, %128, %cst_138 {dimension_numbers = #tpu.dot_dimension_numbers<[1], [0], [0], [1], [0, 0, 1, 1], [], []>} : vector<512x4xbf16>, vector<4x4xbf16>, vector<512x4xf32> -> vector<512x4xf32>
    %130 = arith.addf %123, %129 : vector<512x4xf32>
    %c0_139 = arith.constant 0 : index
    %c1_140 = arith.constant 1 : index
    %c9_141 = arith.constant 9 : index
    %c0_142 = arith.constant 0 : index
    %131 = vector.load %arg8[%c0_139, %c1_140, %c9_141, %c0_142] : memref<2x18x32x4xf32, #tpu.memory_space<vmem>>, vector<2x16x16x4xf32>
    %132 = vector.shape_cast %131 : vector<2x16x16x4xf32> to vector<512x4xf32>
    %133 = arith.truncf %132 : vector<512x4xf32> to vector<512x4xbf16>
    %c5_143 = arith.constant 5 : index
    %c0_144 = arith.constant 0 : index
    %c0_145 = arith.constant 0 : index
    %134 = vector.load %arg2[%c5_143, %c0_144, %c0_145] : memref<9x4x4xbf16, #tpu.memory_space<vmem>>, vector<1x4x4xbf16>
    %135 = vector.shape_cast %134 : vector<1x4x4xbf16> to vector<4x4xbf16>
    %cst_146 = arith.constant dense<0.000000e+00> : vector<512x4xf32>
    %136 = tpu.matmul %133, %135, %cst_146 {dimension_numbers = #tpu.dot_dimension_numbers<[1], [0], [0], [1], [0, 0, 1, 1], [], []>} : vector<512x4xbf16>, vector<4x4xbf16>, vector<512x4xf32> -> vector<512x4xf32>
    %137 = arith.addf %130, %136 : vector<512x4xf32>
    %c0_147 = arith.constant 0 : index
    %c2_148 = arith.constant 2 : index
    %c7_149 = arith.constant 7 : index
    %c0_150 = arith.constant 0 : index
    %138 = vector.load %arg8[%c0_147, %c2_148, %c7_149, %c0_150] : memref<2x18x32x4xf32, #tpu.memory_space<vmem>>, vector<2x16x16x4xf32>
    %139 = vector.shape_cast %138 : vector<2x16x16x4xf32> to vector<512x4xf32>
    %140 = arith.truncf %139 : vector<512x4xf32> to vector<512x4xbf16>
    %c6_151 = arith.constant 6 : index
    %c0_152 = arith.constant 0 : index
    %c0_153 = arith.constant 0 : index
    %141 = vector.load %arg2[%c6_151, %c0_152, %c0_153] : memref<9x4x4xbf16, #tpu.memory_space<vmem>>, vector<1x4x4xbf16>
    %142 = vector.shape_cast %141 : vector<1x4x4xbf16> to vector<4x4xbf16>
    %cst_154 = arith.constant dense<0.000000e+00> : vector<512x4xf32>
    %143 = tpu.matmul %140, %142, %cst_154 {dimension_numbers = #tpu.dot_dimension_numbers<[1], [0], [0], [1], [0, 0, 1, 1], [], []>} : vector<512x4xbf16>, vector<4x4xbf16>, vector<512x4xf32> -> vector<512x4xf32>
    %144 = arith.addf %137, %143 : vector<512x4xf32>
    %c0_155 = arith.constant 0 : index
    %c2_156 = arith.constant 2 : index
    %c8_157 = arith.constant 8 : index
    %c0_158 = arith.constant 0 : index
    %145 = vector.load %arg8[%c0_155, %c2_156, %c8_157, %c0_158] : memref<2x18x32x4xf32, #tpu.memory_space<vmem>>, vector<2x16x16x4xf32>
    %146 = vector.shape_cast %145 : vector<2x16x16x4xf32> to vector<512x4xf32>
    %147 = arith.truncf %146 : vector<512x4xf32> to vector<512x4xbf16>
    %c7_159 = arith.constant 7 : index
    %c0_160 = arith.constant 0 : index
    %c0_161 = arith.constant 0 : index
    %148 = vector.load %arg2[%c7_159, %c0_160, %c0_161] : memref<9x4x4xbf16, #tpu.memory_space<vmem>>, vector<1x4x4xbf16>
    %149 = vector.shape_cast %148 : vector<1x4x4xbf16> to vector<4x4xbf16>
    %cst_162 = arith.constant dense<0.000000e+00> : vector<512x4xf32>
    %150 = tpu.matmul %147, %149, %cst_162 {dimension_numbers = #tpu.dot_dimension_numbers<[1], [0], [0], [1], [0, 0, 1, 1], [], []>} : vector<512x4xbf16>, vector<4x4xbf16>, vector<512x4xf32> -> vector<512x4xf32>
    %151 = arith.addf %144, %150 : vector<512x4xf32>
    %c0_163 = arith.constant 0 : index
    %c2_164 = arith.constant 2 : index
    %c9_165 = arith.constant 9 : index
    %c0_166 = arith.constant 0 : index
    %152 = vector.load %arg8[%c0_163, %c2_164, %c9_165, %c0_166] : memref<2x18x32x4xf32, #tpu.memory_space<vmem>>, vector<2x16x16x4xf32>
    %153 = vector.shape_cast %152 : vector<2x16x16x4xf32> to vector<512x4xf32>
    %154 = arith.truncf %153 : vector<512x4xf32> to vector<512x4xbf16>
    %c8_167 = arith.constant 8 : index
    %c0_168 = arith.constant 0 : index
    %c0_169 = arith.constant 0 : index
    %155 = vector.load %arg2[%c8_167, %c0_168, %c0_169] : memref<9x4x4xbf16, #tpu.memory_space<vmem>>, vector<1x4x4xbf16>
    %156 = vector.shape_cast %155 : vector<1x4x4xbf16> to vector<4x4xbf16>
    %cst_170 = arith.constant dense<0.000000e+00> : vector<512x4xf32>
    %157 = tpu.matmul %154, %156, %cst_170 {dimension_numbers = #tpu.dot_dimension_numbers<[1], [0], [0], [1], [0, 0, 1, 1], [], []>} : vector<512x4xbf16>, vector<4x4xbf16>, vector<512x4xf32> -> vector<512x4xf32>
    %158 = arith.addf %151, %157 : vector<512x4xf32>
    %cst_171 = arith.constant dense<0.000000e+00> : vector<4xf32>
    %159 = vector.multi_reduction <add>, %158, %cst_171 [0] : vector<512x4xf32> to vector<4xf32>
    %160 = vector.shape_cast %159 : vector<4xf32> to vector<1x4xf32>
    %cst_172 = arith.constant 5.120000e+02 : f32
    %161 = vector.broadcast %cst_172 : f32 to vector<1x4xf32>
    %162 = arith.divf %160, %161 : vector<1x4xf32>
    %163 = arith.mulf %158, %158 : vector<512x4xf32>
    %cst_173 = arith.constant dense<0.000000e+00> : vector<4xf32>
    %164 = vector.multi_reduction <add>, %163, %cst_173 [0] : vector<512x4xf32> to vector<4xf32>
    %165 = vector.shape_cast %164 : vector<4xf32> to vector<1x4xf32>
    %cst_174 = arith.constant 5.120000e+02 : f32
    %166 = vector.broadcast %cst_174 : f32 to vector<1x4xf32>
    %167 = arith.divf %165, %166 : vector<1x4xf32>
    %168 = arith.mulf %162, %162 : vector<1x4xf32>
    %169 = arith.subf %167, %168 : vector<1x4xf32>
    %cst_175 = arith.constant 0.000000e+00 : f32
    %170 = vector.broadcast %cst_175 : f32 to vector<1x4xf32>
    %171 = arith.maximumf %169, %170 : vector<1x4xf32>
    %172 = vector.broadcast %162 : vector<1x4xf32> to vector<512x4xf32>
    %173 = arith.subf %158, %172 : vector<512x4xf32>
    %cst_176 = arith.constant 9.99999974E-6 : f32
    %174 = vector.broadcast %cst_176 : f32 to vector<1x4xf32>
    %175 = arith.addf %171, %174 : vector<1x4xf32>
    %176 = math.rsqrt %175 : vector<1x4xf32>
    %177 = vector.broadcast %176 : vector<1x4xf32> to vector<512x4xf32>
    %178 = arith.mulf %173, %177 : vector<512x4xf32>
    %cst_177 = arith.constant 0.000000e+00 : f32
    %179 = vector.broadcast %cst_177 : f32 to vector<512x4xf32>
    %180 = arith.maximumf %178, %179 : vector<512x4xf32>
    %181 = arith.truncf %180 : vector<512x4xf32> to vector<512x4xbf16>
    %c0_178 = arith.constant 0 : index
    %c0_179 = arith.constant 0 : index
    %182 = vector.load %arg5[%c0_178, %c0_179] : memref<4x8xbf16, #tpu.memory_space<vmem>>, vector<4x8xbf16>
    %cst_180 = arith.constant dense<0.000000e+00> : vector<512x8xf32>
    %183 = tpu.matmul %181, %182, %cst_180 {dimension_numbers = #tpu.dot_dimension_numbers<[1], [0], [0], [1], [0, 0, 1, 1], [], []>} : vector<512x4xbf16>, vector<4x8xbf16>, vector<512x8xf32> -> vector<512x8xf32>
    %184 = arith.addf %94, %183 : vector<512x8xf32>
    %185 = vector.shape_cast %180 : vector<512x4xf32> to vector<2x16x16x4xf32>
    %c0_181 = arith.constant 0 : index
    %c1_182 = arith.constant 1 : index
    %c8_183 = arith.constant 8 : index
    %c0_184 = arith.constant 0 : index
    %186 = vector.load %arg8[%c0_181, %c1_182, %c8_183, %c0_184] : memref<2x18x32x4xf32, #tpu.memory_space<vmem>>, vector<2x16x16x4xf32>
    tpu.vector_store %arg8[%c0_181, %c1_182, %c8_183, %c0_184], %185 {strides = array<i32>} : memref<2x18x32x4xf32, #tpu.memory_space<vmem>>, vector<2x16x16x4xf32>,
    %c0_185 = arith.constant 0 : index
    %c0_186 = arith.constant 0 : index
    %c7_187 = arith.constant 7 : index
    %c0_188 = arith.constant 0 : index
    %187 = vector.load %arg8[%c0_185, %c0_186, %c7_187, %c0_188] : memref<2x18x32x4xf32, #tpu.memory_space<vmem>>, vector<2x16x16x4xf32>
    %188 = vector.shape_cast %187 : vector<2x16x16x4xf32> to vector<512x4xf32>
    %189 = arith.truncf %188 : vector<512x4xf32> to vector<512x4xbf16>
    %c0_189 = arith.constant 0 : index
    %c0_190 = arith.constant 0 : index
    %c0_191 = arith.constant 0 : index
    %190 = vector.load %arg3[%c0_189, %c0_190, %c0_191] : memref<9x4x4xbf16, #tpu.memory_space<vmem>>, vector<1x4x4xbf16>
    %191 = vector.shape_cast %190 : vector<1x4x4xbf16> to vector<4x4xbf16>
    %cst_192 = arith.constant dense<0.000000e+00> : vector<512x4xf32>
    %192 = tpu.matmul %189, %191, %cst_192 {dimension_numbers = #tpu.dot_dimension_numbers<[1], [0], [0], [1], [0, 0, 1, 1], [], []>} : vector<512x4xbf16>, vector<4x4xbf16>, vector<512x4xf32> -> vector<512x4xf32>
    %c0_193 = arith.constant 0 : index
    %c0_194 = arith.constant 0 : index
    %c8_195 = arith.constant 8 : index
    %c0_196 = arith.constant 0 : index
    %193 = vector.load %arg8[%c0_193, %c0_194, %c8_195, %c0_196] : memref<2x18x32x4xf32, #tpu.memory_space<vmem>>, vector<2x16x16x4xf32>
    %194 = vector.shape_cast %193 : vector<2x16x16x4xf32> to vector<512x4xf32>
    %195 = arith.truncf %194 : vector<512x4xf32> to vector<512x4xbf16>
    %c1_197 = arith.constant 1 : index
    %c0_198 = arith.constant 0 : index
    %c0_199 = arith.constant 0 : index
    %196 = vector.load %arg3[%c1_197, %c0_198, %c0_199] : memref<9x4x4xbf16, #tpu.memory_space<vmem>>, vector<1x4x4xbf16>
    %197 = vector.shape_cast %196 : vector<1x4x4xbf16> to vector<4x4xbf16>
    %cst_200 = arith.constant dense<0.000000e+00> : vector<512x4xf32>
    %198 = tpu.matmul %195, %197, %cst_200 {dimension_numbers = #tpu.dot_dimension_numbers<[1], [0], [0], [1], [0, 0, 1, 1], [], []>} : vector<512x4xbf16>, vector<4x4xbf16>, vector<512x4xf32> -> vector<512x4xf32>
    %199 = arith.addf %192, %198 : vector<512x4xf32>
    %c0_201 = arith.constant 0 : index
    %c0_202 = arith.constant 0 : index
    %c9_203 = arith.constant 9 : index
    %c0_204 = arith.constant 0 : index
    %200 = vector.load %arg8[%c0_201, %c0_202, %c9_203, %c0_204] : memref<2x18x32x4xf32, #tpu.memory_space<vmem>>, vector<2x16x16x4xf32>
    %201 = vector.shape_cast %200 : vector<2x16x16x4xf32> to vector<512x4xf32>
    %202 = arith.truncf %201 : vector<512x4xf32> to vector<512x4xbf16>
    %c2_205 = arith.constant 2 : index
    %c0_206 = arith.constant 0 : index
    %c0_207 = arith.constant 0 : index
    %203 = vector.load %arg3[%c2_205, %c0_206, %c0_207] : memref<9x4x4xbf16, #tpu.memory_space<vmem>>, vector<1x4x4xbf16>
    %204 = vector.shape_cast %203 : vector<1x4x4xbf16> to vector<4x4xbf16>
    %cst_208 = arith.constant dense<0.000000e+00> : vector<512x4xf32>
    %205 = tpu.matmul %202, %204, %cst_208 {dimension_numbers = #tpu.dot_dimension_numbers<[1], [0], [0], [1], [0, 0, 1, 1], [], []>} : vector<512x4xbf16>, vector<4x4xbf16>, vector<512x4xf32> -> vector<512x4xf32>
    %206 = arith.addf %199, %205 : vector<512x4xf32>
    %c0_209 = arith.constant 0 : index
    %c1_210 = arith.constant 1 : index
    %c7_211 = arith.constant 7 : index
    %c0_212 = arith.constant 0 : index
    %207 = vector.load %arg8[%c0_209, %c1_210, %c7_211, %c0_212] : memref<2x18x32x4xf32, #tpu.memory_space<vmem>>, vector<2x16x16x4xf32>
    %208 = vector.shape_cast %207 : vector<2x16x16x4xf32> to vector<512x4xf32>
    %209 = arith.truncf %208 : vector<512x4xf32> to vector<512x4xbf16>
    %c3_213 = arith.constant 3 : index
    %c0_214 = arith.constant 0 : index
    %c0_215 = arith.constant 0 : index
    %210 = vector.load %arg3[%c3_213, %c0_214, %c0_215] : memref<9x4x4xbf16, #tpu.memory_space<vmem>>, vector<1x4x4xbf16>
    %211 = vector.shape_cast %210 : vector<1x4x4xbf16> to vector<4x4xbf16>
    %cst_216 = arith.constant dense<0.000000e+00> : vector<512x4xf32>
    %212 = tpu.matmul %209, %211, %cst_216 {dimension_numbers = #tpu.dot_dimension_numbers<[1], [0], [0], [1], [0, 0, 1, 1], [], []>} : vector<512x4xbf16>, vector<4x4xbf16>, vector<512x4xf32> -> vector<512x4xf32>
    %213 = arith.addf %206, %212 : vector<512x4xf32>
    %c0_217 = arith.constant 0 : index
    %c1_218 = arith.constant 1 : index
    %c8_219 = arith.constant 8 : index
    %c0_220 = arith.constant 0 : index
    %214 = vector.load %arg8[%c0_217, %c1_218, %c8_219, %c0_220] : memref<2x18x32x4xf32, #tpu.memory_space<vmem>>, vector<2x16x16x4xf32>
    %215 = vector.shape_cast %214 : vector<2x16x16x4xf32> to vector<512x4xf32>
    %216 = arith.truncf %215 : vector<512x4xf32> to vector<512x4xbf16>
    %c4_221 = arith.constant 4 : index
    %c0_222 = arith.constant 0 : index
    %c0_223 = arith.constant 0 : index
    %217 = vector.load %arg3[%c4_221, %c0_222, %c0_223] : memref<9x4x4xbf16, #tpu.memory_space<vmem>>, vector<1x4x4xbf16>
    %218 = vector.shape_cast %217 : vector<1x4x4xbf16> to vector<4x4xbf16>
    %cst_224 = arith.constant dense<0.000000e+00> : vector<512x4xf32>
    %219 = tpu.matmul %216, %218, %cst_224 {dimension_numbers = #tpu.dot_dimension_numbers<[1], [0], [0], [1], [0, 0, 1, 1], [], []>} : vector<512x4xbf16>, vector<4x4xbf16>, vector<512x4xf32> -> vector<512x4xf32>
    %220 = arith.addf %213, %219 : vector<512x4xf32>
    %c0_225 = arith.constant 0 : index
    %c1_226 = arith.constant 1 : index
    %c9_227 = arith.constant 9 : index
    %c0_228 = arith.constant 0 : index
    %221 = vector.load %arg8[%c0_225, %c1_226, %c9_227, %c0_228] : memref<2x18x32x4xf32, #tpu.memory_space<vmem>>, vector<2x16x16x4xf32>
    %222 = vector.shape_cast %221 : vector<2x16x16x4xf32> to vector<512x4xf32>
    %223 = arith.truncf %222 : vector<512x4xf32> to vector<512x4xbf16>
    %c5_229 = arith.constant 5 : index
    %c0_230 = arith.constant 0 : index
    %c0_231 = arith.constant 0 : index
    %224 = vector.load %arg3[%c5_229, %c0_230, %c0_231] : memref<9x4x4xbf16, #tpu.memory_space<vmem>>, vector<1x4x4xbf16>
    %225 = vector.shape_cast %224 : vector<1x4x4xbf16> to vector<4x4xbf16>
    %cst_232 = arith.constant dense<0.000000e+00> : vector<512x4xf32>
    %226 = tpu.matmul %223, %225, %cst_232 {dimension_numbers = #tpu.dot_dimension_numbers<[1], [0], [0], [1], [0, 0, 1, 1], [], []>} : vector<512x4xbf16>, vector<4x4xbf16>, vector<512x4xf32> -> vector<512x4xf32>
    %227 = arith.addf %220, %226 : vector<512x4xf32>
    %c0_233 = arith.constant 0 : index
    %c2_234 = arith.constant 2 : index
    %c7_235 = arith.constant 7 : index
    %c0_236 = arith.constant 0 : index
    %228 = vector.load %arg8[%c0_233, %c2_234, %c7_235, %c0_236] : memref<2x18x32x4xf32, #tpu.memory_space<vmem>>, vector<2x16x16x4xf32>
    %229 = vector.shape_cast %228 : vector<2x16x16x4xf32> to vector<512x4xf32>
    %230 = arith.truncf %229 : vector<512x4xf32> to vector<512x4xbf16>
    %c6_237 = arith.constant 6 : index
    %c0_238 = arith.constant 0 : index
    %c0_239 = arith.constant 0 : index
    %231 = vector.load %arg3[%c6_237, %c0_238, %c0_239] : memref<9x4x4xbf16, #tpu.memory_space<vmem>>, vector<1x4x4xbf16>
    %232 = vector.shape_cast %231 : vector<1x4x4xbf16> to vector<4x4xbf16>
    %cst_240 = arith.constant dense<0.000000e+00> : vector<512x4xf32>
    %233 = tpu.matmul %230, %232, %cst_240 {dimension_numbers = #tpu.dot_dimension_numbers<[1], [0], [0], [1], [0, 0, 1, 1], [], []>} : vector<512x4xbf16>, vector<4x4xbf16>, vector<512x4xf32> -> vector<512x4xf32>
    %234 = arith.addf %227, %233 : vector<512x4xf32>
    %c0_241 = arith.constant 0 : index
    %c2_242 = arith.constant 2 : index
    %c8_243 = arith.constant 8 : index
    %c0_244 = arith.constant 0 : index
    %235 = vector.load %arg8[%c0_241, %c2_242, %c8_243, %c0_244] : memref<2x18x32x4xf32, #tpu.memory_space<vmem>>, vector<2x16x16x4xf32>
    %236 = vector.shape_cast %235 : vector<2x16x16x4xf32> to vector<512x4xf32>
    %237 = arith.truncf %236 : vector<512x4xf32> to vector<512x4xbf16>
    %c7_245 = arith.constant 7 : index
    %c0_246 = arith.constant 0 : index
    %c0_247 = arith.constant 0 : index
    %238 = vector.load %arg3[%c7_245, %c0_246, %c0_247] : memref<9x4x4xbf16, #tpu.memory_space<vmem>>, vector<1x4x4xbf16>
    %239 = vector.shape_cast %238 : vector<1x4x4xbf16> to vector<4x4xbf16>
    %cst_248 = arith.constant dense<0.000000e+00> : vector<512x4xf32>
    %240 = tpu.matmul %237, %239, %cst_248 {dimension_numbers = #tpu.dot_dimension_numbers<[1], [0], [0], [1], [0, 0, 1, 1], [], []>} : vector<512x4xbf16>, vector<4x4xbf16>, vector<512x4xf32> -> vector<512x4xf32>
    %241 = arith.addf %234, %240 : vector<512x4xf32>
    %c0_249 = arith.constant 0 : index
    %c2_250 = arith.constant 2 : index
    %c9_251 = arith.constant 9 : index
    %c0_252 = arith.constant 0 : index
    %242 = vector.load %arg8[%c0_249, %c2_250, %c9_251, %c0_252] : memref<2x18x32x4xf32, #tpu.memory_space<vmem>>, vector<2x16x16x4xf32>
    %243 = vector.shape_cast %242 : vector<2x16x16x4xf32> to vector<512x4xf32>
    %244 = arith.truncf %243 : vector<512x4xf32> to vector<512x4xbf16>
    %c8_253 = arith.constant 8 : index
    %c0_254 = arith.constant 0 : index
    %c0_255 = arith.constant 0 : index
    %245 = vector.load %arg3[%c8_253, %c0_254, %c0_255] : memref<9x4x4xbf16, #tpu.memory_space<vmem>>, vector<1x4x4xbf16>
    %246 = vector.shape_cast %245 : vector<1x4x4xbf16> to vector<4x4xbf16>
    %cst_256 = arith.constant dense<0.000000e+00> : vector<512x4xf32>
    %247 = tpu.matmul %244, %246, %cst_256 {dimension_numbers = #tpu.dot_dimension_numbers<[1], [0], [0], [1], [0, 0, 1, 1], [], []>} : vector<512x4xbf16>, vector<4x4xbf16>, vector<512x4xf32> -> vector<512x4xf32>
    %248 = arith.addf %241, %247 : vector<512x4xf32>
    %cst_257 = arith.constant dense<0.000000e+00> : vector<4xf32>
    %249 = vector.multi_reduction <add>, %248, %cst_257 [0] : vector<512x4xf32> to vector<4xf32>
    %250 = vector.shape_cast %249 : vector<4xf32> to vector<1x4xf32>
    %cst_258 = arith.constant 5.120000e+02 : f32
    %251 = vector.broadcast %cst_258 : f32 to vector<1x4xf32>
    %252 = arith.divf %250, %251 : vector<1x4xf32>
    %253 = arith.mulf %248, %248 : vector<512x4xf32>
    %cst_259 = arith.constant dense<0.000000e+00> : vector<4xf32>
    %254 = vector.multi_reduction <add>, %253, %cst_259 [0] : vector<512x4xf32> to vector<4xf32>
    %255 = vector.shape_cast %254 : vector<4xf32> to vector<1x4xf32>
    %cst_260 = arith.constant 5.120000e+02 : f32
    %256 = vector.broadcast %cst_260 : f32 to vector<1x4xf32>
    %257 = arith.divf %255, %256 : vector<1x4xf32>
    %258 = arith.mulf %252, %252 : vector<1x4xf32>
    %259 = arith.subf %257, %258 : vector<1x4xf32>
    %cst_261 = arith.constant 0.000000e+00 : f32
    %260 = vector.broadcast %cst_261 : f32 to vector<1x4xf32>
    %261 = arith.maximumf %259, %260 : vector<1x4xf32>
    %262 = vector.broadcast %252 : vector<1x4xf32> to vector<512x4xf32>
    %263 = arith.subf %248, %262 : vector<512x4xf32>
    %cst_262 = arith.constant 9.99999974E-6 : f32
    %264 = vector.broadcast %cst_262 : f32 to vector<1x4xf32>
    %265 = arith.addf %261, %264 : vector<1x4xf32>
    %266 = math.rsqrt %265 : vector<1x4xf32>
    %267 = vector.broadcast %266 : vector<1x4xf32> to vector<512x4xf32>
    %268 = arith.mulf %263, %267 : vector<512x4xf32>
    %cst_263 = arith.constant 0.000000e+00 : f32
    %269 = vector.broadcast %cst_263 : f32 to vector<512x4xf32>
    %270 = arith.maximumf %268, %269 : vector<512x4xf32>
    %271 = arith.truncf %270 : vector<512x4xf32> to vector<512x4xbf16>
    %c0_264 = arith.constant 0 : index
    %c0_265 = arith.constant 0 : index
    %272 = vector.load %arg6[%c0_264, %c0_265] : memref<4x8xbf16, #tpu.memory_space<vmem>>, vector<4x8xbf16>
    %cst_266 = arith.constant dense<0.000000e+00> : vector<512x8xf32>
    %273 = tpu.matmul %271, %272, %cst_266 {dimension_numbers = #tpu.dot_dimension_numbers<[1], [0], [0], [1], [0, 0, 1, 1], [], []>} : vector<512x4xbf16>, vector<4x8xbf16>, vector<512x8xf32> -> vector<512x8xf32>
    %274 = arith.addf %184, %273 : vector<512x8xf32>
    %cst_267 = arith.constant dense<0.000000e+00> : vector<8xf32>
    %275 = vector.multi_reduction <add>, %274, %cst_267 [0] : vector<512x8xf32> to vector<8xf32>
    %276 = vector.shape_cast %275 : vector<8xf32> to vector<1x8xf32>
    %cst_268 = arith.constant 5.120000e+02 : f32
    %277 = vector.broadcast %cst_268 : f32 to vector<1x8xf32>
    %278 = arith.divf %276, %277 : vector<1x8xf32>
    %279 = arith.mulf %274, %274 : vector<512x8xf32>
    %cst_269 = arith.constant dense<0.000000e+00> : vector<8xf32>
    %280 = vector.multi_reduction <add>, %279, %cst_269 [0] : vector<512x8xf32> to vector<8xf32>
    %281 = vector.shape_cast %280 : vector<8xf32> to vector<1x8xf32>
    %cst_270 = arith.constant 5.120000e+02 : f32
    %282 = vector.broadcast %cst_270 : f32 to vector<1x8xf32>
    %283 = arith.divf %281, %282 : vector<1x8xf32>
    %284 = arith.mulf %278, %278 : vector<1x8xf32>
    %285 = arith.subf %283, %284 : vector<1x8xf32>
    %cst_271 = arith.constant 0.000000e+00 : f32
    %286 = vector.broadcast %cst_271 : f32 to vector<1x8xf32>
    %287 = arith.maximumf %285, %286 : vector<1x8xf32>
    %288 = vector.broadcast %278 : vector<1x8xf32> to vector<512x8xf32>
    %289 = arith.subf %274, %288 : vector<512x8xf32>
    %cst_272 = arith.constant 9.99999974E-6 : f32
    %290 = vector.broadcast %cst_272 : f32 to vector<1x8xf32>
    %291 = arith.addf %287, %290 : vector<1x8xf32>
    %292 = math.rsqrt %291 : vector<1x8xf32>
    %293 = vector.broadcast %292 : vector<1x8xf32> to vector<512x8xf32>
    %294 = arith.mulf %289, %293 : vector<512x8xf32>
    %cst_273 = arith.constant 0.000000e+00 : f32
    %295 = vector.broadcast %cst_273 : f32 to vector<512x8xf32>
    %296 = arith.maximumf %294, %295 : vector<512x8xf32>
    %c0_274 = arith.constant 0 : index
    %c0_275 = arith.constant 0 : index
    %297 = vector.load %arg7[%c0_274, %c0_275] : memref<512x8xf32, #tpu.memory_space<vmem>>, vector<512x8xf32>
    tpu.vector_store %arg7[%c0_274, %c0_275], %296 {strides = array<i32>} : memref<512x8xf32, #tpu.memory_space<vmem>>, vector<512x8xf32>,
    return
  }
}

</mosaic_0001>

<bundles_post_ra>
// kernel: tpu_custom_call.1
= control target key start
LH: loop header
LB: loop body
LE: loop exit
PB: predicated region body
PF: predicated region fallthrough
CT: control target
= control target key end

     0   :  { %vm537_vm0 = vcmask 1041408   ;;  %vm27_vm1 = vcmask 31744   ;;  %v24009_v1 = vmov 0.0   ;;  %vm17754_vm2 = vcmask 64512   ;;  %s32073_s1 = inlined_call_operand.vmem [shape: bf16[9,4,4], index: 1, kind: input, shape index: {}]   ;;  %s32074_s0 = inlined_call_operand.vmem [shape: f32[2,16,16,4], index: 0, kind: input, shape index: {}]   ;;  %s32075_s2 = inlined_call_operand.vmem [shape: bf16[9,4,4], index: 2, kind: input, shape index: {}]   ;;  %s32076_s3 = inlined_call_operand.vmem [shape: bf16[9,4,4], index: 3, kind: input, shape index: {}]   ;;  %s32077_s5 = inlined_call_operand.vmem [shape: bf16[4,8], index: 5, kind: input, shape index: {}]   ;;  %s32078_s4 = inlined_call_operand.vmem [shape: bf16[4,8], index: 4, kind: input, shape index: {}]   ;;  %s32079_s6 = inlined_call_operand.vmem [shape: bf16[4,8], index: 6, kind: input, shape index: {}]   ;;  %s32080_s7 = inlined_call_operand.vmem [shape: f32[512,8], index: 7, kind: output, shape index: {}]  }
   0x1   :  { %v24053_v0 = vld [vmem:[%s32073_s1 + $0x2] sm:$0x3]  ;;  %29 = vst.msk [vmem:[#allocation2 + $0x8] sm:$0xff] %vm27_vm1, %v24009_v1  ;;  %30 = vst.msk [vmem:[#allocation2 + $0x10] sm:$0xff] %vm27_vm1, %v24009_v1  ;;  %v24218_v2 = vld [vmem:[%s32073_s1] sm:$0x3] }
   0x2   :  { %28 = vst.msk [vmem:[#allocation2] sm:$0xff] %vm27_vm1, %v24009_v1  ;;  %31 = vst.msk [vmem:[#allocation2 + $0x18] sm:$0xff] %vm27_vm1, %v24009_v1  ;;  %v117_v3 = vld [vmem:[%s32074_s0] sm:$0xff]  ;;  %23970 = vmatprep.subr.msk.bf16.mxu0 %vm537_vm0, %v24053_v0  ;;  %v539_v4 = vsel %vm537_vm0, %v24053_v0, 0  ;;  %v118_v5 = vld [vmem:[%s32074_s0 + $0x8] sm:$0xff]  ;;  %v927_v34 = vsel %vm537_vm0, %v24218_v2, 0 }
   0x3   :  { %32 = vst.msk [vmem:[#allocation2 + $0x240] sm:$0xff] %vm27_vm1, %v24009_v1  ;;  %33 = vst.msk [vmem:[#allocation2 + $0x248] sm:$0xff] %vm27_vm1, %v24009_v1  ;;  %v119_v6 = vld [vmem:[%s32074_s0 + $0x10] sm:$0xff]  ;;  %v120_v7 = vld [vmem:[%s32074_s0 + $0x18] sm:$0xff]  ;;  %20327 = vmatpush3.bf16.msra.mxu0 %v539_v4 }
   0x4   :  { %34 = vst.msk [vmem:[#allocation2 + $0x250] sm:$0xff] %vm27_vm1, %v24009_v1  ;;  %35 = vst.msk [vmem:[#allocation2 + $0x258] sm:$0xff] %vm27_vm1, %v24009_v1  ;;  %v121_v8 = vld [vmem:[%s32074_s0 + $0x20] sm:$0xff]  ;;  %v122_v9 = vld [vmem:[%s32074_s0 + $0x28] sm:$0xff]  ;;  %23971 = vmatprep.subr.msk.bf16.mxu0 %vm537_vm0, %v24218_v2 }
   0x5   :  { %37 = vst.msk [vmem:[#allocation2 + $0x220] sm:$0xff] %vm27_vm1, %v24009_v1  ;;  %38 = vst.msk [vmem:[#allocation2 + $0x228] sm:$0xff] %vm27_vm1, %v24009_v1  ;;  %v123_v10 = vld [vmem:[%s32074_s0 + $0x30] sm:$0xff]  ;;  %v124_v11 = vld [vmem:[%s32074_s0 + $0x38] sm:$0xff] }
   0x6   :  { %39 = vst.msk [vmem:[#allocation2 + $0x230] sm:$0xff] %vm27_vm1, %v24009_v1  ;;  %40 = vst.msk [vmem:[#allocation2 + $0x238] sm:$0xff] %vm27_vm1, %v24009_v1  ;;  %v125_v12 = vld [vmem:[%s32074_s0 + $0x40] sm:$0xff]  ;;  %v126_v13 = vld [vmem:[%s32074_s0 + $0x48] sm:$0xff] }
   0x7   :  { %41 = vst.msk [vmem:[#allocation2 + $0x460] sm:$0xff] %vm27_vm1, %v24009_v1  ;;  %42 = vst.msk [vmem:[#allocation2 + $0x468] sm:$0xff] %vm27_vm1, %v24009_v1  ;;  %v127_v14 = vld [vmem:[%s32074_s0 + $0x50] sm:$0xff]  ;;  %v128_v15 = vld [vmem:[%s32074_s0 + $0x58] sm:$0xff] }
   0x8   :  { %43 = vst.msk [vmem:[#allocation2 + $0x470] sm:$0xff] %vm27_vm1, %v24009_v1  ;;  %44 = vst.msk [vmem:[#allocation2 + $0x478] sm:$0xff] %vm27_vm1, %v24009_v1  ;;  %v129_v16 = vld [vmem:[%s32074_s0 + $0x60] sm:$0xff]  ;;  %v130_v17 = vld [vmem:[%s32074_s0 + $0x68] sm:$0xff] }
   0x9   :  { %46 = vst.msk [vmem:[#allocation2 + $0x20] sm:$0xff] %vm27_vm1, %v24009_v1  ;;  %47 = vst.msk [vmem:[#allocation2 + $0x40] sm:$0xff] %vm27_vm1, %v24009_v1  ;;  %v131_v18 = vld [vmem:[%s32074_s0 + $0x70] sm:$0xff]  ;;  %v132_v19 = vld [vmem:[%s32074_s0 + $0x78] sm:$0xff] }
   0xa   :  { %48 = vst.msk [vmem:[#allocation2 + $0x60] sm:$0xff] %vm27_vm1, %v24009_v1  ;;  %49 = vst.msk [vmem:[#allocation2 + $0x80] sm:$0xff] %vm27_vm1, %v24009_v1  ;;  %v133_v20 = vld [vmem:[%s32074_s0 + $0x80] sm:$0xff]  ;;  %v134_v21 = vld [vmem:[%s32074_s0 + $0x88] sm:$0xff] }
   0xb   :  { %50 = vst.msk [vmem:[#allocation2 + $0xa0] sm:$0xff] %vm27_vm1, %v24009_v1  ;;  %51 = vst.msk [vmem:[#allocation2 + $0xc0] sm:$0xff] %vm27_vm1, %v24009_v1  ;;  %v135_v22 = vld [vmem:[%s32074_s0 + $0x90] sm:$0xff]  ;;  %v343_v23 = vld [vmem:[#allocation2 + $0x8] sm:$0xff] }
   0xc   :  { %52 = vst.msk [vmem:[#allocation2 + $0xe0] sm:$0xff] %vm27_vm1, %v24009_v1  ;;  %53 = vst.msk [vmem:[#allocation2 + $0x100] sm:$0xff] %vm27_vm1, %v24009_v1  ;;  %v344_v24 = vld [vmem:[#allocation2 + $0x10] sm:$0xff]  ;;  %v136_v25 = vld [vmem:[%s32074_s0 + $0x98] sm:$0xff] }
   0xd   :  { %54 = vst.msk [vmem:[#allocation2 + $0x120] sm:$0xff] %vm27_vm1, %v24009_v1  ;;  %55 = vst.msk [vmem:[#allocation2 + $0x140] sm:$0xff] %vm27_vm1, %v24009_v1  ;;  %v407_v26 = vpack.c.bf16 %v344_v24, %v343_v23  ;;  %v137_v28 = vld [vmem:[%s32074_s0 + $0xa0] sm:$0xff]  ;;  %v138_v29 = vld [vmem:[%s32074_s0 + $0xa8] sm:$0xff] }
   0xe   :  { %56 = vst.msk [vmem:[#allocation2 + $0x160] sm:$0xff] %vm27_vm1, %v24009_v1  ;;  %57 = vst.msk [vmem:[#allocation2 + $0x180] sm:$0xff] %vm27_vm1, %v24009_v1  ;;  %v139_v40 = vld [vmem:[%s32074_s0 + $0xb0] sm:$0xff]  ;;  %v140_v41 = vld [vmem:[%s32074_s0 + $0xb8] sm:$0xff] }
   0xf   :  { %58 = vst.msk [vmem:[#allocation2 + $0x1a0] sm:$0xff] %vm27_vm1, %v24009_v1  ;;  %59 = vst.msk [vmem:[#allocation2 + $0x1c0] sm:$0xff] %vm27_vm1, %v24009_v1  ;;  %20328 = vmatprep.mubr.msk.bf16.mxu0 %vm27_vm1, %v407_v26  ;;  %v141_v43 = vld [vmem:[%s32074_s0 + $0xc0] sm:$0xff]  ;;  %v142_v45 = vld [vmem:[%s32074_s0 + $0xc8] sm:$0xff] }
  0x10   :  { %60 = vst.msk [vmem:[#allocation2 + $0x1e0] sm:$0xff] %vm27_vm1, %v24009_v1  ;;  %61 = vst.msk [vmem:[#allocation2 + $0x200] sm:$0xff] %vm27_vm1, %v24009_v1  ;;  %v143_v46 = vld [vmem:[%s32074_s0 + $0xd0] sm:$0xff]  ;;  %v144_v47 = vld [vmem:[%s32074_s0 + $0xd8] sm:$0xff] }
  0x11   :  { %64 = vst.msk [vmem:[#allocation2 + $0x260] sm:$0xff] %vm27_vm1, %v24009_v1  ;;  %65 = vst.msk [vmem:[#allocation2 + $0x280] sm:$0xff] %vm27_vm1, %v24009_v1  ;;  %v145_v48 = vld [vmem:[%s32074_s0 + $0xe0] sm:$0xff]  ;;  %v146_v49 = vld [vmem:[%s32074_s0 + $0xe8] sm:$0xff] }
  0x12   :  { %66 = vst.msk [vmem:[#allocation2 + $0x2a0] sm:$0xff] %vm27_vm1, %v24009_v1  ;;  %67 = vst.msk [vmem:[#allocation2 + $0x2c0] sm:$0xff] %vm27_vm1, %v24009_v1  ;;  %v149_v52 = vld [vmem:[%s32074_s0 + $0x100] sm:$0xff]  ;;  %v150_v53 = vld [vmem:[%s32074_s0 + $0x108] sm:$0xff] }
  0x13   :  { %68 = vst.msk [vmem:[#allocation2 + $0x2e0] sm:$0xff] %vm27_vm1, %v24009_v1  ;;  %69 = vst.msk [vmem:[#allocation2 + $0x300] sm:$0xff] %vm27_vm1, %v24009_v1  ;;  %v151_v56 = vld [vmem:[%s32074_s0 + $0x110] sm:$0xff]  ;;  %v152_v57 = vld [vmem:[%s32074_s0 + $0x118] sm:$0xff] }
  0x14   :  { %70 = vst.msk [vmem:[#allocation2 + $0x320] sm:$0xff] %vm27_vm1, %v24009_v1  ;;  %71 = vst.msk [vmem:[#allocation2 + $0x340] sm:$0xff] %vm27_vm1, %v24009_v1  ;;  %v153_v58 = vld [vmem:[%s32074_s0 + $0x120] sm:$0xff]  ;;  %v154_v59 = vld [vmem:[%s32074_s0 + $0x128] sm:$0xff] }
  0x15   :  { %72 = vst.msk [vmem:[#allocation2 + $0x360] sm:$0xff] %vm27_vm1, %v24009_v1  ;;  %73 = vst.msk [vmem:[#allocation2 + $0x380] sm:$0xff] %vm27_vm1, %v24009_v1  ;;  %v155_v60 = vld [vmem:[%s32074_s0 + $0x130] sm:$0xff]  ;;  %v156_v61 = vld [vmem:[%s32074_s0 + $0x138] sm:$0xff] }
  0x16   :  { %74 = vst.msk [vmem:[#allocation2 + $0x3a0] sm:$0xff] %vm27_vm1, %v24009_v1  ;;  %75 = vst.msk [vmem:[#allocation2 + $0x3c0] sm:$0xff] %vm27_vm1, %v24009_v1  ;;  %v157_v62 = vld [vmem:[%s32074_s0 + $0x140] sm:$0xff]  ;;  %v158_v63 = vld [vmem:[%s32074_s0 + $0x148] sm:$0xff] }
  0x17   :  { %76 = vst.msk [vmem:[#allocation2 + $0x3e0] sm:$0xff] %vm27_vm1, %v24009_v1  ;;  %77 = vst.msk [vmem:[#allocation2 + $0x400] sm:$0xff] %vm27_vm1, %v24009_v1  ;;  %v159_v0 = vld [vmem:[%s32074_s0 + $0x150] sm:$0xff]  ;;  %v162_v4 = vld [vmem:[%s32074_s0 + $0x168] sm:$0xff] }
  0x18   :  { %78 = vst.msk [vmem:[#allocation2 + $0x420] sm:$0xff] %vm27_vm1, %v24009_v1  ;;  %79 = vst.msk [vmem:[#allocation2 + $0x440] sm:$0xff] %vm27_vm1, %v24009_v1  ;;  %v174_v23 = vld [vmem:[%s32074_s0 + $0x1c8] sm:$0xff]  ;;  %v175_v24 = vld [vmem:[%s32074_s0 + $0x1d0] sm:$0xff] }
  0x19   :  { %82 = vst.msk [vmem:[#allocation2 + $0x38] sm:$0xff] %vm27_vm1, %v24009_v1  ;;  %83 = vst.msk [vmem:[#allocation2 + $0x58] sm:$0xff] %vm27_vm1, %v24009_v1  ;;  %v177_v26 = vld [vmem:[%s32074_s0 + $0x1e0] sm:$0xff] }
  0x1a   :  { %84 = vst.msk [vmem:[#allocation2 + $0x78] sm:$0xff] %vm27_vm1, %v24009_v1  ;;  %85 = vst.msk [vmem:[#allocation2 + $0x98] sm:$0xff] %vm27_vm1, %v24009_v1 }
  0x1b   :  { %86 = vst.msk [vmem:[#allocation2 + $0xb8] sm:$0xff] %vm27_vm1, %v24009_v1  ;;  %87 = vst.msk [vmem:[#allocation2 + $0xd8] sm:$0xff] %vm27_vm1, %v24009_v1 }
  0x1c   :  { %88 = vst.msk [vmem:[#allocation2 + $0xf8] sm:$0xff] %vm27_vm1, %v24009_v1  ;;  %89 = vst.msk [vmem:[#allocation2 + $0x118] sm:$0xff] %vm27_vm1, %v24009_v1 }
  0x1d   :  { %90 = vst.msk [vmem:[#allocation2 + $0x138] sm:$0xff] %vm27_vm1, %v24009_v1  ;;  %91 = vst.msk [vmem:[#allocation2 + $0x158] sm:$0xff] %vm27_vm1, %v24009_v1 }
  0x1e   :  { %92 = vst.msk [vmem:[#allocation2 + $0x178] sm:$0xff] %vm27_vm1, %v24009_v1  ;;  %93 = vst.msk [vmem:[#allocation2 + $0x198] sm:$0xff] %vm27_vm1, %v24009_v1 }
  0x1f   :  { %94 = vst.msk [vmem:[#allocation2 + $0x1b8] sm:$0xff] %vm27_vm1, %v24009_v1  ;;  %95 = vst.msk [vmem:[#allocation2 + $0x1d8] sm:$0xff] %vm27_vm1, %v24009_v1 }
  0x20   :  { %96 = vst.msk [vmem:[#allocation2 + $0x1f8] sm:$0xff] %vm27_vm1, %v24009_v1  ;;  %97 = vst.msk [vmem:[#allocation2 + $0x218] sm:$0xff] %vm27_vm1, %v24009_v1 }
  0x21   :  { %100 = vst.msk [vmem:[#allocation2 + $0x278] sm:$0xff] %vm27_vm1, %v24009_v1  ;;  %101 = vst.msk [vmem:[#allocation2 + $0x298] sm:$0xff] %vm27_vm1, %v24009_v1 }
  0x22   :  { %102 = vst.msk [vmem:[#allocation2 + $0x2b8] sm:$0xff] %vm27_vm1, %v24009_v1  ;;  %103 = vst.msk [vmem:[#allocation2 + $0x2d8] sm:$0xff] %vm27_vm1, %v24009_v1 }
  0x23   :  { %104 = vst.msk [vmem:[#allocation2 + $0x2f8] sm:$0xff] %vm27_vm1, %v24009_v1  ;;  %105 = vst.msk [vmem:[#allocation2 + $0x318] sm:$0xff] %vm27_vm1, %v24009_v1 }
  0x24   :  { %106 = vst.msk [vmem:[#allocation2 + $0x338] sm:$0xff] %vm27_vm1, %v24009_v1  ;;  %107 = vst.msk [vmem:[#allocation2 + $0x358] sm:$0xff] %vm27_vm1, %v24009_v1 }
  0x25   :  { %108 = vst.msk [vmem:[#allocation2 + $0x378] sm:$0xff] %vm27_vm1, %v24009_v1  ;;  %109 = vst.msk [vmem:[#allocation2 + $0x398] sm:$0xff] %vm27_vm1, %v24009_v1 }
  0x26   :  { %110 = vst.msk [vmem:[#allocation2 + $0x3b8] sm:$0xff] %vm27_vm1, %v24009_v1  ;;  %111 = vst.msk [vmem:[#allocation2 + $0x3d8] sm:$0xff] %vm27_vm1, %v24009_v1 }
  0x27   :  { %112 = vst.msk [vmem:[#allocation2 + $0x3f8] sm:$0xff] %vm27_vm1, %v24009_v1  ;;  %113 = vst.msk [vmem:[#allocation2 + $0x418] sm:$0xff] %vm27_vm1, %v24009_v1 }
  0x28   :  { %114 = vst.msk [vmem:[#allocation2 + $0x438] sm:$0xff] %vm27_vm1, %v24009_v1  ;;  %115 = vst.msk [vmem:[#allocation2 + $0x458] sm:$0xff] %vm27_vm1, %v24009_v1 }
  0x29   :  { %45 = vst.msk [vmem:[#allocation2] sm:$0xff] %vm27_vm1, %v24009_v1  ;;  %62 = vst.msk [vmem:[#allocation2 + $0x220] sm:$0xff] %vm27_vm1, %v24009_v1 }
  0x2a   :  { %63 = vst.msk [vmem:[#allocation2 + $0x240] sm:$0xff] %vm27_vm1, %v24009_v1  ;;  %80 = vst.msk [vmem:[#allocation2 + $0x460] sm:$0xff] %vm27_vm1, %v24009_v1 }
  0x2b   :  { %81 = vst.msk [vmem:[#allocation2 + $0x18] sm:$0xff] %vm27_vm1, %v24009_v1  ;;  %98 = vst.msk [vmem:[#allocation2 + $0x238] sm:$0xff] %vm27_vm1, %v24009_v1 }
  0x2c   :  { %99 = vst.msk [vmem:[#allocation2 + $0x258] sm:$0xff] %vm27_vm1, %v24009_v1  ;;  %116 = vst.msk [vmem:[#allocation2 + $0x478] sm:$0xff] %vm27_vm1, %v24009_v1  ;;  %v160_v1 = vld [vmem:[%s32074_s0 + $0x158] sm:$0xff] }
  0x2d   :  { %182 = vst.msk [vmem:[#allocation2 + $0x28] sm:$0xff] %vm27_vm1, %v117_v3  ;;  %183 = vst.msk [vmem:[#allocation2 + $0x30] sm:$0xff] %vm27_vm1, %v118_v5  ;;  %v161_v3 = vld [vmem:[%s32074_s0 + $0x160] sm:$0xff] }
  0x2e   :  { %184 = vst.msk [vmem:[#allocation2 + $0x48] sm:$0xff] %vm27_vm1, %v119_v6  ;;  %185 = vst.msk [vmem:[#allocation2 + $0x50] sm:$0xff] %vm27_vm1, %v120_v7  ;;  %v163_v6 = vld [vmem:[%s32074_s0 + $0x170] sm:$0xff]  ;;  %v164_v7 = vld [vmem:[%s32074_s0 + $0x178] sm:$0xff] }
  0x2f   :  { %186 = vst.msk [vmem:[#allocation2 + $0x68] sm:$0xff] %vm27_vm1, %v121_v8  ;;  %187 = vst.msk [vmem:[#allocation2 + $0x70] sm:$0xff] %vm27_vm1, %v122_v9 }
  0x30   :  { %188 = vst.msk [vmem:[#allocation2 + $0x88] sm:$0xff] %vm27_vm1, %v123_v10  ;;  %189 = vst.msk [vmem:[#allocation2 + $0x90] sm:$0xff] %vm27_vm1, %v124_v11 }
  0x31   :  { %190 = vst.msk [vmem:[#allocation2 + $0xa8] sm:$0xff] %vm27_vm1, %v125_v12  ;;  %191 = vst.msk [vmem:[#allocation2 + $0xb0] sm:$0xff] %vm27_vm1, %v126_v13  ;;  %v165_v12 = vld [vmem:[%s32074_s0 + $0x180] sm:$0xff]  ;;  %v166_v13 = vld [vmem:[%s32074_s0 + $0x188] sm:$0xff] }
  0x32   :  { %192 = vst.msk [vmem:[#allocation2 + $0xc8] sm:$0xff] %vm27_vm1, %v127_v14  ;;  %193 = vst.msk [vmem:[#allocation2 + $0xd0] sm:$0xff] %vm27_vm1, %v128_v15  ;;  %v167_v15 = vld [vmem:[%s32074_s0 + $0x190] sm:$0xff] }
  0x33   :  { %194 = vst.msk [vmem:[#allocation2 + $0xe8] sm:$0xff] %vm27_vm1, %v129_v16  ;;  %195 = vst.msk [vmem:[#allocation2 + $0xf0] sm:$0xff] %vm27_vm1, %v130_v17  ;;  %v168_v17 = vld [vmem:[%s32074_s0 + $0x198] sm:$0xff] }
  0x34   :  { %196 = vst.msk [vmem:[#allocation2 + $0x108] sm:$0xff] %vm27_vm1, %v131_v18  ;;  %197 = vst.msk [vmem:[#allocation2 + $0x110] sm:$0xff] %vm27_vm1, %v132_v19  ;;  %v345_v27 = vld [vmem:[#allocation2 + $0x28] sm:$0xff]  ;;  %v346_v30 = vld [vmem:[#allocation2 + $0x30] sm:$0xff] }
  0x35   :  { %198 = vst.msk [vmem:[#allocation2 + $0x128] sm:$0xff] %vm27_vm1, %v133_v20  ;;  %199 = vst.msk [vmem:[#allocation2 + $0x130] sm:$0xff] %vm27_vm1, %v134_v21  ;;  %v347_v31 = vld [vmem:[#allocation2 + $0x48] sm:$0xff]  ;;  %v348_v32 = vld [vmem:[#allocation2 + $0x50] sm:$0xff]  ;;  %v408_v33 = vpack.c.bf16 %v346_v30, %v345_v27 }
  0x36   :  { %200 = vst.msk [vmem:[#allocation2 + $0x148] sm:$0xff] %vm27_vm1, %v135_v22  ;;  %201 = vst.msk [vmem:[#allocation2 + $0x150] sm:$0xff] %vm27_vm1, %v136_v25  ;;  %v409_v35 = vpack.c.bf16 %v348_v32, %v347_v31  ;;  %v349_v36 = vld [vmem:[#allocation2 + $0x68] sm:$0xff]  ;;  %v350_v37 = vld [vmem:[#allocation2 + $0x70] sm:$0xff] }
  0x37   :  { %202 = vst.msk [vmem:[#allocation2 + $0x168] sm:$0xff] %vm27_vm1, %v137_v28  ;;  %203 = vst.msk [vmem:[#allocation2 + $0x170] sm:$0xff] %vm27_vm1, %v138_v29  ;;  %20329 = vmatmul.mubr.msk.bf16.vlgmr.msra.gmra.mrb[0].mxu0 %vm27_vm1, %v408_v33  ;;  %v351_v38 = vld [vmem:[#allocation2 + $0x88] sm:$0xff]  ;;  %v352_v39 = vld [vmem:[#allocation2 + $0x90] sm:$0xff]  ;;  %v410_v42 = vpack.c.bf16 %v350_v37, %v349_v36 }
  0x38   :  { %20393 = vmatpush3.bf16.msra.mxu0 %v927_v34  ;;  %20332 = vmatprep.mubr.msk.bf16.mxu0 %vm27_vm1, %v409_v35  ;;  %204 = vst.msk [vmem:[#allocation2 + $0x188] sm:$0xff] %vm27_vm1, %v139_v40  ;;  %205 = vst.msk [vmem:[#allocation2 + $0x190] sm:$0xff] %vm27_vm1, %v140_v41  ;;  %v411_v44 = vpack.c.bf16 %v352_v39, %v351_v38  ;;  %v353_v50 = vld [vmem:[#allocation2 + $0xa8] sm:$0xff]  ;;  %v354_v51 = vld [vmem:[#allocation2 + $0xb0] sm:$0xff] }
  0x39   :  { %206 = vst.msk [vmem:[#allocation2 + $0x1a8] sm:$0xff] %vm27_vm1, %v141_v43  ;;  %207 = vst.msk [vmem:[#allocation2 + $0x1b0] sm:$0xff] %vm27_vm1, %v142_v45  ;;  %v355_v54 = vld [vmem:[#allocation2 + $0xc8] sm:$0xff]  ;;  %v356_v55 = vld [vmem:[#allocation2 + $0xd0] sm:$0xff]  ;;  %v412_v2 = vpack.c.bf16 %v354_v51, %v353_v50 }
  0x3a   :  { %208 = vst.msk [vmem:[#allocation2 + $0x1c8] sm:$0xff] %vm27_vm1, %v143_v46  ;;  %209 = vst.msk [vmem:[#allocation2 + $0x1d0] sm:$0xff] %vm27_vm1, %v144_v47  ;;  %v413_v5 = vpack.c.bf16 %v356_v55, %v355_v54  ;;  %v357_v8 = vld [vmem:[#allocation2 + $0xe8] sm:$0xff]  ;;  %v358_v9 = vld [vmem:[#allocation2 + $0xf0] sm:$0xff] }
  0x3b   :  { %210 = vst.msk [vmem:[#allocation2 + $0x1e8] sm:$0xff] %vm27_vm1, %v145_v48  ;;  %211 = vst.msk [vmem:[#allocation2 + $0x1f0] sm:$0xff] %vm27_vm1, %v146_v49  ;;  %v359_v10 = vld [vmem:[#allocation2 + $0x108] sm:$0xff]  ;;  %v360_v11 = vld [vmem:[#allocation2 + $0x110] sm:$0xff]  ;;  %v414_v14 = vpack.c.bf16 %v358_v9, %v357_v8 }
  0x3c   :  { %214 = vst.msk [vmem:[#allocation2 + $0x268] sm:$0xff] %vm27_vm1, %v149_v52  ;;  %215 = vst.msk [vmem:[#allocation2 + $0x270] sm:$0xff] %vm27_vm1, %v150_v53  ;;  %v415_v16 = vpack.c.bf16 %v360_v11, %v359_v10  ;;  %v169_v18 = vld [vmem:[%s32074_s0 + $0x1a0] sm:$0xff]  ;;  %v170_v19 = vld [vmem:[%s32074_s0 + $0x1a8] sm:$0xff] }
  0x3d   :  { %216 = vst.msk [vmem:[#allocation2 + $0x288] sm:$0xff] %vm27_vm1, %v151_v56  ;;  %217 = vst.msk [vmem:[#allocation2 + $0x290] sm:$0xff] %vm27_vm1, %v152_v57  ;;  %v171_v20 = vld [vmem:[%s32074_s0 + $0x1b0] sm:$0xff]  ;;  %v172_v21 = vld [vmem:[%s32074_s0 + $0x1b8] sm:$0xff] }
  0x3e   :  { %218 = vst.msk [vmem:[#allocation2 + $0x2a8] sm:$0xff] %vm27_vm1, %v153_v58  ;;  %219 = vst.msk [vmem:[#allocation2 + $0x2b0] sm:$0xff] %vm27_vm1, %v154_v59  ;;  %v173_v22 = vld [vmem:[%s32074_s0 + $0x1c0] sm:$0xff]  ;;  %v176_v25 = vld [vmem:[%s32074_s0 + $0x1d8] sm:$0xff] }
  0x3f   :  { %20333 = vmatmul.mubr.msk.bf16.gmra.mrb[4].mxu0 %vm27_vm1, %v410_v42  ;;  %220 = vst.msk [vmem:[#allocation2 + $0x2c8] sm:$0xff] %vm27_vm1, %v155_v60  ;;  %221 = vst.msk [vmem:[#allocation2 + $0x2d0] sm:$0xff] %vm27_vm1, %v156_v61  ;;  %v361_v27 = vld [vmem:[#allocation2 + $0x128] sm:$0xff]  ;;  %v362_v28 = vld [vmem:[#allocation2 + $0x130] sm:$0xff] }
  0x40   :  { %20336 = vmatprep.mubr.msk.bf16.mxu0 %vm27_vm1, %v411_v44  ;;  %222 = vst.msk [vmem:[#allocation2 + $0x2e8] sm:$0xff] %vm27_vm1, %v157_v62  ;;  %223 = vst.msk [vmem:[#allocation2 + $0x2f0] sm:$0xff] %vm27_vm1, %v158_v63  ;;  %v178_v29 = vld [vmem:[%s32074_s0 + $0x1e8] sm:$0xff]  ;;  %v364_v31 = vld [vmem:[#allocation2 + $0x150] sm:$0xff]  ;;  %v416_v33 = vpack.c.bf16 %v362_v28, %v361_v27 }
  0x41   :  { %224 = vst.msk [vmem:[#allocation2 + $0x308] sm:$0xff] %vm27_vm1, %v159_v0  ;;  %225 = vst.msk [vmem:[#allocation2 + $0x310] sm:$0xff] %vm27_vm1, %v160_v1  ;;  %v363_v30 = vld [vmem:[#allocation2 + $0x148] sm:$0xff]  ;;  %v24496_v32 = vld [vmem:[%s32073_s1 + $0x4] sm:$0x3] }
  0x42   :  { %226 = vst.msk [vmem:[#allocation2 + $0x328] sm:$0xff] %vm27_vm1, %v161_v3  ;;  %227 = vst.msk [vmem:[#allocation2 + $0x330] sm:$0xff] %vm27_vm1, %v162_v4  ;;  %23972 = vmatprep.subr.msk.bf16.mxu0 %vm537_vm0, %v24496_v32  ;;  %v417_v34 = vpack.c.bf16 %v364_v31, %v363_v30  ;;  %v365_v35 = vld [vmem:[#allocation2 + $0x168] sm:$0xff]  ;;  %v366_v36 = vld [vmem:[#allocation2 + $0x170] sm:$0xff] }
  0x43   :  { %228 = vst.msk [vmem:[#allocation2 + $0x348] sm:$0xff] %vm27_vm1, %v163_v6  ;;  %229 = vst.msk [vmem:[#allocation2 + $0x350] sm:$0xff] %vm27_vm1, %v164_v7  ;;  %v367_v37 = vld [vmem:[#allocation2 + $0x188] sm:$0xff]  ;;  %v368_v38 = vld [vmem:[#allocation2 + $0x190] sm:$0xff]  ;;  %v418_v39 = vpack.c.bf16 %v366_v36, %v365_v35 }
  0x44   :  { %230 = vst.msk [vmem:[#allocation2 + $0x368] sm:$0xff] %vm27_vm1, %v165_v12  ;;  %231 = vst.msk [vmem:[#allocation2 + $0x370] sm:$0xff] %vm27_vm1, %v166_v13  ;;  %v419_v40 = vpack.c.bf16 %v368_v38, %v367_v37  ;;  %v369_v41 = vld [vmem:[#allocation2 + $0x1a8] sm:$0xff]  ;;  %v370_v42 = vld [vmem:[#allocation2 + $0x1b0] sm:$0xff] }
  0x45   :  { %232 = vst.msk [vmem:[#allocation2 + $0x388] sm:$0xff] %vm27_vm1, %v167_v15  ;;  %233 = vst.msk [vmem:[#allocation2 + $0x390] sm:$0xff] %vm27_vm1, %v168_v17  ;;  %v371_v43 = vld [vmem:[#allocation2 + $0x1c8] sm:$0xff]  ;;  %v372_v44 = vld [vmem:[#allocation2 + $0x1d0] sm:$0xff]  ;;  %v420_v45 = vpack.c.bf16 %v370_v42, %v369_v41 }
  0x46   :  { %234 = vst.msk [vmem:[#allocation2 + $0x3a8] sm:$0xff] %vm27_vm1, %v169_v18  ;;  %235 = vst.msk [vmem:[#allocation2 + $0x3b0] sm:$0xff] %vm27_vm1, %v170_v19  ;;  %v421_v46 = vpack.c.bf16 %v372_v44, %v371_v43  ;;  %v373_v47 = vld [vmem:[#allocation2 + $0x1e8] sm:$0xff]  ;;  %v374_v48 = vld [vmem:[#allocation2 + $0x1f0] sm:$0xff]  ;;  %v1413_v44 = vsel %vm537_vm0, %v24496_v32, 0 }
  0x47   :  { %20337 = vmatmul.mubr.msk.bf16.gmra.mrb[8].mxu0 %vm27_vm1, %v412_v2  ;;  %236 = vst.msk [vmem:[#allocation2 + $0x3c8] sm:$0xff] %vm27_vm1, %v171_v20  ;;  %237 = vst.msk [vmem:[#allocation2 + $0x3d0] sm:$0xff] %vm27_vm1, %v172_v21  ;;  %v375_v49 = vld [vmem:[#allocation2 + $0x248] sm:$0xff]  ;;  %v376_v50 = vld [vmem:[#allocation2 + $0x250] sm:$0xff]  ;;  %v422_v51 = vpack.c.bf16 %v374_v48, %v373_v47 }
  0x48   :  { %20340 = vmatprep.mubr.msk.bf16.mxu0 %vm27_vm1, %v413_v5  ;;  %238 = vst.msk [vmem:[#allocation2 + $0x3e8] sm:$0xff] %vm27_vm1, %v173_v22  ;;  %239 = vst.msk [vmem:[#allocation2 + $0x3f0] sm:$0xff] %vm27_vm1, %v174_v23  ;;  %v423_v52 = vpack.c.bf16 %v376_v50, %v375_v49  ;;  %v377_v53 = vld [vmem:[#allocation2 + $0x268] sm:$0xff]  ;;  %v378_v54 = vld [vmem:[#allocation2 + $0x270] sm:$0xff] }
  0x49   :  { %240 = vst.msk [vmem:[#allocation2 + $0x408] sm:$0xff] %vm27_vm1, %v175_v24  ;;  %241 = vst.msk [vmem:[#allocation2 + $0x410] sm:$0xff] %vm27_vm1, %v176_v25  ;;  %v379_v55 = vld [vmem:[#allocation2 + $0x288] sm:$0xff]  ;;  %v380_v56 = vld [vmem:[#allocation2 + $0x290] sm:$0xff]  ;;  %v424_v57 = vpack.c.bf16 %v378_v54, %v377_v53 }
  0x4a   :  { %242 = vst.msk [vmem:[#allocation2 + $0x428] sm:$0xff] %vm27_vm1, %v177_v26  ;;  %243 = vst.msk [vmem:[#allocation2 + $0x430] sm:$0xff] %vm27_vm1, %v178_v29  ;;  %v425_v58 = vpack.c.bf16 %v380_v56, %v379_v55  ;;  %v381_v59 = vld [vmem:[#allocation2 + $0x2a8] sm:$0xff]  ;;  %v382_v60 = vld [vmem:[#allocation2 + $0x2b0] sm:$0xff] }
  0x4b   :  { %v383_v61 = vld [vmem:[#allocation2 + $0x2c8] sm:$0xff]  ;;  %v384_v62 = vld [vmem:[#allocation2 + $0x2d0] sm:$0xff]  ;;  %v426_v63 = vpack.c.bf16 %v382_v60, %v381_v59 }
  0x4c   :  { %v427_v0 = vpack.c.bf16 %v384_v62, %v383_v61  ;;  %v385_v1 = vld [vmem:[#allocation2 + $0x2e8] sm:$0xff]  ;;  %v386_v2 = vld [vmem:[#allocation2 + $0x2f0] sm:$0xff] }
  0x4d   :  { %v387_v3 = vld [vmem:[#allocation2 + $0x308] sm:$0xff]  ;;  %v388_v4 = vld [vmem:[#allocation2 + $0x310] sm:$0xff]  ;;  %v428_v5 = vpack.c.bf16 %v386_v2, %v385_v1 }
  0x4e   :  { %v429_v6 = vpack.c.bf16 %v388_v4, %v387_v3  ;;  %v389_v7 = vld [vmem:[#allocation2 + $0x328] sm:$0xff]  ;;  %v390_v8 = vld [vmem:[#allocation2 + $0x330] sm:$0xff] }
  0x4f   :  { %20341 = vmatmul.mubr.msk.bf16.gmra.mrb[12].mxu0 %vm27_vm1, %v414_v14  ;;  %v391_v9 = vld [vmem:[#allocation2 + $0x348] sm:$0xff]  ;;  %v392_v10 = vld [vmem:[#allocation2 + $0x350] sm:$0xff]  ;;  %v430_v11 = vpack.c.bf16 %v390_v8, %v389_v7 }
  0x50   :  { %20344 = vmatprep.mubr.msk.bf16.mxu0 %vm27_vm1, %v415_v16  ;;  %v431_v12 = vpack.c.bf16 %v392_v10, %v391_v9  ;;  %v393_v13 = vld [vmem:[#allocation2 + $0x368] sm:$0xff]  ;;  %v394_v14 = vld [vmem:[#allocation2 + $0x370] sm:$0xff] }
  0x51   :  { %v395_v15 = vld [vmem:[#allocation2 + $0x388] sm:$0xff]  ;;  %v396_v16 = vld [vmem:[#allocation2 + $0x390] sm:$0xff]  ;;  %v432_v17 = vpack.c.bf16 %v394_v14, %v393_v13 }
  0x52   :  { %v433_v18 = vpack.c.bf16 %v396_v16, %v395_v15  ;;  %v397_v19 = vld [vmem:[#allocation2 + $0x3a8] sm:$0xff]  ;;  %v398_v20 = vld [vmem:[#allocation2 + $0x3b0] sm:$0xff] }
  0x53   :  { %v399_v21 = vld [vmem:[#allocation2 + $0x3c8] sm:$0xff]  ;;  %v400_v22 = vld [vmem:[#allocation2 + $0x3d0] sm:$0xff]  ;;  %v434_v23 = vpack.c.bf16 %v398_v20, %v397_v19 }
  0x54   :  { %v435_v24 = vpack.c.bf16 %v400_v22, %v399_v21  ;;  %v401_v25 = vld [vmem:[#allocation2 + $0x3e8] sm:$0xff]  ;;  %v402_v26 = vld [vmem:[#allocation2 + $0x3f0] sm:$0xff] }
  0x55   :  { %v403_v27 = vld [vmem:[#allocation2 + $0x408] sm:$0xff]  ;;  %v404_v28 = vld [vmem:[#allocation2 + $0x410] sm:$0xff]  ;;  %v436_v29 = vpack.c.bf16 %v402_v26, %v401_v25 }
  0x56   :  { %v437_v30 = vpack.c.bf16 %v404_v28, %v403_v27  ;;  %v405_v31 = vld [vmem:[#allocation2 + $0x428] sm:$0xff] }
  0x57   :  { %20345 = vmatmul.mubr.msk.bf16.gmra.mrb[16].mxu0 %vm27_vm1, %v416_v33  ;;  %v406_v33 = vld [vmem:[#allocation2 + $0x430] sm:$0xff]  ;;  %v248_v38 = vld [vmem:[#allocation2 + $0x27] sm:$0xff] }
  0x58   :  { %20348 = vmatprep.mubr.msk.bf16.mxu0 %vm27_vm1, %v417_v34  ;;  %v246_v34 = vld [vmem:[#allocation2 + $0x7] sm:$0xff]  ;;  %v247_v35 = vld [vmem:[#allocation2 + $0xf] sm:$0xff]  ;;  %v438_v36 = vpack.c.bf16 %v406_v33, %v405_v31 }
  0x59   :  { %v310_v37 = vpack.c.bf16 %v247_v35, %v246_v34  ;;  %v251_v41 = vld [vmem:[#allocation2 + $0x4f] sm:$0xff]  ;;  %v254_v48 = vld [vmem:[#allocation2 + $0x87] sm:$0xff] }
  0x5a   :  { %v253_v47 = vld [vmem:[#allocation2 + $0x6f] sm:$0xff]  ;;  %v258_v53 = vld [vmem:[#allocation2 + $0xc7] sm:$0xff] }
  0x5b   :  { %v255_v49 = vld [vmem:[#allocation2 + $0x8f] sm:$0xff]  ;;  %v262_v59 = vld [vmem:[#allocation2 + $0x107] sm:$0xff] }
  0x5c   :  { %v24543_v50 = vpack.c.bf16 %v255_v49, %v254_v48  ;;  %v259_v54 = vld [vmem:[#allocation2 + $0xcf] sm:$0xff]  ;;  %v266_v1 = vld [vmem:[#allocation2 + $0x147] sm:$0xff] }
  0x5d   :  { %v24551_v56 = vpack.c.bf16 %v259_v54, %v258_v53  ;;  %v263_v60 = vld [vmem:[#allocation2 + $0x10f] sm:$0xff]  ;;  %v270_v7 = vld [vmem:[#allocation2 + $0x187] sm:$0xff] }
  0x5e   :  { %v24559_v62 = vpack.c.bf16 %v263_v60, %v262_v59  ;;  %v267_v2 = vld [vmem:[#allocation2 + $0x14f] sm:$0xff]  ;;  %v274_v13 = vld [vmem:[#allocation2 + $0x1c7] sm:$0xff] }
  0x5f   :  { %20349 = vmatmul.mubr.msk.bf16.gmra.mrb[20].mxu0 %vm27_vm1, %v418_v39  ;;  %v249_v39 = vld [vmem:[#allocation2 + $0x2f] sm:$0xff]  ;;  %v24567_v4 = vpack.c.bf16 %v267_v2, %v266_v1  ;;  %v278_v19 = vld [vmem:[#allocation2 + $0x247] sm:$0xff] }
  0x60   :  { %20352 = vmatprep.mubr.msk.bf16.mxu0 %vm27_vm1, %v419_v40  ;;  %v250_v40 = vld [vmem:[#allocation2 + $0x47] sm:$0xff]  ;;  %v24524_v42 = vpack.c.bf16 %v249_v39, %v248_v38  ;;  %v271_v8 = vld [vmem:[#allocation2 + $0x18f] sm:$0xff] }
  0x61   :  { %v24526_v43 = vpack.c.bf16 %v251_v41, %v250_v40  ;;  %v24575_v10 = vpack.c.bf16 %v271_v8, %v270_v7  ;;  %v275_v14 = vld [vmem:[#allocation2 + $0x1cf] sm:$0xff]  ;;  %v282_v25 = vld [vmem:[#allocation2 + $0x287] sm:$0xff] }
  0x62   :  { %v24583_v16 = vpack.c.bf16 %v275_v14, %v274_v13  ;;  %v279_v20 = vld [vmem:[#allocation2 + $0x24f] sm:$0xff]  ;;  %v286_v31 = vld [vmem:[#allocation2 + $0x2c7] sm:$0xff] }
  0x63   :  { %v326_v22 = vpack.c.bf16 %v279_v20, %v278_v19  ;;  %v283_v26 = vld [vmem:[#allocation2 + $0x28f] sm:$0xff]  ;;  %v290_v38 = vld [vmem:[#allocation2 + $0x307] sm:$0xff] }
  0x64   :  { %v24596_v28 = vpack.c.bf16 %v283_v26, %v282_v25  ;;  %v287_v33 = vld [vmem:[#allocation2 + $0x2cf] sm:$0xff]  ;;  %v298_v54 = vld [vmem:[#allocation2 + $0x387] sm:$0xff] }
  0x65   :  { %v24604_v35 = vpack.c.bf16 %v287_v33, %v286_v31  ;;  %v291_v39 = vld [vmem:[#allocation2 + $0x30f] sm:$0xff]  ;;  %v300_v60 = vld [vmem:[#allocation2 + $0x3a7] sm:$0xff] }
  0x66   :  { %v24612_v41 = vpack.c.bf16 %v291_v39, %v290_v38  ;;  %v295_v48 = vld [vmem:[#allocation2 + $0x34f] sm:$0xff]  ;;  %v306_v8 = vld [vmem:[#allocation2 + $0x407] sm:$0xff] }
  0x67   :  { %20353 = vmatmul.mubr.msk.bf16.gmra.mrb[24].mxu0 %vm27_vm1, %v420_v45  ;;  %v24533_v45 = vld [vmem:[%s32073_s1 + $0x6] sm:$0x3]  ;;  %v297_v53 = vld [vmem:[#allocation2 + $0x36f] sm:$0xff]  ;;  %v24664_v33 = vld [vmem:[%s32073_s1 + $0x8] sm:$0x3] }
  0x68   :  { %20356 = vmatprep.mubr.msk.bf16.mxu0 %vm27_vm1, %v421_v46  ;;  %v252_v46 = vld [vmem:[#allocation2 + $0x67] sm:$0xff]  ;;  %v303_v1 = vld [vmem:[#allocation2 + $0x3cf] sm:$0xff]  ;;  %v1963_v31 = vsel %vm537_vm0, %v24533_v45, 0 }
  0x69   :  { %v24541_v32 = vpack.c.bf16 %v253_v47, %v252_v46  ;;  %v293_v46 = vld [vmem:[#allocation2 + $0x32f] sm:$0xff]  ;;  %v294_v47 = vld [vmem:[#allocation2 + $0x347] sm:$0xff] }
  0x6a   :  { %v305_v7 = vld [vmem:[#allocation2 + $0x3ef] sm:$0xff]  ;;  %v308_v14 = vld [vmem:[#allocation2 + $0x427] sm:$0xff] }
  0x6b   :  { %v1219_v19 = vld [vmem:[#allocation2 + $0x11] sm:$0xff]  ;;  %v1222_v25 = vld [vmem:[#allocation2 + $0x49] sm:$0xff] }
  0x6c   :  { %v1223_v26 = vld [vmem:[#allocation2 + $0x51] sm:$0xff]  ;;  %v1226_v38 = vld [vmem:[#allocation2 + $0x89] sm:$0xff] }
  0x6d   :  { %v1227_v39 = vld [vmem:[#allocation2 + $0x91] sm:$0xff] }
  0x6f   :  { %20357 = vmatmul.mubr.msk.bf16.gmra.mrb[28].mxu0 %vm27_vm1, %v422_v51  ;;  %v256_v51 = vld [vmem:[#allocation2 + $0xa7] sm:$0xff] }
  0x70   :  { %20360 = vmatprep.mubr.msk.bf16.mxu0 %vm27_vm1, %v423_v52  ;;  %v257_v52 = vld [vmem:[#allocation2 + $0xaf] sm:$0xff] }
  0x71   :  { %v24549_v55 = vpack.c.bf16 %v257_v52, %v256_v51  ;;  %v24620_v51 = vpack.c.bf16 %v295_v48, %v294_v47  ;;  %v296_v52 = vld [vmem:[#allocation2 + $0x367] sm:$0xff]  ;;  %v1229_v47 = vld [vmem:[#allocation2 + $0xb1] sm:$0xff] }
  0x72   :  { %v1230_v48 = vld [vmem:[#allocation2 + $0xc9] sm:$0xff] }
  0x77   :  { %20361 = vmatmul.mubr.msk.bf16.gmra.mrb[32].mxu0 %vm27_vm1, %v424_v57  ;;  %v260_v57 = vld [vmem:[#allocation2 + $0xe7] sm:$0xff] }
  0x78   :  { %20364 = vmatprep.mubr.msk.bf16.mxu0 %vm27_vm1, %v425_v58  ;;  %v261_v58 = vld [vmem:[#allocation2 + $0xef] sm:$0xff] }
  0x79   :  { %v24557_v61 = vpack.c.bf16 %v261_v58, %v260_v57  ;;  %v299_v57 = vld [vmem:[#allocation2 + $0x38f] sm:$0xff]  ;;  %v24626_v58 = vpack.c.bf16 %v297_v53, %v296_v52 }
  0x7a   :  { %v24628_v59 = vpack.c.bf16 %v299_v57, %v298_v54  ;;  %v1231_v52 = vld [vmem:[#allocation2 + $0xd1] sm:$0xff]  ;;  %v1232_v57 = vld [vmem:[#allocation2 + $0xe9] sm:$0xff] }
  0x7b   :  { %v24682_v54 = vpack.c.bf16 %v1231_v52, %v1230_v48  ;;  %v148_v48 = vld [vmem:[%s32074_s0 + $0xf8] sm:$0xff]  ;;  %v1248_v52 = vld [vmem:[#allocation2 + $0x1e9] sm:$0xff] }
  0x7c   :  { %213 = vst.msk [vmem:[#allocation2 + $0x210] sm:$0xff] %vm27_vm1, %v148_v48  ;;  %v1260_v48 = vld [vmem:[#allocation2 + $0x2e9] sm:$0xff] }
  0x7f   :  { %20365 = vmatmul.mubr.msk.bf16.gmra.mrb[36].mxu0 %vm27_vm1, %v426_v63  ;;  %v264_v63 = vld [vmem:[#allocation2 + $0x127] sm:$0xff] }
  0x80   :  { %20368 = vmatprep.mubr.msk.bf16.mxu0 %vm27_vm1, %v427_v0  ;;  %v265_v0 = vld [vmem:[#allocation2 + $0x12f] sm:$0xff] }
  0x81   :  { %v24565_v3 = vpack.c.bf16 %v265_v0, %v264_v63  ;;  %v301_v63 = vld [vmem:[#allocation2 + $0x3af] sm:$0xff]  ;;  %v302_v0 = vld [vmem:[#allocation2 + $0x3c7] sm:$0xff] }
  0x82   :  { %v24634_v2 = vpack.c.bf16 %v301_v63, %v300_v60  ;;  %v1233_v60 = vld [vmem:[#allocation2 + $0xf1] sm:$0xff]  ;;  %v1234_v63 = vld [vmem:[#allocation2 + $0x109] sm:$0xff] }
  0x87   :  { %20369 = vmatmul.mubr.msk.bf16.gmra.mrb[40].mxu0 %vm27_vm1, %v428_v5  ;;  %v268_v5 = vld [vmem:[#allocation2 + $0x167] sm:$0xff] }
  0x88   :  { %20372 = vmatprep.mubr.msk.bf16.mxu0 %vm27_vm1, %v429_v6  ;;  %v269_v6 = vld [vmem:[#allocation2 + $0x16f] sm:$0xff] }
  0x89   :  { %v24573_v9 = vpack.c.bf16 %v269_v6, %v268_v5  ;;  %v24636_v5 = vpack.c.bf16 %v303_v1, %v302_v0  ;;  %v304_v6 = vld [vmem:[#allocation2 + $0x3e7] sm:$0xff]  ;;  %v1235_v0 = vld [vmem:[#allocation2 + $0x111] sm:$0xff]  ;;  %v24688_v1 = vpack.c.bf16 %v1233_v60, %v1232_v57 }
  0x8a   :  { %v1249_v57 = vld [vmem:[#allocation2 + $0x1f1] sm:$0xff]  ;;  %v1250_v60 = vld [vmem:[#allocation2 + $0x249] sm:$0xff] }
  0x8f   :  { %20373 = vmatmul.mubr.msk.bf16.gmra.mrb[44].mxu0 %vm27_vm1, %v430_v11  ;;  %v272_v11 = vld [vmem:[#allocation2 + $0x1a7] sm:$0xff] }
  0x90   :  { %20376 = vmatprep.mubr.msk.bf16.mxu0 %vm27_vm1, %v431_v12  ;;  %v273_v12 = vld [vmem:[#allocation2 + $0x1af] sm:$0xff] }
  0x91   :  { %v24581_v15 = vpack.c.bf16 %v273_v12, %v272_v11  ;;  %v307_v11 = vld [vmem:[#allocation2 + $0x40f] sm:$0xff]  ;;  %v24642_v12 = vpack.c.bf16 %v305_v7, %v304_v6  ;;  %v24690_v6 = vpack.c.bf16 %v1235_v0, %v1234_v63  ;;  %v24728_v0 = vpack.c.bf16 %v1249_v57, %v1248_v52 }
  0x92   :  { %v24644_v13 = vpack.c.bf16 %v307_v11, %v306_v8  ;;  %v1236_v7 = vld [vmem:[#allocation2 + $0x129] sm:$0xff]  ;;  %v1237_v8 = vld [vmem:[#allocation2 + $0x131] sm:$0xff] }
  0x93   :  { %v1238_v11 = vld [vmem:[#allocation2 + $0x149] sm:$0xff]  ;;  %v1251_v63 = vld [vmem:[#allocation2 + $0x251] sm:$0xff] }
  0x94   :  { %v1261_v52 = vld [vmem:[#allocation2 + $0x2f1] sm:$0xff]  ;;  %v1262_v57 = vld [vmem:[#allocation2 + $0x309] sm:$0xff] }
  0x97   :  { %20377 = vmatmul.mubr.msk.bf16.gmra.mrb[48].mxu0 %vm27_vm1, %v432_v17  ;;  %v276_v17 = vld [vmem:[#allocation2 + $0x1e7] sm:$0xff] }
  0x98   :  { %20380 = vmatprep.mubr.msk.bf16.mxu0 %vm27_vm1, %v433_v18  ;;  %v277_v18 = vld [vmem:[#allocation2 + $0x1ef] sm:$0xff] }
  0x99   :  { %v24589_v21 = vpack.c.bf16 %v277_v18, %v276_v17  ;;  %v309_v17 = vld [vmem:[#allocation2 + $0x42f] sm:$0xff] }
  0x9a   :  { %v1218_v18 = vld [vmem:[#allocation2 + $0x9] sm:$0xff]  ;;  %v24650_v20 = vpack.c.bf16 %v309_v17, %v308_v14  ;;  %v1239_v14 = vld [vmem:[#allocation2 + $0x151] sm:$0xff]  ;;  %v24696_v17 = vpack.c.bf16 %v1237_v8, %v1236_v7  ;;  %v1298_v7 = vpack.c.bf16 %v1251_v63, %v1250_v60  ;;  %v24749_v63 = vpack.c.bf16 %v1261_v52, %v1260_v48 }
  0x9b   :  { %v1252_v8 = vld [vmem:[#allocation2 + $0x269] sm:$0xff]  ;;  %v1263_v60 = vld [vmem:[#allocation2 + $0x311] sm:$0xff] }
  0x9c   :  { %v1270_v48 = vld [vmem:[#allocation2 + $0x389] sm:$0xff]  ;;  %v1271_v52 = vld [vmem:[#allocation2 + $0x391] sm:$0xff] }
  0x9f   :  { %20381 = vmatmul.mubr.msk.bf16.gmra.mrb[52].mxu0 %vm27_vm1, %v434_v23  ;;  %v280_v23 = vld [vmem:[#allocation2 + $0x267] sm:$0xff] }
  0xa0   :  { %20384 = vmatprep.mubr.msk.bf16.mxu0 %vm27_vm1, %v435_v24  ;;  %v281_v24 = vld [vmem:[#allocation2 + $0x26f] sm:$0xff] }
  0xa1   :  { %v24594_v27 = vpack.c.bf16 %v281_v24, %v280_v23  ;;  %v1220_v23 = vld [vmem:[#allocation2 + $0x29] sm:$0xff]  ;;  %v1221_v24 = vld [vmem:[#allocation2 + $0x31] sm:$0xff] }
  0xa7   :  { %20385 = vmatmul.mubr.msk.bf16.gmra.mrb[56].mxu0 %vm27_vm1, %v436_v29  ;;  %v284_v29 = vld [vmem:[#allocation2 + $0x2a7] sm:$0xff] }
  0xa8   :  { %20388 = vmatprep.mubr.msk.bf16.mxu0 %vm27_vm1, %v437_v30  ;;  %v285_v30 = vld [vmem:[#allocation2 + $0x2af] sm:$0xff] }
  0xa9   :  { %v24602_v34 = vpack.c.bf16 %v285_v30, %v284_v29  ;;  %v24655_v29 = vpack.c.bf16 %v1221_v24, %v1220_v23  ;;  %v24657_v30 = vpack.c.bf16 %v1223_v26, %v1222_v25  ;;  %v1242_v23 = vld [vmem:[#allocation2 + $0x189] sm:$0xff]  ;;  %v1243_v24 = vld [vmem:[#allocation2 + $0x191] sm:$0xff] }
  0xaa   :  { %v24706_v26 = vpack.c.bf16 %v1243_v24, %v1242_v23  ;;  %v1256_v24 = vld [vmem:[#allocation2 + $0x2a9] sm:$0xff] }
  0xaf   :  { %20389 = vmatmul.mubr.msk.bf16.gmra.mrb[60].mxu0 %vm27_vm1, %v438_v36  ;;  %v288_v36 = vld [vmem:[#allocation2 + $0x2e7] sm:$0xff] }
  0xb0   :  { %20394 = vmatprep.mubr.msk.bf16.mxu0 %vm27_vm1, %v310_v37  ;;  %v289_v37 = vld [vmem:[#allocation2 + $0x2ef] sm:$0xff] }
  0xb1   :  { %v24610_v40 = vpack.c.bf16 %v289_v37, %v288_v36  ;;  %v1224_v36 = vld [vmem:[#allocation2 + $0x69] sm:$0xff]  ;;  %v1225_v37 = vld [vmem:[#allocation2 + $0x71] sm:$0xff] }
  0xb7   :  { %20395 = vmatmul.mubr.msk.bf16.vlgmr.msra.gmra.mrb[0].mxu0 %vm27_vm1, %v24524_v42 }
  0xb8   :  { %20459 = vmatpush3.bf16.msra.mxu0 %v1413_v44  ;;  %20398 = vmatprep.mubr.msk.bf16.mxu0 %vm27_vm1, %v24526_v43  ;;  %v292_v44 = vld [vmem:[#allocation2 + $0x327] sm:$0xff] }
  0xb9   :  { %23973 = vmatprep.subr.msk.bf16.mxu0 %vm537_vm0, %v24533_v45  ;;  %v24618_v49 = vpack.c.bf16 %v293_v46, %v292_v44  ;;  %v24672_v45 = vpack.c.bf16 %v1225_v37, %v1224_v36  ;;  %v24674_v44 = vpack.c.bf16 %v1227_v39, %v1226_v38  ;;  %v1228_v46 = vld [vmem:[#allocation2 + $0xa9] sm:$0xff]  ;;  %v1245_v36 = vld [vmem:[#allocation2 + $0x1b1] sm:$0xff] }
  0xba   :  { %v24680_v53 = vpack.c.bf16 %v1229_v47, %v1228_v46  ;;  %v1246_v37 = vld [vmem:[#allocation2 + $0x1c9] sm:$0xff]  ;;  %v1247_v38 = vld [vmem:[#allocation2 + $0x1d1] sm:$0xff] }
  0xbb   :  { %v24714_v46 = vpack.c.bf16 %v1247_v38, %v1246_v37  ;;  %v147_v47 = vld [vmem:[%s32074_s0 + $0xf0] sm:$0xff] }
  0xbc   :  { %212 = vst.msk [vmem:[#allocation2 + $0x208] sm:$0xff] %vm27_vm1, %v147_v47  ;;  %v1259_v37 = vld [vmem:[#allocation2 + $0x2d1] sm:$0xff] }
  0xbf   :  { %20399 = vmatmul.mubr.msk.bf16.gmra.mrb[4].mxu0 %vm27_vm1, %v24541_v32 }
  0xc0   :  { %20402 = vmatprep.mubr.msk.bf16.mxu0 %vm27_vm1, %v24543_v50 }
  0xc7   :  { %20403 = vmatmul.mubr.msk.bf16.gmra.mrb[8].mxu0 %vm27_vm1, %v24549_v55 }
  0xc8   :  { %20406 = vmatprep.mubr.msk.bf16.mxu0 %vm27_vm1, %v24551_v56 }
  0xcf   :  { %20407 = vmatmul.mubr.msk.bf16.gmra.mrb[12].mxu0 %vm27_vm1, %v24557_v61 }
  0xd0   :  { %20410 = vmatprep.mubr.msk.bf16.mxu0 %vm27_vm1, %v24559_v62 }
  0xd7   :  { %20411 = vmatmul.mubr.msk.bf16.gmra.mrb[16].mxu0 %vm27_vm1, %v24565_v3 }
  0xd8   :  { %20414 = vmatprep.mubr.msk.bf16.mxu0 %vm27_vm1, %v24567_v4 }
  0xdf   :  { %20415 = vmatmul.mubr.msk.bf16.gmra.mrb[20].mxu0 %vm27_vm1, %v24573_v9 }
  0xe0   :  { %20418 = vmatprep.mubr.msk.bf16.mxu0 %vm27_vm1, %v24575_v10 }
  0xe7   :  { %20419 = vmatmul.mubr.msk.bf16.gmra.mrb[24].mxu0 %vm27_vm1, %v24581_v15 }
  0xe8   :  { %20422 = vmatprep.mubr.msk.bf16.mxu0 %vm27_vm1, %v24583_v16 }
  0xef   :  { %20423 = vmatmul.mubr.msk.bf16.gmra.mrb[28].mxu0 %vm27_vm1, %v24589_v21 }
  0xf0   :  { %20426 = vmatprep.mubr.msk.bf16.mxu0 %vm27_vm1, %v326_v22  ;;  %v1282_v22 = vpack.c.bf16 %v1219_v19, %v1218_v18  ;;  %v24698_v18 = vpack.c.bf16 %v1239_v14, %v1238_v11  ;;  %v1240_v19 = vld [vmem:[#allocation2 + $0x169] sm:$0xff]  ;;  %v1253_v11 = vld [vmem:[#allocation2 + $0x271] sm:$0xff] }
  0xf1   :  { %v1254_v14 = vld [vmem:[#allocation2 + $0x289] sm:$0xff] }
  0xf7   :  { %20427 = vmatmul.mubr.msk.bf16.gmra.mrb[32].mxu0 %vm27_vm1, %v24594_v27 }
  0xf8   :  { %20430 = vmatprep.mubr.msk.bf16.mxu0 %vm27_vm1, %v24596_v28 }
  0xff   :  { %20431 = vmatmul.mubr.msk.bf16.gmra.mrb[36].mxu0 %vm27_vm1, %v24602_v34 }
 0x100   :  { %20434 = vmatprep.mubr.msk.bf16.mxu0 %vm27_vm1, %v24604_v35 }
 0x107   :  { %20435 = vmatmul.mubr.msk.bf16.gmra.mrb[40].mxu0 %vm27_vm1, %v24610_v40 }
 0x108   :  { %20438 = vmatprep.mubr.msk.bf16.mxu0 %vm27_vm1, %v24612_v41 }
 0x10f   :  { %20439 = vmatmul.mubr.msk.bf16.gmra.mrb[44].mxu0 %vm27_vm1, %v24618_v49 }
 0x110   :  { %20442 = vmatprep.mubr.msk.bf16.mxu0 %vm27_vm1, %v24620_v51 }
 0x117   :  { %20443 = vmatmul.mubr.msk.bf16.gmra.mrb[48].mxu0 %vm27_vm1, %v24626_v58 }
 0x118   :  { %20446 = vmatprep.mubr.msk.bf16.mxu0 %vm27_vm1, %v24628_v59 }
 0x11f   :  { %20447 = vmatmul.mubr.msk.bf16.gmra.mrb[52].mxu0 %vm27_vm1, %v24634_v2 }
 0x120   :  { %20450 = vmatprep.mubr.msk.bf16.mxu0 %vm27_vm1, %v24636_v5 }
 0x127   :  { %20451 = vmatmul.mubr.msk.bf16.gmra.mrb[56].mxu0 %vm27_vm1, %v24642_v12 }
 0x128   :  { %20454 = vmatprep.mubr.msk.bf16.mxu0 %vm27_vm1, %v24644_v13 }
 0x12f   :  { %20455 = vmatmul.mubr.msk.bf16.gmra.mrb[60].mxu0 %vm27_vm1, %v24650_v20 }
 0x130   :  { %20460 = vmatprep.mubr.msk.bf16.mxu0 %vm27_vm1, %v1282_v22  ;;  %v1241_v22 = vld [vmem:[#allocation2 + $0x171] sm:$0xff] }
 0x131   :  { %v24704_v25 = vpack.c.bf16 %v1241_v22, %v1240_v19  ;;  %v1255_v19 = vld [vmem:[#allocation2 + $0x291] sm:$0xff]  ;;  %v24733_v22 = vpack.c.bf16 %v1253_v11, %v1252_v8  ;;  %v1264_v8 = vld [vmem:[#allocation2 + $0x329] sm:$0xff] }
 0x132   :  { %v24735_v23 = vpack.c.bf16 %v1255_v19, %v1254_v14  ;;  %v1265_v11 = vld [vmem:[#allocation2 + $0x331] sm:$0xff]  ;;  %v1266_v14 = vld [vmem:[#allocation2 + $0x349] sm:$0xff] }
 0x133   :  { %v1267_v19 = vld [vmem:[#allocation2 + $0x351] sm:$0xff] }
 0x137   :  { %20461 = vmatmul.mubr.msk.bf16.vlgmr.msra.gmra.mrb[0].mxu0 %vm27_vm1, %v24655_v29 }
 0x138   :  { %20525 = vmatpush3.bf16.msra.mxu0 %v1963_v31  ;;  %20464 = vmatprep.mubr.msk.bf16.mxu0 %vm27_vm1, %v24657_v30  ;;  %v1244_v31 = vld [vmem:[#allocation2 + $0x1a9] sm:$0xff] }
 0x139   :  { %23974 = vmatprep.subr.msk.bf16.mxu0 %vm537_vm0, %v24664_v33  ;;  %v24712_v39 = vpack.c.bf16 %v1245_v36, %v1244_v31  ;;  %v1257_v31 = vld [vmem:[#allocation2 + $0x2b1] sm:$0xff]  ;;  %v1258_v36 = vld [vmem:[#allocation2 + $0x2c9] sm:$0xff] }
 0x13a   :  { %v24741_v38 = vpack.c.bf16 %v1257_v31, %v1256_v24  ;;  %v24743_v47 = vpack.c.bf16 %v1259_v37, %v1258_v36  ;;  %v24757_v24 = vpack.c.bf16 %v1265_v11, %v1264_v8  ;;  %v24759_v31 = vpack.c.bf16 %v1267_v19, %v1266_v14  ;;  %v1268_v36 = vld [vmem:[#allocation2 + $0x369] sm:$0xff]  ;;  %v1269_v37 = vld [vmem:[#allocation2 + $0x371] sm:$0xff] }
 0x13b   :  { %v1272_v8 = vld [vmem:[#allocation2 + $0x3a9] sm:$0xff]  ;;  %v1273_v11 = vld [vmem:[#allocation2 + $0x3b1] sm:$0xff] }
 0x13c   :  { %32384 = vst [vmem:[#allocation3_spill] sm:$0xff] %v24757_v24  ;;  %32385 = vst [vmem:[#allocation4_spill] sm:$0xff] %v24759_v31  ;;  %v1274_v14 = vld [vmem:[#allocation2 + $0x3c9] sm:$0xff]  ;;  %v1275_v19 = vld [vmem:[#allocation2 + $0x3d1] sm:$0xff] }
 0x13f   :  { %20465 = vmatmul.mubr.msk.bf16.gmra.mrb[4].mxu0 %vm27_vm1, %v24672_v45 }
 0x140   :  { %20468 = vmatprep.mubr.msk.bf16.mxu0 %vm27_vm1, %v24674_v44 }
 0x147   :  { %20469 = vmatmul.mubr.msk.bf16.gmra.mrb[8].mxu0 %vm27_vm1, %v24680_v53 }
 0x148   :  { %20472 = vmatprep.mubr.msk.bf16.mxu0 %vm27_vm1, %v24682_v54 }
 0x14f   :  { %20473 = vmatmul.mubr.msk.bf16.gmra.mrb[12].mxu0 %vm27_vm1, %v24688_v1 }
 0x150   :  { %20476 = vmatprep.mubr.msk.bf16.mxu0 %vm27_vm1, %v24690_v6 }
 0x157   :  { %20477 = vmatmul.mubr.msk.bf16.gmra.mrb[16].mxu0 %vm27_vm1, %v24696_v17 }
 0x158   :  { %20480 = vmatprep.mubr.msk.bf16.mxu0 %vm27_vm1, %v24698_v18 }
 0x15f   :  { %20481 = vmatmul.mubr.msk.bf16.gmra.mrb[20].mxu0 %vm27_vm1, %v24704_v25 }
 0x160   :  { %20484 = vmatprep.mubr.msk.bf16.mxu0 %vm27_vm1, %v24706_v26 }
 0x167   :  { %20485 = vmatmul.mubr.msk.bf16.gmra.mrb[24].mxu0 %vm27_vm1, %v24712_v39 }
 0x168   :  { %20488 = vmatprep.mubr.msk.bf16.mxu0 %vm27_vm1, %v24714_v46 }
 0x16f   :  { %20489 = vmatmul.mubr.msk.bf16.gmra.mrb[28].mxu0 %vm27_vm1, %v24728_v0 }
 0x170   :  { %20492 = vmatprep.mubr.msk.bf16.mxu0 %vm27_vm1, %v1298_v7  ;;  %v24751_v7 = vpack.c.bf16 %v1263_v60, %v1262_v57  ;;  %v24765_v57 = vpack.c.bf16 %v1269_v37, %v1268_v36  ;;  %v24767_v60 = vpack.c.bf16 %v1271_v52, %v1270_v48  ;;  %v1276_v36 = vld [vmem:[#allocation2 + $0x3e9] sm:$0xff]  ;;  %v1277_v37 = vld [vmem:[#allocation2 + $0x3f1] sm:$0xff] }
 0x171   :  { %v1278_v48 = vld [vmem:[#allocation2 + $0x409] sm:$0xff]  ;;  %v1279_v52 = vld [vmem:[#allocation2 + $0x411] sm:$0xff] }
 0x172   :  { %32386 = vst [vmem:[#allocation5_spill] sm:$0xff] %v24765_v57  ;;  %32387 = vst [vmem:[#allocation6_spill] sm:$0xff] %v24767_v60 }
 0x177   :  { %20493 = vmatmul.mubr.msk.bf16.gmra.mrb[32].mxu0 %vm27_vm1, %v24733_v22 }
 0x178   :  { %20496 = vmatprep.mubr.msk.bf16.mxu0 %vm27_vm1, %v24735_v23 }
 0x17f   :  { %20497 = vmatmul.mubr.msk.bf16.gmra.mrb[36].mxu0 %vm27_vm1, %v24741_v38 }
 0x180   :  { %20500 = vmatprep.mubr.msk.bf16.mxu0 %vm27_vm1, %v24743_v47 }
 0x187   :  { %20501 = vmatmul.mubr.msk.bf16.gmra.mrb[40].mxu0 %vm27_vm1, %v24749_v63 }
 0x188   :  { %20504 = vmatprep.mubr.msk.bf16.mxu0 %vm27_vm1, %v24751_v7 }
 0x18f   :  { %20505 = vmatmul.mubr.msk.bf16.gmra.mrb[44].mxu0 %vm27_vm1, %v24757_v24  ;;  %v24773_v24 = vpack.c.bf16 %v1273_v11, %v1272_v8  ;;  %v179_v8 = vld [vmem:[%s32074_s0 + $0x1f0] sm:$0xff]  ;;  %v180_v11 = vld [vmem:[%s32074_s0 + $0x1f8] sm:$0xff] }
 0x190   :  { %20508 = vmatprep.mubr.msk.bf16.mxu0 %vm27_vm1, %v24759_v31  ;;  %v24775_v31 = vpack.c.bf16 %v1275_v19, %v1274_v14  ;;  %244 = vst.msk [vmem:[#allocation2 + $0x448] sm:$0xff] %vm27_vm1, %v179_v8  ;;  %245 = vst.msk [vmem:[#allocation2 + $0x450] sm:$0xff] %vm27_vm1, %v180_v11  ;;  %v1280_v14 = vld [vmem:[#allocation2 + $0x429] sm:$0xff]  ;;  %v1281_v19 = vld [vmem:[#allocation2 + $0x431] sm:$0xff] }
 0x191   :  { %v2335_v8 = vld [vmem:[#allocation2 + $0x130] sm:$0xff] }
 0x197   :  { %20509 = vmatmul.mubr.msk.bf16.gmra.mrb[48].mxu0 %vm27_vm1, %v24765_v57  ;;  %v24781_v57 = vpack.c.bf16 %v1277_v37, %v1276_v36  ;;  %v24797_v36 = vpack.c.bf16 %v1281_v19, %v1280_v14  ;;  %v2513_v37 = vsel %vm537_vm0, %v24664_v33, 0  ;;  %v2333_v33 = vld [vmem:[#allocation2 + $0x110] sm:$0xff]  ;;  %v2336_v19 = vld [vmem:[#allocation2 + $0x148] sm:$0xff] }
 0x198   :  { %20512 = vmatprep.mubr.msk.bf16.mxu0 %vm27_vm1, %v24767_v60  ;;  %v24783_v60 = vpack.c.bf16 %v1279_v52, %v1278_v48  ;;  %v18516_v48 = vld [vmem:[%s32073_s1 + $0xa] sm:$0x3] }
 0x199   :  { %v2334_v52 = vld [vmem:[#allocation2 + $0x128] sm:$0xff] }
 0x19a   :  { %v24910_v14 = vpack.c.bf16 %v2335_v8, %v2334_v52  ;;  %v2353_v52 = vld [vmem:[#allocation2 + $0x290] sm:$0xff]  ;;  %v2354_v8 = vld [vmem:[#allocation2 + $0x2a8] sm:$0xff] }
 0x19f   :  { %20513 = vmatmul.mubr.msk.bf16.gmra.mrb[52].mxu0 %vm27_vm1, %v24773_v24 }
 0x1a0   :  { %20516 = vmatprep.mubr.msk.bf16.mxu0 %vm27_vm1, %v24775_v31 }
 0x1a7   :  { %20517 = vmatmul.mubr.msk.bf16.gmra.mrb[56].mxu0 %vm27_vm1, %v24781_v57 }
 0x1a8   :  { %20520 = vmatprep.mubr.msk.bf16.mxu0 %vm27_vm1, %v24783_v60 }
 0x1af   :  { %20521 = vmatmul.mubr.msk.bf16.gmra.mrb[60].mxu0 %vm27_vm1, %v24797_v36 }
 0x1b0   :  { %20526 = vmatprep.mubr.msk.bf16.mxu0 %vm27_vm1, %v24524_v42  ;;  %v1798_v42 = vld [vmem:[#allocation2 + $0x207] sm:$0xff] }
 0x1b7   :  { %20527 = vmatmul.mubr.msk.bf16.vlgmr.msra.gmra.mrb[0].mxu0 %vm27_vm1, %v24526_v43  ;;  %v1799_v43 = vld [vmem:[#allocation2 + $0x20f] sm:$0xff] }
 0x1b8   :  { %20591 = vmatpush3.bf16.msra.mxu0 %v2513_v37  ;;  %20530 = vmatprep.mubr.msk.bf16.mxu0 %vm27_vm1, %v24541_v32  ;;  %v24837_v32 = vpack.c.bf16 %v1799_v43, %v1798_v42  ;;  %v2337_v37 = vld [vmem:[#allocation2 + $0x150] sm:$0xff] }
 0x1b9   :  { %23975 = vmatprep.subr.msk.bf16.mxu0 %vm537_vm0, %v18516_v48  ;;  %v2339_v42 = vld [vmem:[#allocation2 + $0x170] sm:$0xff]  ;;  %v24916_v43 = vpack.c.bf16 %v2337_v37, %v2336_v19 }
 0x1ba   :  { %v2355_v19 = vld [vmem:[#allocation2 + $0x2b0] sm:$0xff] }
 0x1bf   :  { %20531 = vmatmul.mubr.msk.bf16.gmra.mrb[4].mxu0 %vm27_vm1, %v24543_v50  ;;  %v1830_v50 = vld [vmem:[#allocation2 + $0x447] sm:$0xff] }
 0x1c0   :  { %20534 = vmatprep.mubr.msk.bf16.mxu0 %vm27_vm1, %v24549_v55  ;;  %v1831_v55 = vld [vmem:[#allocation2 + $0x44f] sm:$0xff] }
 0x1c7   :  { %20535 = vmatmul.mubr.msk.bf16.gmra.mrb[8].mxu0 %vm27_vm1, %v24551_v56  ;;  %v2318_v56 = vld [vmem:[#allocation2 + $0x28] sm:$0xff] }
 0x1c8   :  { %20538 = vmatprep.mubr.msk.bf16.mxu0 %vm27_vm1, %v24557_v61  ;;  %v2319_v61 = vld [vmem:[#allocation2 + $0x30] sm:$0xff] }
 0x1cf   :  { %20539 = vmatmul.mubr.msk.bf16.gmra.mrb[12].mxu0 %vm27_vm1, %v24559_v62  ;;  %v24871_v62 = vpack.c.bf16 %v1831_v55, %v1830_v50  ;;  %v2340_v55 = vld [vmem:[#allocation2 + $0x188] sm:$0xff] }
 0x1d0   :  { %20542 = vmatprep.mubr.msk.bf16.mxu0 %vm27_vm1, %v24565_v3  ;;  %v2382_v3 = vpack.c.bf16 %v2319_v61, %v2318_v56  ;;  %v2341_v56 = vld [vmem:[#allocation2 + $0x190] sm:$0xff]  ;;  %v2342_v61 = vld [vmem:[#allocation2 + $0x1a8] sm:$0xff] }
 0x1d7   :  { %20543 = vmatmul.mubr.msk.bf16.gmra.mrb[16].mxu0 %vm27_vm1, %v24567_v4  ;;  %v2320_v4 = vld [vmem:[#allocation2 + $0x48] sm:$0xff] }
 0x1d8   :  { %20546 = vmatprep.mubr.msk.bf16.mxu0 %vm27_vm1, %v24573_v9  ;;  %v2321_v9 = vld [vmem:[#allocation2 + $0x50] sm:$0xff] }
 0x1df   :  { %20547 = vmatmul.mubr.msk.bf16.gmra.mrb[20].mxu0 %vm27_vm1, %v24575_v10  ;;  %v2322_v10 = vld [vmem:[#allocation2 + $0x68] sm:$0xff] }
 0x1e0   :  { %20550 = vmatprep.mubr.msk.bf16.mxu0 %vm27_vm1, %v24581_v15  ;;  %v2323_v15 = vld [vmem:[#allocation2 + $0x70] sm:$0xff] }
 0x1e7   :  { %20551 = vmatmul.mubr.msk.bf16.gmra.mrb[24].mxu0 %vm27_vm1, %v24583_v16  ;;  %v24876_v16 = vpack.c.bf16 %v2321_v9, %v2320_v4  ;;  %v24924_v4 = vpack.c.bf16 %v2341_v56, %v2340_v55  ;;  %v2357_v55 = vld [vmem:[#allocation2 + $0x2d0] sm:$0xff]  ;;  %v2358_v56 = vld [vmem:[#allocation2 + $0x2e8] sm:$0xff] }
 0x1e8   :  { %20554 = vmatprep.mubr.msk.bf16.mxu0 %vm27_vm1, %v24589_v21  ;;  %v24878_v21 = vpack.c.bf16 %v2323_v15, %v2322_v10  ;;  %v2344_v10 = vld [vmem:[#allocation2 + $0x1c8] sm:$0xff]  ;;  %v2345_v15 = vld [vmem:[#allocation2 + $0x1d0] sm:$0xff] }
 0x1ef   :  { %20555 = vmatmul.mubr.msk.bf16.gmra.mrb[28].mxu0 %vm27_vm1, %v24837_v32 }
 0x1f0   :  { %20558 = vmatprep.mubr.msk.bf16.mxu0 %vm27_vm1, %v24594_v27  ;;  %v3063_v27 = vsel %vm537_vm0, %v18516_v48, 0  ;;  %v2338_v48 = vld [vmem:[#allocation2 + $0x168] sm:$0xff] }
 0x1f1   :  { %v24918_v50 = vpack.c.bf16 %v2339_v42, %v2338_v48  ;;  %v24947_v48 = vpack.c.bf16 %v2355_v19, %v2354_v8  ;;  %v2356_v42 = vld [vmem:[#allocation2 + $0x2c8] sm:$0xff] }
 0x1f7   :  { %20559 = vmatmul.mubr.msk.bf16.gmra.mrb[32].mxu0 %vm27_vm1, %v24596_v28  ;;  %v24884_v28 = vld [vmem:[%s32073_s1 + $0xc] sm:$0x3] }
 0x1f8   :  { %20562 = vmatprep.mubr.msk.bf16.mxu0 %vm27_vm1, %v24602_v34  ;;  %v2324_v34 = vld [vmem:[#allocation2 + $0x88] sm:$0xff] }
 0x1ff   :  { %20563 = vmatmul.mubr.msk.bf16.gmra.mrb[36].mxu0 %vm27_vm1, %v24604_v35  ;;  %v2325_v35 = vld [vmem:[#allocation2 + $0x90] sm:$0xff] }
 0x200   :  { %20566 = vmatprep.mubr.msk.bf16.mxu0 %vm27_vm1, %v24610_v40  ;;  %v2326_v40 = vld [vmem:[#allocation2 + $0xa8] sm:$0xff] }
 0x207   :  { %20567 = vmatmul.mubr.msk.bf16.gmra.mrb[40].mxu0 %vm27_vm1, %v24612_v41  ;;  %v2327_v41 = vld [vmem:[#allocation2 + $0xb0] sm:$0xff] }
 0x208   :  { %20570 = vmatprep.mubr.msk.bf16.mxu0 %vm27_vm1, %v24618_v49  ;;  %v24892_v49 = vpack.c.bf16 %v2325_v35, %v2324_v34  ;;  %v2347_v34 = vld [vmem:[#allocation2 + $0x1f0] sm:$0xff]  ;;  %v24932_v35 = vpack.c.bf16 %v2345_v15, %v2344_v10  ;;  %v2360_v15 = vld [vmem:[#allocation2 + $0x308] sm:$0xff] }
 0x20f   :  { %20571 = vmatmul.mubr.msk.bf16.gmra.mrb[44].mxu0 %vm27_vm1, %v24620_v51  ;;  %v24894_v51 = vpack.c.bf16 %v2327_v41, %v2326_v40  ;;  %v2348_v41 = vld [vmem:[#allocation2 + $0x208] sm:$0xff] }
 0x210   :  { %20574 = vmatprep.mubr.msk.bf16.mxu0 %vm27_vm1, %v24626_v58  ;;  %v2328_v58 = vld [vmem:[#allocation2 + $0xc8] sm:$0xff] }
 0x217   :  { %20575 = vmatmul.mubr.msk.bf16.gmra.mrb[48].mxu0 %vm27_vm1, %v24628_v59  ;;  %v2329_v59 = vld [vmem:[#allocation2 + $0xd0] sm:$0xff] }
 0x218   :  { %20578 = vmatprep.mubr.msk.bf16.mxu0 %vm27_vm1, %v24634_v2  ;;  %v2330_v2 = vld [vmem:[#allocation2 + $0xe8] sm:$0xff] }
 0x21f   :  { %20579 = vmatmul.mubr.msk.bf16.gmra.mrb[52].mxu0 %vm27_vm1, %v24636_v5  ;;  %v2331_v5 = vld [vmem:[#allocation2 + $0xf0] sm:$0xff] }
 0x220   :  { %20582 = vmatprep.mubr.msk.bf16.mxu0 %vm27_vm1, %v24642_v12  ;;  %v24900_v12 = vpack.c.bf16 %v2329_v59, %v2328_v58  ;;  %v2349_v58 = vld [vmem:[#allocation2 + $0x210] sm:$0xff]  ;;  %v2350_v59 = vld [vmem:[#allocation2 + $0x268] sm:$0xff] }
 0x227   :  { %20583 = vmatmul.mubr.msk.bf16.gmra.mrb[56].mxu0 %vm27_vm1, %v24644_v13  ;;  %v24902_v13 = vpack.c.bf16 %v2331_v5, %v2330_v2  ;;  %v2351_v2 = vld [vmem:[#allocation2 + $0x270] sm:$0xff]  ;;  %v24940_v5 = vpack.c.bf16 %v2349_v58, %v2348_v41 }
 0x228   :  { %20586 = vmatprep.mubr.msk.bf16.mxu0 %vm27_vm1, %v24650_v20  ;;  %v2332_v20 = vld [vmem:[#allocation2 + $0x108] sm:$0xff]  ;;  %v2363_v41 = vld [vmem:[#allocation2 + $0x330] sm:$0xff] }
 0x229   :  { %v24908_v11 = vpack.c.bf16 %v2333_v33, %v2332_v20  ;;  %v2398_v20 = vpack.c.bf16 %v2351_v2, %v2350_v59  ;;  %v2352_v33 = vld [vmem:[#allocation2 + $0x288] sm:$0xff] }
 0x22a   :  { %v24945_v37 = vpack.c.bf16 %v2353_v52, %v2352_v33  ;;  %v2364_v2 = vld [vmem:[#allocation2 + $0x348] sm:$0xff]  ;;  %v2367_v52 = vld [vmem:[#allocation2 + $0x370] sm:$0xff] }
 0x22b   :  { %v2366_v33 = vld [vmem:[#allocation2 + $0x368] sm:$0xff] }
 0x22c   :  { %v24971_v19 = vpack.c.bf16 %v2367_v52, %v2366_v33 }
 0x22f   :  { %20587 = vmatmul.mubr.msk.bf16.gmra.mrb[60].mxu0 %vm27_vm1, %v24871_v62 }
 0x230   :  { %20592 = vmatprep.mubr.msk.bf16.mxu0 %vm27_vm1, %v2382_v3  ;;  %v2343_v3 = vld [vmem:[#allocation2 + $0x1b0] sm:$0xff] }
 0x231   :  { %v24926_v9 = vpack.c.bf16 %v2343_v3, %v2342_v61  ;;  %v2359_v61 = vld [vmem:[#allocation2 + $0x2f0] sm:$0xff]  ;;  %v24953_v3 = vpack.c.bf16 %v2357_v55, %v2356_v42  ;;  %v2368_v42 = vld [vmem:[#allocation2 + $0x388] sm:$0xff] }
 0x232   :  { %v24955_v10 = vpack.c.bf16 %v2359_v61, %v2358_v56  ;;  %v2369_v55 = vld [vmem:[#allocation2 + $0x390] sm:$0xff]  ;;  %v2370_v56 = vld [vmem:[#allocation2 + $0x3a8] sm:$0xff] }
 0x233   :  { %v2371_v61 = vld [vmem:[#allocation2 + $0x3b0] sm:$0xff] }
 0x237   :  { %20593 = vmatmul.mubr.msk.bf16.vlgmr.msra.gmra.mrb[0].mxu0 %vm27_vm1, %v24876_v16 }
 0x238   :  { %20657 = vmatpush3.bf16.msra.mxu0 %v3063_v27  ;;  %20596 = vmatprep.mubr.msk.bf16.mxu0 %vm27_vm1, %v24878_v21  ;;  %v2346_v27 = vld [vmem:[#allocation2 + $0x1e8] sm:$0xff] }
 0x239   :  { %23976 = vmatprep.subr.msk.bf16.mxu0 %vm537_vm0, %v24884_v28  ;;  %v24934_v40 = vpack.c.bf16 %v2347_v34, %v2346_v27  ;;  %v2361_v27 = vld [vmem:[#allocation2 + $0x310] sm:$0xff]  ;;  %v2362_v34 = vld [vmem:[#allocation2 + $0x328] sm:$0xff] }
 0x23a   :  { %v24961_v58 = vpack.c.bf16 %v2361_v27, %v2360_v15  ;;  %v24963_v59 = vpack.c.bf16 %v2363_v41, %v2362_v34  ;;  %v24977_v15 = vpack.c.bf16 %v2369_v55, %v2368_v42  ;;  %v24979_v27 = vpack.c.bf16 %v2371_v61, %v2370_v56  ;;  %v2372_v34 = vld [vmem:[#allocation2 + $0x3c8] sm:$0xff]  ;;  %v2373_v41 = vld [vmem:[#allocation2 + $0x3d0] sm:$0xff] }
 0x23b   :  { %v24985_v33 = vpack.c.bf16 %v2373_v41, %v2372_v34  ;;  %v2376_v42 = vld [vmem:[#allocation2 + $0x408] sm:$0xff]  ;;  %v2377_v55 = vld [vmem:[#allocation2 + $0x410] sm:$0xff] }
 0x23c   :  { %32388 = vst [vmem:[#allocation7_spill] sm:$0xff] %v24977_v15  ;;  %32389 = vst [vmem:[#allocation8_spill] sm:$0xff] %v24979_v27  ;;  %v2378_v56 = vld [vmem:[#allocation2 + $0x428] sm:$0xff]  ;;  %v2379_v61 = vld [vmem:[#allocation2 + $0x430] sm:$0xff] }
 0x23d   :  { %v2380_v34 = vld [vmem:[#allocation2 + $0x448] sm:$0xff]  ;;  %v2381_v41 = vld [vmem:[#allocation2 + $0x450] sm:$0xff] }
 0x23f   :  { %20597 = vmatmul.mubr.msk.bf16.gmra.mrb[4].mxu0 %vm27_vm1, %v24892_v49 }
 0x240   :  { %20600 = vmatprep.mubr.msk.bf16.mxu0 %vm27_vm1, %v24894_v51 }
 0x247   :  { %20601 = vmatmul.mubr.msk.bf16.gmra.mrb[8].mxu0 %vm27_vm1, %v24900_v12 }
 0x248   :  { %20604 = vmatprep.mubr.msk.bf16.mxu0 %vm27_vm1, %v24902_v13 }
 0x24f   :  { %20605 = vmatmul.mubr.msk.bf16.gmra.mrb[12].mxu0 %vm27_vm1, %v24908_v11 }
 0x250   :  { %20608 = vmatprep.mubr.msk.bf16.mxu0 %vm27_vm1, %v24910_v14 }
 0x257   :  { %20609 = vmatmul.mubr.msk.bf16.gmra.mrb[16].mxu0 %vm27_vm1, %v24916_v43 }
 0x258   :  { %20612 = vmatprep.mubr.msk.bf16.mxu0 %vm27_vm1, %v24918_v50 }
 0x25f   :  { %20613 = vmatmul.mubr.msk.bf16.gmra.mrb[20].mxu0 %vm27_vm1, %v24924_v4 }
 0x260   :  { %20616 = vmatprep.mubr.msk.bf16.mxu0 %vm27_vm1, %v24926_v9 }
 0x267   :  { %20617 = vmatmul.mubr.msk.bf16.gmra.mrb[24].mxu0 %vm27_vm1, %v24932_v35 }
 0x268   :  { %20620 = vmatprep.mubr.msk.bf16.mxu0 %vm27_vm1, %v24934_v40 }
 0x26f   :  { %20621 = vmatmul.mubr.msk.bf16.gmra.mrb[28].mxu0 %vm27_vm1, %v24940_v5 }
 0x270   :  { %20624 = vmatprep.mubr.msk.bf16.mxu0 %vm27_vm1, %v2398_v20  ;;  %v2365_v20 = vld [vmem:[#allocation2 + $0x350] sm:$0xff] }
 0x271   :  { %v24969_v8 = vpack.c.bf16 %v2365_v20, %v2364_v2  ;;  %v2374_v2 = vld [vmem:[#allocation2 + $0x3e8] sm:$0xff]  ;;  %v2375_v20 = vld [vmem:[#allocation2 + $0x3f0] sm:$0xff] }
 0x272   :  { %v24987_v52 = vpack.c.bf16 %v2375_v20, %v2374_v2  ;;  %v25001_v2 = vpack.c.bf16 %v2381_v41, %v2380_v34  ;;  %v3614_v20 = vsel %vm537_vm0, %v24884_v28, 0  ;;  %v3432_v34 = vld [vmem:[#allocation2 + $0x10f] sm:$0xff] }
 0x277   :  { %20625 = vmatmul.mubr.msk.bf16.gmra.mrb[32].mxu0 %vm27_vm1, %v24945_v37 }
 0x278   :  { %20628 = vmatprep.mubr.msk.bf16.mxu0 %vm27_vm1, %v24947_v48 }
 0x27f   :  { %20629 = vmatmul.mubr.msk.bf16.gmra.mrb[36].mxu0 %vm27_vm1, %v24953_v3 }
 0x280   :  { %20632 = vmatprep.mubr.msk.bf16.mxu0 %vm27_vm1, %v24955_v10 }
 0x287   :  { %20633 = vmatmul.mubr.msk.bf16.gmra.mrb[40].mxu0 %vm27_vm1, %v24961_v58 }
 0x288   :  { %20636 = vmatprep.mubr.msk.bf16.mxu0 %vm27_vm1, %v24963_v59 }
 0x28f   :  { %20637 = vmatmul.mubr.msk.bf16.gmra.mrb[44].mxu0 %vm27_vm1, %v24969_v8 }
 0x290   :  { %20640 = vmatprep.mubr.msk.bf16.mxu0 %vm27_vm1, %v24971_v19 }
 0x297   :  { %20641 = vmatmul.mubr.msk.bf16.gmra.mrb[48].mxu0 %vm27_vm1, %v24977_v15  ;;  %v24993_v15 = vpack.c.bf16 %v2377_v55, %v2376_v42  ;;  %v18582_v42 = vld [vmem:[%s32073_s1 + $0xe] sm:$0x3] }
 0x298   :  { %20644 = vmatprep.mubr.msk.bf16.mxu0 %vm27_vm1, %v24979_v27  ;;  %v24995_v27 = vpack.c.bf16 %v2379_v61, %v2378_v56  ;;  %v3429_v55 = vld [vmem:[#allocation2 + $0xe7] sm:$0xff]  ;;  %v3430_v56 = vld [vmem:[#allocation2 + $0xef] sm:$0xff] }
 0x299   :  { %v3431_v61 = vld [vmem:[#allocation2 + $0x107] sm:$0xff]  ;;  %v3488_v41 = vpack.c.bf16 %v3430_v56, %v3429_v55 }
 0x29f   :  { %20645 = vmatmul.mubr.msk.bf16.gmra.mrb[52].mxu0 %vm27_vm1, %v24985_v33 }
 0x2a0   :  { %20648 = vmatprep.mubr.msk.bf16.mxu0 %vm27_vm1, %v24987_v52 }
 0x2a7   :  { %20649 = vmatmul.mubr.msk.bf16.gmra.mrb[56].mxu0 %vm27_vm1, %v24993_v15 }
 0x2a8   :  { %20652 = vmatprep.mubr.msk.bf16.mxu0 %vm27_vm1, %v24995_v27 }
 0x2af   :  { %20653 = vmatmul.mubr.msk.bf16.gmra.mrb[60].mxu0 %vm27_vm1, %v25001_v2 }
 0x2b0   :  { %20658 = vmatprep.mubr.msk.bf16.mxu0 %vm27_vm1, %v24655_v29  ;;  %v2898_v29 = vld [vmem:[#allocation2 + $0x209] sm:$0xff] }
 0x2b7   :  { %20659 = vmatmul.mubr.msk.bf16.vlgmr.msra.gmra.mrb[0].mxu0 %vm27_vm1, %v24657_v30  ;;  %v2899_v30 = vld [vmem:[#allocation2 + $0x211] sm:$0xff] }
 0x2b8   :  { %20723 = vmatpush3.bf16.msra.mxu0 %v3614_v20  ;;  %20662 = vmatprep.mubr.msk.bf16.mxu0 %vm27_vm1, %v24672_v45  ;;  %v25041_v45 = vpack.c.bf16 %v2899_v30, %v2898_v29  ;;  %v3489_v20 = vpack.c.bf16 %v3432_v34, %v3431_v61  ;;  %v3434_v29 = vld [vmem:[#allocation2 + $0x12f] sm:$0xff]  ;;  %v3435_v30 = vld [vmem:[#allocation2 + $0x147] sm:$0xff] }
 0x2b9   :  { %23977 = vmatprep.subr.msk.bf16.mxu0 %vm537_vm0, %v18582_v42  ;;  %v3453_v61 = vld [vmem:[#allocation2 + $0x2a7] sm:$0xff]  ;;  %v3454_v34 = vld [vmem:[#allocation2 + $0x2af] sm:$0xff] }
 0x2bf   :  { %20663 = vmatmul.mubr.msk.bf16.gmra.mrb[4].mxu0 %vm27_vm1, %v24674_v44  ;;  %v32390_v44 = vld [vmem:[#allocation3_spill] sm:$0xff] }
 0x2c0   :  { %20666 = vmatprep.mubr.msk.bf16.mxu0 %vm27_vm1, %v24680_v53  ;;  %v32391_v53 = vld [vmem:[#allocation4_spill] sm:$0xff] }
 0x2c7   :  { %20667 = vmatmul.mubr.msk.bf16.gmra.mrb[8].mxu0 %vm27_vm1, %v24682_v54  ;;  %v32392_v54 = vld [vmem:[#allocation5_spill] sm:$0xff] }
 0x2c8   :  { %20670 = vmatprep.mubr.msk.bf16.mxu0 %vm27_vm1, %v24688_v1  ;;  %v32393_v1 = vld [vmem:[#allocation6_spill] sm:$0xff] }
 0x2cf   :  { %20671 = vmatmul.mubr.msk.bf16.gmra.mrb[12].mxu0 %vm27_vm1, %v24690_v6  ;;  %v2930_v6 = vld [vmem:[#allocation2 + $0x449] sm:$0xff] }
 0x2d0   :  { %20674 = vmatprep.mubr.msk.bf16.mxu0 %vm27_vm1, %v24696_v17  ;;  %v2931_v17 = vld [vmem:[#allocation2 + $0x451] sm:$0xff] }
 0x2d7   :  { %20675 = vmatmul.mubr.msk.bf16.gmra.mrb[16].mxu0 %vm27_vm1, %v24698_v18  ;;  %v3419_v18 = vld [vmem:[#allocation2 + $0x47] sm:$0xff] }
 0x2d8   :  { %20678 = vmatprep.mubr.msk.bf16.mxu0 %vm27_vm1, %v24704_v25  ;;  %v3420_v25 = vld [vmem:[#allocation2 + $0x4f] sm:$0xff] }
 0x2df   :  { %20679 = vmatmul.mubr.msk.bf16.gmra.mrb[20].mxu0 %vm27_vm1, %v24706_v26  ;;  %v25075_v26 = vpack.c.bf16 %v2931_v17, %v2930_v6  ;;  %v3438_v6 = vld [vmem:[#allocation2 + $0x16f] sm:$0xff]  ;;  %v3439_v17 = vld [vmem:[#allocation2 + $0x187] sm:$0xff] }
 0x2e0   :  { %20682 = vmatprep.mubr.msk.bf16.mxu0 %vm27_vm1, %v24712_v39  ;;  %v3483_v39 = vpack.c.bf16 %v3420_v25, %v3419_v18  ;;  %v3440_v18 = vld [vmem:[#allocation2 + $0x18f] sm:$0xff] }
 0x2e7   :  { %20683 = vmatmul.mubr.msk.bf16.gmra.mrb[24].mxu0 %vm27_vm1, %v24714_v46  ;;  %v3421_v46 = vld [vmem:[#allocation2 + $0x67] sm:$0xff] }
 0x2e8   :  { %20686 = vmatprep.mubr.msk.bf16.mxu0 %vm27_vm1, %v24728_v0  ;;  %v3422_v0 = vld [vmem:[#allocation2 + $0x6f] sm:$0xff] }
 0x2ef   :  { %20687 = vmatmul.mubr.msk.bf16.gmra.mrb[28].mxu0 %vm27_vm1, %v25041_v45 }
 0x2f0   :  { %20690 = vmatprep.mubr.msk.bf16.mxu0 %vm27_vm1, %v24733_v22  ;;  %v3423_v22 = vld [vmem:[#allocation2 + $0x87] sm:$0xff] }
 0x2f7   :  { %20691 = vmatmul.mubr.msk.bf16.gmra.mrb[32].mxu0 %vm27_vm1, %v24735_v23  ;;  %v3424_v23 = vld [vmem:[#allocation2 + $0x8f] sm:$0xff] }
 0x2f8   :  { %20694 = vmatprep.mubr.msk.bf16.mxu0 %vm27_vm1, %v24741_v38  ;;  %v3484_v38 = vpack.c.bf16 %v3422_v0, %v3421_v46  ;;  %v3441_v46 = vld [vmem:[#allocation2 + $0x1a7] sm:$0xff]  ;;  %v3442_v0 = vld [vmem:[#allocation2 + $0x1af] sm:$0xff] }
 0x2ff   :  { %20695 = vmatmul.mubr.msk.bf16.gmra.mrb[36].mxu0 %vm27_vm1, %v24743_v47  ;;  %v3485_v47 = vpack.c.bf16 %v3424_v23, %v3423_v22  ;;  %v3443_v22 = vld [vmem:[#allocation2 + $0x1c7] sm:$0xff]  ;;  %v3444_v23 = vld [vmem:[#allocation2 + $0x1cf] sm:$0xff] }
 0x300   :  { %20698 = vmatprep.mubr.msk.bf16.mxu0 %vm27_vm1, %v24749_v63  ;;  %v4164_v63 = vsel %vm537_vm0, %v18582_v42, 0  ;;  %v3433_v42 = vld [vmem:[#allocation2 + $0x127] sm:$0xff] }
 0x307   :  { %20699 = vmatmul.mubr.msk.bf16.gmra.mrb[40].mxu0 %vm27_vm1, %v24751_v7  ;;  %v25084_v7 = vld [vmem:[%s32073_s1 + $0x10] sm:$0x3] }
 0x308   :  { %20702 = vmatprep.mubr.msk.bf16.mxu0 %vm27_vm1, %v32390_v44  ;;  %v3436_v44 = vld [vmem:[#allocation2 + $0x14f] sm:$0xff] }
 0x30f   :  { %20703 = vmatmul.mubr.msk.bf16.gmra.mrb[44].mxu0 %vm27_vm1, %v32391_v53  ;;  %v3490_v53 = vpack.c.bf16 %v3434_v29, %v3433_v42  ;;  %v3500_v42 = vpack.c.bf16 %v3454_v34, %v3453_v61  ;;  %v3475_v61 = vld [vmem:[#allocation2 + $0x407] sm:$0xff]  ;;  %v3476_v34 = vld [vmem:[#allocation2 + $0x40f] sm:$0xff] }
 0x310   :  { %20706 = vmatprep.mubr.msk.bf16.mxu0 %vm27_vm1, %v32392_v54  ;;  %v3491_v54 = vpack.c.bf16 %v3436_v44, %v3435_v30  ;;  %v3458_v30 = vld [vmem:[#allocation2 + $0x2ef] sm:$0xff]  ;;  %v3459_v44 = vld [vmem:[#allocation2 + $0x307] sm:$0xff] }
 0x317   :  { %20707 = vmatmul.mubr.msk.bf16.gmra.mrb[48].mxu0 %vm27_vm1, %v32393_v1  ;;  %v3437_v1 = vld [vmem:[#allocation2 + $0x167] sm:$0xff] }
 0x318   :  { %20710 = vmatprep.mubr.msk.bf16.mxu0 %vm27_vm1, %v24773_v24  ;;  %v3425_v24 = vld [vmem:[#allocation2 + $0xa7] sm:$0xff]  ;;  %v3492_v25 = vpack.c.bf16 %v3438_v6, %v3437_v1 }
 0x319   :  { %v3461_v6 = vld [vmem:[#allocation2 + $0x327] sm:$0xff] }
 0x31f   :  { %20711 = vmatmul.mubr.msk.bf16.gmra.mrb[52].mxu0 %vm27_vm1, %v24775_v31  ;;  %v3426_v31 = vld [vmem:[#allocation2 + $0xaf] sm:$0xff] }
 0x320   :  { %20714 = vmatprep.mubr.msk.bf16.mxu0 %vm27_vm1, %v24781_v57  ;;  %v3427_v57 = vld [vmem:[#allocation2 + $0xc7] sm:$0xff] }
 0x327   :  { %20715 = vmatmul.mubr.msk.bf16.gmra.mrb[56].mxu0 %vm27_vm1, %v24783_v60  ;;  %v3428_v60 = vld [vmem:[#allocation2 + $0xcf] sm:$0xff] }
 0x328   :  { %20718 = vmatprep.mubr.msk.bf16.mxu0 %vm27_vm1, %v24797_v36  ;;  %v3486_v36 = vpack.c.bf16 %v3426_v31, %v3425_v24  ;;  %v3487_v28 = vpack.c.bf16 %v3428_v60, %v3427_v57  ;;  %v3446_v24 = vld [vmem:[#allocation2 + $0x1ef] sm:$0xff]  ;;  %v3449_v57 = vld [vmem:[#allocation2 + $0x227] sm:$0xff] }
 0x329   :  { %v3450_v60 = vld [vmem:[#allocation2 + $0x22f] sm:$0xff] }
 0x32a   :  { %v3498_v55 = vpack.c.bf16 %v3450_v60, %v3449_v57  ;;  %v3471_v57 = vld [vmem:[#allocation2 + $0x3c7] sm:$0xff]  ;;  %v3472_v60 = vld [vmem:[#allocation2 + $0x3cf] sm:$0xff] }
 0x32f   :  { %20719 = vmatmul.mubr.msk.bf16.gmra.mrb[60].mxu0 %vm27_vm1, %v25075_v26 }
 0x330   :  { %20724 = vmatprep.mubr.msk.bf16.mxu0 %vm27_vm1, %v3483_v39  ;;  %v3493_v39 = vpack.c.bf16 %v3440_v18, %v3439_v17  ;;  %v3462_v17 = vld [vmem:[#allocation2 + $0x32f] sm:$0xff]  ;;  %v3463_v18 = vld [vmem:[#allocation2 + $0x347] sm:$0xff] }
 0x337   :  { %20725 = vmatmul.mubr.msk.bf16.vlgmr.msra.gmra.mrb[0].mxu0 %vm27_vm1, %v3484_v38  ;;  %v3494_v38 = vpack.c.bf16 %v3442_v0, %v3441_v46  ;;  %v3465_v0 = vld [vmem:[#allocation2 + $0x367] sm:$0xff] }
 0x338   :  { %20789 = vmatpush3.bf16.msra.mxu0 %v4164_v63  ;;  %20728 = vmatprep.mubr.msk.bf16.mxu0 %vm27_vm1, %v3485_v47  ;;  %v3495_v47 = vpack.c.bf16 %v3444_v23, %v3443_v22  ;;  %v3445_v63 = vld [vmem:[#allocation2 + $0x1e7] sm:$0xff]  ;;  %v3466_v22 = vld [vmem:[#allocation2 + $0x36f] sm:$0xff] }
 0x339   :  { %23978 = vmatprep.subr.msk.bf16.mxu0 %vm537_vm0, %v25084_v7  ;;  %v3496_v31 = vpack.c.bf16 %v3446_v24, %v3445_v63  ;;  %v3467_v23 = vld [vmem:[#allocation2 + $0x387] sm:$0xff] }
 0x33a   :  { %v3469_v24 = vld [vmem:[#allocation2 + $0x3a7] sm:$0xff] }
 0x33f   :  { %20729 = vmatmul.mubr.msk.bf16.gmra.mrb[4].mxu0 %vm27_vm1, %v3486_v36  ;;  %v3451_v36 = vld [vmem:[#allocation2 + $0x287] sm:$0xff] }
 0x340   :  { %20732 = vmatprep.mubr.msk.bf16.mxu0 %vm27_vm1, %v3487_v28  ;;  %v3452_v28 = vld [vmem:[#allocation2 + $0x28f] sm:$0xff] }
 0x341   :  { %v3499_v56 = vpack.c.bf16 %v3452_v28, %v3451_v36  ;;  %v3509_v28 = vpack.c.bf16 %v3472_v60, %v3471_v57 }
 0x347   :  { %20733 = vmatmul.mubr.msk.bf16.gmra.mrb[8].mxu0 %vm27_vm1, %v3488_v41  ;;  %v3455_v41 = vld [vmem:[#allocation2 + $0x2c7] sm:$0xff] }
 0x348   :  { %20736 = vmatprep.mubr.msk.bf16.mxu0 %vm27_vm1, %v3489_v20  ;;  %v3456_v20 = vld [vmem:[#allocation2 + $0x2cf] sm:$0xff] }
 0x349   :  { %v3501_v29 = vpack.c.bf16 %v3456_v20, %v3455_v41  ;;  %v3511_v20 = vpack.c.bf16 %v3476_v34, %v3475_v61  ;;  %v4550_v61 = vld [vmem:[#allocation2 + $0x231] sm:$0xff]  ;;  %v4551_v34 = vld [vmem:[#allocation2 + $0x289] sm:$0xff] }
 0x34f   :  { %20737 = vmatmul.mubr.msk.bf16.gmra.mrb[12].mxu0 %vm27_vm1, %v3490_v53  ;;  %v3460_v53 = vld [vmem:[#allocation2 + $0x30f] sm:$0xff] }
 0x350   :  { %20740 = vmatprep.mubr.msk.bf16.mxu0 %vm27_vm1, %v3491_v54  ;;  %v3503_v1 = vpack.c.bf16 %v3460_v53, %v3459_v44  ;;  %v3482_v44 = vld [vmem:[#allocation2 + $0x46f] sm:$0xff] }
 0x357   :  { %20741 = vmatmul.mubr.msk.bf16.gmra.mrb[16].mxu0 %vm27_vm1, %v3492_v25  ;;  %v3464_v25 = vld [vmem:[#allocation2 + $0x34f] sm:$0xff] }
 0x358   :  { %20744 = vmatprep.mubr.msk.bf16.mxu0 %vm27_vm1, %v3493_v39  ;;  %v3504_v39 = vpack.c.bf16 %v3462_v17, %v3461_v6  ;;  %v3505_v46 = vpack.c.bf16 %v3464_v25, %v3463_v18  ;;  %v4535_v6 = vld [vmem:[#allocation2 + $0x149] sm:$0xff]  ;;  %v4536_v17 = vld [vmem:[#allocation2 + $0x151] sm:$0xff] }
 0x359   :  { %v4591_v25 = vpack.c.bf16 %v4536_v17, %v4535_v6  ;;  %v4581_v17 = vld [vmem:[#allocation2 + $0x469] sm:$0xff] }
 0x35f   :  { %20745 = vmatmul.mubr.msk.bf16.gmra.mrb[20].mxu0 %vm27_vm1, %v3494_v38  ;;  %v3468_v38 = vld [vmem:[#allocation2 + $0x38f] sm:$0xff] }
 0x360   :  { %20748 = vmatprep.mubr.msk.bf16.mxu0 %vm27_vm1, %v3495_v47  ;;  %v3506_v47 = vpack.c.bf16 %v3466_v22, %v3465_v0  ;;  %v3507_v63 = vpack.c.bf16 %v3468_v38, %v3467_v23  ;;  %v4539_v0 = vld [vmem:[#allocation2 + $0x189] sm:$0xff]  ;;  %v4540_v22 = vld [vmem:[#allocation2 + $0x191] sm:$0xff] }
 0x361   :  { %v4593_v38 = vpack.c.bf16 %v4540_v22, %v4539_v0 }
 0x367   :  { %20749 = vmatmul.mubr.msk.bf16.gmra.mrb[24].mxu0 %vm27_vm1, %v3496_v31  ;;  %v3470_v31 = vld [vmem:[#allocation2 + $0x3af] sm:$0xff] }
 0x368   :  { %20752 = vmatprep.mubr.msk.bf16.mxu0 %vm27_vm1, %v24837_v32  ;;  %v3457_v32 = vld [vmem:[#allocation2 + $0x2e7] sm:$0xff]  ;;  %v3508_v36 = vpack.c.bf16 %v3470_v31, %v3469_v24  ;;  %v4544_v31 = vld [vmem:[#allocation2 + $0x1d1] sm:$0xff] }
 0x369   :  { %v3502_v54 = vpack.c.bf16 %v3458_v30, %v3457_v32  ;;  %v3481_v30 = vld [vmem:[#allocation2 + $0x467] sm:$0xff] }
 0x36a   :  { %v3514_v53 = vpack.c.bf16 %v3482_v44, %v3481_v30  ;;  %v4543_v24 = vld [vmem:[#allocation2 + $0x1c9] sm:$0xff]  ;;  %v4556_v44 = vld [vmem:[#allocation2 + $0x2d1] sm:$0xff] }
 0x36b   :  { %v4595_v60 = vpack.c.bf16 %v4544_v31, %v4543_v24  ;;  %v4555_v30 = vld [vmem:[#allocation2 + $0x2c9] sm:$0xff] }
 0x36f   :  { %20753 = vmatmul.mubr.msk.bf16.gmra.mrb[28].mxu0 %vm27_vm1, %v3498_v55  ;;  %v3473_v55 = vld [vmem:[#allocation2 + $0x3e7] sm:$0xff] }
 0x370   :  { %20756 = vmatprep.mubr.msk.bf16.mxu0 %vm27_vm1, %v3499_v56  ;;  %v3474_v56 = vld [vmem:[#allocation2 + $0x3ef] sm:$0xff] }
 0x371   :  { %v3510_v41 = vpack.c.bf16 %v3474_v56, %v3473_v55  ;;  %v4549_v56 = vld [vmem:[#allocation2 + $0x229] sm:$0xff] }
 0x377   :  { %20757 = vmatmul.mubr.msk.bf16.gmra.mrb[32].mxu0 %vm27_vm1, %v3500_v42  ;;  %v3477_v42 = vld [vmem:[#allocation2 + $0x427] sm:$0xff] }
 0x378   :  { %20760 = vmatprep.mubr.msk.bf16.mxu0 %vm27_vm1, %v3501_v29  ;;  %v3478_v29 = vld [vmem:[#allocation2 + $0x42f] sm:$0xff] }
 0x379   :  { %v3512_v32 = vpack.c.bf16 %v3478_v29, %v3477_v42  ;;  %v4553_v29 = vld [vmem:[#allocation2 + $0x2a9] sm:$0xff] }
 0x37f   :  { %20761 = vmatmul.mubr.msk.bf16.gmra.mrb[36].mxu0 %vm27_vm1, %v3502_v54  ;;  %v4714_v54 = vsel %vm537_vm0, %v25084_v7, 0  ;;  %v4533_v7 = vld [vmem:[#allocation2 + $0x129] sm:$0xff] }
 0x380   :  { %20764 = vmatprep.mubr.msk.bf16.mxu0 %vm27_vm1, %v3503_v1  ;;  %v4534_v1 = vld [vmem:[#allocation2 + $0x131] sm:$0xff] }
 0x381   :  { %v4590_v18 = vpack.c.bf16 %v4534_v1, %v4533_v7  ;;  %v4577_v7 = vld [vmem:[#allocation2 + $0x429] sm:$0xff]  ;;  %v4578_v1 = vld [vmem:[#allocation2 + $0x431] sm:$0xff] }
 0x382   :  { %v4612_v6 = vpack.c.bf16 %v4578_v1, %v4577_v7 }
 0x387   :  { %20765 = vmatmul.mubr.msk.bf16.gmra.mrb[40].mxu0 %vm27_vm1, %v3504_v39  ;;  %v4537_v39 = vld [vmem:[#allocation2 + $0x169] sm:$0xff] }
 0x388   :  { %20768 = vmatprep.mubr.msk.bf16.mxu0 %vm27_vm1, %v3505_v46  ;;  %v4538_v46 = vld [vmem:[#allocation2 + $0x171] sm:$0xff] }
 0x389   :  { %v4592_v23 = vpack.c.bf16 %v4538_v46, %v4537_v39 }
 0x38f   :  { %20769 = vmatmul.mubr.msk.bf16.gmra.mrb[44].mxu0 %vm27_vm1, %v3506_v47  ;;  %v4541_v47 = vld [vmem:[#allocation2 + $0x1a9] sm:$0xff] }
 0x390   :  { %20772 = vmatprep.mubr.msk.bf16.mxu0 %vm27_vm1, %v3507_v63  ;;  %v4542_v63 = vld [vmem:[#allocation2 + $0x1b1] sm:$0xff] }
 0x391   :  { %v4594_v57 = vpack.c.bf16 %v4542_v63, %v4541_v47 }
 0x397   :  { %20773 = vmatmul.mubr.msk.bf16.gmra.mrb[48].mxu0 %vm27_vm1, %v3508_v36  ;;  %v4545_v36 = vld [vmem:[#allocation2 + $0x1e9] sm:$0xff] }
 0x398   :  { %20776 = vmatprep.mubr.msk.bf16.mxu0 %vm27_vm1, %v3509_v28  ;;  %v4546_v28 = vld [vmem:[#allocation2 + $0x1f1] sm:$0xff] }
 0x399   :  { %v4596_v55 = vpack.c.bf16 %v4546_v28, %v4545_v36 }
 0x39f   :  { %20777 = vmatmul.mubr.msk.bf16.gmra.mrb[52].mxu0 %vm27_vm1, %v3510_v41  ;;  %v4552_v41 = vld [vmem:[#allocation2 + $0x291] sm:$0xff] }
 0x3a0   :  { %20780 = vmatprep.mubr.msk.bf16.mxu0 %vm27_vm1, %v3511_v20  ;;  %v4598_v20 = vpack.c.bf16 %v4550_v61, %v4549_v56  ;;  %v4599_v42 = vpack.c.bf16 %v4552_v41, %v4551_v34 }
 0x3a7   :  { %20781 = vmatmul.mubr.msk.bf16.gmra.mrb[56].mxu0 %vm27_vm1, %v3512_v32  ;;  %v4554_v32 = vld [vmem:[#allocation2 + $0x2b1] sm:$0xff] }
 0x3a8   :  { %20784 = vmatprep.mubr.msk.bf16.mxu0 %vm27_vm1, %v24871_v62  ;;  %v3999_v62 = vld [vmem:[#allocation2 + $0x228] sm:$0xff] }
 0x3af   :  { %20785 = vmatmul.mubr.msk.bf16.gmra.mrb[60].mxu0 %vm27_vm1, %v3514_v53  ;;  %v4600_v53 = vpack.c.bf16 %v4554_v32, %v4553_v29 }
 0x3b0   :  { %20790 = vmatprep.mubr.msk.bf16.mxu0 %vm27_vm1, %v24876_v16  ;;  %v4000_v16 = vld [vmem:[#allocation2 + $0x230] sm:$0xff] }
 0x3b7   :  { %20791 = vmatmul.mubr.msk.bf16.vlgmr.msra.gmra.mrb[0].mxu0 %vm27_vm1, %v24878_v21  ;;  %v4048_v21 = vpack.c.bf16 %v4000_v16, %v3999_v62  ;;  %v4558_v62 = vld [vmem:[#allocation2 + $0x2f1] sm:$0xff]  ;;  %v4559_v16 = vld [vmem:[#allocation2 + $0x309] sm:$0xff] }
 0x3b8   :  { %20855 = vmatpush3.bf16.msra.mxu0 %v4714_v54  ;;  %20794 = vmatprep.mubr.msk.bf16.mxu0 %vm27_vm1, %v24892_v49  ;;  %v32394_v49 = vld [vmem:[#allocation7_spill] sm:$0xff]  ;;  %v4601_v54 = vpack.c.bf16 %v4556_v44, %v4555_v30 }
 0x3bf   :  { %20795 = vmatmul.mubr.msk.bf16.gmra.mrb[4].mxu0 %vm27_vm1, %v24894_v51  ;;  %v32395_v51 = vld [vmem:[#allocation8_spill] sm:$0xff] }
 0x3c0   :  { %20798 = vmatprep.mubr.msk.bf16.mxu0 %vm27_vm1, %v24900_v12  ;;  %v4031_v12 = vld [vmem:[#allocation2 + $0x468] sm:$0xff] }
 0x3c7   :  { %20799 = vmatmul.mubr.msk.bf16.gmra.mrb[8].mxu0 %vm27_vm1, %v24902_v13  ;;  %v4032_v13 = vld [vmem:[#allocation2 + $0x470] sm:$0xff] }
 0x3c8   :  { %20802 = vmatprep.mubr.msk.bf16.mxu0 %vm27_vm1, %v24908_v11  ;;  %v4519_v11 = vld [vmem:[#allocation2 + $0x49] sm:$0xff] }
 0x3cf   :  { %20803 = vmatmul.mubr.msk.bf16.gmra.mrb[12].mxu0 %vm27_vm1, %v24910_v14  ;;  %v4520_v14 = vld [vmem:[#allocation2 + $0x51] sm:$0xff] }
 0x3d0   :  { %20806 = vmatprep.mubr.msk.bf16.mxu0 %vm27_vm1, %v24916_v43  ;;  %v4064_v43 = vpack.c.bf16 %v4032_v13, %v4031_v12  ;;  %v4561_v12 = vld [vmem:[#allocation2 + $0x329] sm:$0xff]  ;;  %v4562_v13 = vld [vmem:[#allocation2 + $0x331] sm:$0xff] }
 0x3d7   :  { %20807 = vmatmul.mubr.msk.bf16.gmra.mrb[16].mxu0 %vm27_vm1, %v24918_v50  ;;  %v4583_v50 = vpack.c.bf16 %v4520_v14, %v4519_v11  ;;  %v4563_v11 = vld [vmem:[#allocation2 + $0x349] sm:$0xff]  ;;  %v4564_v14 = vld [vmem:[#allocation2 + $0x351] sm:$0xff] }
 0x3d8   :  { %20810 = vmatprep.mubr.msk.bf16.mxu0 %vm27_vm1, %v24924_v4  ;;  %v4521_v4 = vld [vmem:[#allocation2 + $0x69] sm:$0xff] }
 0x3df   :  { %20811 = vmatmul.mubr.msk.bf16.gmra.mrb[20].mxu0 %vm27_vm1, %v24926_v9  ;;  %v4522_v9 = vld [vmem:[#allocation2 + $0x71] sm:$0xff] }
 0x3e0   :  { %20814 = vmatprep.mubr.msk.bf16.mxu0 %vm27_vm1, %v24932_v35  ;;  %v4523_v35 = vld [vmem:[#allocation2 + $0x89] sm:$0xff] }
 0x3e7   :  { %20815 = vmatmul.mubr.msk.bf16.gmra.mrb[24].mxu0 %vm27_vm1, %v24934_v40  ;;  %v4524_v40 = vld [vmem:[#allocation2 + $0x91] sm:$0xff] }
 0x3e8   :  { %20818 = vmatprep.mubr.msk.bf16.mxu0 %vm27_vm1, %v24940_v5  ;;  %v4584_v5 = vpack.c.bf16 %v4522_v9, %v4521_v4  ;;  %v4565_v4 = vld [vmem:[#allocation2 + $0x369] sm:$0xff]  ;;  %v4566_v9 = vld [vmem:[#allocation2 + $0x371] sm:$0xff] }
 0x3ef   :  { %20819 = vmatmul.mubr.msk.bf16.gmra.mrb[28].mxu0 %vm27_vm1, %v4048_v21  ;;  %v4560_v21 = vld [vmem:[#allocation2 + $0x311] sm:$0xff] }
 0x3f0   :  { %20822 = vmatprep.mubr.msk.bf16.mxu0 %vm27_vm1, %v24945_v37  ;;  %v4585_v37 = vpack.c.bf16 %v4524_v40, %v4523_v35  ;;  %v4567_v35 = vld [vmem:[#allocation2 + $0x389] sm:$0xff]  ;;  %v4568_v40 = vld [vmem:[#allocation2 + $0x391] sm:$0xff] }
 0x3f7   :  { %20823 = vmatmul.mubr.msk.bf16.gmra.mrb[32].mxu0 %vm27_vm1, %v24947_v48  ;;  %v4525_v48 = vld [vmem:[#allocation2 + $0xa9] sm:$0xff] }
 0x3f8   :  { %20826 = vmatprep.mubr.msk.bf16.mxu0 %vm27_vm1, %v24953_v3  ;;  %v4526_v3 = vld [vmem:[#allocation2 + $0xb1] sm:$0xff] }
 0x3ff   :  { %20827 = vmatmul.mubr.msk.bf16.gmra.mrb[36].mxu0 %vm27_vm1, %v24955_v10  ;;  %v4527_v10 = vld [vmem:[#allocation2 + $0xc9] sm:$0xff] }
 0x400   :  { %20830 = vmatprep.mubr.msk.bf16.mxu0 %vm27_vm1, %v24961_v58  ;;  %v4528_v58 = vld [vmem:[#allocation2 + $0xd1] sm:$0xff] }
 0x407   :  { %20831 = vmatmul.mubr.msk.bf16.gmra.mrb[40].mxu0 %vm27_vm1, %v24963_v59  ;;  %v4586_v59 = vpack.c.bf16 %v4526_v3, %v4525_v48  ;;  %v4569_v48 = vld [vmem:[#allocation2 + $0x3a9] sm:$0xff]  ;;  %v4570_v3 = vld [vmem:[#allocation2 + $0x3b1] sm:$0xff] }
 0x408   :  { %20834 = vmatprep.mubr.msk.bf16.mxu0 %vm27_vm1, %v24969_v8  ;;  %v4587_v8 = vpack.c.bf16 %v4528_v58, %v4527_v10  ;;  %v4571_v10 = vld [vmem:[#allocation2 + $0x3c9] sm:$0xff]  ;;  %v4572_v58 = vld [vmem:[#allocation2 + $0x3d1] sm:$0xff] }
 0x40f   :  { %20835 = vmatmul.mubr.msk.bf16.gmra.mrb[44].mxu0 %vm27_vm1, %v24971_v19  ;;  %v4529_v19 = vld [vmem:[#allocation2 + $0xe9] sm:$0xff] }
 0x410   :  { %20838 = vmatprep.mubr.msk.bf16.mxu0 %vm27_vm1, %v32394_v49 }
 0x417   :  { %20839 = vmatmul.mubr.msk.bf16.gmra.mrb[48].mxu0 %vm27_vm1, %v32395_v51  ;;  %v4603_v51 = vpack.c.bf16 %v4560_v21, %v4559_v16 }
 0x418   :  { %20842 = vmatprep.mubr.msk.bf16.mxu0 %vm27_vm1, %v24985_v33  ;;  %v4532_v33 = vld [vmem:[#allocation2 + $0x111] sm:$0xff] }
 0x41f   :  { %20843 = vmatmul.mubr.msk.bf16.gmra.mrb[52].mxu0 %vm27_vm1, %v24987_v52 }
 0x420   :  { %20846 = vmatprep.mubr.msk.bf16.mxu0 %vm27_vm1, %v24993_v15  ;;  %v4530_v15 = vld [vmem:[#allocation2 + $0xf1] sm:$0xff] }
 0x421   :  { %v4588_v52 = vpack.c.bf16 %v4530_v15, %v4529_v19  ;;  %v4573_v19 = vld [vmem:[#allocation2 + $0x3e9] sm:$0xff]  ;;  %v4574_v15 = vld [vmem:[#allocation2 + $0x3f1] sm:$0xff] }
 0x427   :  { %20847 = vmatmul.mubr.msk.bf16.gmra.mrb[56].mxu0 %vm27_vm1, %v24995_v27  ;;  %v4531_v27 = vld [vmem:[#allocation2 + $0x109] sm:$0xff] }
 0x428   :  { %20850 = vmatprep.mubr.msk.bf16.mxu0 %vm27_vm1, %v25001_v2  ;;  %v4589_v2 = vpack.c.bf16 %v4532_v33, %v4531_v27  ;;  %v4575_v27 = vld [vmem:[#allocation2 + $0x409] sm:$0xff]  ;;  %v4576_v33 = vld [vmem:[#allocation2 + $0x411] sm:$0xff] }
 0x42f   :  { %20851 = vmatmul.mubr.msk.bf16.gmra.mrb[60].mxu0 %vm27_vm1, %v4064_v43  ;;  %v4604_v43 = vpack.c.bf16 %v4562_v13, %v4561_v12 }
 0x430   :  { %20856 = vmatprep.mubr.msk.bf16.mxu0 %vm27_vm1, %v4583_v50  ;;  %v4605_v50 = vpack.c.bf16 %v4564_v14, %v4563_v11 }
 0x437   :  { %20857 = vmatmul.mubr.msk.bf16.vlgmr.msra.gmra.mrb[0].mxu0 %vm27_vm1, %v4584_v5  ;;  %v4606_v5 = vpack.c.bf16 %v4566_v9, %v4565_v4 }
 0x438   :  { %20860 = vmatprep.mubr.msk.bf16.mxu0 %vm27_vm1, %v4585_v37  ;;  %v4607_v37 = vpack.c.bf16 %v4568_v40, %v4567_v35 }
 0x43f   :  { %20861 = vmatmul.mubr.msk.bf16.gmra.mrb[4].mxu0 %vm27_vm1, %v4586_v59  ;;  %v4608_v59 = vpack.c.bf16 %v4570_v3, %v4569_v48 }
 0x440   :  { %20864 = vmatprep.mubr.msk.bf16.mxu0 %vm27_vm1, %v4587_v8  ;;  %v4609_v8 = vpack.c.bf16 %v4572_v58, %v4571_v10 }
 0x447   :  { %20865 = vmatmul.mubr.msk.bf16.gmra.mrb[8].mxu0 %vm27_vm1, %v4588_v52  ;;  %v4610_v52 = vpack.c.bf16 %v4574_v15, %v4573_v19 }
 0x448   :  { %20868 = vmatprep.mubr.msk.bf16.mxu0 %vm27_vm1, %v4589_v2  ;;  %v4611_v2 = vpack.c.bf16 %v4576_v33, %v4575_v27 }
 0x44f   :  { %20869 = vmatmul.mubr.msk.bf16.gmra.mrb[12].mxu0 %vm27_vm1, %v4590_v18  ;;  %v4582_v18 = vld [vmem:[#allocation2 + $0x471] sm:$0xff] }
 0x450   :  { %20872 = vmatprep.mubr.msk.bf16.mxu0 %vm27_vm1, %v4591_v25  ;;  %v4614_v25 = vpack.c.bf16 %v4582_v18, %v4581_v17 }
 0x457   :  { %20873 = vmatmul.mubr.msk.bf16.gmra.mrb[16].mxu0 %vm27_vm1, %v4592_v23 }
 0x458   :  { %20876 = vmatprep.mubr.msk.bf16.mxu0 %vm27_vm1, %v4593_v38 }
 0x45f   :  { %20877 = vmatmul.mubr.msk.bf16.gmra.mrb[20].mxu0 %vm27_vm1, %v4594_v57 }
 0x460   :  { %20880 = vmatprep.mubr.msk.bf16.mxu0 %vm27_vm1, %v4595_v60 }
 0x467   :  { %20881 = vmatmul.mubr.msk.bf16.gmra.mrb[24].mxu0 %vm27_vm1, %v4596_v55 }
 0x468   :  { %20884 = vmatprep.mubr.msk.bf16.mxu0 %vm27_vm1, %v25041_v45  ;;  %v4557_v45 = vld [vmem:[#allocation2 + $0x2e9] sm:$0xff] }
 0x469   :  { %v4602_v49 = vpack.c.bf16 %v4558_v62, %v4557_v45 }
 0x46f   :  { %20885 = vmatmul.mubr.msk.bf16.gmra.mrb[28].mxu0 %vm27_vm1, %v4598_v20 }
 0x470   :  { %20888 = vmatprep.mubr.msk.bf16.mxu0 %vm27_vm1, %v4599_v42 }
 0x477   :  { %20889 = vmatmul.mubr.msk.bf16.gmra.mrb[32].mxu0 %vm27_vm1, %v4600_v53 }
 0x478   :  { %20892 = vmatprep.mubr.msk.bf16.mxu0 %vm27_vm1, %v4601_v54 }
 0x47f   :  { %20893 = vmatmul.mubr.msk.bf16.gmra.mrb[36].mxu0 %vm27_vm1, %v4602_v49 }
 0x480   :  { %20896 = vmatprep.mubr.msk.bf16.mxu0 %vm27_vm1, %v4603_v51 }
 0x487   :  { %20897 = vmatmul.mubr.msk.bf16.gmra.mrb[40].mxu0 %vm27_vm1, %v4604_v43 }
 0x488   :  { %20900 = vmatprep.mubr.msk.bf16.mxu0 %vm27_vm1, %v4605_v50 }
 0x48f   :  { %20901 = vmatmul.mubr.msk.bf16.gmra.mrb[44].mxu0 %vm27_vm1, %v4606_v5 }
 0x490   :  { %20904 = vmatprep.mubr.msk.bf16.mxu0 %vm27_vm1, %v4607_v37 }
 0x497   :  { %20905 = vmatmul.mubr.msk.bf16.gmra.mrb[48].mxu0 %vm27_vm1, %v4608_v59 }
 0x498   :  { %20908 = vmatprep.mubr.msk.bf16.mxu0 %vm27_vm1, %v4609_v8 }
 0x49f   :  { %20909 = vmatmul.mubr.msk.bf16.gmra.mrb[52].mxu0 %vm27_vm1, %v4610_v52 }
 0x4a0   :  { %20912 = vmatprep.mubr.msk.bf16.mxu0 %vm27_vm1, %v4611_v2 }
 0x4a7   :  { %20913 = vmatmul.mubr.msk.bf16.gmra.mrb[56].mxu0 %vm27_vm1, %v4612_v6 }
 0x4a8   :  { %20916 = vmatprep.mubr.msk.bf16.mxu0 %vm27_vm1, %v25075_v26 }
 0x4af   :  { %20917 = vmatmul.mubr.msk.bf16.gmra.mrb[60].mxu0 %vm27_vm1, %v4614_v25 }
 0x50a   :  { %v25219_v39 = vpop.f32.mrb[0].mxu0 }
 0x50b   :  { %v25221_v46 = vpop.f32.mrb[1].mxu0  ;;  %v5206_v38 = vmul.f32 %v25219_v39, %v25219_v39  ;;  %v5072_v31 = vsel %vm27_vm1, %v25219_v39, 0.0 }
 0x50c   :  { %v5204_v0 = vmul.f32 %v25221_v46, %v25221_v46  ;;  %v25225_v22 = vpop.f32.mrb[2].mxu0  ;;  %v5069_v26 = vsel %vm27_vm1, %v25221_v46, 0.0 }
 0x50d   :  { %v25227_v23 = vpop.f32.mrb[3].mxu0  ;;  %v5207_v60 = vmul.f32 %v25225_v22, %v25225_v22  ;;  %v5271_v56 = vsel %vm27_vm1, %v5206_v38, 0.0  ;;  %v5074_v61 = vsel %vm27_vm1, %v25225_v22, 0.0 }
 0x50e   :  { %v5070_v47 = vsel %vm27_vm1, %v25227_v23, 0.0  ;;  %v5205_v63 = vmul.f32 %v25227_v23, %v25227_v23  ;;  %v5268_v57 = vsel %vm27_vm1, %v5204_v0, 0.0 }
 0x50f   :  { %v5071_v24 = vadd.f32 %v5070_v47, %v5069_v26  ;;  %v5273_v29 = vsel %vm27_vm1, %v5207_v60, 0.0 }
 0x510   :  { %v5269_v36 = vsel %vm27_vm1, %v5205_v63, 0.0 }
 0x511   :  { %v5073_v28 = vadd.f32 %v5072_v31, %v5071_v24  ;;  %v5270_v55 = vadd.f32 %v5269_v36, %v5268_v57 }
 0x512   :  { %v25246_v34 = vpop.f32.mrb[4].mxu0 }
 0x513   :  { %v5272_v41 = vadd.f32 %v5271_v56, %v5270_v55  ;;  %v25248_v20 = vpop.f32.mrb[5].mxu0  ;;  %v5075_v42 = vadd.f32 %v5074_v61, %v5073_v28  ;;  %v5210_v62 = vmul.f32 %v25246_v34, %v25246_v34  ;;  %v5080_v13 = vsel %vm27_vm1, %v25246_v34, 0.0 }
 0x514   :  { %v5076_v32 = vsel %vm27_vm1, %v25248_v20, 0.0  ;;  %v5208_v30 = vmul.f32 %v25248_v20, %v25248_v20  ;;  %v25255_v44 = vpop.f32.mrb[6].mxu0 }
 0x515   :  { %v5077_v53 = vadd.f32 %v5076_v32, %v5075_v42  ;;  %v5274_v54 = vadd.f32 %v5273_v29, %v5272_v41  ;;  %v25257_v45 = vpop.f32.mrb[7].mxu0  ;;  %v5211_v11 = vmul.f32 %v25255_v44, %v25255_v44  ;;  %v5279_v4 = vsel %vm27_vm1, %v5210_v62, 0.0 }
 0x516   :  { %v5275_v16 = vsel %vm27_vm1, %v5208_v30, 0.0  ;;  %v5078_v21 = vsel %vm27_vm1, %v25257_v45, 0.0  ;;  %v5209_v49 = vmul.f32 %v25257_v45, %v25257_v45  ;;  %v5082_v9 = vsel %vm27_vm1, %v25255_v44, 0.0 }
 0x517   :  { %v5276_v51 = vadd.f32 %v5275_v16, %v5274_v54  ;;  %v5079_v12 = vadd.f32 %v5078_v21, %v5077_v53  ;;  %v5281_v48 = vsel %vm27_vm1, %v5211_v11, 0.0 }
 0x518   :  { %v5277_v14 = vsel %vm27_vm1, %v5209_v49, 0.0 }
 0x519   :  { %v5081_v43 = vadd.f32 %v5080_v13, %v5079_v12  ;;  %v5278_v50 = vadd.f32 %v5277_v14, %v5276_v51 }
 0x51a   :  { %v25274_v35 = vpop.f32.mrb[8].mxu0 }
 0x51b   :  { %v5280_v40 = vadd.f32 %v5279_v4, %v5278_v50  ;;  %v25276_v5 = vpop.f32.mrb[9].mxu0  ;;  %v5083_v37 = vadd.f32 %v5082_v9, %v5081_v43  ;;  %v5214_v15 = vmul.f32 %v25274_v35, %v25274_v35  ;;  %v5088_v1 = vsel %vm27_vm1, %v25274_v35, 0.0 }
 0x51c   :  { %v5084_v3 = vsel %vm27_vm1, %v25276_v5, 0.0  ;;  %v5212_v10 = vmul.f32 %v25276_v5, %v25276_v5  ;;  %v25283_v58 = vpop.f32.mrb[10].mxu0 }
 0x51d   :  { %v5085_v59 = vadd.f32 %v5084_v3, %v5083_v37  ;;  %v5282_v8 = vadd.f32 %v5281_v48, %v5280_v40  ;;  %v25285_v19 = vpop.f32.mrb[11].mxu0  ;;  %v5215_v6 = vmul.f32 %v25283_v58, %v25283_v58  ;;  %v5287_v0 = vsel %vm27_vm1, %v5214_v15, 0.0 }
 0x51e   :  { %v5283_v27 = vsel %vm27_vm1, %v5212_v10, 0.0  ;;  %v5086_v33 = vsel %vm27_vm1, %v25285_v19, 0.0  ;;  %v5213_v52 = vmul.f32 %v25285_v19, %v25285_v19  ;;  %v5090_v38 = vsel %vm27_vm1, %v25283_v58, 0.0 }
 0x51f   :  { %v5284_v2 = vadd.f32 %v5283_v27, %v5282_v8  ;;  %v5087_v7 = vadd.f32 %v5086_v33, %v5085_v59  ;;  %v5289_v31 = vsel %vm27_vm1, %v5215_v6, 0.0 }
 0x520   :  { %v5285_v17 = vsel %vm27_vm1, %v5213_v52, 0.0 }
 0x521   :  { %v5089_v18 = vadd.f32 %v5088_v1, %v5087_v7  ;;  %v5286_v25 = vadd.f32 %v5285_v17, %v5284_v2 }
 0x522   :  { %v25302_v26 = vpop.f32.mrb[12].mxu0 }
 0x523   :  { %v5288_v47 = vadd.f32 %v5287_v0, %v5286_v25  ;;  %v25304_v63 = vpop.f32.mrb[13].mxu0  ;;  %v5091_v24 = vadd.f32 %v5090_v38, %v5089_v18  ;;  %v5218_v61 = vmul.f32 %v25302_v26, %v25302_v26  ;;  %v5096_v53 = vsel %vm27_vm1, %v25302_v26, 0.0 }
 0x524   :  { %v5092_v57 = vsel %vm27_vm1, %v25304_v63, 0.0  ;;  %v5216_v60 = vmul.f32 %v25304_v63, %v25304_v63  ;;  %v25311_v36 = vpop.f32.mrb[14].mxu0 }
 0x525   :  { %v5093_v28 = vadd.f32 %v5092_v57, %v5091_v24  ;;  %v5290_v55 = vadd.f32 %v5289_v31, %v5288_v47  ;;  %v25313_v56 = vpop.f32.mrb[15].mxu0  ;;  %v5219_v54 = vmul.f32 %v25311_v36, %v25311_v36  ;;  %v5295_v49 = vsel %vm27_vm1, %v5218_v61, 0.0 }
 0x526   :  { %v5291_v41 = vsel %vm27_vm1, %v5216_v60, 0.0  ;;  %v5094_v42 = vsel %vm27_vm1, %v25313_v56, 0.0  ;;  %v5217_v29 = vmul.f32 %v25313_v56, %v25313_v56  ;;  %v5098_v51 = vsel %vm27_vm1, %v25311_v36, 0.0 }
 0x527   :  { %v5292_v32 = vadd.f32 %v5291_v41, %v5290_v55  ;;  %v5095_v30 = vadd.f32 %v5094_v42, %v5093_v28  ;;  %v5297_v43 = vsel %vm27_vm1, %v5219_v54, 0.0 }
 0x528   :  { %v5293_v62 = vsel %vm27_vm1, %v5217_v29, 0.0 }
 0x529   :  { %v5097_v16 = vadd.f32 %v5096_v53, %v5095_v30  ;;  %v5294_v21 = vadd.f32 %v5293_v62, %v5292_v32 }
 0x52a   :  { %v25330_v12 = vpop.f32.mrb[16].mxu0 }
 0x52b   :  { %v5296_v13 = vadd.f32 %v5295_v49, %v5294_v21  ;;  %v25332_v11 = vpop.f32.mrb[17].mxu0  ;;  %v5099_v14 = vadd.f32 %v5098_v51, %v5097_v16  ;;  %v5222_v3 = vmul.f32 %v25330_v12, %v25330_v12  ;;  %v5104_v33 = vsel %vm27_vm1, %v25330_v12, 0.0 }
 0x52c   :  { %v5100_v50 = vsel %vm27_vm1, %v25332_v11, 0.0  ;;  %v5220_v4 = vmul.f32 %v25332_v11, %v25332_v11  ;;  %v25339_v9 = vpop.f32.mrb[18].mxu0 }
 0x52d   :  { %v5101_v40 = vadd.f32 %v5100_v50, %v5099_v14  ;;  %v5298_v37 = vadd.f32 %v5297_v43, %v5296_v13  ;;  %v25341_v48 = vpop.f32.mrb[19].mxu0  ;;  %v5223_v52 = vmul.f32 %v25339_v9, %v25339_v9  ;;  %v5303_v6 = vsel %vm27_vm1, %v5222_v3, 0.0 }
 0x52e   :  { %v5299_v10 = vsel %vm27_vm1, %v5220_v4, 0.0  ;;  %v5102_v59 = vsel %vm27_vm1, %v25341_v48, 0.0  ;;  %v5221_v8 = vmul.f32 %v25341_v48, %v25341_v48  ;;  %v5106_v17 = vsel %vm27_vm1, %v25339_v9, 0.0 }
 0x52f   :  { %v5300_v15 = vadd.f32 %v5299_v10, %v5298_v37  ;;  %v5103_v27 = vadd.f32 %v5102_v59, %v5101_v40  ;;  %v5305_v47 = vsel %vm27_vm1, %v5223_v52, 0.0 }
 0x530   :  { %v5301_v2 = vsel %vm27_vm1, %v5221_v8, 0.0 }
 0x531   :  { %v5105_v7 = vadd.f32 %v5104_v33, %v5103_v27  ;;  %v5302_v1 = vadd.f32 %v5301_v2, %v5300_v15 }
 0x532   :  { %v25358_v18 = vpop.f32.mrb[20].mxu0 }
 0x533   :  { %v5304_v25 = vadd.f32 %v5303_v6, %v5302_v1  ;;  %v25360_v0 = vpop.f32.mrb[21].mxu0  ;;  %v5107_v38 = vadd.f32 %v5106_v17, %v5105_v7  ;;  %v5226_v61 = vmul.f32 %v25358_v18, %v25358_v18  ;;  %v5112_v53 = vsel %vm27_vm1, %v25358_v18, 0.0 }
 0x534   :  { %v5108_v24 = vsel %vm27_vm1, %v25360_v0, 0.0  ;;  %v5224_v31 = vmul.f32 %v25360_v0, %v25360_v0  ;;  %v25367_v57 = vpop.f32.mrb[22].mxu0 }
 0x535   :  { %v5109_v60 = vadd.f32 %v5108_v24, %v5107_v38  ;;  %v5306_v28 = vadd.f32 %v5305_v47, %v5304_v25  ;;  %v25369_v55 = vpop.f32.mrb[23].mxu0  ;;  %v5227_v54 = vmul.f32 %v25367_v57, %v25367_v57  ;;  %v5311_v49 = vsel %vm27_vm1, %v5226_v61, 0.0 }
 0x536   :  { %v5307_v41 = vsel %vm27_vm1, %v5224_v31, 0.0  ;;  %v5110_v42 = vsel %vm27_vm1, %v25369_v55, 0.0  ;;  %v5225_v29 = vmul.f32 %v25369_v55, %v25369_v55  ;;  %v5114_v51 = vsel %vm27_vm1, %v25367_v57, 0.0 }
 0x537   :  { %v5308_v32 = vadd.f32 %v5307_v41, %v5306_v28  ;;  %v5111_v30 = vadd.f32 %v5110_v42, %v5109_v60  ;;  %v5313_v4 = vsel %vm27_vm1, %v5227_v54, 0.0 }
 0x538   :  { %v5309_v62 = vsel %vm27_vm1, %v5225_v29, 0.0 }
 0x539   :  { %v5113_v16 = vadd.f32 %v5112_v53, %v5111_v30  ;;  %v5310_v21 = vadd.f32 %v5309_v62, %v5308_v32 }
 0x53a   :  { %v25386_v13 = vpop.f32.mrb[24].mxu0 }
 0x53b   :  { %v5312_v14 = vadd.f32 %v5311_v49, %v5310_v21  ;;  %v25388_v43 = vpop.f32.mrb[25].mxu0  ;;  %v5115_v50 = vadd.f32 %v5114_v51, %v5113_v16  ;;  %v5230_v15 = vmul.f32 %v25386_v13, %v25386_v13  ;;  %v5120_v1 = vsel %vm27_vm1, %v25386_v13, 0.0 }
 0x53c   :  { %v5116_v40 = vsel %vm27_vm1, %v25388_v43, 0.0  ;;  %v5228_v37 = vmul.f32 %v25388_v43, %v25388_v43  ;;  %v25395_v3 = vpop.f32.mrb[26].mxu0 }
 0x53d   :  { %v5117_v10 = vadd.f32 %v5116_v40, %v5115_v50  ;;  %v5314_v59 = vadd.f32 %v5313_v4, %v5312_v14  ;;  %v25397_v8 = vpop.f32.mrb[27].mxu0  ;;  %v5231_v6 = vmul.f32 %v25395_v3, %v25395_v3  ;;  %v5319_v47 = vsel %vm27_vm1, %v5230_v15, 0.0 }
 0x53e   :  { %v5315_v27 = vsel %vm27_vm1, %v5228_v37, 0.0  ;;  %v5118_v33 = vsel %vm27_vm1, %v25397_v8, 0.0  ;;  %v5229_v52 = vmul.f32 %v25397_v8, %v25397_v8  ;;  %v5122_v24 = vsel %vm27_vm1, %v25395_v3, 0.0 }
 0x53f   :  { %v5316_v2 = vadd.f32 %v5315_v27, %v5314_v59  ;;  %v5119_v7 = vadd.f32 %v5118_v33, %v5117_v10  ;;  %v5321_v41 = vsel %vm27_vm1, %v5231_v6, 0.0 }
 0x540   :  { %v5317_v17 = vsel %vm27_vm1, %v5229_v52, 0.0 }
 0x541   :  { %v5121_v25 = vadd.f32 %v5120_v1, %v5119_v7  ;;  %v5318_v38 = vadd.f32 %v5317_v17, %v5316_v2 }
 0x542   :  { %v25414_v31 = vpop.f32.mrb[28].mxu0 }
 0x543   :  { %v5320_v60 = vadd.f32 %v5319_v47, %v5318_v38  ;;  %v25416_v28 = vpop.f32.mrb[29].mxu0  ;;  %v5123_v61 = vadd.f32 %v5122_v24, %v5121_v25  ;;  %v5234_v62 = vmul.f32 %v25414_v31, %v25414_v31  ;;  %v5128_v50 = vsel %vm27_vm1, %v25414_v31, 0.0 }
 0x544   :  { %v5124_v42 = vsel %vm27_vm1, %v25416_v28, 0.0  ;;  %v5232_v29 = vmul.f32 %v25416_v28, %v25416_v28  ;;  %v25423_v32 = vpop.f32.mrb[30].mxu0 }
 0x545   :  { %v5125_v30 = vadd.f32 %v5124_v42, %v5123_v61  ;;  %v5322_v53 = vadd.f32 %v5321_v41, %v5320_v60  ;;  %v25425_v54 = vpop.f32.mrb[31].mxu0  ;;  %v5235_v4 = vmul.f32 %v25423_v32, %v25423_v32  ;;  %v5327_v59 = vsel %vm27_vm1, %v5234_v62, 0.0  ;;  %v18648_v42 = vld [vmem:[%s32075_s2 + $0x2] sm:$0x3]  ;;  %v18746_v62 = vld [vmem:[%s32075_s2 + $0x6] sm:$0x3] }
 0x546   :  { %v5323_v16 = vsel %vm27_vm1, %v5232_v29, 0.0  ;;  %v5126_v21 = vsel %vm27_vm1, %v25425_v54, 0.0  ;;  %v5233_v49 = vmul.f32 %v25425_v54, %v25425_v54  ;;  %v5130_v15 = vsel %vm27_vm1, %v25423_v32, 0.0  ;;  %23979 = vmatprep.subr.msk.bf16.mxu0 %vm537_vm0, %v18648_v42  ;;  %23982 = vmatprep.subr.msk.bf16.mxu1 %vm537_vm0, %v18746_v62 }
 0x547   :  { %v5324_v51 = vadd.f32 %v5323_v16, %v5322_v53  ;;  %v5127_v14 = vadd.f32 %v5126_v21, %v5125_v30  ;;  %v5329_v7 = vsel %vm27_vm1, %v5235_v4, 0.0  ;;  %v5988_v16 = vsel %vm537_vm0, %v18648_v42, 0  ;;  %v5793_v21 = vld [vmem:[#allocation2 + $0x8] sm:$0xff] }
 0x548   :  { %v5325_v40 = vsel %vm27_vm1, %v5233_v49, 0.0  ;;  %v5794_v49 = vld [vmem:[#allocation2 + $0x10] sm:$0xff]  ;;  %20921 = vmatpush3.bf16.msra.mxu0 %v5988_v16 }
 0x549   :  { %v5129_v37 = vadd.f32 %v5128_v50, %v5127_v14  ;;  %v5326_v10 = vadd.f32 %v5325_v40, %v5324_v51  ;;  %v7412_v50 = vsel %vm537_vm0, %v18746_v62, 0  ;;  %v5857_v4 = vpack.c.bf16 %v5794_v49, %v5793_v21  ;;  %v25480_v40 = vld [vmem:[%s32075_s2 + $0x8] sm:$0x3] }
 0x54a   :  { %v25442_v27 = vpop.f32.mrb[32].mxu0  ;;  %32396 = vst [vmem:[#allocation3_spill] sm:$0xff] %v25480_v40  ;;  %21119 = vmatpush3.bf16.msra.mxu1 %v7412_v50 }
 0x54b   :  { %v5328_v33 = vadd.f32 %v5327_v59, %v5326_v10  ;;  %v25444_v52 = vpop.f32.mrb[33].mxu0  ;;  %v5131_v2 = vadd.f32 %v5130_v15, %v5129_v37  ;;  %v5238_v24 = vmul.f32 %v25442_v27, %v25442_v27  ;;  %v5136_v29 = vsel %vm27_vm1, %v25442_v27, 0.0  ;;  %20922 = vmatprep.mubr.msk.bf16.mxu0 %vm27_vm1, %v5857_v4  ;;  %23983 = vmatprep.subr.msk.bf16.mxu1 %vm537_vm0, %v25480_v40 }
 0x54c   :  { %v5132_v1 = vsel %vm27_vm1, %v25444_v52, 0.0  ;;  %v5236_v6 = vmul.f32 %v25444_v52, %v25444_v52  ;;  %v25451_v17 = vpop.f32.mrb[34].mxu0 }
 0x54d   :  { %v5133_v25 = vadd.f32 %v5132_v1, %v5131_v2  ;;  %v5330_v38 = vadd.f32 %v5329_v7, %v5328_v33  ;;  %v25453_v47 = vpop.f32.mrb[35].mxu0  ;;  %v5239_v51 = vmul.f32 %v25451_v17, %v25451_v17  ;;  %v5335_v59 = vsel %vm27_vm1, %v5238_v24, 0.0 }
 0x54e   :  { %v5331_v60 = vsel %vm27_vm1, %v5236_v6, 0.0  ;;  %v5134_v61 = vsel %vm27_vm1, %v25453_v47, 0.0  ;;  %v5237_v41 = vmul.f32 %v25453_v47, %v25453_v47  ;;  %v5138_v15 = vsel %vm27_vm1, %v25451_v17, 0.0 }
 0x54f   :  { %v5332_v30 = vadd.f32 %v5331_v60, %v5330_v38  ;;  %v5135_v53 = vadd.f32 %v5134_v61, %v5133_v25  ;;  %v5337_v6 = vsel %vm27_vm1, %v5239_v51, 0.0 }
 0x550   :  { %v5333_v14 = vsel %vm27_vm1, %v5237_v41, 0.0 }
 0x551   :  { %v5137_v37 = vadd.f32 %v5136_v29, %v5135_v53  ;;  %v5334_v10 = vadd.f32 %v5333_v14, %v5332_v30 }
 0x552   :  { %v25485_v33 = vpop.f32.mrb[36].mxu0 }
 0x553   :  { %v5336_v2 = vadd.f32 %v5335_v59, %v5334_v10  ;;  %v25490_v7 = vpop.f32.mrb[37].mxu0  ;;  %v5139_v1 = vadd.f32 %v5138_v15, %v5137_v37  ;;  %v5242_v42 = vmul.f32 %v25485_v33, %v25485_v33  ;;  %v5144_v21 = vsel %vm27_vm1, %v25485_v33, 0.0 }
 0x554   :  { %v5140_v25 = vsel %vm27_vm1, %v25490_v7, 0.0  ;;  %v5240_v38 = vmul.f32 %v25490_v7, %v25490_v7  ;;  %v25497_v24 = vpop.f32.mrb[38].mxu0 }
 0x555   :  { %v5141_v60 = vadd.f32 %v5140_v25, %v5139_v1  ;;  %v5338_v61 = vadd.f32 %v5337_v6, %v5336_v2  ;;  %v25499_v41 = vpop.f32.mrb[39].mxu0  ;;  %v5243_v49 = vmul.f32 %v25497_v24, %v25497_v24  ;;  %v5343_v4 = vsel %vm27_vm1, %v5242_v42, 0.0 }
 0x556   :  { %v5339_v29 = vsel %vm27_vm1, %v5240_v38, 0.0  ;;  %v5142_v30 = vsel %vm27_vm1, %v25499_v41, 0.0  ;;  %v5241_v53 = vmul.f32 %v25499_v41, %v25499_v41  ;;  %v5146_v37 = vsel %vm27_vm1, %v25497_v24, 0.0 }
 0x557   :  { %v5340_v62 = vadd.f32 %v5339_v29, %v5338_v61  ;;  %v5143_v16 = vadd.f32 %v5142_v30, %v5141_v60  ;;  %v5345_v1 = vsel %vm27_vm1, %v5243_v49, 0.0 }
 0x558   :  { %v5341_v51 = vsel %vm27_vm1, %v5241_v53, 0.0 }
 0x559   :  { %v5145_v14 = vadd.f32 %v5144_v21, %v5143_v16  ;;  %v5342_v50 = vadd.f32 %v5341_v51, %v5340_v62 }
 0x55a   :  { %v25516_v10 = vpop.f32.mrb[40].mxu0 }
 0x55b   :  { %32397 = vst [vmem:[#allocation4_spill] sm:$0xff] %v25516_v10  ;;  %v5344_v59 = vadd.f32 %v5343_v4, %v5342_v50  ;;  %v25518_v15 = vpop.f32.mrb[41].mxu0  ;;  %v5147_v2 = vadd.f32 %v5146_v37, %v5145_v14  ;;  %v5246_v29 = vmul.f32 %v25516_v10, %v25516_v10  ;;  %v5152_v49 = vsel %vm27_vm1, %v25516_v10, 0.0 }
 0x55c   :  { %32398 = vst [vmem:[#allocation5_spill] sm:$0xff] %v25518_v15  ;;  %v5148_v6 = vsel %vm27_vm1, %v25518_v15, 0.0  ;;  %v5244_v25 = vmul.f32 %v25518_v15, %v25518_v15  ;;  %v25525_v38 = vpop.f32.mrb[42].mxu0 }
 0x55d   :  { %32399 = vst [vmem:[#allocation6_spill] sm:$0xff] %v25525_v38  ;;  %v5149_v60 = vadd.f32 %v5148_v6, %v5147_v2  ;;  %v5346_v61 = vadd.f32 %v5345_v1, %v5344_v59  ;;  %v25527_v42 = vpop.f32.mrb[43].mxu0  ;;  %v5247_v51 = vmul.f32 %v25525_v38, %v25525_v38  ;;  %v5351_v37 = vsel %vm27_vm1, %v5246_v29, 0.0 }
 0x55e   :  { %32400 = vst [vmem:[#allocation7_spill] sm:$0xff] %v25527_v42  ;;  %v5347_v30 = vsel %vm27_vm1, %v5244_v25, 0.0  ;;  %v5150_v53 = vsel %vm27_vm1, %v25527_v42, 0.0  ;;  %v5245_v62 = vmul.f32 %v25527_v42, %v25527_v42  ;;  %v5154_v59 = vsel %vm27_vm1, %v25525_v38, 0.0 }
 0x55f   :  { %v5348_v16 = vadd.f32 %v5347_v30, %v5346_v61  ;;  %v5151_v21 = vadd.f32 %v5150_v53, %v5149_v60  ;;  %v5353_v60 = vsel %vm27_vm1, %v5247_v51, 0.0 }
 0x560   :  { %v5349_v14 = vsel %vm27_vm1, %v5245_v62, 0.0 }
 0x561   :  { %v5153_v50 = vadd.f32 %v5152_v49, %v5151_v21  ;;  %v5350_v4 = vadd.f32 %v5349_v14, %v5348_v16 }
 0x562   :  { %v25544_v2 = vpop.f32.mrb[44].mxu0 }
 0x563   :  { %32401 = vst [vmem:[#allocation8_spill] sm:$0xff] %v25544_v2  ;;  %v5352_v1 = vadd.f32 %v5351_v37, %v5350_v4  ;;  %v25546_v6 = vpop.f32.mrb[45].mxu0  ;;  %v5155_v25 = vadd.f32 %v5154_v59, %v5153_v50  ;;  %v5250_v21 = vmul.f32 %v25544_v2, %v25544_v2  ;;  %v5160_v37 = vsel %vm27_vm1, %v25544_v2, 0.0 }
 0x564   :  { %32402 = vst [vmem:[#allocation9_spill] sm:$0xff] %v25546_v6  ;;  %v5156_v61 = vsel %vm27_vm1, %v25546_v6, 0.0  ;;  %v5248_v30 = vmul.f32 %v25546_v6, %v25546_v6  ;;  %v25553_v53 = vpop.f32.mrb[46].mxu0 }
 0x565   :  { %32403 = vst [vmem:[#allocation10_spill] sm:$0xff] %v25553_v53  ;;  %v5157_v29 = vadd.f32 %v5156_v61, %v5155_v25  ;;  %v5354_v62 = vadd.f32 %v5353_v60, %v5352_v1  ;;  %v25555_v16 = vpop.f32.mrb[47].mxu0  ;;  %v5251_v59 = vmul.f32 %v25553_v53, %v25553_v53  ;;  %v5359_v61 = vsel %vm27_vm1, %v5250_v21, 0.0 }
 0x566   :  { %32404 = vst [vmem:[#allocation11_spill] sm:$0xff] %v25555_v16  ;;  %v5355_v49 = vsel %vm27_vm1, %v5248_v30, 0.0  ;;  %v5158_v51 = vsel %vm27_vm1, %v25555_v16, 0.0  ;;  %v5249_v14 = vmul.f32 %v25555_v16, %v25555_v16  ;;  %v5162_v30 = vsel %vm27_vm1, %v25553_v53, 0.0 }
 0x567   :  { %v5356_v50 = vadd.f32 %v5355_v49, %v5354_v62  ;;  %v5159_v4 = vadd.f32 %v5158_v51, %v5157_v29  ;;  %v5361_v49 = vsel %vm27_vm1, %v5251_v59, 0.0 }
 0x568   :  { %v5357_v1 = vsel %vm27_vm1, %v5249_v14, 0.0 }
 0x569   :  { %v5161_v25 = vadd.f32 %v5160_v37, %v5159_v4  ;;  %v5358_v60 = vadd.f32 %v5357_v1, %v5356_v50 }
 0x56a   :  { %v25572_v40 = vpop.f32.mrb[48].mxu0 }
 0x56b   :  { %32405 = vst [vmem:[#allocation12_spill] sm:$0xff] %v25572_v40  ;;  %v5360_v16 = vadd.f32 %v5359_v61, %v5358_v60  ;;  %v25574_v62 = vpop.f32.mrb[49].mxu0  ;;  %v5163_v29 = vadd.f32 %v5162_v30, %v5161_v25  ;;  %v5254_v1 = vmul.f32 %v25572_v40, %v25572_v40 }
 0x56c   :  { %32406 = vst [vmem:[#allocation13_spill] sm:$0xff] %v25574_v62  ;;  %v5164_v51 = vsel %vm27_vm1, %v25574_v62, 0.0  ;;  %v5252_v14 = vmul.f32 %v25574_v62, %v25574_v62  ;;  %v25581_v50 = vpop.f32.mrb[50].mxu0  ;;  %v5168_v62 = vsel %vm27_vm1, %v25572_v40, 0.0 }
 0x56d   :  { %32407 = vst [vmem:[#allocation14_spill] sm:$0xff] %v25581_v50  ;;  %v5165_v21 = vadd.f32 %v5164_v51, %v5163_v29  ;;  %v5362_v4 = vadd.f32 %v5361_v49, %v5360_v16  ;;  %v25583_v37 = vpop.f32.mrb[51].mxu0  ;;  %v5255_v16 = vmul.f32 %v25581_v50, %v25581_v50  ;;  %v5170_v53 = vsel %vm27_vm1, %v25581_v50, 0.0 }
 0x56e   :  { %32408 = vst [vmem:[#allocation15_spill] sm:$0xff] %v25583_v37  ;;  %v5363_v60 = vsel %vm27_vm1, %v5252_v14, 0.0  ;;  %v5166_v59 = vsel %vm27_vm1, %v25583_v37, 0.0  ;;  %v5253_v25 = vmul.f32 %v25583_v37, %v25583_v37  ;;  %v5367_v14 = vsel %vm27_vm1, %v5254_v1, 0.0 }
 0x56f   :  { %v5364_v61 = vadd.f32 %v5363_v60, %v5362_v4  ;;  %v5167_v30 = vadd.f32 %v5166_v59, %v5165_v21  ;;  %v5369_v60 = vsel %vm27_vm1, %v5255_v16, 0.0 }
 0x570   :  { %v5365_v29 = vsel %vm27_vm1, %v5253_v25, 0.0 }
 0x571   :  { %v5169_v49 = vadd.f32 %v5168_v62, %v5167_v30  ;;  %v5366_v51 = vadd.f32 %v5365_v29, %v5364_v61 }
 0x572   :  { %v25600_v2 = vpop.f32.mrb[52].mxu0 }
 0x573   :  { %32409 = vst [vmem:[#allocation16_spill] sm:$0xff] %v25600_v2  ;;  %v5368_v37 = vadd.f32 %v5367_v14, %v5366_v51  ;;  %v25602_v4 = vpop.f32.mrb[53].mxu0  ;;  %v5171_v21 = vadd.f32 %v5170_v53, %v5169_v49  ;;  %v5258_v29 = vmul.f32 %v25600_v2, %v25600_v2 }
 0x574   :  { %32410 = vst [vmem:[#allocation17_spill] sm:$0xff] %v25602_v4  ;;  %v5172_v59 = vsel %vm27_vm1, %v25602_v4, 0.0  ;;  %v5256_v62 = vmul.f32 %v25602_v4, %v25602_v4  ;;  %v25609_v25 = vpop.f32.mrb[54].mxu0  ;;  %v5176_v4 = vsel %vm27_vm1, %v25600_v2, 0.0 }
 0x575   :  { %32411 = vst [vmem:[#allocation18_spill] sm:$0xff] %v25609_v25  ;;  %v5173_v1 = vadd.f32 %v5172_v59, %v5171_v21  ;;  %v5370_v61 = vadd.f32 %v5369_v60, %v5368_v37  ;;  %v25611_v30 = vpop.f32.mrb[55].mxu0  ;;  %v5259_v37 = vmul.f32 %v25609_v25, %v25609_v25  ;;  %v5178_v50 = vsel %vm27_vm1, %v25609_v25, 0.0 }
 0x576   :  { %32412 = vst [vmem:[#allocation19_spill] sm:$0xff] %v25611_v30  ;;  %v5371_v51 = vsel %vm27_vm1, %v5256_v62, 0.0  ;;  %v5174_v53 = vsel %vm27_vm1, %v25611_v30, 0.0  ;;  %v5257_v16 = vmul.f32 %v25611_v30, %v25611_v30  ;;  %v5375_v62 = vsel %vm27_vm1, %v5258_v29, 0.0 }
 0x577   :  { %v5372_v49 = vadd.f32 %v5371_v51, %v5370_v61  ;;  %v5175_v14 = vadd.f32 %v5174_v53, %v5173_v1  ;;  %v5377_v51 = vsel %vm27_vm1, %v5259_v37, 0.0 }
 0x578   :  { %v5373_v21 = vsel %vm27_vm1, %v5257_v16, 0.0 }
 0x579   :  { %v5177_v60 = vadd.f32 %v5176_v4, %v5175_v14  ;;  %v5374_v59 = vadd.f32 %v5373_v21, %v5372_v49 }
 0x57a   :  { %v25628_v40 = vpop.f32.mrb[56].mxu0 }
 0x57b   :  { %32413 = vst [vmem:[#allocation20_spill] sm:$0xff] %v25628_v40  ;;  %v5376_v30 = vadd.f32 %v5375_v62, %v5374_v59  ;;  %v25630_v61 = vpop.f32.mrb[57].mxu0  ;;  %v5179_v1 = vadd.f32 %v5178_v50, %v5177_v60  ;;  %v5262_v21 = vmul.f32 %v25628_v40, %v25628_v40 }
 0x57c   :  { %32414 = vst [vmem:[#allocation21_spill] sm:$0xff] %v25630_v61  ;;  %v5180_v53 = vsel %vm27_vm1, %v25630_v61, 0.0  ;;  %v5260_v4 = vmul.f32 %v25630_v61, %v25630_v61  ;;  %v25637_v16 = vpop.f32.mrb[58].mxu0  ;;  %v5184_v61 = vsel %vm27_vm1, %v25628_v40, 0.0 }
 0x57d   :  { %32415 = vst [vmem:[#allocation22_spill] sm:$0xff] %v25637_v16  ;;  %v5181_v29 = vadd.f32 %v5180_v53, %v5179_v1  ;;  %v5378_v49 = vadd.f32 %v5377_v51, %v5376_v30  ;;  %v25639_v14 = vpop.f32.mrb[59].mxu0  ;;  %v5263_v30 = vmul.f32 %v25637_v16, %v25637_v16  ;;  %v5186_v25 = vsel %vm27_vm1, %v25637_v16, 0.0 }
 0x57e   :  { %32416 = vst [vmem:[#allocation23_spill] sm:$0xff] %v25639_v14  ;;  %v5379_v59 = vsel %vm27_vm1, %v5260_v4, 0.0  ;;  %v5182_v50 = vsel %vm27_vm1, %v25639_v14, 0.0  ;;  %v5261_v37 = vmul.f32 %v25639_v14, %v25639_v14  ;;  %v5383_v4 = vsel %vm27_vm1, %v5262_v21, 0.0 }
 0x57f   :  { %v5380_v60 = vadd.f32 %v5379_v59, %v5378_v49  ;;  %v5183_v62 = vadd.f32 %v5182_v50, %v5181_v29  ;;  %v5385_v59 = vsel %vm27_vm1, %v5263_v30, 0.0 }
 0x580   :  { %v5381_v1 = vsel %vm27_vm1, %v5261_v37, 0.0 }
 0x581   :  { %v5185_v51 = vadd.f32 %v5184_v61, %v5183_v62  ;;  %v5382_v53 = vadd.f32 %v5381_v1, %v5380_v60 }
 0x582   :  { %v25656_v2 = vpop.f32.mrb[60].mxu0 }
 0x583   :  { %32417 = vst [vmem:[#allocation24_spill] sm:$0xff] %v25656_v2  ;;  %v5384_v14 = vadd.f32 %v5383_v4, %v5382_v53  ;;  %v25658_v49 = vpop.f32.mrb[61].mxu0  ;;  %v5187_v29 = vadd.f32 %v5186_v25, %v5185_v51  ;;  %v5266_v1 = vmul.f32 %v25656_v2, %v25656_v2 }
 0x584   :  { %32418 = vst [vmem:[#allocation25_spill] sm:$0xff] %v25658_v49  ;;  %v5188_v50 = vsel %vm27_vm1, %v25658_v49, 0.0  ;;  %v5264_v61 = vmul.f32 %v25658_v49, %v25658_v49  ;;  %v25665_v37 = vpop.f32.mrb[62].mxu0  ;;  %v5192_v49 = vsel %vm27_vm1, %v25656_v2, 0.0 }
 0x585   :  { %32419 = vst [vmem:[#allocation26_spill] sm:$0xff] %v25665_v37  ;;  %v5189_v21 = vadd.f32 %v5188_v50, %v5187_v29  ;;  %v5386_v60 = vadd.f32 %v5385_v59, %v5384_v14  ;;  %v25667_v62 = vpop.f32.mrb[63].mxu0  ;;  %v5267_v14 = vmul.f32 %v25665_v37, %v25665_v37  ;;  %v5194_v16 = vsel %vm27_vm1, %v25665_v37, 0.0 }
 0x586   :  { %v5387_v53 = vsel %vm27_vm1, %v5264_v61, 0.0  ;;  %v5190_v25 = vsel %vm27_vm1, %v25667_v62, 0.0  ;;  %v5265_v30 = vmul.f32 %v25667_v62, %v25667_v62  ;;  %v5391_v61 = vsel %vm27_vm1, %v5266_v1, 0.0 }
 0x587   :  { %v5388_v51 = vadd.f32 %v5387_v53, %v5386_v60  ;;  %v5191_v4 = vadd.f32 %v5190_v25, %v5189_v21  ;;  %v5393_v60 = vsel %vm27_vm1, %v5267_v14, 0.0 }
 0x588   :  { %v5389_v29 = vsel %vm27_vm1, %v5265_v30, 0.0 }
 0x589   :  { %v5193_v59 = vadd.f32 %v5192_v49, %v5191_v4  ;;  %v5390_v50 = vadd.f32 %v5389_v29, %v5388_v51 }
 0x58b   :  { %v5195_v40 = vadd.f32 %v5194_v16, %v5193_v59  ;;  %v5392_v6 = vadd.f32 %v5391_v61, %v5390_v50 }
 0x58d   :  { %v5196_v21 = vrot.slane %v5195_v40, 4  ;;  %v5394_v53 = vadd.f32 %v5393_v60, %v5392_v6  ;;  %v32441_v6 = vld [vmem:[#allocation24_spill] sm:$0xff] }
 0x58f   :  { %v5197_v25 = vadd.f32 %v5196_v21, %v5195_v40  ;;  %v5395_v2 = vrot.slane %v5394_v53, 4  ;;  %v32440_v40 = vld [vmem:[#allocation25_spill] sm:$0xff] }
 0x591   :  { %v5198_v38 = vrot.slane %v5197_v25, 2  ;;  %v5396_v10 = vadd.f32 %v5395_v2, %v5394_v53 }
 0x593   :  { %v5199_v42 = vadd.f32 %v5198_v38, %v5197_v25  ;;  %v5397_v15 = vrot.slane %v5396_v10, 2  ;;  %v32420_v25 = vld [vmem:[#allocation5_spill] sm:$0xff]  ;;  %v32439_v38 = vld [vmem:[#allocation22_spill] sm:$0xff] }
 0x595   :  { %v5200_v30 = vrot.slane %v5199_v42, 1  ;;  %v5398_v49 = vadd.f32 %v5397_v15, %v5396_v10  ;;  %v32437_v15 = vld [vmem:[#allocation23_spill] sm:$0xff]  ;;  %v32438_v10 = vld [vmem:[#allocation20_spill] sm:$0xff] }
 0x597   :  { %v5201_v51 = vadd.f32 %v5200_v30, %v5199_v42  ;;  %v5399_v4 = vrot.slane %v5398_v49, 1  ;;  %v32421_v30 = vld [vmem:[#allocation7_spill] sm:$0xff]  ;;  %v32436_v42 = vld [vmem:[#allocation21_spill] sm:$0xff] }
 0x599   :  { %v25685_v1 = vmul.f32 0.001953125, %v5201_v51  ;;  %v5400_v29 = vadd.f32 %v5399_v4, %v5398_v49  ;;  %v32422_v49 = vld [vmem:[#allocation4_spill] sm:$0xff]  ;;  %v32423_v51 = vld [vmem:[#allocation6_spill] sm:$0xff]  ;;  %v32424_v4 = vld [vmem:[#allocation9_spill] sm:$0xff] }
 0x59b   :  { %v5401_v37 = vmul.f32 0.001953125, %v5400_v29  ;;  %v5402_v16 = vmul.f32 %v25685_v1, %v25685_v1  ;;  %v32425_v29 = vld [vmem:[#allocation11_spill] sm:$0xff]  ;;  %v32443_v21 = vsub.f32 %v25667_v62, %v25685_v1  ;;  %v32445_v61 = vsub.f32 %v25221_v46, %v25685_v1 }
 0x59c   :  { %v32446_v59 = vsub.f32 %v25227_v23, %v25685_v1  ;;  %v32447_v14 = vsub.f32 %v25219_v39, %v25685_v1 }
 0x59d   :  { %v5403_v2 = vsub.f32 %v5401_v37, %v5402_v16  ;;  %v32442_v16 = vld [vmem:[#allocation26_spill] sm:$0xff] }
 0x59f   :  { %v5404_v53 = vmax.f32 %v5403_v2, 0.0 }
 0x5a1   :  { %v5469_v2 = vadd.f32 1e-05, %v5404_v53 }
 0x5a3   :  { %24001 = vrsqrt.f32 %v5469_v2  ;;  %v32426_v2 = vld [vmem:[#allocation8_spill] sm:$0xff] }
 0x5ad   :  { %v25817_v53 = vpop.eup %24001 }
 0x5ae   :  { %v25823_v37 = vmul.f32 %v25817_v53, %v32443_v21  ;;  %v25829_v60 = vmul.f32 %v25817_v53, %v32445_v61  ;;  %v25835_v50 = vmul.f32 %v25817_v53, %v32446_v59  ;;  %v25841_v62 = vmul.f32 %v25817_v53, %v32447_v14 }
 0x5af   :  { %v32448_v21 = vsub.f32 %v25225_v22, %v25685_v1  ;;  %v32449_v61 = vsub.f32 %v25248_v20, %v25685_v1  ;;  %v32450_v59 = vsub.f32 %v25257_v45, %v25685_v1  ;;  %v32451_v14 = vsub.f32 %v25246_v34, %v25685_v1 }
 0x5b0   :  { %32444 = vst [vmem:[#allocation5_spill] sm:$0xff] %v25823_v37  ;;  %v32452_v20 = vsub.f32 %v25255_v44, %v25685_v1  ;;  %v32453_v45 = vsub.f32 %v25276_v5, %v25685_v1  ;;  %v32454_v34 = vsub.f32 %v25285_v19, %v25685_v1 }
 0x5b1   :  { %v25847_v46 = vmul.f32 %v25817_v53, %v32448_v21  ;;  %v25853_v23 = vmul.f32 %v25817_v53, %v32449_v61  ;;  %v25859_v39 = vmul.f32 %v25817_v53, %v32450_v59  ;;  %v25865_v22 = vmul.f32 %v25817_v53, %v32451_v14 }
 0x5b2   :  { %v25872_v61 = vmul.f32 %v25817_v53, %v32452_v20  ;;  %v25878_v59 = vmul.f32 %v25817_v53, %v32453_v45  ;;  %v25884_v14 = vmul.f32 %v25817_v53, %v32454_v34  ;;  %v32455_v21 = vsub.f32 %v25274_v35, %v25685_v1 }
 0x5b3   :  { %v32456_v20 = vsub.f32 %v25283_v58, %v25685_v1  ;;  %v32457_v45 = vsub.f32 %v25304_v63, %v25685_v1  ;;  %v32458_v34 = vsub.f32 %v25313_v56, %v25685_v1  ;;  %v32460_v58 = vsub.f32 %v25302_v26, %v25685_v1 }
 0x5b4   :  { %v25890_v44 = vmul.f32 %v25817_v53, %v32455_v21  ;;  %v32459_v21 = vmax.f32 %v25823_v37, 0.0  ;;  %v32461_v63 = vsub.f32 %v25311_v36, %v25685_v1  ;;  %v32462_v56 = vsub.f32 %v25332_v11, %v25685_v1 }
 0x5b5   :  { %v25896_v5 = vmul.f32 %v25817_v53, %v32456_v20  ;;  %v25902_v19 = vmul.f32 %v25817_v53, %v32457_v45  ;;  %v25908_v35 = vmul.f32 %v25817_v53, %v32458_v34  ;;  %v25917_v20 = vmul.f32 %v25817_v53, %v32460_v58 }
 0x5b6   :  { %5693 = vst.msk [vmem:[#allocation2 + $0x430] sm:$0xff] %vm27_vm1, %v32459_v21  ;;  %v25923_v45 = vmul.f32 %v25817_v53, %v32461_v63  ;;  %v25929_v34 = vmul.f32 %v25817_v53, %v32462_v56  ;;  %v32463_v21 = vsub.f32 %v25341_v48, %v25685_v1  ;;  %v32464_v58 = vsub.f32 %v25330_v12, %v25685_v1 }
 0x5b7   :  { %v32465_v63 = vsub.f32 %v25339_v9, %v25685_v1  ;;  %v32466_v56 = vsub.f32 %v25360_v0, %v25685_v1 }
 0x5b8   :  { %v25935_v26 = vmul.f32 %v25817_v53, %v32463_v21  ;;  %v25941_v36 = vmul.f32 %v25817_v53, %v32464_v58  ;;  %v32467_v21 = vsub.f32 %v25369_v55, %v25685_v1  ;;  %v32468_v58 = vsub.f32 %v25358_v18, %v25685_v1 }
 0x5b9   :  { %v25947_v11 = vmul.f32 %v25817_v53, %v32465_v63  ;;  %v25953_v48 = vmul.f32 %v25817_v53, %v32466_v56  ;;  %v32469_v63 = vsub.f32 %v25367_v57, %v25685_v1  ;;  %v32470_v56 = vsub.f32 %v25388_v43, %v25685_v1 }
 0x5ba   :  { %v25959_v12 = vmul.f32 %v25817_v53, %v32467_v21  ;;  %v25965_v9 = vmul.f32 %v25817_v53, %v32468_v58  ;;  %v32471_v21 = vsub.f32 %v25397_v8, %v25685_v1  ;;  %v32472_v58 = vsub.f32 %v25386_v13, %v25685_v1 }
 0x5bb   :  { %v25971_v0 = vmul.f32 %v25817_v53, %v32469_v63  ;;  %v25977_v55 = vmul.f32 %v25817_v53, %v32470_v56  ;;  %v32473_v63 = vsub.f32 %v25395_v3, %v25685_v1  ;;  %v32474_v56 = vsub.f32 %v25416_v28, %v25685_v1 }
 0x5bc   :  { %v25983_v18 = vmul.f32 %v25817_v53, %v32471_v21  ;;  %v25989_v57 = vmul.f32 %v25817_v53, %v32472_v58  ;;  %v32475_v21 = vsub.f32 %v25425_v54, %v25685_v1  ;;  %v32476_v58 = vsub.f32 %v25414_v31, %v25685_v1 }
 0x5bd   :  { %v25995_v43 = vmul.f32 %v25817_v53, %v32473_v63  ;;  %v26001_v8 = vmul.f32 %v25817_v53, %v32474_v56  ;;  %v32477_v63 = vsub.f32 %v25423_v32, %v25685_v1  ;;  %v32478_v56 = vsub.f32 %v25444_v52, %v25685_v1 }
 0x5be   :  { %v26007_v13 = vmul.f32 %v25817_v53, %v32475_v21  ;;  %v26013_v3 = vmul.f32 %v25817_v53, %v32476_v58  ;;  %v32479_v21 = vsub.f32 %v25453_v47, %v25685_v1  ;;  %v32481_v58 = vsub.f32 %v25442_v27, %v25685_v1 }
 0x5bf   :  { %v26019_v28 = vmul.f32 %v25817_v53, %v32477_v63  ;;  %v26025_v54 = vmul.f32 %v25817_v53, %v32478_v56  ;;  %v32483_v63 = vsub.f32 %v25451_v17, %v25685_v1  ;;  %v32485_v56 = vsub.f32 %v25490_v7, %v25685_v1 }
 0x5c0   :  { %v26031_v31 = vmul.f32 %v25817_v53, %v32479_v21  ;;  %v26037_v32 = vmul.f32 %v25817_v53, %v32481_v58  ;;  %v32487_v21 = vsub.f32 %v25499_v41, %v25685_v1  ;;  %v32488_v58 = vsub.f32 %v25485_v33, %v25685_v1 }
 0x5c1   :  { %v26043_v52 = vmul.f32 %v25817_v53, %v32483_v63  ;;  %v26049_v47 = vmul.f32 %v25817_v53, %v32485_v56  ;;  %v32490_v63 = vsub.f32 %v25497_v24, %v25685_v1  ;;  %v32492_v56 = vsub.f32 %v32420_v25, %v25685_v1 }
 0x5c2   :  { %32480 = vst [vmem:[#allocation7_spill] sm:$0xff] %v26031_v31  ;;  %32482 = vst [vmem:[#allocation4_spill] sm:$0xff] %v26037_v32  ;;  %v26055_v27 = vmul.f32 %v25817_v53, %v32487_v21  ;;  %v26061_v17 = vmul.f32 %v25817_v53, %v32488_v58  ;;  %v32494_v21 = vsub.f32 %v32421_v30, %v25685_v1 }
 0x5c3   :  { %32484 = vst [vmem:[#allocation6_spill] sm:$0xff] %v26043_v52  ;;  %32486 = vst [vmem:[#allocation9_spill] sm:$0xff] %v26049_v47  ;;  %v26067_v7 = vmul.f32 %v25817_v53, %v32490_v63  ;;  %v26073_v41 = vmul.f32 %v25817_v53, %v32492_v56  ;;  %v32495_v58 = vsub.f32 %v32422_v49, %v25685_v1 }
 0x5c4   :  { %32489 = vst [vmem:[#allocation11_spill] sm:$0xff] %v26061_v17  ;;  %v26079_v33 = vmul.f32 %v25817_v53, %v32494_v21  ;;  %v32497_v63 = vsub.f32 %v32423_v51, %v25685_v1  ;;  %v32499_v56 = vsub.f32 %v32424_v4, %v25685_v1  ;;  %v32501_v21 = vsub.f32 %v32425_v29, %v25685_v1 }
 0x5c5   :  { %32491 = vst [vmem:[#allocation8_spill] sm:$0xff] %v26067_v7  ;;  %32493 = vst [vmem:[#allocation21_spill] sm:$0xff] %v26073_v41  ;;  %v26085_v24 = vmul.f32 %v25817_v53, %v32495_v58  ;;  %v32503_v58 = vsub.f32 %v32426_v2, %v25685_v1 }
 0x5c6   :  { %v26091_v25 = vmul.f32 %v25817_v53, %v32497_v63  ;;  %v26097_v30 = vmul.f32 %v25817_v53, %v32499_v56  ;;  %v26103_v49 = vmul.f32 %v25817_v53, %v32501_v21  ;;  %v32505_v63 = vld [vmem:[#allocation10_spill] sm:$0xff]  ;;  %v32508_v56 = vld [vmem:[#allocation13_spill] sm:$0xff]  ;;  %v32511_v21 = vld [vmem:[#allocation15_spill] sm:$0xff] }
 0x5c7   :  { %32496 = vst [vmem:[#allocation23_spill] sm:$0xff] %v26085_v24  ;;  %v26109_v51 = vmul.f32 %v25817_v53, %v32503_v58  ;;  %v32506_v37 = vsub.f32 %v32505_v63, %v25685_v1  ;;  %v32514_v58 = vld [vmem:[#allocation12_spill] sm:$0xff] }
 0x5c8   :  { %32498 = vst [vmem:[#allocation20_spill] sm:$0xff] %v26091_v25  ;;  %32500 = vst [vmem:[#allocation22_spill] sm:$0xff] %v26097_v30  ;;  %v32509_v30 = vsub.f32 %v32508_v56, %v25685_v1 }
 0x5c9   :  { %32502 = vst [vmem:[#allocation25_spill] sm:$0xff] %v26103_v49  ;;  %32504 = vst [vmem:[#allocation24_spill] sm:$0xff] %v26109_v51  ;;  %v26115_v4 = vmul.f32 %v25817_v53, %v32506_v37  ;;  %v32512_v49 = vsub.f32 %v32511_v21, %v25685_v1  ;;  %v32515_v51 = vsub.f32 %v32514_v58, %v25685_v1  ;;  %v32517_v37 = vld [vmem:[#allocation14_spill] sm:$0xff] }
 0x5ca   :  { %v26121_v29 = vmul.f32 %v25817_v53, %v32509_v30  ;;  %v32520_v30 = vld [vmem:[#allocation17_spill] sm:$0xff] }
 0x5cb   :  { %32507 = vst [vmem:[#allocation26_spill] sm:$0xff] %v26115_v4  ;;  %v26127_v2 = vmul.f32 %v25817_v53, %v32512_v49  ;;  %v26133_v63 = vmul.f32 %v25817_v53, %v32515_v51  ;;  %v32518_v4 = vsub.f32 %v32517_v37, %v25685_v1  ;;  %v32522_v49 = vld [vmem:[#allocation19_spill] sm:$0xff]  ;;  %v32524_v51 = vld [vmem:[#allocation16_spill] sm:$0xff] }
 0x5cc   :  { %32510 = vst [vmem:[#allocation10_spill] sm:$0xff] %v26121_v29  ;;  %v32521_v29 = vsub.f32 %v32520_v30, %v25685_v1 }
 0x5cd   :  { %32513 = vst [vmem:[#allocation13_spill] sm:$0xff] %v26127_v2  ;;  %32516 = vst [vmem:[#allocation15_spill] sm:$0xff] %v26133_v63  ;;  %v26139_v56 = vmul.f32 %v25817_v53, %v32518_v4  ;;  %v32523_v2 = vsub.f32 %v32522_v49, %v25685_v1  ;;  %v32525_v63 = vsub.f32 %v32524_v51, %v25685_v1  ;;  %v32526_v4 = vld [vmem:[#allocation18_spill] sm:$0xff] }
 0x5ce   :  { %v26145_v21 = vmul.f32 %v25817_v53, %v32521_v29  ;;  %v32528_v29 = vsub.f32 %v32436_v42, %v25685_v1 }
 0x5cf   :  { %32519 = vst [vmem:[#allocation12_spill] sm:$0xff] %v26139_v56  ;;  %v26151_v58 = vmul.f32 %v25817_v53, %v32523_v2  ;;  %v26157_v37 = vmul.f32 %v25817_v53, %v32525_v63  ;;  %v32527_v56 = vsub.f32 %v32526_v4, %v25685_v1  ;;  %v32529_v2 = vsub.f32 %v32437_v15, %v25685_v1 }
 0x5d0   :  { %v26169_v49 = vmul.f32 %v25817_v53, %v32528_v29  ;;  %v32530_v63 = vsub.f32 %v32438_v10, %v25685_v1  ;;  %v32533_v29 = vsub.f32 %v32440_v40, %v25685_v1  ;;  %v32148_v40 = vmax.f32 %v25841_v62, 0.0 }
 0x5d1   :  { %v26163_v30 = vmul.f32 %v25817_v53, %v32527_v56  ;;  %v26175_v51 = vmul.f32 %v25817_v53, %v32529_v2  ;;  %v32531_v56 = vsub.f32 %v32439_v38, %v25685_v1  ;;  %v32535_v2 = vsub.f32 %v32441_v6, %v25685_v1 }
 0x5d2   :  { %v26181_v4 = vmul.f32 %v25817_v53, %v32530_v63  ;;  %v26193_v15 = vmul.f32 %v25817_v53, %v32533_v29  ;;  %v32537_v63 = vsub.f32 %v32442_v16, %v25685_v1  ;;  %v32149_v29 = vmax.f32 %v25847_v46, 0.0  ;;  %5634 = vst.msk [vmem:[#allocation2 + $0x48] sm:$0xff] %vm27_vm1, %v32148_v40 }
 0x5d3   :  { %v26187_v42 = vmul.f32 %v25817_v53, %v32531_v56  ;;  %v26199_v10 = vmul.f32 %v25817_v53, %v32535_v2  ;;  %v32147_v56 = vmax.f32 %v25829_v60, 0.0  ;;  %v32151_v6 = vmax.f32 %v25859_v39, 0.0 }
 0x5d4   :  { %32534 = vst [vmem:[#allocation17_spill] sm:$0xff] %v26193_v15  ;;  %v26205_v38 = vmul.f32 %v25817_v53, %v32537_v63  ;;  %v32150_v15 = vmax.f32 %v25853_v23, 0.0  ;;  %v32152_v2 = vmax.f32 %v25865_v22, 0.0  ;;  %v32154_v63 = vmax.f32 %v25896_v5, 0.0  ;;  %5635 = vst.msk [vmem:[#allocation2 + $0x50] sm:$0xff] %vm27_vm1, %v32149_v29 }
 0x5d5   :  { %32532 = vst [vmem:[#allocation14_spill] sm:$0xff] %v26187_v42  ;;  %32536 = vst [vmem:[#allocation19_spill] sm:$0xff] %v26199_v10  ;;  %v32146_v42 = vmax.f32 %v25835_v50, 0.0  ;;  %v32153_v10 = vmax.f32 %v25872_v61, 0.0  ;;  %v32155_v1 = vmax.f32 %v25902_v19, 0.0  ;;  %v32156_v16 = vmax.f32 %v25908_v35, 0.0 }
 0x5d6   :  { %5632 = vst.msk [vmem:[#allocation2 + $0x28] sm:$0xff] %vm27_vm1, %v32147_v56  ;;  %v32157_v53 = vmax.f32 %v25917_v20, 0.0  ;;  %5636 = vst.msk [vmem:[#allocation2 + $0x68] sm:$0xff] %vm27_vm1, %v32150_v15  ;;  %v32538_v15 = vmax.f32 %v25878_v59, 0.0  ;;  %v32159_v40 = vmax.f32 %v25947_v11, 0.0  ;;  %v32160_v29 = vmax.f32 %v25953_v48, 0.0 }
 0x5d7   :  { %5633 = vst.msk [vmem:[#allocation2 + $0x30] sm:$0xff] %vm27_vm1, %v32146_v42  ;;  %5637 = vst.msk [vmem:[#allocation2 + $0x70] sm:$0xff] %vm27_vm1, %v32151_v6  ;;  %v32158_v42 = vmax.f32 %v25923_v45, 0.0  ;;  %v32539_v6 = vmax.f32 %v25884_v14, 0.0  ;;  %v32161_v56 = vmax.f32 %v25959_v12, 0.0 }
 0x5d8   :  { %5638 = vst.msk [vmem:[#allocation2 + $0x88] sm:$0xff] %vm27_vm1, %v32152_v2  ;;  %5639 = vst.msk [vmem:[#allocation2 + $0x90] sm:$0xff] %vm27_vm1, %v32153_v10  ;;  %v32540_v2 = vmax.f32 %v25890_v44, 0.0  ;;  %v32162_v10 = vmax.f32 %v25965_v9, 0.0 }
 0x5d9   :  { %5640 = vst.msk [vmem:[#allocation2 + $0xa8] sm:$0xff] %vm27_vm1, %v32538_v15  ;;  %5641 = vst.msk [vmem:[#allocation2 + $0xb0] sm:$0xff] %vm27_vm1, %v32539_v6  ;;  %v32163_v15 = vmax.f32 %v25971_v0, 0.0  ;;  %v32166_v6 = vmax.f32 %v26007_v13, 0.0 }
 0x5da   :  { %5642 = vst.msk [vmem:[#allocation2 + $0xc8] sm:$0xff] %vm27_vm1, %v32540_v2  ;;  %5643 = vst.msk [vmem:[#allocation2 + $0xd0] sm:$0xff] %vm27_vm1, %v32154_v63  ;;  %v32164_v2 = vmax.f32 %v25995_v43, 0.0  ;;  %v32165_v63 = vmax.f32 %v26001_v8, 0.0 }
 0x5db   :  { %5644 = vst.msk [vmem:[#allocation2 + $0xe8] sm:$0xff] %vm27_vm1, %v32155_v1  ;;  %5645 = vst.msk [vmem:[#allocation2 + $0xf0] sm:$0xff] %vm27_vm1, %v32156_v16  ;;  %v32541_v1 = vmax.f32 %v25929_v34, 0.0  ;;  %v32542_v16 = vmax.f32 %v25935_v26, 0.0 }
 0x5dc   :  { %5646 = vst.msk [vmem:[#allocation2 + $0x108] sm:$0xff] %vm27_vm1, %v32157_v53  ;;  %5647 = vst.msk [vmem:[#allocation2 + $0x110] sm:$0xff] %vm27_vm1, %v32158_v42  ;;  %v32543_v53 = vmax.f32 %v25941_v36, 0.0  ;;  %v32167_v42 = vmax.f32 %v26013_v3, 0.0 }
 0x5dd   :  { %5648 = vst.msk [vmem:[#allocation2 + $0x128] sm:$0xff] %vm27_vm1, %v32541_v1  ;;  %5649 = vst.msk [vmem:[#allocation2 + $0x130] sm:$0xff] %vm27_vm1, %v32542_v16  ;;  %v32168_v1 = vmax.f32 %v26019_v28, 0.0  ;;  %v32552_v16 = vld [vmem:[#allocation24_spill] sm:$0xff] }
 0x5de   :  { %5650 = vst.msk [vmem:[#allocation2 + $0x148] sm:$0xff] %vm27_vm1, %v32543_v53  ;;  %5651 = vst.msk [vmem:[#allocation2 + $0x150] sm:$0xff] %vm27_vm1, %v32159_v40  ;;  %v32171_v53 = vmax.f32 %v26043_v52, 0.0  ;;  %v32174_v40 = vmax.f32 %v26049_v47, 0.0  ;;  %v7217_v52 = vld [vmem:[#allocation2 + $0x27] sm:$0xff]  ;;  %v32567_v47 = vmax.f32 %v32552_v16, 0.0 }
 0x5df   :  { %5652 = vst.msk [vmem:[#allocation2 + $0x168] sm:$0xff] %vm27_vm1, %v32160_v29  ;;  %5653 = vst.msk [vmem:[#allocation2 + $0x170] sm:$0xff] %vm27_vm1, %v32161_v56  ;;  %v32544_v29 = vmax.f32 %v25977_v55, 0.0  ;;  %v32545_v56 = vmax.f32 %v25983_v18, 0.0  ;;  %v32572_v16 = vld [vmem:[#allocation14_spill] sm:$0xff] }
 0x5e0   :  { %5654 = vst.msk [vmem:[#allocation2 + $0x188] sm:$0xff] %vm27_vm1, %v32162_v10  ;;  %5655 = vst.msk [vmem:[#allocation2 + $0x190] sm:$0xff] %vm27_vm1, %v32163_v15  ;;  %v32546_v10 = vmax.f32 %v25989_v57, 0.0  ;;  %v5796_v15 = vld [vmem:[#allocation2 + $0x30] sm:$0xff] }
 0x5e1   :  { %5656 = vst.msk [vmem:[#allocation2 + $0x1a8] sm:$0xff] %vm27_vm1, %v32544_v29  ;;  %5657 = vst.msk [vmem:[#allocation2 + $0x1b0] sm:$0xff] %vm27_vm1, %v32545_v56  ;;  %v32550_v56 = vld [vmem:[#allocation22_spill] sm:$0xff] }
 0x5e2   :  { %5658 = vst.msk [vmem:[#allocation2 + $0x1c8] sm:$0xff] %vm27_vm1, %v32546_v10  ;;  %5659 = vst.msk [vmem:[#allocation2 + $0x1d0] sm:$0xff] %vm27_vm1, %v32164_v2  ;;  %v32551_v10 = vld [vmem:[#allocation25_spill] sm:$0xff]  ;;  %v32555_v2 = vld [vmem:[#allocation26_spill] sm:$0xff] }
 0x5e3   :  { %5660 = vst.msk [vmem:[#allocation2 + $0x1e8] sm:$0xff] %vm27_vm1, %v32165_v63  ;;  %5661 = vst.msk [vmem:[#allocation2 + $0x1f0] sm:$0xff] %vm27_vm1, %v32166_v6  ;;  %v32547_v63 = vmax.f32 %v26025_v54, 0.0  ;;  %v32548_v6 = vmax.f32 %v26031_v31, 0.0  ;;  %v32556_v29 = vld [vmem:[#allocation10_spill] sm:$0xff]  ;;  %v32558_v31 = vld [vmem:[#allocation15_spill] sm:$0xff] }
 0x5e4   :  { %5662 = vst.msk [vmem:[#allocation2 + $0x208] sm:$0xff] %vm27_vm1, %v32167_v42  ;;  %5663 = vst.msk [vmem:[#allocation2 + $0x210] sm:$0xff] %vm27_vm1, %v32168_v1  ;;  %v32549_v42 = vmax.f32 %v26037_v32, 0.0  ;;  %v32557_v32 = vld [vmem:[#allocation13_spill] sm:$0xff]  ;;  %v32562_v1 = vmax.f32 %v26085_v24, 0.0  ;;  %v32574_v24 = vld [vmem:[#allocation19_spill] sm:$0xff] }
 0x5e5   :  { %5664 = vst.msk [vmem:[#allocation2 + $0x268] sm:$0xff] %vm27_vm1, %v32547_v63  ;;  %5665 = vst.msk [vmem:[#allocation2 + $0x270] sm:$0xff] %vm27_vm1, %v32548_v6  ;;  %v32553_v63 = vmax.f32 %v26055_v27, 0.0  ;;  %v5795_v6 = vld [vmem:[#allocation2 + $0x28] sm:$0xff] }
 0x5e6   :  { %5666 = vst.msk [vmem:[#allocation2 + $0x288] sm:$0xff] %vm27_vm1, %v32549_v42  ;;  %5667 = vst.msk [vmem:[#allocation2 + $0x290] sm:$0xff] %vm27_vm1, %v32171_v53  ;;  %v32554_v42 = vmax.f32 %v26061_v17, 0.0  ;;  %v7218_v53 = vld [vmem:[#allocation2 + $0x2f] sm:$0xff] }
 0x5e7   :  { %5668 = vst.msk [vmem:[#allocation2 + $0x2a8] sm:$0xff] %vm27_vm1, %v32174_v40  ;;  %5669 = vst.msk [vmem:[#allocation2 + $0x2b0] sm:$0xff] %vm27_vm1, %v32553_v63  ;;  %v32559_v40 = vmax.f32 %v26067_v7, 0.0  ;;  %v32560_v63 = vmax.f32 %v26073_v41, 0.0  ;;  %v32563_v17 = vld [vmem:[#allocation12_spill] sm:$0xff]  ;;  %v32571_v41 = vmax.f32 %v32558_v31, 0.0 }
 0x5e8   :  { %5670 = vst.msk [vmem:[#allocation2 + $0x2c8] sm:$0xff] %vm27_vm1, %v32554_v42  ;;  %v32561_v42 = vmax.f32 %v26079_v33, 0.0  ;;  %5674 = vst.msk [vmem:[#allocation2 + $0x308] sm:$0xff] %vm27_vm1, %v32562_v1  ;;  %v32566_v1 = vmax.f32 %v32551_v10, 0.0  ;;  %v5797_v7 = vld [vmem:[#allocation2 + $0x48] sm:$0xff]  ;;  %v32573_v10 = vld [vmem:[#allocation17_spill] sm:$0xff] }
 0x5e9   :  { %5671 = vst.msk [vmem:[#allocation2 + $0x2d0] sm:$0xff] %vm27_vm1, %v32559_v40  ;;  %5672 = vst.msk [vmem:[#allocation2 + $0x2e8] sm:$0xff] %vm27_vm1, %v32560_v63  ;;  %v32564_v63 = vmax.f32 %v26091_v25, 0.0  ;;  %v5798_v40 = vld [vmem:[#allocation2 + $0x50] sm:$0xff]  ;;  %v7219_v25 = vld [vmem:[#allocation2 + $0x47] sm:$0xff] }
 0x5ea   :  { %5673 = vst.msk [vmem:[#allocation2 + $0x2f0] sm:$0xff] %vm27_vm1, %v32561_v42  ;;  %v32565_v42 = vmax.f32 %v32550_v56, 0.0  ;;  %5677 = vst.msk [vmem:[#allocation2 + $0x330] sm:$0xff] %vm27_vm1, %v32566_v1  ;;  %v32569_v1 = vmax.f32 %v32556_v29, 0.0  ;;  %v32578_v56 = vmax.f32 %v26157_v37, 0.0  ;;  %v32579_v29 = vmax.f32 %v25841_v62, 0.0 }
 0x5eb   :  { %5675 = vst.msk [vmem:[#allocation2 + $0x310] sm:$0xff] %vm27_vm1, %v32564_v63  ;;  %5678 = vst.msk [vmem:[#allocation2 + $0x348] sm:$0xff] %vm27_vm1, %v32567_v47  ;;  %v32570_v47 = vmax.f32 %v32557_v32, 0.0  ;;  %v7220_v63 = vld [vmem:[#allocation2 + $0x4f] sm:$0xff]  ;;  %v26453_v62 = vpack.c.bf16 %v5796_v15, %v5795_v6  ;;  %v32592_v6 = vmax.f32 %v25835_v50, 0.0 }
 0x5ec   :  { %5676 = vst.msk [vmem:[#allocation2 + $0x328] sm:$0xff] %vm27_vm1, %v32565_v42  ;;  %v32568_v42 = vmax.f32 %v32555_v2, 0.0  ;;  %5680 = vst.msk [vmem:[#allocation2 + $0x368] sm:$0xff] %vm27_vm1, %v32569_v1  ;;  %v32575_v1 = vmax.f32 %v32563_v17, 0.0  ;;  %v7221_v2 = vld [vmem:[#allocation2 + $0x67] sm:$0xff]  ;;  %v32580_v17 = vmax.f32 %v25847_v46, 0.0  ;;  %v26455_v46 = vpack.c.bf16 %v7218_v53, %v7217_v52 }
 0x5ed   :  { %5681 = vst.msk [vmem:[#allocation2 + $0x370] sm:$0xff] %vm27_vm1, %v32570_v47  ;;  %5682 = vst.msk [vmem:[#allocation2 + $0x388] sm:$0xff] %vm27_vm1, %v32571_v41  ;;  %v32576_v47 = vmax.f32 %v26145_v21, 0.0  ;;  %v32577_v41 = vmax.f32 %v26151_v58, 0.0  ;;  %v26471_v52 = vpack.c.bf16 %v7220_v63, %v7219_v25  ;;  %20923 = vmatmul.mubr.msk.bf16.vlgmr.msra.gmra.mrb[64].mxu0 %vm27_vm1, %v26453_v62  ;;  %v32591_v25 = vmax.f32 %v25829_v60, 0.0  ;;  %v5800_v50 = vld [vmem:[#allocation2 + $0x70] sm:$0xff] }
 0x5ee   :  { %5679 = vst.msk [vmem:[#allocation2 + $0x350] sm:$0xff] %vm27_vm1, %v32568_v42  ;;  %5683 = vst.msk [vmem:[#allocation2 + $0x390] sm:$0xff] %vm27_vm1, %v32575_v1  ;;  %v7222_v42 = vld [vmem:[#allocation2 + $0x6f] sm:$0xff]  ;;  %v26439_v31 = vpack.c.bf16 %v32580_v17, %v32579_v29  ;;  %v32582_v1 = vmax.f32 %v26163_v30, 0.0  ;;  %v26457_v17 = vpack.c.bf16 %v5798_v40, %v5797_v7  ;;  %v32586_v29 = vmax.f32 %v32572_v16, 0.0  ;;  %v32590_v7 = vld [vmem:[#allocation3_spill] sm:$0xff]  ;;  %21120 = vmatprep.mubr.msk.bf16.mxu1 %vm27_vm1, %v26455_v46 }
 0x5ef   :  { %5684 = vst.msk [vmem:[#allocation2 + $0x3a8] sm:$0xff] %vm27_vm1, %v32576_v47  ;;  %5685 = vst.msk [vmem:[#allocation2 + $0x3b0] sm:$0xff] %vm27_vm1, %v32577_v41  ;;  %v32583_v47 = vmax.f32 %v26169_v49, 0.0  ;;  %v32584_v41 = vmax.f32 %v26175_v51, 0.0  ;;  %v7962_v15 = vsel %vm537_vm0, %v32590_v7, 0  ;;  %v26479_v53 = vpack.c.bf16 %v7222_v42, %v7221_v2  ;;  %21121 = vmatmul.mubr.msk.bf16.vlgmr.msra.gmra.mrb[0].mxu1 %vm27_vm1, %v26471_v52  ;;  %v5799_v2 = vld [vmem:[#allocation2 + $0x68] sm:$0xff] }
 0x5f0   :  { %5686 = vst.msk [vmem:[#allocation2 + $0x3c8] sm:$0xff] %vm27_vm1, %v32578_v56  ;;  %32581 = vst [vmem:[#allocation16_spill] sm:$0xff] %v26439_v31  ;;  %v32585_v56 = vmax.f32 %v26181_v4, 0.0  ;;  %20926 = vmatprep.mubr.msk.bf16.mxu0 %vm27_vm1, %v26457_v17  ;;  %v26489_v40 = vpack.c.bf16 %v32592_v6, %v32591_v25  ;;  %v32594_v63 = vmax.f32 %v25853_v23, 0.0  ;;  %21185 = vmatpush3.bf16.msra.mxu1 %v7962_v15  ;;  %v32597_v42 = vmax.f32 %v25865_v22, 0.0 }
 0x5f1   :  { %5687 = vst.msk [vmem:[#allocation2 + $0x3d0] sm:$0xff] %vm27_vm1, %v32582_v1  ;;  %5688 = vst.msk [vmem:[#allocation2 + $0x3e8] sm:$0xff] %vm27_vm1, %v32583_v47  ;;  %v32587_v1 = vmax.f32 %v32573_v10, 0.0  ;;  %v32588_v47 = vmax.f32 %v32574_v24, 0.0  ;;  %21124 = vmatprep.mubr.msk.bf16.mxu1 %vm27_vm1, %v26479_v53  ;;  %v32600_v23 = vmax.f32 %v25878_v59, 0.0  ;;  %v32603_v15 = vmax.f32 %v25890_v44, 0.0 }
 0x5f2   :  { %5689 = vst.msk [vmem:[#allocation2 + $0x3f0] sm:$0xff] %vm27_vm1, %v32584_v41  ;;  %5690 = vst.msk [vmem:[#allocation2 + $0x408] sm:$0xff] %vm27_vm1, %v32585_v56  ;;  %v32589_v41 = vmax.f32 %v26205_v38, 0.0  ;;  %v32595_v56 = vmax.f32 %v25859_v39, 0.0  ;;  %v32601_v39 = vmax.f32 %v25884_v14, 0.0  ;;  %v32604_v25 = vmax.f32 %v25896_v5, 0.0 }
 0x5f3   :  { %5691 = vst.msk [vmem:[#allocation2 + $0x410] sm:$0xff] %vm27_vm1, %v32586_v29  ;;  %5692 = vst.msk [vmem:[#allocation2 + $0x428] sm:$0xff] %vm27_vm1, %v32587_v1  ;;  %v32598_v1 = vmax.f32 %v25872_v61, 0.0  ;;  %v32606_v22 = vmax.f32 %v25902_v19, 0.0  ;;  %v32607_v61 = vmax.f32 %v25908_v35, 0.0  ;;  %v32609_v59 = vmax.f32 %v25917_v20, 0.0 }
 0x5f4   :  { %5694 = vst.msk [vmem:[#allocation2 + $0x448] sm:$0xff] %vm27_vm1, %v32588_v47  ;;  %5695 = vst.msk [vmem:[#allocation2 + $0x450] sm:$0xff] %vm27_vm1, %v32589_v41  ;;  %v26495_v29 = vpack.c.bf16 %v32595_v56, %v32594_v63  ;;  %v5801_v47 = vld [vmem:[#allocation2 + $0x88] sm:$0xff]  ;;  %v5802_v41 = vld [vmem:[#allocation2 + $0x90] sm:$0xff]  ;;  %v26509_v7 = vpack.c.bf16 %v32601_v39, %v32600_v23  ;;  %v26515_v6 = vpack.c.bf16 %v32604_v25, %v32603_v15  ;;  %v32610_v14 = vmax.f32 %v25923_v45, 0.0 }
 0x5f5   :  { %32593 = vst [vmem:[#allocation18_spill] sm:$0xff] %v26489_v40  ;;  %v26503_v60 = vpack.c.bf16 %v32598_v1, %v32597_v42  ;;  %v26521_v63 = vpack.c.bf16 %v32607_v61, %v32606_v22  ;;  %v7223_v56 = vld [vmem:[#allocation2 + $0x87] sm:$0xff]  ;;  %v7224_v42 = vld [vmem:[#allocation2 + $0x8f] sm:$0xff]  ;;  %v32612_v44 = vmax.f32 %v25929_v34, 0.0  ;;  %v32613_v5 = vmax.f32 %v25935_v26, 0.0 }
 0x5f6   :  { %32596 = vst [vmem:[#allocation13_spill] sm:$0xff] %v26495_v29  ;;  %32602 = vst [vmem:[#allocation17_spill] sm:$0xff] %v26509_v7  ;;  %v26527_v1 = vpack.c.bf16 %v32610_v14, %v32609_v59  ;;  %v7225_v39 = vld [vmem:[#allocation2 + $0xa7] sm:$0xff]  ;;  %v7226_v19 = vld [vmem:[#allocation2 + $0xaf] sm:$0xff]  ;;  %v32615_v35 = vmax.f32 %v25941_v36, 0.0  ;;  %v32616_v15 = vmax.f32 %v25947_v11, 0.0  ;;  %v26553_v59 = vpack.c.bf16 %v5800_v50, %v5799_v2 }
 0x5f7   :  { %32599 = vst [vmem:[#allocation14_spill] sm:$0xff] %v26503_v60  ;;  %32605 = vst [vmem:[#allocation19_spill] sm:$0xff] %v26515_v6  ;;  %v26533_v23 = vpack.c.bf16 %v32613_v5, %v32612_v44  ;;  %v32618_v20 = vmax.f32 %v25953_v48, 0.0  ;;  %v32619_v45 = vmax.f32 %v25959_v12, 0.0  ;;  %v32621_v34 = vmax.f32 %v25965_v9, 0.0 }
 0x5f8   :  { %32608 = vst [vmem:[#allocation3_spill] sm:$0xff] %v26521_v63  ;;  %32611 = vst [vmem:[#allocation27_spill] sm:$0xff] %v26527_v1  ;;  %v26539_v25 = vpack.c.bf16 %v32616_v15, %v32615_v35  ;;  %v32622_v26 = vmax.f32 %v25971_v0, 0.0  ;;  %v26555_v14 = vpack.c.bf16 %v5802_v41, %v5801_v47  ;;  %v32624_v36 = vmax.f32 %v25977_v55, 0.0  ;;  %v32637_v41 = vld [vmem:[#allocation7_spill] sm:$0xff]  ;;  %20927 = vmatmul.mubr.msk.bf16.gmra.mrb[68].mxu0 %vm27_vm1, %v26553_v59  ;;  %v7270_v63 = vld [vmem:[#allocation2 + $0x3af] sm:$0xff] }
 0x5f9   :  { %32614 = vst [vmem:[#allocation28_spill] sm:$0xff] %v26533_v23  ;;  %v26545_v22 = vpack.c.bf16 %v32619_v45, %v32618_v20  ;;  %v32625_v11 = vmax.f32 %v25983_v18, 0.0  ;;  %v32627_v48 = vmax.f32 %v25989_v57, 0.0  ;;  %v32628_v12 = vmax.f32 %v25995_v43, 0.0  ;;  %v7269_v1 = vld [vmem:[#allocation2 + $0x3a7] sm:$0xff]  ;;  %v7274_v29 = vld [vmem:[#allocation2 + $0x3ef] sm:$0xff] }
 0x5fa   :  { %32617 = vst [vmem:[#allocation29_spill] sm:$0xff] %v26539_v25  ;;  %v26551_v61 = vpack.c.bf16 %v32622_v26, %v32621_v34  ;;  %v26569_v9 = vpack.c.bf16 %v7224_v42, %v7223_v56  ;;  %v32630_v0 = vmax.f32 %v26001_v8, 0.0  ;;  %v32631_v2 = vmax.f32 %v26007_v13, 0.0  ;;  %v32640_v13 = vld [vmem:[#allocation4_spill] sm:$0xff]  ;;  %v32642_v42 = vld [vmem:[#allocation6_spill] sm:$0xff]  ;;  %20930 = vmatprep.mubr.msk.bf16.mxu0 %vm27_vm1, %v26555_v14 }
 0x5fb   :  { %32620 = vst [vmem:[#allocation30_spill] sm:$0xff] %v26545_v22  ;;  %v26561_v44 = vpack.c.bf16 %v32625_v11, %v32624_v36  ;;  %v26567_v5 = vpack.c.bf16 %v32628_v12, %v32627_v48  ;;  %v32633_v55 = vmax.f32 %v26013_v3, 0.0  ;;  %v32634_v18 = vmax.f32 %v26019_v28, 0.0  ;;  %v32645_v28 = vld [vmem:[#allocation9_spill] sm:$0xff]  ;;  %v32651_v34 = vld [vmem:[#allocation8_spill] sm:$0xff] }
 0x5fc   :  { %32623 = vst [vmem:[#allocation31_spill] sm:$0xff] %v26551_v61  ;;  %v26575_v50 = vpack.c.bf16 %v32631_v2, %v32630_v0  ;;  %v32636_v57 = vmax.f32 %v26025_v54, 0.0  ;;  %v32638_v43 = vmax.f32 %v32637_v41, 0.0  ;;  %v26591_v8 = vpack.c.bf16 %v7226_v19, %v7225_v39  ;;  %21125 = vmatmul.mubr.msk.bf16.gmra.mrb[4].mxu1 %vm27_vm1, %v26569_v9  ;;  %v32649_v39 = vld [vmem:[#allocation11_spill] sm:$0xff]  ;;  %v32654_v11 = vld [vmem:[#allocation21_spill] sm:$0xff]  ;;  %v32663_v41 = vld [vmem:[#allocation22_spill] sm:$0xff] }
 0x5fd   :  { %32626 = vst [vmem:[#allocation32_spill] sm:$0xff] %v26561_v44  ;;  %32629 = vst [vmem:[#allocation33_spill] sm:$0xff] %v26567_v5  ;;  %v26581_v47 = vpack.c.bf16 %v32634_v18, %v32633_v55  ;;  %v32641_v56 = vmax.f32 %v32640_v13, 0.0  ;;  %v32643_v15 = vmax.f32 %v32642_v42, 0.0  ;;  %v32646_v20 = vmax.f32 %v32645_v28, 0.0  ;;  %v32660_v55 = vld [vmem:[#allocation20_spill] sm:$0xff] }
 0x5fe   :  { %32632 = vst [vmem:[#allocation34_spill] sm:$0xff] %v26575_v50  ;;  %v26587_v35 = vpack.c.bf16 %v32638_v43, %v32636_v57  ;;  %v32647_v45 = vmax.f32 %v26055_v27, 0.0  ;;  %v32650_v19 = vmax.f32 %v32649_v39, 0.0  ;;  %v32652_v26 = vmax.f32 %v32651_v34, 0.0  ;;  %21128 = vmatprep.mubr.msk.bf16.mxu1 %vm27_vm1, %v26591_v8  ;;  %v32658_v27 = vld [vmem:[#allocation23_spill] sm:$0xff]  ;;  %v32665_v13 = vld [vmem:[#allocation25_spill] sm:$0xff] }
 0x5ff   :  { %32635 = vst [vmem:[#allocation35_spill] sm:$0xff] %v26581_v47  ;;  %v26597_v3 = vpack.c.bf16 %v32643_v15, %v32641_v56  ;;  %v32655_v48 = vmax.f32 %v32654_v11, 0.0  ;;  %v32656_v12 = vmax.f32 %v26079_v33, 0.0  ;;  %v32659_v2 = vmax.f32 %v32658_v27, 0.0  ;;  %v5803_v15 = vld [vmem:[#allocation2 + $0xa8] sm:$0xff]  ;;  %v5804_v28 = vld [vmem:[#allocation2 + $0xb0] sm:$0xff] }
 0x600   :  { %32639 = vst [vmem:[#allocation7_spill] sm:$0xff] %v26587_v35  ;;  %v26603_v54 = vpack.c.bf16 %v32647_v45, %v32646_v20  ;;  %v26613_v36 = vpack.c.bf16 %v32652_v26, %v32650_v19  ;;  %v32661_v18 = vmax.f32 %v32660_v55, 0.0  ;;  %v32664_v43 = vmax.f32 %v32663_v41, 0.0  ;;  %v5805_v33 = vld [vmem:[#allocation2 + $0xc8] sm:$0xff]  ;;  %v32670_v39 = vld [vmem:[#allocation26_spill] sm:$0xff]  ;;  %v32677_v27 = vld [vmem:[#allocation15_spill] sm:$0xff] }
 0x601   :  { %32644 = vst [vmem:[#allocation4_spill] sm:$0xff] %v26597_v3  ;;  %v26619_v0 = vpack.c.bf16 %v32656_v12, %v32655_v48  ;;  %v32666_v56 = vmax.f32 %v32665_v13, 0.0  ;;  %v32668_v20 = vld [vmem:[#allocation24_spill] sm:$0xff]  ;;  %v32671_v19 = vmax.f32 %v32670_v39, 0.0  ;;  %v32673_v26 = vld [vmem:[#allocation10_spill] sm:$0xff]  ;;  %v32675_v48 = vmax.f32 %v32557_v32, 0.0 }
 0x602   :  { %32648 = vst [vmem:[#allocation6_spill] sm:$0xff] %v26603_v54  ;;  %32653 = vst [vmem:[#allocation9_spill] sm:$0xff] %v26613_v36  ;;  %v26627_v57 = vpack.c.bf16 %v32661_v18, %v32659_v2  ;;  %v32669_v45 = vmax.f32 %v32668_v20, 0.0  ;;  %v32674_v11 = vmax.f32 %v32673_v26, 0.0  ;;  %v32678_v2 = vmax.f32 %v32677_v27, 0.0  ;;  %v32679_v55 = vld [vmem:[#allocation12_spill] sm:$0xff] }
 0x603   :  { %32657 = vst [vmem:[#allocation11_spill] sm:$0xff] %v26619_v0  ;;  %v26633_v42 = vpack.c.bf16 %v32666_v56, %v32664_v43  ;;  %v32680_v18 = vmax.f32 %v32679_v55, 0.0  ;;  %v5806_v43 = vld [vmem:[#allocation2 + $0xd0] sm:$0xff]  ;;  %v7227_v13 = vld [vmem:[#allocation2 + $0xc7] sm:$0xff]  ;;  %v32682_v20 = vmax.f32 %v26145_v21, 0.0  ;;  %v32686_v32 = vmax.f32 %v26163_v30, 0.0 }
 0x604   :  { %32662 = vst [vmem:[#allocation8_spill] sm:$0xff] %v26627_v57  ;;  %v26639_v34 = vpack.c.bf16 %v32671_v19, %v32669_v45  ;;  %v26645_v12 = vpack.c.bf16 %v32675_v48, %v32674_v11  ;;  %v7228_v56 = vld [vmem:[#allocation2 + $0xcf] sm:$0xff]  ;;  %v32683_v45 = vmax.f32 %v26151_v58, 0.0  ;;  %v32685_v19 = vmax.f32 %v26157_v37, 0.0  ;;  %v7229_v11 = vld [vmem:[#allocation2 + $0xe7] sm:$0xff] }
 0x605   :  { %32667 = vst [vmem:[#allocation21_spill] sm:$0xff] %v26633_v42  ;;  %v26651_v41 = vpack.c.bf16 %v32680_v18, %v32678_v2  ;;  %v7230_v48 = vld [vmem:[#allocation2 + $0xef] sm:$0xff]  ;;  %v32688_v27 = vmax.f32 %v26169_v49, 0.0  ;;  %v32689_v2 = vmax.f32 %v26175_v51, 0.0  ;;  %v32691_v21 = vmax.f32 %v26181_v4, 0.0  ;;  %v7261_v47 = vld [vmem:[#allocation2 + $0x327] sm:$0xff] }
 0x606   :  { %32672 = vst [vmem:[#allocation23_spill] sm:$0xff] %v26639_v34  ;;  %32676 = vst [vmem:[#allocation20_spill] sm:$0xff] %v26645_v12  ;;  %v26657_v39 = vpack.c.bf16 %v32683_v45, %v32682_v20  ;;  %v26663_v26 = vpack.c.bf16 %v32686_v32, %v32685_v19  ;;  %v32692_v58 = vmax.f32 %v32572_v16, 0.0  ;;  %v32694_v37 = vmax.f32 %v32573_v10, 0.0  ;;  %v32695_v20 = vld [vmem:[#allocation5_spill] sm:$0xff]  ;;  %v5809_v10 = vld [vmem:[#allocation2 + $0x108] sm:$0xff] }
 0x607   :  { %32681 = vst [vmem:[#allocation22_spill] sm:$0xff] %v26651_v41  ;;  %v26669_v55 = vpack.c.bf16 %v32689_v2, %v32688_v27  ;;  %v32696_v30 = vmax.f32 %v32695_v20, 0.0  ;;  %v26683_v19 = vpack.c.bf16 %v5804_v28, %v5803_v15  ;;  %v32698_v49 = vmax.f32 %v32574_v24, 0.0  ;;  %v5807_v24 = vld [vmem:[#allocation2 + $0xe8] sm:$0xff]  ;;  %v5810_v15 = vld [vmem:[#allocation2 + $0x110] sm:$0xff] }
 0x608   :  { %32684 = vst [vmem:[#allocation25_spill] sm:$0xff] %v26657_v39  ;;  %32687 = vst [vmem:[#allocation24_spill] sm:$0xff] %v26663_v26  ;;  %v26675_v18 = vpack.c.bf16 %v32692_v58, %v32691_v21  ;;  %v32699_v51 = vmax.f32 %v26205_v38, 0.0  ;;  %v26691_v27 = vpack.c.bf16 %v5806_v43, %v5805_v33  ;;  %v26693_v4 = vpack.c.bf16 %v7228_v56, %v7227_v13  ;;  %v5808_v38 = vld [vmem:[#allocation2 + $0xf0] sm:$0xff]  ;;  %v7231_v28 = vld [vmem:[#allocation2 + $0x107] sm:$0xff] }
 0x609   :  { %32690 = vst [vmem:[#allocation26_spill] sm:$0xff] %v26669_v55  ;;  %v26681_v45 = vpack.c.bf16 %v32696_v30, %v32694_v37  ;;  %20931 = vmatmul.mubr.msk.bf16.gmra.mrb[72].mxu0 %vm27_vm1, %v26683_v19  ;;  %v26697_v16 = vpack.c.bf16 %v7230_v48, %v7229_v11  ;;  %v7232_v33 = vld [vmem:[#allocation2 + $0x10f] sm:$0xff]  ;;  %v7233_v43 = vld [vmem:[#allocation2 + $0x127] sm:$0xff]  ;;  %v26705_v56 = vpack.c.bf16 %v5808_v38, %v5807_v24 }
 0x60a   :  { %32693 = vst [vmem:[#allocation10_spill] sm:$0xff] %v26675_v18  ;;  %v26689_v32 = vpack.c.bf16 %v32699_v51, %v32698_v49  ;;  %20934 = vmatprep.mubr.msk.bf16.mxu0 %vm27_vm1, %v26691_v27  ;;  %21129 = vmatmul.mubr.msk.bf16.gmra.mrb[8].mxu1 %vm27_vm1, %v26693_v4  ;;  %v7234_v13 = vld [vmem:[#allocation2 + $0x12f] sm:$0xff]  ;;  %v26707_v11 = vpack.c.bf16 %v5810_v15, %v5809_v10  ;;  %v7235_v30 = vld [vmem:[#allocation2 + $0x147] sm:$0xff] }
 0x60b   :  { %32697 = vst [vmem:[#allocation15_spill] sm:$0xff] %v26681_v45  ;;  %21132 = vmatprep.mubr.msk.bf16.mxu1 %vm27_vm1, %v26697_v16  ;;  %v26709_v48 = vpack.c.bf16 %v7232_v33, %v7231_v28  ;;  %v26713_v2 = vpack.c.bf16 %v7234_v13, %v7233_v43  ;;  %v5811_v21 = vld [vmem:[#allocation2 + $0x128] sm:$0xff]  ;;  %v5812_v58 = vld [vmem:[#allocation2 + $0x130] sm:$0xff]  ;;  %v5792_v43 = vld [vmem:[%s32075_s2] sm:$0x3]  ;;  %v26863_v7 = vpack.c.bf16 %v7270_v63, %v7269_v1 }
 0x60c   :  { %32700 = vst [vmem:[#allocation12_spill] sm:$0xff] %v26689_v32  ;;  %v5813_v37 = vld [vmem:[#allocation2 + $0x148] sm:$0xff]  ;;  %v5814_v20 = vld [vmem:[#allocation2 + $0x150] sm:$0xff]  ;;  %v26721_v38 = vpack.c.bf16 %v5812_v58, %v5811_v21  ;;  %23980 = vmatprep.subr.msk.bf16.mxu0 %vm537_vm0, %v5792_v43  ;;  %v6376_v58 = vsel %vm537_vm0, %v5792_v43, 0 }
 0x60d   :  { %v7236_v49 = vld [vmem:[#allocation2 + $0x14f] sm:$0xff]  ;;  %v7237_v51 = vld [vmem:[#allocation2 + $0x167] sm:$0xff]  ;;  %v26723_v10 = vpack.c.bf16 %v5814_v20, %v5813_v37  ;;  %20987 = vmatpush3.bf16.msra.mxu0 %v6376_v58  ;;  %32702 = vst [vmem:[#allocation36_spill] sm:$0xff] %v26863_v7 }
 0x60e   :  { %v7238_v24 = vld [vmem:[#allocation2 + $0x16f] sm:$0xff]  ;;  %v26725_v15 = vpack.c.bf16 %v7236_v49, %v7235_v30  ;;  %v26745_v37 = vld [vmem:[%s32075_s2 + $0xa] sm:$0x3] }
 0x60f   :  { %v26729_v28 = vpack.c.bf16 %v7238_v24, %v7237_v51  ;;  %v5815_v33 = vld [vmem:[#allocation2 + $0x168] sm:$0xff]  ;;  %v5816_v13 = vld [vmem:[#allocation2 + $0x170] sm:$0xff]  ;;  %23984 = vmatprep.subr.msk.bf16.mxu1 %vm537_vm0, %v26745_v37 }
 0x610   :  { %v5817_v21 = vld [vmem:[#allocation2 + $0x188] sm:$0xff]  ;;  %v5818_v20 = vld [vmem:[#allocation2 + $0x190] sm:$0xff]  ;;  %v26749_v32 = vpack.c.bf16 %v5816_v13, %v5815_v33 }
 0x611   :  { %20935 = vmatmul.mubr.msk.bf16.gmra.mrb[76].mxu0 %vm27_vm1, %v26705_v56  ;;  %v7239_v30 = vld [vmem:[#allocation2 + $0x187] sm:$0xff]  ;;  %v7240_v49 = vld [vmem:[#allocation2 + $0x18f] sm:$0xff]  ;;  %v26751_v45 = vpack.c.bf16 %v5818_v20, %v5817_v21 }
 0x612   :  { %20938 = vmatprep.mubr.msk.bf16.mxu0 %vm27_vm1, %v26707_v11  ;;  %21133 = vmatmul.mubr.msk.bf16.gmra.mrb[12].mxu1 %vm27_vm1, %v26709_v48  ;;  %v7241_v51 = vld [vmem:[#allocation2 + $0x1a7] sm:$0xff]  ;;  %v7242_v24 = vld [vmem:[#allocation2 + $0x1af] sm:$0xff]  ;;  %v26753_v18 = vpack.c.bf16 %v7240_v49, %v7239_v30 }
 0x613   :  { %21136 = vmatprep.mubr.msk.bf16.mxu1 %vm27_vm1, %v26713_v2  ;;  %v26757_v43 = vpack.c.bf16 %v7242_v24, %v7241_v51  ;;  %v5819_v33 = vld [vmem:[#allocation2 + $0x1a8] sm:$0xff]  ;;  %v5820_v13 = vld [vmem:[#allocation2 + $0x1b0] sm:$0xff] }
 0x614   :  { %v5821_v21 = vld [vmem:[#allocation2 + $0x1c8] sm:$0xff]  ;;  %v5822_v58 = vld [vmem:[#allocation2 + $0x1d0] sm:$0xff]  ;;  %v26765_v26 = vpack.c.bf16 %v5820_v13, %v5819_v33 }
 0x615   :  { %v7243_v20 = vld [vmem:[#allocation2 + $0x1c7] sm:$0xff]  ;;  %v7244_v30 = vld [vmem:[#allocation2 + $0x1cf] sm:$0xff]  ;;  %v26767_v51 = vpack.c.bf16 %v5822_v58, %v5821_v21 }
 0x616   :  { %v7245_v49 = vld [vmem:[#allocation2 + $0x1e7] sm:$0xff]  ;;  %v7246_v55 = vld [vmem:[#allocation2 + $0x1ef] sm:$0xff]  ;;  %v26769_v24 = vpack.c.bf16 %v7244_v30, %v7243_v20 }
 0x617   :  { %v26773_v39 = vpack.c.bf16 %v7246_v55, %v7245_v49  ;;  %v5825_v33 = vld [vmem:[#allocation2 + $0x248] sm:$0xff]  ;;  %v5826_v13 = vld [vmem:[#allocation2 + $0x250] sm:$0xff] }
 0x618   :  { %v5823_v21 = vld [vmem:[#allocation2 + $0x1e8] sm:$0xff]  ;;  %v5824_v58 = vld [vmem:[#allocation2 + $0x1f0] sm:$0xff]  ;;  %v5873_v34 = vpack.c.bf16 %v5826_v13, %v5825_v33 }
 0x619   :  { %20939 = vmatmul.mubr.msk.bf16.gmra.mrb[80].mxu0 %vm27_vm1, %v26721_v38  ;;  %v7247_v20 = vld [vmem:[#allocation2 + $0x207] sm:$0xff]  ;;  %v7248_v30 = vld [vmem:[#allocation2 + $0x20f] sm:$0xff]  ;;  %v26781_v55 = vpack.c.bf16 %v5824_v58, %v5823_v21 }
 0x61a   :  { %20942 = vmatprep.mubr.msk.bf16.mxu0 %vm27_vm1, %v26723_v10  ;;  %21137 = vmatmul.mubr.msk.bf16.gmra.mrb[16].mxu1 %vm27_vm1, %v26725_v15  ;;  %v7249_v41 = vld [vmem:[#allocation2 + $0x267] sm:$0xff]  ;;  %v7250_v12 = vld [vmem:[#allocation2 + $0x26f] sm:$0xff]  ;;  %v7296_v49 = vpack.c.bf16 %v7248_v30, %v7247_v20 }
 0x61b   :  { %21140 = vmatprep.mubr.msk.bf16.mxu1 %vm27_vm1, %v26729_v28  ;;  %v26785_v42 = vpack.c.bf16 %v7250_v12, %v7249_v41  ;;  %v5827_v57 = vld [vmem:[#allocation2 + $0x268] sm:$0xff]  ;;  %v5828_v0 = vld [vmem:[#allocation2 + $0x270] sm:$0xff] }
 0x61c   :  { %v5829_v36 = vld [vmem:[#allocation2 + $0x288] sm:$0xff]  ;;  %v5830_v54 = vld [vmem:[#allocation2 + $0x290] sm:$0xff]  ;;  %v26791_v20 = vpack.c.bf16 %v5828_v0, %v5827_v57 }
 0x61d   :  { %v7251_v33 = vld [vmem:[#allocation2 + $0x287] sm:$0xff]  ;;  %v7252_v13 = vld [vmem:[#allocation2 + $0x28f] sm:$0xff]  ;;  %v26793_v30 = vpack.c.bf16 %v5830_v54, %v5829_v36 }
 0x61e   :  { %v7253_v21 = vld [vmem:[#allocation2 + $0x2a7] sm:$0xff]  ;;  %v7254_v58 = vld [vmem:[#allocation2 + $0x2af] sm:$0xff]  ;;  %v26795_v12 = vpack.c.bf16 %v7252_v13, %v7251_v33 }
 0x61f   :  { %v5831_v0 = vld [vmem:[#allocation2 + $0x2a8] sm:$0xff]  ;;  %v5832_v57 = vld [vmem:[#allocation2 + $0x2b0] sm:$0xff] }
 0x620   :  { %v5833_v54 = vld [vmem:[#allocation2 + $0x2c8] sm:$0xff]  ;;  %v5834_v36 = vld [vmem:[#allocation2 + $0x2d0] sm:$0xff]  ;;  %v26807_v3 = vpack.c.bf16 %v5832_v57, %v5831_v0 }
 0x621   :  { %20943 = vmatmul.mubr.msk.bf16.gmra.mrb[84].mxu0 %vm27_vm1, %v26749_v32  ;;  %v7255_v41 = vld [vmem:[#allocation2 + $0x2c7] sm:$0xff]  ;;  %v7258_v13 = vld [vmem:[#allocation2 + $0x2ef] sm:$0xff] }
 0x622   :  { %20946 = vmatprep.mubr.msk.bf16.mxu0 %vm27_vm1, %v26751_v45  ;;  %21141 = vmatmul.mubr.msk.bf16.gmra.mrb[20].mxu1 %vm27_vm1, %v26753_v18  ;;  %v7257_v33 = vld [vmem:[#allocation2 + $0x2e7] sm:$0xff]  ;;  %v5836_v57 = vld [vmem:[#allocation2 + $0x2f0] sm:$0xff] }
 0x623   :  { %21144 = vmatprep.mubr.msk.bf16.mxu1 %vm27_vm1, %v26757_v43  ;;  %v26815_v35 = vpack.c.bf16 %v7258_v13, %v7257_v33  ;;  %v5835_v0 = vld [vmem:[#allocation2 + $0x2e8] sm:$0xff] }
 0x624   :  { %v7262_v50 = vld [vmem:[#allocation2 + $0x32f] sm:$0xff]  ;;  %v26823_v5 = vpack.c.bf16 %v5836_v57, %v5835_v0  ;;  %v7265_v61 = vld [vmem:[#allocation2 + $0x367] sm:$0xff] }
 0x625   :  { %v26831_v44 = vpack.c.bf16 %v7262_v50, %v7261_v47  ;;  %v5839_v0 = vld [vmem:[#allocation2 + $0x328] sm:$0xff]  ;;  %v5840_v57 = vld [vmem:[#allocation2 + $0x330] sm:$0xff] }
 0x626   :  { %v7266_v22 = vld [vmem:[#allocation2 + $0x36f] sm:$0xff]  ;;  %v26839_v25 = vpack.c.bf16 %v5840_v57, %v5839_v0  ;;  %v7273_v60 = vld [vmem:[#allocation2 + $0x3e7] sm:$0xff] }
 0x627   :  { %v26847_v23 = vpack.c.bf16 %v7266_v22, %v7265_v61  ;;  %v5843_v0 = vld [vmem:[#allocation2 + $0x368] sm:$0xff]  ;;  %v5844_v57 = vld [vmem:[#allocation2 + $0x370] sm:$0xff]  ;;  %v26879_v40 = vpack.c.bf16 %v7274_v29, %v7273_v60 }
 0x628   :  { %v26855_v6 = vpack.c.bf16 %v5844_v57, %v5843_v0  ;;  %v5847_v0 = vld [vmem:[#allocation2 + $0x3a8] sm:$0xff]  ;;  %v5848_v57 = vld [vmem:[#allocation2 + $0x3b0] sm:$0xff] }
 0x629   :  { %20947 = vmatmul.mubr.msk.bf16.gmra.mrb[88].mxu0 %vm27_vm1, %v26765_v26  ;;  %v26871_v31 = vpack.c.bf16 %v5848_v57, %v5847_v0  ;;  %32706 = vst [vmem:[#allocation40_spill] sm:$0xff] %v26879_v40  ;;  %v5851_v0 = vld [vmem:[#allocation2 + $0x3e8] sm:$0xff]  ;;  %v5852_v57 = vld [vmem:[#allocation2 + $0x3f0] sm:$0xff] }
 0x62a   :  { %20950 = vmatprep.mubr.msk.bf16.mxu0 %vm27_vm1, %v26767_v51  ;;  %21145 = vmatmul.mubr.msk.bf16.gmra.mrb[24].mxu1 %vm27_vm1, %v26769_v24 }
 0x62b   :  { %21148 = vmatprep.mubr.msk.bf16.mxu1 %vm27_vm1, %v26773_v39  ;;  %32703 = vst [vmem:[#allocation37_spill] sm:$0xff] %v26871_v31 }
 0x631   :  { %20951 = vmatmul.mubr.msk.bf16.gmra.mrb[92].mxu0 %vm27_vm1, %v26781_v55 }
 0x632   :  { %21149 = vmatmul.mubr.msk.bf16.gmra.mrb[28].mxu1 %vm27_vm1, %v7296_v49  ;;  %20954 = vmatprep.mubr.msk.bf16.mxu0 %vm27_vm1, %v5873_v34  ;;  %v26799_v34 = vpack.c.bf16 %v7254_v58, %v7253_v21  ;;  %v7256_v49 = vld [vmem:[#allocation2 + $0x2cf] sm:$0xff]  ;;  %v26809_v21 = vpack.c.bf16 %v5834_v36, %v5833_v54 }
 0x633   :  { %21152 = vmatprep.mubr.msk.bf16.mxu1 %vm27_vm1, %v26785_v42  ;;  %v26811_v58 = vpack.c.bf16 %v7256_v49, %v7255_v41  ;;  %v5837_v54 = vld [vmem:[#allocation2 + $0x308] sm:$0xff]  ;;  %v5838_v36 = vld [vmem:[#allocation2 + $0x310] sm:$0xff] }
 0x634   :  { %v7259_v41 = vld [vmem:[#allocation2 + $0x307] sm:$0xff]  ;;  %v7260_v49 = vld [vmem:[#allocation2 + $0x30f] sm:$0xff]  ;;  %v26825_v33 = vpack.c.bf16 %v5838_v36, %v5837_v54 }
 0x635   :  { %v26827_v13 = vpack.c.bf16 %v7260_v49, %v7259_v41  ;;  %v5841_v54 = vld [vmem:[#allocation2 + $0x348] sm:$0xff]  ;;  %v5842_v36 = vld [vmem:[#allocation2 + $0x350] sm:$0xff] }
 0x636   :  { %v7263_v41 = vld [vmem:[#allocation2 + $0x347] sm:$0xff]  ;;  %v7264_v49 = vld [vmem:[#allocation2 + $0x34f] sm:$0xff]  ;;  %v26841_v50 = vpack.c.bf16 %v5842_v36, %v5841_v54 }
 0x637   :  { %v26843_v47 = vpack.c.bf16 %v7264_v49, %v7263_v41  ;;  %v5845_v54 = vld [vmem:[#allocation2 + $0x388] sm:$0xff]  ;;  %v5846_v36 = vld [vmem:[#allocation2 + $0x390] sm:$0xff] }
 0x638   :  { %v7267_v41 = vld [vmem:[#allocation2 + $0x387] sm:$0xff]  ;;  %v7268_v49 = vld [vmem:[#allocation2 + $0x38f] sm:$0xff]  ;;  %v26857_v22 = vpack.c.bf16 %v5846_v36, %v5845_v54 }
 0x639   :  { %20955 = vmatmul.mubr.msk.bf16.gmra.mrb[96].mxu0 %vm27_vm1, %v26791_v20  ;;  %v26859_v61 = vpack.c.bf16 %v7268_v49, %v7267_v41  ;;  %v5849_v54 = vld [vmem:[#allocation2 + $0x3c8] sm:$0xff]  ;;  %v5850_v36 = vld [vmem:[#allocation2 + $0x3d0] sm:$0xff] }
 0x63a   :  { %20958 = vmatprep.mubr.msk.bf16.mxu0 %vm27_vm1, %v26793_v30  ;;  %21153 = vmatmul.mubr.msk.bf16.gmra.mrb[32].mxu1 %vm27_vm1, %v26795_v12  ;;  %32701 = vst [vmem:[#allocation5_spill] sm:$0xff] %v26857_v22  ;;  %v7271_v41 = vld [vmem:[#allocation2 + $0x3c7] sm:$0xff]  ;;  %v7272_v49 = vld [vmem:[#allocation2 + $0x3cf] sm:$0xff]  ;;  %v26873_v63 = vpack.c.bf16 %v5850_v36, %v5849_v54 }
 0x63b   :  { %21156 = vmatprep.mubr.msk.bf16.mxu1 %vm27_vm1, %v26799_v34  ;;  %v26875_v1 = vpack.c.bf16 %v7272_v49, %v7271_v41  ;;  %v5853_v54 = vld [vmem:[#allocation2 + $0x408] sm:$0xff]  ;;  %v5854_v36 = vld [vmem:[#allocation2 + $0x410] sm:$0xff] }
 0x63c   :  { %32704 = vst [vmem:[#allocation38_spill] sm:$0xff] %v26873_v63  ;;  %v7275_v41 = vld [vmem:[#allocation2 + $0x407] sm:$0xff]  ;;  %v7276_v49 = vld [vmem:[#allocation2 + $0x40f] sm:$0xff]  ;;  %v26889_v29 = vpack.c.bf16 %v5854_v36, %v5853_v54 }
 0x63d   :  { %32705 = vst [vmem:[#allocation39_spill] sm:$0xff] %v26875_v1  ;;  %v26891_v60 = vpack.c.bf16 %v7276_v49, %v7275_v41  ;;  %v5855_v54 = vld [vmem:[#allocation2 + $0x428] sm:$0xff]  ;;  %v5856_v36 = vld [vmem:[#allocation2 + $0x430] sm:$0xff] }
 0x63e   :  { %v7279_v41 = vld [vmem:[#allocation2 + $0x447] sm:$0xff]  ;;  %v7280_v49 = vld [vmem:[#allocation2 + $0x44f] sm:$0xff] }
 0x641   :  { %20959 = vmatmul.mubr.msk.bf16.gmra.mrb[100].mxu0 %vm27_vm1, %v26807_v3 }
 0x642   :  { %20962 = vmatprep.mubr.msk.bf16.mxu0 %vm27_vm1, %v26809_v21  ;;  %21157 = vmatmul.mubr.msk.bf16.gmra.mrb[36].mxu1 %vm27_vm1, %v26811_v58 }
 0x643   :  { %21160 = vmatprep.mubr.msk.bf16.mxu1 %vm27_vm1, %v26815_v35 }
 0x649   :  { %20963 = vmatmul.mubr.msk.bf16.gmra.mrb[104].mxu0 %vm27_vm1, %v26823_v5 }
 0x64a   :  { %20966 = vmatprep.mubr.msk.bf16.mxu0 %vm27_vm1, %v26825_v33  ;;  %21161 = vmatmul.mubr.msk.bf16.gmra.mrb[40].mxu1 %vm27_vm1, %v26827_v13 }
 0x64b   :  { %21164 = vmatprep.mubr.msk.bf16.mxu1 %vm27_vm1, %v26831_v44 }
 0x651   :  { %20967 = vmatmul.mubr.msk.bf16.gmra.mrb[108].mxu0 %vm27_vm1, %v26839_v25 }
 0x652   :  { %20970 = vmatprep.mubr.msk.bf16.mxu0 %vm27_vm1, %v26841_v50  ;;  %21165 = vmatmul.mubr.msk.bf16.gmra.mrb[44].mxu1 %vm27_vm1, %v26843_v47 }
 0x653   :  { %21168 = vmatprep.mubr.msk.bf16.mxu1 %vm27_vm1, %v26847_v23 }
 0x659   :  { %20971 = vmatmul.mubr.msk.bf16.gmra.mrb[112].mxu0 %vm27_vm1, %v26855_v6 }
 0x65a   :  { %20974 = vmatprep.mubr.msk.bf16.mxu0 %vm27_vm1, %v26857_v22  ;;  %21169 = vmatmul.mubr.msk.bf16.gmra.mrb[48].mxu1 %vm27_vm1, %v26859_v61  ;;  %v7278_v22 = vld [vmem:[#allocation2 + $0x42f] sm:$0xff] }
 0x65b   :  { %21172 = vmatprep.mubr.msk.bf16.mxu1 %vm27_vm1, %v26863_v7  ;;  %v7277_v7 = vld [vmem:[#allocation2 + $0x427] sm:$0xff] }
 0x661   :  { %20975 = vmatmul.mubr.msk.bf16.gmra.mrb[116].mxu0 %vm27_vm1, %v26871_v31  ;;  %v26887_v31 = vpack.c.bf16 %v5852_v57, %v5851_v0  ;;  %v5696_v0 = vld [vmem:[#allocation2 + $0x7] sm:$0xff]  ;;  %v5697_v57 = vld [vmem:[#allocation2 + $0xf] sm:$0xff] }
 0x662   :  { %20978 = vmatprep.mubr.msk.bf16.mxu0 %vm27_vm1, %v26873_v63  ;;  %21173 = vmatmul.mubr.msk.bf16.gmra.mrb[52].mxu1 %vm27_vm1, %v26875_v1  ;;  %v26895_v63 = vpack.c.bf16 %v7278_v22, %v7277_v7  ;;  %v26903_v1 = vpack.c.bf16 %v5856_v36, %v5855_v54  ;;  %v7312_v7 = vpack.c.bf16 %v7280_v49, %v7279_v41  ;;  %v18713_v22 = vld [vmem:[%s32075_s2 + $0x4] sm:$0x3]  ;;  %v8341_v54 = vld [vmem:[#allocation2 + $0x1a9] sm:$0xff]  ;;  %v8342_v36 = vld [vmem:[#allocation2 + $0x1b1] sm:$0xff] }
 0x663   :  { %21176 = vmatprep.mubr.msk.bf16.mxu1 %vm27_vm1, %v26879_v40  ;;  %v5760_v40 = vpack.c.bf16 %v5697_v57, %v5696_v0  ;;  %23981 = vmatprep.subr.msk.bf16.mxu0 %vm537_vm0, %v18713_v22  ;;  %v8512_v0 = vsel %vm537_vm0, %v26745_v37, 0  ;;  %v6862_v57 = vsel %vm537_vm0, %v18713_v22, 0  ;;  %v6679_v37 = vld [vmem:[#allocation2 + $0xc9] sm:$0xff]  ;;  %v8393_v49 = vpack.c.bf16 %v8342_v36, %v8341_v54  ;;  %v6696_v22 = vld [vmem:[#allocation2 + $0x1d1] sm:$0xff] }
 0x664   :  { %v8867_v54 = vld [vmem:[#allocation2 + $0x47] sm:$0xff]  ;;  %v8868_v36 = vld [vmem:[#allocation2 + $0x4f] sm:$0xff] }
 0x669   :  { %20979 = vmatmul.mubr.msk.bf16.gmra.mrb[120].mxu0 %vm27_vm1, %v26887_v31 }
 0x66a   :  { %20982 = vmatprep.mubr.msk.bf16.mxu0 %vm27_vm1, %v26889_v29  ;;  %21177 = vmatmul.mubr.msk.bf16.gmra.mrb[56].mxu1 %vm27_vm1, %v26891_v60 }
 0x66b   :  { %21180 = vmatprep.mubr.msk.bf16.mxu1 %vm27_vm1, %v26895_v63 }
 0x671   :  { %20983 = vmatmul.mubr.msk.bf16.gmra.mrb[124].mxu0 %vm27_vm1, %v26903_v1 }
 0x672   :  { %21181 = vmatmul.mubr.msk.bf16.gmra.mrb[60].mxu1 %vm27_vm1, %v7312_v7  ;;  %20988 = vmatprep.mubr.msk.bf16.mxu0 %vm27_vm1, %v5760_v40  ;;  %v26923_v40 = vld [vmem:[%s32075_s2 + $0xc] sm:$0x3] }
 0x673   :  { %21186 = vmatprep.mubr.msk.bf16.mxu1 %vm27_vm1, %v26453_v62  ;;  %v5728_v62 = vld [vmem:[#allocation2 + $0x247] sm:$0xff] }
 0x674   :  { %v6695_v7 = vld [vmem:[#allocation2 + $0x1c9] sm:$0xff] }
 0x679   :  { %20989 = vmatmul.mubr.msk.bf16.vlgmr.msra.gmra.mrb[64].mxu0 %vm27_vm1, %v26455_v46  ;;  %v5729_v46 = vld [vmem:[#allocation2 + $0x24f] sm:$0xff] }
 0x67a   :  { %20992 = vmatprep.mubr.msk.bf16.mxu0 %vm27_vm1, %v26471_v52  ;;  %21187 = vmatmul.mubr.msk.bf16.vlgmr.msra.gmra.mrb[0].mxu1 %vm27_vm1, %v26457_v17  ;;  %v7797_v17 = vld [vmem:[#allocation2 + $0x208] sm:$0xff]  ;;  %v7798_v52 = vld [vmem:[#allocation2 + $0x210] sm:$0xff] }
 0x67b   :  { %21251 = vmatpush3.bf16.msra.mxu1 %v8512_v0  ;;  %21190 = vmatprep.mubr.msk.bf16.mxu1 %vm27_vm1, %v26553_v59  ;;  %v7846_v59 = vpack.c.bf16 %v7798_v52, %v7797_v17  ;;  %v8345_v0 = vld [vmem:[#allocation2 + $0x1e9] sm:$0xff]  ;;  %v6700_v17 = vld [vmem:[#allocation2 + $0x251] sm:$0xff] }
 0x67c   :  { %21053 = vmatpush3.bf16.msra.mxu0 %v6862_v57  ;;  %23985 = vmatprep.subr.msk.bf16.mxu1 %vm537_vm0, %v26923_v40  ;;  %v8346_v57 = vld [vmem:[#allocation2 + $0x1f1] sm:$0xff]  ;;  %v8347_v52 = vld [vmem:[#allocation2 + $0x209] sm:$0xff] }
 0x681   :  { %20993 = vmatmul.mubr.msk.bf16.gmra.mrb[68].mxu0 %vm27_vm1, %v26479_v53  ;;  %v5776_v53 = vpack.c.bf16 %v5729_v46, %v5728_v62  ;;  %v8395_v62 = vpack.c.bf16 %v8346_v57, %v8345_v0  ;;  %v6699_v46 = vld [vmem:[#allocation2 + $0x249] sm:$0xff] }
 0x682   :  { %20996 = vmatprep.mubr.msk.bf16.mxu0 %vm27_vm1, %v26569_v9  ;;  %21191 = vmatmul.mubr.msk.bf16.gmra.mrb[4].mxu1 %vm27_vm1, %v26555_v14  ;;  %v32707_v14 = vld [vmem:[#allocation5_spill] sm:$0xff]  ;;  %v32711_v9 = vld [vmem:[#allocation38_spill] sm:$0xff]  ;;  %v8871_v0 = vld [vmem:[#allocation2 + $0x87] sm:$0xff] }
 0x683   :  { %21194 = vmatprep.mubr.msk.bf16.mxu1 %vm27_vm1, %v26683_v19  ;;  %v6672_v19 = vld [vmem:[#allocation2 + $0x51] sm:$0xff] }
 0x684   :  { %v8872_v57 = vld [vmem:[#allocation2 + $0x8f] sm:$0xff] }
 0x689   :  { %20997 = vmatmul.mubr.msk.bf16.gmra.mrb[72].mxu0 %vm27_vm1, %v26591_v8  ;;  %v7829_v8 = vld [vmem:[#allocation2 + $0x448] sm:$0xff] }
 0x68a   :  { %21000 = vmatprep.mubr.msk.bf16.mxu0 %vm27_vm1, %v26693_v4  ;;  %21195 = vmatmul.mubr.msk.bf16.gmra.mrb[8].mxu1 %vm27_vm1, %v26691_v27  ;;  %v8322_v27 = vld [vmem:[#allocation2 + $0x71] sm:$0xff] }
 0x68b   :  { %21198 = vmatprep.mubr.msk.bf16.mxu1 %vm27_vm1, %v26705_v56 }
 0x691   :  { %21001 = vmatmul.mubr.msk.bf16.gmra.mrb[76].mxu0 %vm27_vm1, %v26697_v16  ;;  %v9062_v16 = vsel %vm537_vm0, %v26923_v40, 0  ;;  %v6745_v40 = vpack.c.bf16 %v6696_v22, %v6695_v7  ;;  %v8869_v7 = vld [vmem:[#allocation2 + $0x67] sm:$0xff]  ;;  %v8870_v22 = vld [vmem:[#allocation2 + $0x6f] sm:$0xff] }
 0x692   :  { %21004 = vmatprep.mubr.msk.bf16.mxu0 %vm27_vm1, %v26709_v48  ;;  %21199 = vmatmul.mubr.msk.bf16.gmra.mrb[12].mxu1 %vm27_vm1, %v26707_v11  ;;  %v27054_v11 = vld [vmem:[%s32075_s2 + $0xe] sm:$0x3] }
 0x693   :  { %21202 = vmatprep.mubr.msk.bf16.mxu1 %vm27_vm1, %v26721_v38  ;;  %v6675_v48 = vld [vmem:[#allocation2 + $0x89] sm:$0xff] }
 0x694   :  { %v8325_v38 = vld [vmem:[#allocation2 + $0xa9] sm:$0xff] }
 0x699   :  { %21005 = vmatmul.mubr.msk.bf16.gmra.mrb[80].mxu0 %vm27_vm1, %v26713_v2  ;;  %v6676_v2 = vld [vmem:[#allocation2 + $0x91] sm:$0xff] }
 0x69a   :  { %21008 = vmatprep.mubr.msk.bf16.mxu0 %vm27_vm1, %v26725_v15  ;;  %21203 = vmatmul.mubr.msk.bf16.gmra.mrb[16].mxu1 %vm27_vm1, %v26723_v10  ;;  %v8326_v10 = vld [vmem:[#allocation2 + $0xb1] sm:$0xff]  ;;  %v6735_v15 = vpack.c.bf16 %v6676_v2, %v6675_v48  ;;  %v6715_v48 = vld [vmem:[#allocation2 + $0x349] sm:$0xff] }
 0x69b   :  { %21206 = vmatprep.mubr.msk.bf16.mxu1 %vm27_vm1, %v26749_v32  ;;  %v8321_v32 = vld [vmem:[#allocation2 + $0x69] sm:$0xff]  ;;  %v6716_v2 = vld [vmem:[#allocation2 + $0x351] sm:$0xff] }
 0x69c   :  { %v8383_v56 = vpack.c.bf16 %v8322_v27, %v8321_v32  ;;  %v6712_v32 = vld [vmem:[#allocation2 + $0x311] sm:$0xff]  ;;  %v8361_v27 = vld [vmem:[#allocation2 + $0x329] sm:$0xff] }
 0x6a1   :  { %21009 = vmatmul.mubr.msk.bf16.gmra.mrb[84].mxu0 %vm27_vm1, %v26729_v28  ;;  %v8385_v28 = vpack.c.bf16 %v8326_v10, %v8325_v38  ;;  %v8365_v38 = vld [vmem:[#allocation2 + $0x369] sm:$0xff]  ;;  %v8366_v10 = vld [vmem:[#allocation2 + $0x371] sm:$0xff] }
 0x6a2   :  { %21012 = vmatprep.mubr.msk.bf16.mxu0 %vm27_vm1, %v26753_v18  ;;  %21207 = vmatmul.mubr.msk.bf16.gmra.mrb[20].mxu1 %vm27_vm1, %v26751_v45  ;;  %v6671_v45 = vld [vmem:[#allocation2 + $0x49] sm:$0xff] }
 0x6a3   :  { %21210 = vmatprep.mubr.msk.bf16.mxu1 %vm27_vm1, %v26765_v26  ;;  %v6733_v4 = vpack.c.bf16 %v6672_v19, %v6671_v45  ;;  %v6711_v19 = vld [vmem:[#allocation2 + $0x309] sm:$0xff] }
 0x6a9   :  { %21013 = vmatmul.mubr.msk.bf16.gmra.mrb[88].mxu0 %vm27_vm1, %v26757_v43  ;;  %v6680_v43 = vld [vmem:[#allocation2 + $0xd1] sm:$0xff] }
 0x6aa   :  { %21016 = vmatprep.mubr.msk.bf16.mxu0 %vm27_vm1, %v26769_v24  ;;  %21211 = vmatmul.mubr.msk.bf16.gmra.mrb[24].mxu1 %vm27_vm1, %v26767_v51  ;;  %v8329_v51 = vld [vmem:[#allocation2 + $0xe9] sm:$0xff]  ;;  %v8330_v24 = vld [vmem:[#allocation2 + $0xf1] sm:$0xff] }
 0x6ab   :  { %21214 = vmatprep.mubr.msk.bf16.mxu1 %vm27_vm1, %v26781_v55  ;;  %v6737_v55 = vpack.c.bf16 %v6680_v43, %v6679_v37  ;;  %v6719_v37 = vld [vmem:[#allocation2 + $0x389] sm:$0xff]  ;;  %v6720_v43 = vld [vmem:[#allocation2 + $0x391] sm:$0xff] }
 0x6b1   :  { %21017 = vmatmul.mubr.msk.bf16.gmra.mrb[92].mxu0 %vm27_vm1, %v26773_v39  ;;  %v8318_v39 = vld [vmem:[#allocation2 + $0x31] sm:$0xff] }
 0x6b2   :  { %21215 = vmatmul.mubr.msk.bf16.gmra.mrb[28].mxu1 %vm27_vm1, %v7846_v59  ;;  %21020 = vmatprep.mubr.msk.bf16.mxu0 %vm27_vm1, %v5776_v53  ;;  %v8348_v53 = vld [vmem:[#allocation2 + $0x211] sm:$0xff]  ;;  %v8349_v59 = vld [vmem:[#allocation2 + $0x269] sm:$0xff] }
 0x6b3   :  { %21218 = vmatprep.mubr.msk.bf16.mxu1 %vm27_vm1, %v26791_v20  ;;  %v8387_v20 = vpack.c.bf16 %v8330_v24, %v8329_v51  ;;  %v8369_v51 = vld [vmem:[#allocation2 + $0x3a9] sm:$0xff]  ;;  %v8370_v24 = vld [vmem:[#allocation2 + $0x3b1] sm:$0xff] }
 0x6b9   :  { %21021 = vmatmul.mubr.msk.bf16.gmra.mrb[96].mxu0 %vm27_vm1, %v26785_v42  ;;  %v8317_v42 = vld [vmem:[#allocation2 + $0x29] sm:$0xff] }
 0x6ba   :  { %21024 = vmatprep.mubr.msk.bf16.mxu0 %vm27_vm1, %v26795_v12  ;;  %21219 = vmatmul.mubr.msk.bf16.gmra.mrb[32].mxu1 %vm27_vm1, %v26793_v30  ;;  %v8381_v18 = vpack.c.bf16 %v8318_v39, %v8317_v42  ;;  %v6683_v30 = vld [vmem:[#allocation2 + $0x109] sm:$0xff]  ;;  %v6684_v12 = vld [vmem:[#allocation2 + $0x111] sm:$0xff] }
 0x6bb   :  { %21222 = vmatprep.mubr.msk.bf16.mxu1 %vm27_vm1, %v26807_v3  ;;  %v7830_v3 = vld [vmem:[#allocation2 + $0x450] sm:$0xff] }
 0x6bc   :  { %v6707_v42 = vld [vmem:[#allocation2 + $0x2c9] sm:$0xff]  ;;  %v6708_v39 = vld [vmem:[#allocation2 + $0x2d1] sm:$0xff] }
 0x6c1   :  { %21025 = vmatmul.mubr.msk.bf16.gmra.mrb[100].mxu0 %vm27_vm1, %v26799_v34  ;;  %v8333_v34 = vld [vmem:[#allocation2 + $0x129] sm:$0xff] }
 0x6c2   :  { %21028 = vmatprep.mubr.msk.bf16.mxu0 %vm27_vm1, %v26811_v58  ;;  %21223 = vmatmul.mubr.msk.bf16.gmra.mrb[36].mxu1 %vm27_vm1, %v26809_v21  ;;  %v8334_v21 = vld [vmem:[#allocation2 + $0x131] sm:$0xff]  ;;  %v6739_v58 = vpack.c.bf16 %v6684_v12, %v6683_v30  ;;  %v6723_v30 = vld [vmem:[#allocation2 + $0x3c9] sm:$0xff] }
 0x6c3   :  { %21226 = vmatprep.mubr.msk.bf16.mxu1 %vm27_vm1, %v26823_v5  ;;  %v32710_v5 = vld [vmem:[#allocation39_spill] sm:$0xff]  ;;  %v6724_v12 = vld [vmem:[#allocation2 + $0x3d1] sm:$0xff] }
 0x6c9   :  { %21029 = vmatmul.mubr.msk.bf16.gmra.mrb[104].mxu0 %vm27_vm1, %v26815_v35  ;;  %v6668_v35 = vld [vmem:[#allocation2 + $0x11] sm:$0xff] }
 0x6ca   :  { %21032 = vmatprep.mubr.msk.bf16.mxu0 %vm27_vm1, %v26827_v13  ;;  %21227 = vmatmul.mubr.msk.bf16.gmra.mrb[40].mxu1 %vm27_vm1, %v26825_v33  ;;  %v8389_v33 = vpack.c.bf16 %v8334_v21, %v8333_v34  ;;  %v6687_v13 = vld [vmem:[#allocation2 + $0x149] sm:$0xff]  ;;  %v8374_v21 = vld [vmem:[#allocation2 + $0x3f1] sm:$0xff] }
 0x6cb   :  { %21230 = vmatprep.mubr.msk.bf16.mxu1 %vm27_vm1, %v26839_v25  ;;  %v32708_v25 = vld [vmem:[#allocation37_spill] sm:$0xff] }
 0x6cc   :  { %v8373_v34 = vld [vmem:[#allocation2 + $0x3e9] sm:$0xff] }
 0x6d1   :  { %21033 = vmatmul.mubr.msk.bf16.gmra.mrb[108].mxu0 %vm27_vm1, %v26831_v44  ;;  %v32709_v44 = vld [vmem:[#allocation36_spill] sm:$0xff] }
 0x6d2   :  { %21036 = vmatprep.mubr.msk.bf16.mxu0 %vm27_vm1, %v26843_v47  ;;  %21231 = vmatmul.mubr.msk.bf16.gmra.mrb[44].mxu1 %vm27_vm1, %v26841_v50  ;;  %v6688_v50 = vld [vmem:[#allocation2 + $0x151] sm:$0xff]  ;;  %v8337_v47 = vld [vmem:[#allocation2 + $0x169] sm:$0xff] }
 0x6d3   :  { %21234 = vmatprep.mubr.msk.bf16.mxu1 %vm27_vm1, %v26855_v6  ;;  %v32712_v6 = vld [vmem:[#allocation40_spill] sm:$0xff] }
 0x6d9   :  { %21037 = vmatmul.mubr.msk.bf16.gmra.mrb[112].mxu0 %vm27_vm1, %v26847_v23  ;;  %v6667_v23 = vld [vmem:[#allocation2 + $0x9] sm:$0xff] }
 0x6da   :  { %21040 = vmatprep.mubr.msk.bf16.mxu0 %vm27_vm1, %v26859_v61  ;;  %21235 = vmatmul.mubr.msk.bf16.gmra.mrb[48].mxu1 %vm27_vm1, %v32707_v14  ;;  %v6731_v26 = vpack.c.bf16 %v6668_v35, %v6667_v23  ;;  %v8338_v61 = vld [vmem:[#allocation2 + $0x171] sm:$0xff]  ;;  %v8353_v23 = vld [vmem:[#allocation2 + $0x2a9] sm:$0xff] }
 0x6db   :  { %21238 = vmatprep.mubr.msk.bf16.mxu1 %vm27_vm1, %v32708_v25  ;;  %v8350_v14 = vld [vmem:[#allocation2 + $0x271] sm:$0xff]  ;;  %v6747_v25 = vpack.c.bf16 %v6700_v17, %v6699_v46  ;;  %v8933_v46 = vpack.c.bf16 %v8872_v57, %v8871_v0  ;;  %v8903_v57 = vld [vmem:[#allocation2 + $0x2c7] sm:$0xff] }
 0x6dc   :  { %v8354_v35 = vld [vmem:[#allocation2 + $0x2b1] sm:$0xff] }
 0x6dd   :  { %v27184_v17 = vld [vmem:[%s32075_s2 + $0x10] sm:$0x3] }
 0x6de   :  { %v8902_v0 = vld [vmem:[#allocation2 + $0x2af] sm:$0xff] }
 0x6e1   :  { %21041 = vmatmul.mubr.msk.bf16.gmra.mrb[116].mxu0 %vm27_vm1, %v32709_v44  ;;  %v8396_v44 = vpack.c.bf16 %v8348_v53, %v8347_v52  ;;  %v8873_v52 = vld [vmem:[#allocation2 + $0xa7] sm:$0xff]  ;;  %v8874_v53 = vld [vmem:[#allocation2 + $0xaf] sm:$0xff] }
 0x6e2   :  { %21044 = vmatprep.mubr.msk.bf16.mxu0 %vm27_vm1, %v32710_v5  ;;  %21239 = vmatmul.mubr.msk.bf16.gmra.mrb[52].mxu1 %vm27_vm1, %v32711_v9  ;;  %v8397_v5 = vpack.c.bf16 %v8350_v14, %v8349_v59  ;;  %v6703_v9 = vld [vmem:[#allocation2 + $0x289] sm:$0xff] }
 0x6e3   :  { %21242 = vmatprep.mubr.msk.bf16.mxu1 %vm27_vm1, %v26887_v31  ;;  %v7862_v31 = vpack.c.bf16 %v7830_v3, %v7829_v8  ;;  %v27092_v3 = vpack.c.bf16 %v8354_v35, %v8353_v23  ;;  %v8875_v59 = vld [vmem:[#allocation2 + $0xc7] sm:$0xff]  ;;  %v8876_v14 = vld [vmem:[#allocation2 + $0xcf] sm:$0xff] }
 0x6e9   :  { %21045 = vmatmul.mubr.msk.bf16.gmra.mrb[120].mxu0 %vm27_vm1, %v32712_v6  ;;  %v6704_v6 = vld [vmem:[#allocation2 + $0x291] sm:$0xff] }
 0x6ea   :  { %21048 = vmatprep.mubr.msk.bf16.mxu0 %vm27_vm1, %v26891_v60  ;;  %21243 = vmatmul.mubr.msk.bf16.gmra.mrb[56].mxu1 %vm27_vm1, %v26889_v29  ;;  %v6691_v29 = vld [vmem:[#allocation2 + $0x189] sm:$0xff]  ;;  %v6692_v60 = vld [vmem:[#allocation2 + $0x191] sm:$0xff]  ;;  %v27089_v8 = vpack.c.bf16 %v6704_v6, %v6703_v9 }
 0x6eb   :  { %21246 = vmatprep.mubr.msk.bf16.mxu1 %vm27_vm1, %v26903_v1  ;;  %v8391_v1 = vpack.c.bf16 %v8338_v61, %v8337_v47  ;;  %v6743_v41 = vpack.c.bf16 %v6692_v60, %v6691_v29  ;;  %v8377_v47 = vld [vmem:[#allocation2 + $0x429] sm:$0xff]  ;;  %v8378_v61 = vld [vmem:[#allocation2 + $0x431] sm:$0xff] }
 0x6ec   :  { %v8379_v29 = vld [vmem:[#allocation2 + $0x449] sm:$0xff]  ;;  %v8380_v60 = vld [vmem:[#allocation2 + $0x451] sm:$0xff] }
 0x6ed   :  { %v8879_v9 = vld [vmem:[#allocation2 + $0x107] sm:$0xff]  ;;  %v8880_v6 = vld [vmem:[#allocation2 + $0x10f] sm:$0xff] }
 0x6ee   :  { %v8937_v35 = vpack.c.bf16 %v8880_v6, %v8879_v9  ;;  %v8911_v9 = vld [vmem:[#allocation2 + $0x347] sm:$0xff]  ;;  %v8912_v6 = vld [vmem:[#allocation2 + $0x34f] sm:$0xff] }
 0x6f1   :  { %21049 = vmatmul.mubr.msk.bf16.gmra.mrb[124].mxu0 %vm27_vm1, %v26895_v63  ;;  %v6741_v63 = vpack.c.bf16 %v6688_v50, %v6687_v13  ;;  %v6727_v13 = vld [vmem:[#allocation2 + $0x409] sm:$0xff]  ;;  %v6728_v50 = vld [vmem:[#allocation2 + $0x411] sm:$0xff] }
 0x6f2   :  { %21247 = vmatmul.mubr.msk.bf16.gmra.mrb[60].mxu1 %vm27_vm1, %v7862_v31  ;;  %21054 = vmatprep.mubr.msk.bf16.mxu0 %vm27_vm1, %v6731_v26  ;;  %v8357_v26 = vld [vmem:[#allocation2 + $0x2e9] sm:$0xff]  ;;  %v8358_v31 = vld [vmem:[#allocation2 + $0x2f1] sm:$0xff] }
 0x6f3   :  { %21252 = vmatprep.mubr.msk.bf16.mxu1 %vm27_vm1, %v8381_v18  ;;  %v27104_v45 = vpack.c.bf16 %v8358_v31, %v8357_v26  ;;  %v8883_v26 = vld [vmem:[#allocation2 + $0x147] sm:$0xff]  ;;  %v8884_v31 = vld [vmem:[#allocation2 + $0x14f] sm:$0xff] }
 0x6f9   :  { %21055 = vmatmul.mubr.msk.bf16.vlgmr.msra.gmra.mrb[64].mxu0 %vm27_vm1, %v8381_v18  ;;  %v27100_v18 = vpack.c.bf16 %v6708_v39, %v6707_v42  ;;  %v8881_v42 = vld [vmem:[#allocation2 + $0x127] sm:$0xff]  ;;  %v8882_v39 = vld [vmem:[#allocation2 + $0x12f] sm:$0xff] }
 0x6fa   :  { %21058 = vmatprep.mubr.msk.bf16.mxu0 %vm27_vm1, %v6733_v4  ;;  %21253 = vmatmul.mubr.msk.bf16.vlgmr.msra.gmra.mrb[0].mxu1 %vm27_vm1, %v6733_v4  ;;  %v8362_v4 = vld [vmem:[#allocation2 + $0x331] sm:$0xff] }
 0x6fb   :  { %21317 = vmatpush3.bf16.msra.mxu1 %v9062_v16  ;;  %21256 = vmatprep.mubr.msk.bf16.mxu1 %vm27_vm1, %v8383_v56  ;;  %v27112_v16 = vpack.c.bf16 %v6712_v32, %v6711_v19  ;;  %v8938_v19 = vpack.c.bf16 %v8882_v39, %v8881_v42  ;;  %v8939_v32 = vpack.c.bf16 %v8884_v31, %v8883_v26  ;;  %v8913_v26 = vld [vmem:[#allocation2 + $0x367] sm:$0xff]  ;;  %v8914_v31 = vld [vmem:[#allocation2 + $0x36f] sm:$0xff] }
 0x6fc   :  { %23986 = vmatprep.subr.msk.bf16.mxu1 %vm537_vm0, %v27054_v11 }
 0x701   :  { %21059 = vmatmul.mubr.msk.bf16.gmra.mrb[68].mxu0 %vm27_vm1, %v8383_v56  ;;  %v27116_v56 = vpack.c.bf16 %v8362_v4, %v8361_v27  ;;  %v8885_v27 = vld [vmem:[#allocation2 + $0x167] sm:$0xff]  ;;  %v8886_v4 = vld [vmem:[#allocation2 + $0x16f] sm:$0xff] }
 0x702   :  { %21062 = vmatprep.mubr.msk.bf16.mxu0 %vm27_vm1, %v6735_v15  ;;  %21257 = vmatmul.mubr.msk.bf16.gmra.mrb[4].mxu1 %vm27_vm1, %v6735_v15  ;;  %v27124_v15 = vpack.c.bf16 %v6716_v2, %v6715_v48  ;;  %v8887_v48 = vld [vmem:[#allocation2 + $0x187] sm:$0xff]  ;;  %v8888_v2 = vld [vmem:[#allocation2 + $0x18f] sm:$0xff] }
 0x703   :  { %21260 = vmatprep.mubr.msk.bf16.mxu1 %vm27_vm1, %v8385_v28 }
 0x709   :  { %21063 = vmatmul.mubr.msk.bf16.gmra.mrb[72].mxu0 %vm27_vm1, %v8385_v28  ;;  %v27128_v28 = vpack.c.bf16 %v8366_v10, %v8365_v38  ;;  %v8940_v38 = vpack.c.bf16 %v8886_v4, %v8885_v27  ;;  %v8941_v10 = vpack.c.bf16 %v8888_v2, %v8887_v48  ;;  %v8916_v27 = vld [vmem:[#allocation2 + $0x38f] sm:$0xff]  ;;  %v8954_v48 = vpack.c.bf16 %v8914_v31, %v8913_v26 }
 0x70a   :  { %21066 = vmatprep.mubr.msk.bf16.mxu0 %vm27_vm1, %v6737_v55  ;;  %21261 = vmatmul.mubr.msk.bf16.gmra.mrb[8].mxu1 %vm27_vm1, %v6737_v55  ;;  %v27136_v55 = vpack.c.bf16 %v6720_v43, %v6719_v37  ;;  %v8889_v37 = vld [vmem:[#allocation2 + $0x1a7] sm:$0xff]  ;;  %v8890_v43 = vld [vmem:[#allocation2 + $0x1af] sm:$0xff] }
 0x70b   :  { %21264 = vmatprep.mubr.msk.bf16.mxu1 %vm27_vm1, %v8387_v20 }
 0x711   :  { %21067 = vmatmul.mubr.msk.bf16.gmra.mrb[76].mxu0 %vm27_vm1, %v8387_v20  ;;  %v27140_v20 = vpack.c.bf16 %v8370_v24, %v8369_v51  ;;  %v8891_v51 = vld [vmem:[#allocation2 + $0x1c7] sm:$0xff]  ;;  %v8892_v24 = vld [vmem:[#allocation2 + $0x1cf] sm:$0xff] }
 0x712   :  { %21070 = vmatprep.mubr.msk.bf16.mxu0 %vm27_vm1, %v6739_v58  ;;  %21265 = vmatmul.mubr.msk.bf16.gmra.mrb[12].mxu1 %vm27_vm1, %v6739_v58  ;;  %v27148_v58 = vpack.c.bf16 %v6724_v12, %v6723_v30  ;;  %v8942_v30 = vpack.c.bf16 %v8890_v43, %v8889_v37  ;;  %v8943_v12 = vpack.c.bf16 %v8892_v24, %v8891_v51  ;;  %v8917_v37 = vld [vmem:[#allocation2 + $0x3a7] sm:$0xff]  ;;  %v8918_v43 = vld [vmem:[#allocation2 + $0x3af] sm:$0xff] }
 0x713   :  { %21268 = vmatprep.mubr.msk.bf16.mxu1 %vm27_vm1, %v8389_v33  ;;  %v8919_v24 = vld [vmem:[#allocation2 + $0x3c7] sm:$0xff] }
 0x719   :  { %21071 = vmatmul.mubr.msk.bf16.gmra.mrb[80].mxu0 %vm27_vm1, %v8389_v33  ;;  %v27152_v33 = vpack.c.bf16 %v8374_v21, %v8373_v34  ;;  %v8893_v34 = vld [vmem:[#allocation2 + $0x1e7] sm:$0xff]  ;;  %v8894_v21 = vld [vmem:[#allocation2 + $0x1ef] sm:$0xff] }
 0x71a   :  { %21074 = vmatprep.mubr.msk.bf16.mxu0 %vm27_vm1, %v6741_v63  ;;  %21269 = vmatmul.mubr.msk.bf16.gmra.mrb[16].mxu1 %vm27_vm1, %v6741_v63  ;;  %v27160_v63 = vpack.c.bf16 %v6728_v50, %v6727_v13  ;;  %v8895_v13 = vld [vmem:[#allocation2 + $0x207] sm:$0xff]  ;;  %v8896_v50 = vld [vmem:[#allocation2 + $0x20f] sm:$0xff] }
 0x71b   :  { %21272 = vmatprep.mubr.msk.bf16.mxu1 %vm27_vm1, %v8391_v1 }
 0x721   :  { %21075 = vmatmul.mubr.msk.bf16.gmra.mrb[84].mxu0 %vm27_vm1, %v8391_v1  ;;  %v27164_v1 = vpack.c.bf16 %v8378_v61, %v8377_v47  ;;  %v8944_v47 = vpack.c.bf16 %v8894_v21, %v8893_v34  ;;  %v8945_v61 = vpack.c.bf16 %v8896_v50, %v8895_v13  ;;  %v8956_v34 = vpack.c.bf16 %v8918_v43, %v8917_v37  ;;  %v9421_v43 = vld [vmem:[#allocation2 + $0x88] sm:$0xff] }
 0x722   :  { %21078 = vmatprep.mubr.msk.bf16.mxu0 %vm27_vm1, %v6743_v41  ;;  %21273 = vmatmul.mubr.msk.bf16.gmra.mrb[20].mxu1 %vm27_vm1, %v6743_v41  ;;  %v27172_v41 = vpack.c.bf16 %v8380_v60, %v8379_v29  ;;  %v8897_v29 = vld [vmem:[#allocation2 + $0x227] sm:$0xff]  ;;  %v8898_v60 = vld [vmem:[#allocation2 + $0x22f] sm:$0xff] }
 0x723   :  { %21276 = vmatprep.mubr.msk.bf16.mxu1 %vm27_vm1, %v8393_v49 }
 0x729   :  { %21079 = vmatmul.mubr.msk.bf16.gmra.mrb[88].mxu0 %vm27_vm1, %v8393_v49  ;;  %v8931_v49 = vpack.c.bf16 %v8868_v36, %v8867_v54  ;;  %v8946_v54 = vpack.c.bf16 %v8898_v60, %v8897_v29  ;;  %v8899_v36 = vld [vmem:[#allocation2 + $0x287] sm:$0xff] }
 0x72a   :  { %21082 = vmatprep.mubr.msk.bf16.mxu0 %vm27_vm1, %v6745_v40  ;;  %21277 = vmatmul.mubr.msk.bf16.gmra.mrb[24].mxu1 %vm27_vm1, %v6745_v40  ;;  %v8932_v40 = vpack.c.bf16 %v8870_v22, %v8869_v7  ;;  %v8901_v22 = vld [vmem:[#allocation2 + $0x2a7] sm:$0xff] }
 0x72b   :  { %21280 = vmatprep.mubr.msk.bf16.mxu1 %vm27_vm1, %v8395_v62  ;;  %v8923_v60 = vld [vmem:[#allocation2 + $0x407] sm:$0xff] }
 0x731   :  { %21083 = vmatmul.mubr.msk.bf16.gmra.mrb[92].mxu0 %vm27_vm1, %v8395_v62  ;;  %v9612_v62 = vsel %vm537_vm0, %v27054_v11, 0  ;;  %v8935_v11 = vpack.c.bf16 %v8876_v14, %v8875_v59  ;;  %v8907_v59 = vld [vmem:[#allocation2 + $0x307] sm:$0xff]  ;;  %v8908_v14 = vld [vmem:[#allocation2 + $0x30f] sm:$0xff] }
 0x732   :  { %21281 = vmatmul.mubr.msk.bf16.gmra.mrb[28].mxu1 %vm27_vm1, %v8396_v44  ;;  %21086 = vmatprep.mubr.msk.bf16.mxu0 %vm27_vm1, %v6747_v25  ;;  %v8934_v25 = vpack.c.bf16 %v8874_v53, %v8873_v52  ;;  %v8877_v44 = vld [vmem:[#allocation2 + $0xe7] sm:$0xff]  ;;  %v8906_v53 = vld [vmem:[#allocation2 + $0x2ef] sm:$0xff] }
 0x733   :  { %21284 = vmatprep.mubr.msk.bf16.mxu1 %vm27_vm1, %v8397_v5  ;;  %v8905_v52 = vld [vmem:[#allocation2 + $0x2e7] sm:$0xff] }
 0x739   :  { %21087 = vmatmul.mubr.msk.bf16.gmra.mrb[96].mxu0 %vm27_vm1, %v8397_v5  ;;  %v8878_v5 = vld [vmem:[#allocation2 + $0xef] sm:$0xff] }
 0x73a   :  { %21090 = vmatprep.mubr.msk.bf16.mxu0 %vm27_vm1, %v27089_v8  ;;  %21285 = vmatmul.mubr.msk.bf16.gmra.mrb[32].mxu1 %vm27_vm1, %v27089_v8  ;;  %v8936_v23 = vpack.c.bf16 %v8878_v5, %v8877_v44  ;;  %v8909_v44 = vld [vmem:[#allocation2 + $0x327] sm:$0xff]  ;;  %v8910_v5 = vld [vmem:[#allocation2 + $0x32f] sm:$0xff] }
 0x73b   :  { %21288 = vmatprep.mubr.msk.bf16.mxu1 %vm27_vm1, %v27092_v3 }
 0x741   :  { %21091 = vmatmul.mubr.msk.bf16.gmra.mrb[100].mxu0 %vm27_vm1, %v27092_v3 }
 0x742   :  { %21094 = vmatprep.mubr.msk.bf16.mxu0 %vm27_vm1, %v27100_v18  ;;  %21289 = vmatmul.mubr.msk.bf16.gmra.mrb[36].mxu1 %vm27_vm1, %v27100_v18 }
 0x743   :  { %21292 = vmatprep.mubr.msk.bf16.mxu1 %vm27_vm1, %v27104_v45 }
 0x749   :  { %21095 = vmatmul.mubr.msk.bf16.gmra.mrb[104].mxu0 %vm27_vm1, %v27104_v45 }
 0x74a   :  { %21098 = vmatprep.mubr.msk.bf16.mxu0 %vm27_vm1, %v27112_v16  ;;  %21293 = vmatmul.mubr.msk.bf16.gmra.mrb[40].mxu1 %vm27_vm1, %v27112_v16 }
 0x74b   :  { %21296 = vmatprep.mubr.msk.bf16.mxu1 %vm27_vm1, %v27116_v56 }
 0x751   :  { %21099 = vmatmul.mubr.msk.bf16.gmra.mrb[108].mxu0 %vm27_vm1, %v27116_v56 }
 0x752   :  { %21102 = vmatprep.mubr.msk.bf16.mxu0 %vm27_vm1, %v27124_v15  ;;  %21297 = vmatmul.mubr.msk.bf16.gmra.mrb[44].mxu1 %vm27_vm1, %v27124_v15 }
 0x753   :  { %21300 = vmatprep.mubr.msk.bf16.mxu1 %vm27_vm1, %v27128_v28 }
 0x759   :  { %21103 = vmatmul.mubr.msk.bf16.gmra.mrb[112].mxu0 %vm27_vm1, %v27128_v28 }
 0x75a   :  { %21106 = vmatprep.mubr.msk.bf16.mxu0 %vm27_vm1, %v27136_v55  ;;  %21301 = vmatmul.mubr.msk.bf16.gmra.mrb[48].mxu1 %vm27_vm1, %v27136_v55 }
 0x75b   :  { %21304 = vmatprep.mubr.msk.bf16.mxu1 %vm27_vm1, %v27140_v20 }
 0x761   :  { %21107 = vmatmul.mubr.msk.bf16.gmra.mrb[116].mxu0 %vm27_vm1, %v27140_v20 }
 0x762   :  { %21110 = vmatprep.mubr.msk.bf16.mxu0 %vm27_vm1, %v27148_v58  ;;  %21305 = vmatmul.mubr.msk.bf16.gmra.mrb[52].mxu1 %vm27_vm1, %v27148_v58 }
 0x763   :  { %21308 = vmatprep.mubr.msk.bf16.mxu1 %vm27_vm1, %v27152_v33 }
 0x769   :  { %21111 = vmatmul.mubr.msk.bf16.gmra.mrb[120].mxu0 %vm27_vm1, %v27152_v33 }
 0x76a   :  { %21114 = vmatprep.mubr.msk.bf16.mxu0 %vm27_vm1, %v27160_v63  ;;  %21309 = vmatmul.mubr.msk.bf16.gmra.mrb[56].mxu1 %vm27_vm1, %v27160_v63 }
 0x76b   :  { %21312 = vmatprep.mubr.msk.bf16.mxu1 %vm27_vm1, %v27164_v1 }
 0x771   :  { %21115 = vmatmul.mubr.msk.bf16.gmra.mrb[124].mxu0 %vm27_vm1, %v27164_v1 }
 0x772   :  { %21313 = vmatmul.mubr.msk.bf16.gmra.mrb[60].mxu1 %vm27_vm1, %v27172_v41 }
 0x773   :  { %21318 = vmatprep.mubr.msk.bf16.mxu1 %vm27_vm1, %v8931_v49  ;;  %v8900_v49 = vld [vmem:[#allocation2 + $0x28f] sm:$0xff] }
 0x774   :  { %v8947_v7 = vpack.c.bf16 %v8900_v49, %v8899_v36 }
 0x77a   :  { %21319 = vmatmul.mubr.msk.bf16.vlgmr.msra.gmra.mrb[0].mxu1 %vm27_vm1, %v8932_v40  ;;  %v8904_v40 = vld [vmem:[#allocation2 + $0x2cf] sm:$0xff] }
 0x77b   :  { %21383 = vmatpush3.bf16.msra.mxu1 %v9612_v62  ;;  %21322 = vmatprep.mubr.msk.bf16.mxu1 %vm27_vm1, %v8933_v46  ;;  %v8948_v62 = vpack.c.bf16 %v8902_v0, %v8901_v22  ;;  %v8949_v46 = vpack.c.bf16 %v8904_v40, %v8903_v57  ;;  %v8925_v57 = vld [vmem:[#allocation2 + $0x427] sm:$0xff]  ;;  %v8926_v40 = vld [vmem:[#allocation2 + $0x42f] sm:$0xff] }
 0x77c   :  { %23987 = vmatprep.subr.msk.bf16.mxu1 %vm537_vm0, %v27184_v17 }
 0x782   :  { %21323 = vmatmul.mubr.msk.bf16.gmra.mrb[4].mxu1 %vm27_vm1, %v8934_v25  ;;  %v8950_v25 = vpack.c.bf16 %v8906_v53, %v8905_v52  ;;  %v8928_v52 = vld [vmem:[#allocation2 + $0x44f] sm:$0xff] }
 0x783   :  { %21326 = vmatprep.mubr.msk.bf16.mxu1 %vm27_vm1, %v8935_v11  ;;  %v8951_v11 = vpack.c.bf16 %v8908_v14, %v8907_v59  ;;  %v8960_v59 = vpack.c.bf16 %v8926_v40, %v8925_v57  ;;  %v9425_v57 = vld [vmem:[#allocation2 + $0xc8] sm:$0xff]  ;;  %v9426_v40 = vld [vmem:[#allocation2 + $0xd0] sm:$0xff] }
 0x78a   :  { %21327 = vmatmul.mubr.msk.bf16.gmra.mrb[8].mxu1 %vm27_vm1, %v8936_v23  ;;  %v8952_v23 = vpack.c.bf16 %v8910_v5, %v8909_v44 }
 0x78b   :  { %21330 = vmatprep.mubr.msk.bf16.mxu1 %vm27_vm1, %v8937_v35  ;;  %v8953_v35 = vpack.c.bf16 %v8912_v6, %v8911_v9 }
 0x792   :  { %21331 = vmatmul.mubr.msk.bf16.gmra.mrb[12].mxu1 %vm27_vm1, %v8938_v19 }
 0x793   :  { %21334 = vmatprep.mubr.msk.bf16.mxu1 %vm27_vm1, %v8939_v32  ;;  %v8915_v32 = vld [vmem:[#allocation2 + $0x387] sm:$0xff] }
 0x794   :  { %v8955_v2 = vpack.c.bf16 %v8916_v27, %v8915_v32 }
 0x79a   :  { %21335 = vmatmul.mubr.msk.bf16.gmra.mrb[16].mxu1 %vm27_vm1, %v8940_v38 }
 0x79b   :  { %21338 = vmatprep.mubr.msk.bf16.mxu1 %vm27_vm1, %v8941_v10 }
 0x7a2   :  { %21339 = vmatmul.mubr.msk.bf16.gmra.mrb[20].mxu1 %vm27_vm1, %v8942_v30  ;;  %v8920_v30 = vld [vmem:[#allocation2 + $0x3cf] sm:$0xff] }
 0x7a3   :  { %21342 = vmatprep.mubr.msk.bf16.mxu1 %vm27_vm1, %v8943_v12  ;;  %v8957_v21 = vpack.c.bf16 %v8920_v30, %v8919_v24  ;;  %v9422_v24 = vld [vmem:[#allocation2 + $0x90] sm:$0xff] }
 0x7aa   :  { %21343 = vmatmul.mubr.msk.bf16.gmra.mrb[24].mxu1 %vm27_vm1, %v8944_v47  ;;  %v8921_v47 = vld [vmem:[#allocation2 + $0x3e7] sm:$0xff] }
 0x7ab   :  { %21346 = vmatprep.mubr.msk.bf16.mxu1 %vm27_vm1, %v8945_v61  ;;  %v8922_v61 = vld [vmem:[#allocation2 + $0x3ef] sm:$0xff] }
 0x7ac   :  { %v8958_v49 = vpack.c.bf16 %v8922_v61, %v8921_v47  ;;  %v9483_v47 = vpack.c.bf16 %v9422_v24, %v9421_v43 }
 0x7b2   :  { %21347 = vmatmul.mubr.msk.bf16.gmra.mrb[28].mxu1 %vm27_vm1, %v8946_v54  ;;  %v8924_v54 = vld [vmem:[#allocation2 + $0x40f] sm:$0xff] }
 0x7b3   :  { %21350 = vmatprep.mubr.msk.bf16.mxu1 %vm27_vm1, %v8947_v7  ;;  %v8959_v7 = vpack.c.bf16 %v8924_v54, %v8923_v60  ;;  %v9423_v54 = vld [vmem:[#allocation2 + $0xa8] sm:$0xff] }
 0x7ba   :  { %21351 = vmatmul.mubr.msk.bf16.gmra.mrb[32].mxu1 %vm27_vm1, %v8948_v62 }
 0x7bb   :  { %21354 = vmatprep.mubr.msk.bf16.mxu1 %vm27_vm1, %v8949_v46  ;;  %v8927_v46 = vld [vmem:[#allocation2 + $0x447] sm:$0xff] }
 0x7bc   :  { %v8961_v14 = vpack.c.bf16 %v8928_v52, %v8927_v46 }
 0x7c2   :  { %21355 = vmatmul.mubr.msk.bf16.gmra.mrb[36].mxu1 %vm27_vm1, %v8950_v25  ;;  %v8929_v25 = vld [vmem:[#allocation2 + $0x467] sm:$0xff] }
 0x7c3   :  { %21358 = vmatprep.mubr.msk.bf16.mxu1 %vm27_vm1, %v8951_v11  ;;  %v8930_v11 = vld [vmem:[#allocation2 + $0x46f] sm:$0xff] }
 0x7c4   :  { %v8962_v6 = vpack.c.bf16 %v8930_v11, %v8929_v25  ;;  %v9427_v25 = vld [vmem:[#allocation2 + $0xe8] sm:$0xff]  ;;  %v9428_v11 = vld [vmem:[#allocation2 + $0xf0] sm:$0xff] }
 0x7ca   :  { %21359 = vmatmul.mubr.msk.bf16.gmra.mrb[40].mxu1 %vm27_vm1, %v8952_v23  ;;  %v9417_v23 = vld [vmem:[#allocation2 + $0x48] sm:$0xff] }
 0x7cb   :  { %21362 = vmatprep.mubr.msk.bf16.mxu1 %vm27_vm1, %v8953_v35  ;;  %v9418_v35 = vld [vmem:[#allocation2 + $0x50] sm:$0xff] }
 0x7cc   :  { %v27210_v42 = vpop.f32.mrb[64].mxu0  ;;  %v9481_v31 = vpack.c.bf16 %v9418_v35, %v9417_v23  ;;  %v9429_v23 = vld [vmem:[#allocation2 + $0x108] sm:$0xff]  ;;  %v9430_v35 = vld [vmem:[#allocation2 + $0x110] sm:$0xff] }
 0x7cd   :  { %v27212_v39 = vpop.f32.mrb[65].mxu0 }
 0x7ce   :  { %v27214_v19 = vpop.f32.mrb[66].mxu0 }
 0x7cf   :  { %v27216_v4 = vpop.f32.mrb[67].mxu0 }
 0x7d2   :  { %21363 = vmatmul.mubr.msk.bf16.gmra.mrb[44].mxu1 %vm27_vm1, %v8954_v48  ;;  %v9419_v48 = vld [vmem:[#allocation2 + $0x68] sm:$0xff] }
 0x7d3   :  { %21366 = vmatprep.mubr.msk.bf16.mxu1 %vm27_vm1, %v8955_v2  ;;  %v9420_v2 = vld [vmem:[#allocation2 + $0x70] sm:$0xff] }
 0x7d4   :  { %v27220_v38 = vpop.f32.mrb[68].mxu0 }
 0x7d5   :  { %v27222_v10 = vpop.f32.mrb[69].mxu0 }
 0x7d6   :  { %v27224_v51 = vpop.f32.mrb[70].mxu0 }
 0x7d7   :  { %v27226_v12 = vpop.f32.mrb[71].mxu0 }
 0x7da   :  { %21367 = vmatmul.mubr.msk.bf16.gmra.mrb[48].mxu1 %vm27_vm1, %v8956_v34  ;;  %v9482_v34 = vpack.c.bf16 %v9420_v2, %v9419_v48  ;;  %v9486_v48 = vpack.c.bf16 %v9428_v11, %v9427_v25  ;;  %v9487_v2 = vpack.c.bf16 %v9430_v35, %v9429_v23  ;;  %v9435_v11 = vld [vmem:[#allocation2 + $0x168] sm:$0xff]  ;;  %v9436_v23 = vld [vmem:[#allocation2 + $0x170] sm:$0xff] }
 0x7db   :  { %21370 = vmatprep.mubr.msk.bf16.mxu1 %vm27_vm1, %v8957_v21  ;;  %v10162_v21 = vsel %vm537_vm0, %v27184_v17, 0  ;;  %v9485_v17 = vpack.c.bf16 %v9426_v40, %v9425_v57 }
 0x7dc   :  { %v27230_v13 = vpop.f32.mrb[72].mxu0 }
 0x7dd   :  { %v27232_v50 = vpop.f32.mrb[73].mxu0 }
 0x7de   :  { %v27234_v29 = vpop.f32.mrb[74].mxu0 }
 0x7df   :  { %v27236_v36 = vpop.f32.mrb[75].mxu0 }
 0x7e2   :  { %21371 = vmatmul.mubr.msk.bf16.gmra.mrb[52].mxu1 %vm27_vm1, %v8958_v49  ;;  %v9424_v49 = vld [vmem:[#allocation2 + $0xb0] sm:$0xff] }
 0x7e3   :  { %21374 = vmatprep.mubr.msk.bf16.mxu1 %vm27_vm1, %v8959_v7  ;;  %v9484_v52 = vpack.c.bf16 %v9424_v49, %v9423_v54  ;;  %v9433_v54 = vld [vmem:[#allocation2 + $0x148] sm:$0xff]  ;;  %v9434_v49 = vld [vmem:[#allocation2 + $0x150] sm:$0xff] }
 0x7e4   :  { %v27240_v22 = vpop.f32.mrb[76].mxu0 }
 0x7e5   :  { %v27242_v0 = vpop.f32.mrb[77].mxu0 }
 0x7e6   :  { %v27244_v62 = vpop.f32.mrb[78].mxu0 }
 0x7e7   :  { %v27246_v53 = vpop.f32.mrb[79].mxu0 }
 0x7ea   :  { %21375 = vmatmul.mubr.msk.bf16.gmra.mrb[56].mxu1 %vm27_vm1, %v8960_v59 }
 0x7eb   :  { %21378 = vmatprep.mubr.msk.bf16.mxu1 %vm27_vm1, %v8961_v14 }
 0x7ec   :  { %v27250_v44 = vpop.f32.mrb[80].mxu0 }
 0x7ed   :  { %v27252_v5 = vpop.f32.mrb[81].mxu0 }
 0x7ee   :  { %v27254_v9 = vpop.f32.mrb[82].mxu0 }
 0x7ef   :  { %v27256_v26 = vpop.f32.mrb[83].mxu0 }
 0x7f2   :  { %21379 = vmatmul.mubr.msk.bf16.gmra.mrb[60].mxu1 %vm27_vm1, %v8962_v6 }
 0x7f3   :  { %21384 = vmatprep.mubr.msk.bf16.mxu1 %vm27_vm1, %v9481_v31 }
 0x7f4   :  { %v27260_v32 = vpop.f32.mrb[84].mxu0 }
 0x7f5   :  { %v27262_v27 = vpop.f32.mrb[85].mxu0 }
 0x7f6   :  { %v27264_v37 = vpop.f32.mrb[86].mxu0 }
 0x7f7   :  { %v27266_v30 = vpop.f32.mrb[87].mxu0 }
 0x7fa   :  { %21385 = vmatmul.mubr.msk.bf16.vlgmr.msra.gmra.mrb[0].mxu1 %vm27_vm1, %v9482_v34  ;;  %v9431_v34 = vld [vmem:[#allocation2 + $0x128] sm:$0xff] }
 0x7fb   :  { %21449 = vmatpush3.bf16.msra.mxu1 %v10162_v21  ;;  %21388 = vmatprep.mubr.msk.bf16.mxu1 %vm27_vm1, %v9483_v47  ;;  %v9432_v21 = vld [vmem:[#allocation2 + $0x130] sm:$0xff] }
 0x7fc   :  { %v27272_v61 = vpop.f32.mrb[88].mxu0  ;;  %v9488_v40 = vpack.c.bf16 %v9432_v21, %v9431_v34 }
 0x7fd   :  { %v27274_v60 = vpop.f32.mrb[89].mxu0 }
 0x7fe   :  { %v27276_v7 = vpop.f32.mrb[90].mxu0 }
 0x7ff   :  { %v27278_v46 = vpop.f32.mrb[91].mxu0 }
 0x802   :  { %21389 = vmatmul.mubr.msk.bf16.gmra.mrb[4].mxu1 %vm27_vm1, %v9484_v52  ;;  %v9489_v52 = vpack.c.bf16 %v9434_v49, %v9433_v54  ;;  %v9439_v54 = vld [vmem:[#allocation2 + $0x1a8] sm:$0xff]  ;;  %v9440_v49 = vld [vmem:[#allocation2 + $0x1b0] sm:$0xff] }
 0x803   :  { %21392 = vmatprep.mubr.msk.bf16.mxu1 %vm27_vm1, %v9485_v17 }
 0x804   :  { %v27282_v59 = vpop.f32.mrb[92].mxu0 }
 0x805   :  { %v27284_v14 = vpop.f32.mrb[93].mxu0 }
 0x806   :  { %v27286_v6 = vpop.f32.mrb[94].mxu0 }
 0x807   :  { %v27288_v31 = vpop.f32.mrb[95].mxu0 }
 0x80a   :  { %21393 = vmatmul.mubr.msk.bf16.gmra.mrb[8].mxu1 %vm27_vm1, %v9486_v48  ;;  %v9437_v48 = vld [vmem:[#allocation2 + $0x188] sm:$0xff] }
 0x80b   :  { %21396 = vmatprep.mubr.msk.bf16.mxu1 %vm27_vm1, %v9487_v2  ;;  %v9438_v2 = vld [vmem:[#allocation2 + $0x190] sm:$0xff] }
 0x80c   :  { %v27292_v43 = vpop.f32.mrb[96].mxu0 }
 0x80d   :  { %v27294_v24 = vpop.f32.mrb[97].mxu0 }
 0x80e   :  { %32713 = vst [vmem:[#allocation5_spill] sm:$0xff] %v27294_v24  ;;  %v27296_v47 = vpop.f32.mrb[98].mxu0  ;;  %v9490_v24 = vpack.c.bf16 %v9436_v23, %v9435_v11  ;;  %v9443_v11 = vld [vmem:[#allocation2 + $0x1e8] sm:$0xff]  ;;  %v9444_v23 = vld [vmem:[#allocation2 + $0x1f0] sm:$0xff] }
 0x80f   :  { %32714 = vst [vmem:[#allocation37_spill] sm:$0xff] %v27296_v47  ;;  %v27298_v57 = vpop.f32.mrb[99].mxu0 }
 0x810   :  { %32715 = vst [vmem:[#allocation36_spill] sm:$0xff] %v27298_v57  ;;  %v9491_v57 = vpack.c.bf16 %v9438_v2, %v9437_v48  ;;  %v9445_v2 = vld [vmem:[#allocation2 + $0x208] sm:$0xff] }
 0x812   :  { %21397 = vmatmul.mubr.msk.bf16.gmra.mrb[12].mxu1 %vm27_vm1, %v9488_v40 }
 0x813   :  { %21400 = vmatprep.mubr.msk.bf16.mxu1 %vm27_vm1, %v9489_v52  ;;  %v9441_v52 = vld [vmem:[#allocation2 + $0x1c8] sm:$0xff] }
 0x814   :  { %v27302_v17 = vpop.f32.mrb[100].mxu0 }
 0x815   :  { %32716 = vst [vmem:[#allocation39_spill] sm:$0xff] %v27302_v17  ;;  %v27304_v25 = vpop.f32.mrb[101].mxu0  ;;  %v9492_v17 = vpack.c.bf16 %v9440_v49, %v9439_v54 }
 0x816   :  { %32717 = vst [vmem:[#allocation38_spill] sm:$0xff] %v27304_v25  ;;  %v27306_v35 = vpop.f32.mrb[102].mxu0 }
 0x817   :  { %32718 = vst [vmem:[#allocation40_spill] sm:$0xff] %v27306_v35  ;;  %v27308_v47 = vpop.f32.mrb[103].mxu0  ;;  %v9442_v35 = vld [vmem:[#allocation2 + $0x1d0] sm:$0xff] }
 0x818   :  { %32719 = vst [vmem:[#allocation41_spill] sm:$0xff] %v27308_v47  ;;  %v9493_v47 = vpack.c.bf16 %v9442_v35, %v9441_v52 }
 0x81a   :  { %21401 = vmatmul.mubr.msk.bf16.gmra.mrb[16].mxu1 %vm27_vm1, %v9490_v24 }
 0x81b   :  { %21404 = vmatprep.mubr.msk.bf16.mxu1 %vm27_vm1, %v9491_v57 }
 0x81c   :  { %v27312_v34 = vpop.f32.mrb[104].mxu0 }
 0x81d   :  { %32720 = vst [vmem:[#allocation42_spill] sm:$0xff] %v27312_v34  ;;  %v27314_v21 = vpop.f32.mrb[105].mxu0  ;;  %v9494_v34 = vpack.c.bf16 %v9444_v23, %v9443_v11  ;;  %v9452_v11 = vld [vmem:[#allocation2 + $0x2b0] sm:$0xff] }
 0x81e   :  { %32721 = vst [vmem:[#allocation43_spill] sm:$0xff] %v27314_v21  ;;  %v27316_v40 = vpop.f32.mrb[106].mxu0 }
 0x81f   :  { %32722 = vst [vmem:[#allocation44_spill] sm:$0xff] %v27316_v40  ;;  %v27318_v25 = vpop.f32.mrb[107].mxu0  ;;  %v9446_v40 = vld [vmem:[#allocation2 + $0x210] sm:$0xff] }
 0x820   :  { %32723 = vst [vmem:[#allocation45_spill] sm:$0xff] %v27318_v25  ;;  %v9495_v25 = vpack.c.bf16 %v9446_v40, %v9445_v2  ;;  %v9451_v40 = vld [vmem:[#allocation2 + $0x2a8] sm:$0xff] }
 0x821   :  { %v9453_v2 = vld [vmem:[#allocation2 + $0x2c8] sm:$0xff] }
 0x822   :  { %21405 = vmatmul.mubr.msk.bf16.gmra.mrb[20].mxu1 %vm27_vm1, %v9492_v17  ;;  %v9447_v17 = vld [vmem:[#allocation2 + $0x228] sm:$0xff] }
 0x823   :  { %21408 = vmatprep.mubr.msk.bf16.mxu1 %vm27_vm1, %v9493_v47  ;;  %v9448_v47 = vld [vmem:[#allocation2 + $0x230] sm:$0xff] }
 0x824   :  { %v27322_v24 = vpop.f32.mrb[108].mxu0  ;;  %v9496_v52 = vpack.c.bf16 %v9448_v47, %v9447_v17  ;;  %v9498_v47 = vpack.c.bf16 %v9452_v11, %v9451_v40  ;;  %v9459_v40 = vld [vmem:[#allocation2 + $0x328] sm:$0xff]  ;;  %v9460_v11 = vld [vmem:[#allocation2 + $0x330] sm:$0xff] }
 0x825   :  { %32724 = vst [vmem:[#allocation46_spill] sm:$0xff] %v27322_v24  ;;  %v27324_v57 = vpop.f32.mrb[109].mxu0 }
 0x826   :  { %32725 = vst [vmem:[#allocation47_spill] sm:$0xff] %v27324_v57  ;;  %v27326_v48 = vpop.f32.mrb[110].mxu0  ;;  %v9450_v57 = vld [vmem:[#allocation2 + $0x290] sm:$0xff] }
 0x827   :  { %32726 = vst [vmem:[#allocation48_spill] sm:$0xff] %v27326_v48  ;;  %v27328_v21 = vpop.f32.mrb[111].mxu0  ;;  %v9449_v48 = vld [vmem:[#allocation2 + $0x288] sm:$0xff] }
 0x828   :  { %32727 = vst [vmem:[#allocation49_spill] sm:$0xff] %v27328_v21  ;;  %v9497_v21 = vpack.c.bf16 %v9450_v57, %v9449_v48  ;;  %v9455_v48 = vld [vmem:[#allocation2 + $0x2e8] sm:$0xff] }
 0x82a   :  { %21409 = vmatmul.mubr.msk.bf16.gmra.mrb[24].mxu1 %vm27_vm1, %v9494_v34 }
 0x82b   :  { %21412 = vmatprep.mubr.msk.bf16.mxu1 %vm27_vm1, %v9495_v25 }
 0x82c   :  { %v27332_v35 = vpop.f32.mrb[112].mxu0 }
 0x82d   :  { %32728 = vst [vmem:[#allocation50_spill] sm:$0xff] %v27332_v35  ;;  %v27334_v54 = vpop.f32.mrb[113].mxu0 }
 0x82e   :  { %32729 = vst [vmem:[#allocation51_spill] sm:$0xff] %v27334_v54  ;;  %v27336_v49 = vpop.f32.mrb[114].mxu0 }
 0x82f   :  { %32730 = vst [vmem:[#allocation52_spill] sm:$0xff] %v27336_v49  ;;  %v27338_v24 = vpop.f32.mrb[115].mxu0  ;;  %v9454_v49 = vld [vmem:[#allocation2 + $0x2d0] sm:$0xff] }
 0x830   :  { %32731 = vst [vmem:[#allocation53_spill] sm:$0xff] %v27338_v24  ;;  %v9499_v54 = vpack.c.bf16 %v9454_v49, %v9453_v2 }
 0x832   :  { %21413 = vmatmul.mubr.msk.bf16.gmra.mrb[28].mxu1 %vm27_vm1, %v9496_v52  ;;  %v9456_v52 = vld [vmem:[#allocation2 + $0x2f0] sm:$0xff] }
 0x833   :  { %21416 = vmatprep.mubr.msk.bf16.mxu1 %vm27_vm1, %v9497_v21  ;;  %v9500_v35 = vpack.c.bf16 %v9456_v52, %v9455_v48 }
 0x834   :  { %v27342_v34 = vpop.f32.mrb[116].mxu0 }
 0x835   :  { %32732 = vst [vmem:[#allocation54_spill] sm:$0xff] %v27342_v34  ;;  %v27344_v25 = vpop.f32.mrb[117].mxu0  ;;  %v9457_v34 = vld [vmem:[#allocation2 + $0x308] sm:$0xff] }
 0x836   :  { %32733 = vst [vmem:[#allocation55_spill] sm:$0xff] %v27344_v25  ;;  %v27346_v23 = vpop.f32.mrb[118].mxu0 }
 0x837   :  { %32734 = vst [vmem:[#allocation56_spill] sm:$0xff] %v27346_v23  ;;  %v27348_v17 = vpop.f32.mrb[119].mxu0  ;;  %v9458_v23 = vld [vmem:[#allocation2 + $0x310] sm:$0xff] }
 0x838   :  { %32735 = vst [vmem:[#allocation57_spill] sm:$0xff] %v27348_v17  ;;  %v9501_v17 = vpack.c.bf16 %v9458_v23, %v9457_v34  ;;  %v9464_v34 = vld [vmem:[#allocation2 + $0x370] sm:$0xff]  ;;  %v9465_v23 = vld [vmem:[#allocation2 + $0x388] sm:$0xff] }
 0x83a   :  { %21417 = vmatmul.mubr.msk.bf16.gmra.mrb[32].mxu1 %vm27_vm1, %v9498_v47  ;;  %v9461_v47 = vld [vmem:[#allocation2 + $0x348] sm:$0xff] }
 0x83b   :  { %21420 = vmatprep.mubr.msk.bf16.mxu1 %vm27_vm1, %v9499_v54 }
 0x83c   :  { %v27352_v57 = vpop.f32.mrb[120].mxu0 }
 0x83d   :  { %32736 = vst [vmem:[#allocation58_spill] sm:$0xff] %v27352_v57  ;;  %v27354_v21 = vpop.f32.mrb[121].mxu0  ;;  %v9502_v57 = vpack.c.bf16 %v9460_v11, %v9459_v40  ;;  %v9473_v11 = vld [vmem:[#allocation2 + $0x408] sm:$0xff] }
 0x83e   :  { %32737 = vst [vmem:[#allocation59_spill] sm:$0xff] %v27354_v21  ;;  %v27356_v25 = vpop.f32.mrb[122].mxu0 }
 0x83f   :  { %32738 = vst [vmem:[#allocation60_spill] sm:$0xff] %v27356_v25  ;;  %v27358_v24 = vpop.f32.mrb[123].mxu0  ;;  %v9462_v25 = vld [vmem:[#allocation2 + $0x350] sm:$0xff] }
 0x840   :  { %32739 = vst [vmem:[#allocation61_spill] sm:$0xff] %v27358_v24  ;;  %v9503_v24 = vpack.c.bf16 %v9462_v25, %v9461_v47  ;;  %v9474_v47 = vld [vmem:[#allocation2 + $0x410] sm:$0xff] }
 0x842   :  { %21421 = vmatmul.mubr.msk.bf16.gmra.mrb[36].mxu1 %vm27_vm1, %v9500_v35  ;;  %v9463_v35 = vld [vmem:[#allocation2 + $0x368] sm:$0xff] }
 0x843   :  { %21424 = vmatprep.mubr.msk.bf16.mxu1 %vm27_vm1, %v9501_v17  ;;  %v9466_v17 = vld [vmem:[#allocation2 + $0x390] sm:$0xff]  ;;  %v9504_v48 = vpack.c.bf16 %v9464_v34, %v9463_v35  ;;  %v9509_v34 = vpack.c.bf16 %v9474_v47, %v9473_v11 }
 0x844   :  { %v27362_v49 = vpop.f32.mrb[124].mxu0  ;;  %v9505_v52 = vpack.c.bf16 %v9466_v17, %v9465_v23  ;;  %v9475_v23 = vld [vmem:[#allocation2 + $0x428] sm:$0xff]  ;;  %v9476_v17 = vld [vmem:[#allocation2 + $0x430] sm:$0xff] }
 0x845   :  { %32740 = vst [vmem:[#allocation62_spill] sm:$0xff] %v27362_v49  ;;  %v27364_v54 = vpop.f32.mrb[125].mxu0  ;;  %v9469_v49 = vld [vmem:[#allocation2 + $0x3c8] sm:$0xff]  ;;  %v9970_v47 = vld [vmem:[#allocation2 + $0x71] sm:$0xff] }
 0x846   :  { %32741 = vst [vmem:[#allocation63_spill] sm:$0xff] %v27364_v54  ;;  %v27366_v2 = vpop.f32.mrb[126].mxu0  ;;  %v9468_v54 = vld [vmem:[#allocation2 + $0x3b0] sm:$0xff] }
 0x847   :  { %32742 = vst [vmem:[#allocation64_spill] sm:$0xff] %v27366_v2  ;;  %v27368_v21 = vpop.f32.mrb[127].mxu0  ;;  %v9467_v2 = vld [vmem:[#allocation2 + $0x3a8] sm:$0xff] }
 0x848   :  { %32743 = vst [vmem:[#allocation65_spill] sm:$0xff] %v27368_v21  ;;  %v9470_v21 = vld [vmem:[#allocation2 + $0x3d0] sm:$0xff]  ;;  %v9506_v40 = vpack.c.bf16 %v9468_v54, %v9467_v2  ;;  %v9510_v54 = vpack.c.bf16 %v9476_v17, %v9475_v23 }
 0x849   :  { %v9507_v25 = vpack.c.bf16 %v9470_v21, %v9469_v49  ;;  %v9479_v49 = vld [vmem:[#allocation2 + $0x468] sm:$0xff]  ;;  %v9480_v2 = vld [vmem:[#allocation2 + $0x470] sm:$0xff] }
 0x84a   :  { %21425 = vmatmul.mubr.msk.bf16.gmra.mrb[40].mxu1 %vm27_vm1, %v9502_v57  ;;  %v9472_v57 = vld [vmem:[#allocation2 + $0x3f0] sm:$0xff] }
 0x84b   :  { %21428 = vmatprep.mubr.msk.bf16.mxu1 %vm27_vm1, %v9503_v24  ;;  %v9471_v24 = vld [vmem:[#allocation2 + $0x3e8] sm:$0xff] }
 0x84c   :  { %v9508_v35 = vpack.c.bf16 %v9472_v57, %v9471_v24  ;;  %v9968_v24 = vld [vmem:[#allocation2 + $0x51] sm:$0xff]  ;;  %v9969_v11 = vld [vmem:[#allocation2 + $0x69] sm:$0xff] }
 0x84d   :  { %v10032_v23 = vpack.c.bf16 %v9970_v47, %v9969_v11 }
 0x852   :  { %21429 = vmatmul.mubr.msk.bf16.gmra.mrb[44].mxu1 %vm27_vm1, %v9504_v48  ;;  %v9477_v48 = vld [vmem:[#allocation2 + $0x448] sm:$0xff] }
 0x853   :  { %21432 = vmatprep.mubr.msk.bf16.mxu1 %vm27_vm1, %v9505_v52  ;;  %v9478_v52 = vld [vmem:[#allocation2 + $0x450] sm:$0xff] }
 0x854   :  { %v9511_v21 = vpack.c.bf16 %v9478_v52, %v9477_v48  ;;  %v9973_v48 = vld [vmem:[#allocation2 + $0xa9] sm:$0xff]  ;;  %v9974_v52 = vld [vmem:[#allocation2 + $0xb1] sm:$0xff] }
 0x85a   :  { %21433 = vmatmul.mubr.msk.bf16.gmra.mrb[48].mxu1 %vm27_vm1, %v9506_v40  ;;  %v9512_v40 = vpack.c.bf16 %v9480_v2, %v9479_v49  ;;  %v10034_v49 = vpack.c.bf16 %v9974_v52, %v9973_v48 }
 0x85b   :  { %21436 = vmatprep.mubr.msk.bf16.mxu1 %vm27_vm1, %v9507_v25  ;;  %v9967_v25 = vld [vmem:[#allocation2 + $0x49] sm:$0xff] }
 0x85c   :  { %v10031_v57 = vpack.c.bf16 %v9968_v24, %v9967_v25  ;;  %v9978_v25 = vld [vmem:[#allocation2 + $0xf1] sm:$0xff]  ;;  %v9979_v24 = vld [vmem:[#allocation2 + $0x109] sm:$0xff] }
 0x862   :  { %21437 = vmatmul.mubr.msk.bf16.gmra.mrb[52].mxu1 %vm27_vm1, %v9508_v35  ;;  %v9971_v35 = vld [vmem:[#allocation2 + $0x89] sm:$0xff] }
 0x863   :  { %21440 = vmatprep.mubr.msk.bf16.mxu1 %vm27_vm1, %v9509_v34  ;;  %v9972_v34 = vld [vmem:[#allocation2 + $0x91] sm:$0xff] }
 0x864   :  { %v10033_v17 = vpack.c.bf16 %v9972_v34, %v9971_v35  ;;  %v9981_v35 = vld [vmem:[#allocation2 + $0x129] sm:$0xff]  ;;  %v9982_v34 = vld [vmem:[#allocation2 + $0x131] sm:$0xff] }
 0x865   :  { %v10038_v48 = vpack.c.bf16 %v9982_v34, %v9981_v35 }
 0x86a   :  { %21441 = vmatmul.mubr.msk.bf16.gmra.mrb[56].mxu1 %vm27_vm1, %v9510_v54  ;;  %v9975_v54 = vld [vmem:[#allocation2 + $0xc9] sm:$0xff] }
 0x86b   :  { %21444 = vmatprep.mubr.msk.bf16.mxu1 %vm27_vm1, %v9511_v21  ;;  %v9976_v21 = vld [vmem:[#allocation2 + $0xd1] sm:$0xff] }
 0x86c   :  { %v10035_v2 = vpack.c.bf16 %v9976_v21, %v9975_v54  ;;  %v9985_v54 = vld [vmem:[#allocation2 + $0x169] sm:$0xff]  ;;  %v9986_v21 = vld [vmem:[#allocation2 + $0x171] sm:$0xff] }
 0x872   :  { %21445 = vmatmul.mubr.msk.bf16.gmra.mrb[60].mxu1 %vm27_vm1, %v9512_v40  ;;  %v9977_v40 = vld [vmem:[#allocation2 + $0xe9] sm:$0xff] }
 0x873   :  { %21450 = vmatprep.mubr.msk.bf16.mxu1 %vm27_vm1, %v10031_v57  ;;  %v9980_v57 = vld [vmem:[#allocation2 + $0x111] sm:$0xff]  ;;  %v10036_v11 = vpack.c.bf16 %v9978_v25, %v9977_v40  ;;  %v10040_v40 = vpack.c.bf16 %v9986_v21, %v9985_v54 }
 0x874   :  { %v10037_v47 = vpack.c.bf16 %v9980_v57, %v9979_v24  ;;  %v9989_v24 = vld [vmem:[#allocation2 + $0x1a9] sm:$0xff]  ;;  %v9990_v57 = vld [vmem:[#allocation2 + $0x1b1] sm:$0xff] }
 0x875   :  { %v10042_v35 = vpack.c.bf16 %v9990_v57, %v9989_v24 }
 0x87a   :  { %21451 = vmatmul.mubr.msk.bf16.vlgmr.msra.gmra.mrb[0].mxu1 %vm27_vm1, %v10032_v23  ;;  %v9983_v23 = vld [vmem:[#allocation2 + $0x149] sm:$0xff] }
 0x87b   :  { %21454 = vmatprep.mubr.msk.bf16.mxu1 %vm27_vm1, %v10033_v17  ;;  %v9984_v17 = vld [vmem:[#allocation2 + $0x151] sm:$0xff] }
 0x87c   :  { %v10039_v52 = vpack.c.bf16 %v9984_v17, %v9983_v23  ;;  %v9993_v23 = vld [vmem:[#allocation2 + $0x1e9] sm:$0xff]  ;;  %v9994_v17 = vld [vmem:[#allocation2 + $0x1f1] sm:$0xff] }
 0x87d   :  { %v10044_v54 = vpack.c.bf16 %v9994_v17, %v9993_v23 }
 0x882   :  { %21455 = vmatmul.mubr.msk.bf16.gmra.mrb[4].mxu1 %vm27_vm1, %v10034_v49  ;;  %v9987_v49 = vld [vmem:[#allocation2 + $0x189] sm:$0xff] }
 0x883   :  { %21458 = vmatprep.mubr.msk.bf16.mxu1 %vm27_vm1, %v10035_v2  ;;  %v9988_v2 = vld [vmem:[#allocation2 + $0x191] sm:$0xff] }
 0x884   :  { %v10041_v25 = vpack.c.bf16 %v9988_v2, %v9987_v49  ;;  %v9997_v49 = vld [vmem:[#allocation2 + $0x229] sm:$0xff]  ;;  %v9998_v2 = vld [vmem:[#allocation2 + $0x231] sm:$0xff] }
 0x88a   :  { %21459 = vmatmul.mubr.msk.bf16.gmra.mrb[8].mxu1 %vm27_vm1, %v10036_v11  ;;  %v9991_v11 = vld [vmem:[#allocation2 + $0x1c9] sm:$0xff] }
 0x88b   :  { %21462 = vmatprep.mubr.msk.bf16.mxu1 %vm27_vm1, %v10037_v47  ;;  %v9992_v47 = vld [vmem:[#allocation2 + $0x1d1] sm:$0xff] }
 0x88c   :  { %v10043_v34 = vpack.c.bf16 %v9992_v47, %v9991_v11 }
 0x892   :  { %21463 = vmatmul.mubr.msk.bf16.gmra.mrb[12].mxu1 %vm27_vm1, %v10038_v48  ;;  %v9995_v48 = vld [vmem:[#allocation2 + $0x209] sm:$0xff] }
 0x893   :  { %21466 = vmatprep.mubr.msk.bf16.mxu1 %vm27_vm1, %v10039_v52  ;;  %v9996_v52 = vld [vmem:[#allocation2 + $0x211] sm:$0xff] }
 0x894   :  { %v10045_v21 = vpack.c.bf16 %v9996_v52, %v9995_v48 }
 0x89a   :  { %21467 = vmatmul.mubr.msk.bf16.gmra.mrb[16].mxu1 %vm27_vm1, %v10040_v40  ;;  %v10046_v40 = vpack.c.bf16 %v9998_v2, %v9997_v49 }
 0x89b   :  { %21470 = vmatprep.mubr.msk.bf16.mxu1 %vm27_vm1, %v10041_v25 }
 0x8a2   :  { %21471 = vmatmul.mubr.msk.bf16.gmra.mrb[20].mxu1 %vm27_vm1, %v10042_v35 }
 0x8a3   :  { %21474 = vmatprep.mubr.msk.bf16.mxu1 %vm27_vm1, %v10043_v34 }
 0x8aa   :  { %21475 = vmatmul.mubr.msk.bf16.gmra.mrb[24].mxu1 %vm27_vm1, %v10044_v54 }
 0x8ab   :  { %21478 = vmatprep.mubr.msk.bf16.mxu1 %vm27_vm1, %v10045_v21 }
 0x8b2   :  { %21479 = vmatmul.mubr.msk.bf16.gmra.mrb[28].mxu1 %vm27_vm1, %v10046_v40 }
 0x8b3   :  { %21482 = vmatprep.mubr.msk.bf16.mxu1 %vm27_vm1, %v27089_v8  ;;  %v10029_v8 = vld [vmem:[#allocation2 + $0x469] sm:$0xff] }
 0x8ba   :  { %21483 = vmatmul.mubr.msk.bf16.gmra.mrb[32].mxu1 %vm27_vm1, %v27092_v3  ;;  %v10030_v3 = vld [vmem:[#allocation2 + $0x471] sm:$0xff] }
 0x8bb   :  { %21486 = vmatprep.mubr.msk.bf16.mxu1 %vm27_vm1, %v27100_v18  ;;  %v10062_v18 = vpack.c.bf16 %v10030_v3, %v10029_v8 }
 0x8c2   :  { %21487 = vmatmul.mubr.msk.bf16.gmra.mrb[36].mxu1 %vm27_vm1, %v27104_v45  ;;  %v19008_v45 = vld [vmem:[%s32076_s3 + $0x2] sm:$0x3] }
 0x8c3   :  { %21490 = vmatprep.mubr.msk.bf16.mxu1 %vm27_vm1, %v27112_v16  ;;  %23990 = vmatprep.subr.msk.bf16.mxu1 %vm537_vm0, %v19008_v45  ;;  %v12211_v16 = vsel %vm537_vm0, %v19008_v45, 0 }
 0x8c4   :  { %21647 = vmatpush3.bf16.msra.mxu1 %v12211_v16 }
 0x8ca   :  { %21491 = vmatmul.mubr.msk.bf16.gmra.mrb[40].mxu1 %vm27_vm1, %v27116_v56 }
 0x8cb   :  { %21494 = vmatprep.mubr.msk.bf16.mxu1 %vm27_vm1, %v27124_v15 }
 0x8d2   :  { %21495 = vmatmul.mubr.msk.bf16.gmra.mrb[44].mxu1 %vm27_vm1, %v27128_v28 }
 0x8d3   :  { %21498 = vmatprep.mubr.msk.bf16.mxu1 %vm27_vm1, %v27136_v55 }
 0x8da   :  { %21499 = vmatmul.mubr.msk.bf16.gmra.mrb[48].mxu1 %vm27_vm1, %v27140_v20 }
 0x8db   :  { %21502 = vmatprep.mubr.msk.bf16.mxu1 %vm27_vm1, %v27148_v58 }
 0x8e2   :  { %21503 = vmatmul.mubr.msk.bf16.gmra.mrb[52].mxu1 %vm27_vm1, %v27152_v33 }
 0x8e3   :  { %21506 = vmatprep.mubr.msk.bf16.mxu1 %vm27_vm1, %v27160_v63 }
 0x8ea   :  { %21507 = vmatmul.mubr.msk.bf16.gmra.mrb[56].mxu1 %vm27_vm1, %v27164_v1 }
 0x8eb   :  { %21510 = vmatprep.mubr.msk.bf16.mxu1 %vm27_vm1, %v27172_v41 }
 0x8f2   :  { %21511 = vmatmul.mubr.msk.bf16.gmra.mrb[60].mxu1 %vm27_vm1, %v10062_v18 }
 0x94d   :  { %v21452_v56 = vpop.f32.mrb[0].mxu1 }
 0x94e   :  { %v27434_v15 = vadd.f32 %v21452_v56, %v27210_v42  ;;  %v10198_v28 = vpop.f32.mrb[1].mxu1 }
 0x94f   :  { %v27437_v55 = vadd.f32 %v10198_v28, %v27212_v39  ;;  %v21453_v20 = vpop.f32.mrb[2].mxu1 }
 0x950   :  { %v27440_v58 = vadd.f32 %v21453_v20, %v27214_v19  ;;  %v10201_v33 = vpop.f32.mrb[3].mxu1  ;;  %v10653_v41 = vmul.f32 %v27434_v15, %v27434_v15 }
 0x951   :  { %v10651_v63 = vmul.f32 %v27437_v55, %v27437_v55  ;;  %v27445_v1 = vadd.f32 %v10201_v33, %v27216_v4  ;;  %v10517_v42 = vsel %vm27_vm1, %v27437_v55, 0.0  ;;  %v10520_v4 = vsel %vm27_vm1, %v27434_v15, 0.0 }
 0x952   :  { %v10654_v25 = vmul.f32 %v27440_v58, %v27440_v58  ;;  %v10718_v48 = vsel %vm27_vm1, %v10653_v41, 0.0  ;;  %v10522_v52 = vsel %vm27_vm1, %v27440_v58, 0.0 }
 0x953   :  { %v10518_v39 = vsel %vm27_vm1, %v27445_v1, 0.0  ;;  %v10652_v19 = vmul.f32 %v27445_v1, %v27445_v1  ;;  %v10715_v57 = vsel %vm27_vm1, %v10651_v63, 0.0 }
 0x954   :  { %v10519_v24 = vadd.f32 %v10518_v39, %v10517_v42  ;;  %v10720_v49 = vsel %vm27_vm1, %v10654_v25, 0.0 }
 0x955   :  { %v10716_v11 = vsel %vm27_vm1, %v10652_v19, 0.0  ;;  %v21456_v47 = vpop.f32.mrb[4].mxu1 }
 0x956   :  { %v10521_v35 = vadd.f32 %v10520_v4, %v10519_v24  ;;  %v10717_v34 = vadd.f32 %v10716_v11, %v10715_v57  ;;  %v27462_v23 = vadd.f32 %v21456_v47, %v27220_v38  ;;  %v10214_v17 = vpop.f32.mrb[5].mxu1 }
 0x957   :  { %v27468_v54 = vadd.f32 %v10214_v17, %v27222_v10  ;;  %v21457_v21 = vpop.f32.mrb[6].mxu1 }
 0x958   :  { %v10719_v2 = vadd.f32 %v10718_v48, %v10717_v34  ;;  %v10523_v40 = vadd.f32 %v10522_v52, %v10521_v35  ;;  %v10217_v8 = vpop.f32.mrb[7].mxu1  ;;  %v27476_v18 = vadd.f32 %v21457_v21, %v27224_v51  ;;  %v10657_v20 = vmul.f32 %v27462_v23, %v27462_v23 }
 0x959   :  { %v10524_v3 = vsel %vm27_vm1, %v27468_v54, 0.0  ;;  %v10655_v38 = vmul.f32 %v27468_v54, %v27468_v54  ;;  %v27479_v45 = vadd.f32 %v10217_v8, %v27226_v12  ;;  %v10528_v51 = vsel %vm27_vm1, %v27462_v23, 0.0 }
 0x95a   :  { %v10525_v10 = vadd.f32 %v10524_v3, %v10523_v40  ;;  %v10721_v16 = vadd.f32 %v10720_v49, %v10719_v2  ;;  %v10658_v42 = vmul.f32 %v27476_v18, %v27476_v18  ;;  %v10530_v4 = vsel %vm27_vm1, %v27476_v18, 0.0 }
 0x95b   :  { %v10722_v56 = vsel %vm27_vm1, %v10655_v38, 0.0  ;;  %v10526_v28 = vsel %vm27_vm1, %v27479_v45, 0.0  ;;  %v10656_v41 = vmul.f32 %v27479_v45, %v27479_v45  ;;  %v10726_v35 = vsel %vm27_vm1, %v10657_v20, 0.0 }
 0x95c   :  { %v10723_v33 = vadd.f32 %v10722_v56, %v10721_v16  ;;  %v10527_v63 = vadd.f32 %v10526_v28, %v10525_v10 }
 0x95d   :  { %v21460_v12 = vpop.f32.mrb[8].mxu1  ;;  %v10724_v19 = vsel %vm27_vm1, %v10656_v41, 0.0 }
 0x95e   :  { %v10529_v39 = vadd.f32 %v10528_v51, %v10527_v63  ;;  %v27494_v25 = vadd.f32 %v21460_v12, %v27230_v13  ;;  %v10230_v24 = vpop.f32.mrb[9].mxu1  ;;  %v10725_v57 = vadd.f32 %v10724_v19, %v10723_v33 }
 0x95f   :  { %v27499_v11 = vadd.f32 %v10230_v24, %v27232_v50  ;;  %v21461_v47 = vpop.f32.mrb[10].mxu1  ;;  %v10728_v50 = vsel %vm27_vm1, %v10658_v42, 0.0 }
 0x960   :  { %v10531_v34 = vadd.f32 %v10530_v4, %v10529_v39  ;;  %v27503_v17 = vadd.f32 %v21461_v47, %v27234_v29  ;;  %v10233_v48 = vpop.f32.mrb[11].mxu1  ;;  %v10727_v52 = vadd.f32 %v10726_v35, %v10725_v57  ;;  %v10661_v38 = vmul.f32 %v27494_v25, %v27494_v25 }
 0x961   :  { %v10532_v13 = vsel %vm27_vm1, %v27499_v11, 0.0  ;;  %v10659_v21 = vmul.f32 %v27499_v11, %v27499_v11  ;;  %v27510_v49 = vadd.f32 %v10233_v48, %v27236_v36  ;;  %v10536_v36 = vsel %vm27_vm1, %v27494_v25, 0.0 }
 0x962   :  { %v10533_v2 = vadd.f32 %v10532_v13, %v10531_v34  ;;  %v10729_v40 = vadd.f32 %v10728_v50, %v10727_v52  ;;  %v10662_v20 = vmul.f32 %v27503_v17, %v27503_v17  ;;  %v10538_v51 = vsel %vm27_vm1, %v27503_v17, 0.0 }
 0x963   :  { %v10730_v8 = vsel %vm27_vm1, %v10659_v21, 0.0  ;;  %v10534_v29 = vsel %vm27_vm1, %v27510_v49, 0.0  ;;  %v10660_v3 = vmul.f32 %v27510_v49, %v27510_v49  ;;  %v10734_v19 = vsel %vm27_vm1, %v10661_v38, 0.0 }
 0x964   :  { %v10535_v10 = vadd.f32 %v10534_v29, %v10533_v2  ;;  %v10731_v16 = vadd.f32 %v10730_v8, %v10729_v40 }
 0x965   :  { %v10732_v56 = vsel %vm27_vm1, %v10660_v3, 0.0  ;;  %v21464_v28 = vpop.f32.mrb[12].mxu1 }
 0x966   :  { %v10537_v33 = vadd.f32 %v10536_v36, %v10535_v10  ;;  %v27526_v63 = vadd.f32 %v21464_v28, %v27240_v22  ;;  %v10246_v41 = vpop.f32.mrb[13].mxu1  ;;  %v10733_v12 = vadd.f32 %v10732_v56, %v10731_v16 }
 0x967   :  { %v27531_v42 = vadd.f32 %v10246_v41, %v27242_v0  ;;  %v21465_v39 = vpop.f32.mrb[14].mxu1  ;;  %v10736_v0 = vsel %vm27_vm1, %v10662_v20, 0.0 }
 0x968   :  { %v10539_v24 = vadd.f32 %v10538_v51, %v10537_v33  ;;  %v27535_v4 = vadd.f32 %v21465_v39, %v27244_v62  ;;  %v10249_v57 = vpop.f32.mrb[15].mxu1  ;;  %v10735_v47 = vadd.f32 %v10734_v19, %v10733_v12  ;;  %v10665_v50 = vmul.f32 %v27526_v63, %v27526_v63 }
 0x969   :  { %v10540_v22 = vsel %vm27_vm1, %v27531_v42, 0.0  ;;  %v10663_v35 = vmul.f32 %v27531_v42, %v27531_v42  ;;  %v27542_v34 = vadd.f32 %v10249_v57, %v27246_v53  ;;  %v10544_v53 = vsel %vm27_vm1, %v27526_v63, 0.0 }
 0x96a   :  { %v10541_v48 = vadd.f32 %v10540_v22, %v10539_v24  ;;  %v10737_v52 = vadd.f32 %v10736_v0, %v10735_v47  ;;  %v10666_v3 = vmul.f32 %v27535_v4, %v27535_v4  ;;  %v10546_v16 = vsel %vm27_vm1, %v27535_v4, 0.0 }
 0x96b   :  { %v10738_v13 = vsel %vm27_vm1, %v10663_v35, 0.0  ;;  %v10542_v62 = vsel %vm27_vm1, %v27542_v34, 0.0  ;;  %v10664_v21 = vmul.f32 %v27542_v34, %v27542_v34  ;;  %v10742_v33 = vsel %vm27_vm1, %v10665_v50, 0.0 }
 0x96c   :  { %v10543_v2 = vadd.f32 %v10542_v62, %v10541_v48  ;;  %v10739_v40 = vadd.f32 %v10738_v13, %v10737_v52 }
 0x96d   :  { %v10740_v8 = vsel %vm27_vm1, %v10664_v21, 0.0  ;;  %v21468_v29 = vpop.f32.mrb[16].mxu1 }
 0x96e   :  { %v10545_v38 = vadd.f32 %v10544_v53, %v10543_v2  ;;  %v27558_v10 = vadd.f32 %v21468_v29, %v27250_v44  ;;  %v10262_v36 = vpop.f32.mrb[17].mxu1  ;;  %v10741_v56 = vadd.f32 %v10740_v8, %v10739_v40 }
 0x96f   :  { %v27563_v28 = vadd.f32 %v10262_v36, %v27252_v5  ;;  %v21469_v20 = vpop.f32.mrb[18].mxu1  ;;  %v10744_v5 = vsel %vm27_vm1, %v10666_v3, 0.0 }
 0x970   :  { %v10547_v41 = vadd.f32 %v10546_v16, %v10545_v38  ;;  %v27567_v51 = vadd.f32 %v21469_v20, %v27254_v9  ;;  %v10265_v12 = vpop.f32.mrb[19].mxu1  ;;  %v10743_v39 = vadd.f32 %v10742_v33, %v10741_v56  ;;  %v10669_v0 = vmul.f32 %v27558_v10, %v27558_v10 }
 0x971   :  { %v10548_v44 = vsel %vm27_vm1, %v27563_v28, 0.0  ;;  %v10667_v19 = vmul.f32 %v27563_v28, %v27563_v28  ;;  %v27574_v24 = vadd.f32 %v10265_v12, %v27256_v26  ;;  %v10552_v26 = vsel %vm27_vm1, %v27558_v10, 0.0 }
 0x972   :  { %v10549_v57 = vadd.f32 %v10548_v44, %v10547_v41  ;;  %v10745_v47 = vadd.f32 %v10744_v5, %v10743_v39  ;;  %v10670_v21 = vmul.f32 %v27567_v51, %v27567_v51  ;;  %v10554_v40 = vsel %vm27_vm1, %v27567_v51, 0.0 }
 0x973   :  { %v10746_v22 = vsel %vm27_vm1, %v10667_v19, 0.0  ;;  %v10550_v9 = vsel %vm27_vm1, %v27574_v24, 0.0  ;;  %v10668_v35 = vmul.f32 %v27574_v24, %v27574_v24  ;;  %v10750_v38 = vsel %vm27_vm1, %v10669_v0, 0.0 }
 0x974   :  { %v10551_v48 = vadd.f32 %v10550_v9, %v10549_v57  ;;  %v10747_v52 = vadd.f32 %v10746_v22, %v10745_v47 }
 0x975   :  { %v10748_v13 = vsel %vm27_vm1, %v10668_v35, 0.0  ;;  %v21472_v62 = vpop.f32.mrb[20].mxu1 }
 0x976   :  { %v10553_v50 = vadd.f32 %v10552_v26, %v10551_v48  ;;  %v27590_v2 = vadd.f32 %v21472_v62, %v27260_v32  ;;  %v10278_v53 = vpop.f32.mrb[21].mxu1  ;;  %v10749_v8 = vadd.f32 %v10748_v13, %v10747_v52 }
 0x977   :  { %v27595_v29 = vadd.f32 %v10278_v53, %v27262_v27  ;;  %v21473_v3 = vpop.f32.mrb[22].mxu1  ;;  %v10752_v27 = vsel %vm27_vm1, %v10670_v21, 0.0 }
 0x978   :  { %v10555_v36 = vadd.f32 %v10554_v40, %v10553_v50  ;;  %v27599_v16 = vadd.f32 %v21473_v3, %v27264_v37  ;;  %v10281_v56 = vpop.f32.mrb[23].mxu1  ;;  %v10751_v20 = vadd.f32 %v10750_v38, %v10749_v8  ;;  %v10673_v5 = vmul.f32 %v27590_v2, %v27590_v2 }
 0x979   :  { %v10556_v32 = vsel %vm27_vm1, %v27595_v29, 0.0  ;;  %v10671_v33 = vmul.f32 %v27595_v29, %v27595_v29  ;;  %v27606_v41 = vadd.f32 %v10281_v56, %v27266_v30  ;;  %v10560_v30 = vsel %vm27_vm1, %v27590_v2, 0.0 }
 0x97a   :  { %v10557_v12 = vadd.f32 %v10556_v32, %v10555_v36  ;;  %v10753_v39 = vadd.f32 %v10752_v27, %v10751_v20  ;;  %v10674_v35 = vmul.f32 %v27599_v16, %v27599_v16  ;;  %v10562_v52 = vsel %vm27_vm1, %v27599_v16, 0.0 }
 0x97b   :  { %v10754_v44 = vsel %vm27_vm1, %v10671_v33, 0.0  ;;  %v10558_v37 = vsel %vm27_vm1, %v27606_v41, 0.0  ;;  %v10672_v19 = vmul.f32 %v27606_v41, %v27606_v41  ;;  %v10758_v50 = vsel %vm27_vm1, %v10673_v5, 0.0 }
 0x97c   :  { %v10559_v57 = vadd.f32 %v10558_v37, %v10557_v12  ;;  %v10755_v47 = vadd.f32 %v10754_v44, %v10753_v39 }
 0x97d   :  { %v10756_v22 = vsel %vm27_vm1, %v10672_v19, 0.0  ;;  %v21476_v9 = vpop.f32.mrb[24].mxu1 }
 0x97e   :  { %v10561_v0 = vadd.f32 %v10560_v30, %v10559_v57  ;;  %v27622_v48 = vadd.f32 %v21476_v9, %v27272_v61  ;;  %v10294_v26 = vpop.f32.mrb[25].mxu1  ;;  %v10757_v13 = vadd.f32 %v10756_v22, %v10755_v47 }
 0x97f   :  { %v27627_v62 = vadd.f32 %v10294_v26, %v27274_v60  ;;  %v21477_v21 = vpop.f32.mrb[26].mxu1  ;;  %v10760_v60 = vsel %vm27_vm1, %v10674_v35, 0.0 }
 0x980   :  { %v10563_v53 = vadd.f32 %v10562_v52, %v10561_v0  ;;  %v27631_v40 = vadd.f32 %v21477_v21, %v27276_v7  ;;  %v10297_v8 = vpop.f32.mrb[27].mxu1  ;;  %v10759_v3 = vadd.f32 %v10758_v50, %v10757_v13  ;;  %v10677_v27 = vmul.f32 %v27622_v48, %v27622_v48 }
 0x981   :  { %v10564_v61 = vsel %vm27_vm1, %v27627_v62, 0.0  ;;  %v10675_v38 = vmul.f32 %v27627_v62, %v27627_v62  ;;  %v27638_v36 = vadd.f32 %v10297_v8, %v27278_v46  ;;  %v10568_v46 = vsel %vm27_vm1, %v27622_v48, 0.0 }
 0x982   :  { %v10565_v56 = vadd.f32 %v10564_v61, %v10563_v53  ;;  %v10761_v20 = vadd.f32 %v10760_v60, %v10759_v3  ;;  %v10678_v19 = vmul.f32 %v27631_v40, %v27631_v40  ;;  %v10570_v47 = vsel %vm27_vm1, %v27631_v40, 0.0 }
 0x983   :  { %v10762_v32 = vsel %vm27_vm1, %v10675_v38, 0.0  ;;  %v10566_v7 = vsel %vm27_vm1, %v27638_v36, 0.0  ;;  %v10676_v33 = vmul.f32 %v27638_v36, %v27638_v36  ;;  %v10766_v0 = vsel %vm27_vm1, %v10677_v27, 0.0 }
 0x984   :  { %v10567_v12 = vadd.f32 %v10566_v7, %v10565_v56  ;;  %v10763_v39 = vadd.f32 %v10762_v32, %v10761_v20 }
 0x985   :  { %v10764_v44 = vsel %vm27_vm1, %v10676_v33, 0.0  ;;  %v21480_v37 = vpop.f32.mrb[28].mxu1 }
 0x986   :  { %v10569_v5 = vadd.f32 %v10568_v46, %v10567_v12  ;;  %v27654_v57 = vadd.f32 %v21480_v37, %v27282_v59  ;;  %v10310_v30 = vpop.f32.mrb[29].mxu1  ;;  %v10765_v22 = vadd.f32 %v10764_v44, %v10763_v39  ;;  %v32744_v37 = vld [vmem:[#allocation5_spill] sm:$0xff] }
 0x987   :  { %v27659_v9 = vadd.f32 %v10310_v30, %v27284_v14  ;;  %v21481_v35 = vpop.f32.mrb[30].mxu1  ;;  %v10768_v14 = vsel %vm27_vm1, %v10678_v19, 0.0 }
 0x988   :  { %v10571_v26 = vadd.f32 %v10570_v47, %v10569_v5  ;;  %v27663_v52 = vadd.f32 %v21481_v35, %v27286_v6  ;;  %v10313_v13 = vpop.f32.mrb[31].mxu1  ;;  %v10767_v21 = vadd.f32 %v10766_v0, %v10765_v22  ;;  %v10681_v60 = vmul.f32 %v27654_v57, %v27654_v57  ;;  %v32745_v22 = vld [vmem:[#allocation37_spill] sm:$0xff] }
 0x989   :  { %v10572_v59 = vsel %vm27_vm1, %v27659_v9, 0.0  ;;  %v10679_v50 = vmul.f32 %v27659_v9, %v27659_v9  ;;  %v27670_v53 = vadd.f32 %v10313_v13, %v27288_v31  ;;  %v10576_v31 = vsel %vm27_vm1, %v27654_v57, 0.0 }
 0x98a   :  { %v10573_v8 = vadd.f32 %v10572_v59, %v10571_v26  ;;  %v10769_v3 = vadd.f32 %v10768_v14, %v10767_v21  ;;  %v10682_v33 = vmul.f32 %v27663_v52, %v27663_v52  ;;  %v10578_v39 = vsel %vm27_vm1, %v27663_v52, 0.0  ;;  %v32746_v21 = vld [vmem:[#allocation36_spill] sm:$0xff] }
 0x98b   :  { %v10770_v61 = vsel %vm27_vm1, %v10679_v50, 0.0  ;;  %v10574_v6 = vsel %vm27_vm1, %v27670_v53, 0.0  ;;  %v10680_v38 = vmul.f32 %v27670_v53, %v27670_v53  ;;  %v10774_v30 = vsel %vm27_vm1, %v10681_v60, 0.0 }
 0x98c   :  { %v10575_v56 = vadd.f32 %v10574_v6, %v10573_v8  ;;  %v10771_v20 = vadd.f32 %v10770_v61, %v10769_v3  ;;  %v10776_v50 = vsel %vm27_vm1, %v10682_v33, 0.0 }
 0x98d   :  { %v10772_v32 = vsel %vm27_vm1, %v10680_v38, 0.0  ;;  %v21484_v7 = vpop.f32.mrb[32].mxu1 }
 0x98e   :  { %v10577_v27 = vadd.f32 %v10576_v31, %v10575_v56  ;;  %v27686_v12 = vadd.f32 %v21484_v7, %v27292_v43  ;;  %v10326_v46 = vpop.f32.mrb[33].mxu1  ;;  %v10773_v44 = vadd.f32 %v10772_v32, %v10771_v20  ;;  %v11078_v56 = vld [vmem:[%s32077_s5] sm:$0x3] }
 0x98f   :  { %v27691_v19 = vadd.f32 %v10326_v46, %v32744_v37  ;;  %v21485_v5 = vpop.f32.mrb[34].mxu1  ;;  %23988 = vmatprep.subr.msk.bf16.mxu0 %vm537_vm0, %v11078_v56  ;;  %v11176_v33 = vsel %vm537_vm0, %v11078_v56, 0  ;;  %v12017_v56 = vld [vmem:[#allocation2 + $0x10] sm:$0xff] }
 0x990   :  { %v10579_v47 = vadd.f32 %v10578_v39, %v10577_v27  ;;  %v27695_v35 = vadd.f32 %v21485_v5, %v32745_v22  ;;  %v10329_v0 = vpop.f32.mrb[35].mxu1  ;;  %v10775_v26 = vadd.f32 %v10774_v30, %v10773_v44  ;;  %v10685_v38 = vmul.f32 %v27686_v12, %v27686_v12  ;;  %v32747_v39 = vld [vmem:[#allocation39_spill] sm:$0xff]  ;;  %21515 = vmatpush3.bf16.msra.mxu0 %v11176_v33 }
 0x991   :  { %v10580_v43 = vsel %vm27_vm1, %v27691_v19, 0.0  ;;  %v10683_v13 = vmul.f32 %v27691_v19, %v27691_v19  ;;  %v27702_v59 = vadd.f32 %v10329_v0, %v32746_v21  ;;  %v10584_v31 = vsel %vm27_vm1, %v27686_v12, 0.0 }
 0x992   :  { %v10581_v14 = vadd.f32 %v10580_v43, %v10579_v47  ;;  %v10777_v8 = vadd.f32 %v10776_v50, %v10775_v26  ;;  %v10686_v27 = vmul.f32 %v27695_v35, %v27695_v35  ;;  %v10586_v5 = vsel %vm27_vm1, %v27695_v35, 0.0  ;;  %v32749_v47 = vld [vmem:[#allocation38_spill] sm:$0xff] }
 0x993   :  { %v10778_v3 = vsel %vm27_vm1, %v10683_v13, 0.0  ;;  %v10582_v61 = vsel %vm27_vm1, %v27702_v59, 0.0  ;;  %v10684_v6 = vmul.f32 %v27702_v59, %v27702_v59  ;;  %v10782_v26 = vsel %vm27_vm1, %v10685_v38, 0.0  ;;  %v32750_v13 = vld [vmem:[#allocation40_spill] sm:$0xff] }
 0x994   :  { %v10583_v60 = vadd.f32 %v10582_v61, %v10581_v14  ;;  %v10779_v20 = vadd.f32 %v10778_v3, %v10777_v8  ;;  %v27737_v14 = vld [vmem:[%s32076_s3] sm:$0x3]  ;;  %v12016_v38 = vld [vmem:[#allocation2 + $0x8] sm:$0xff] }
 0x995   :  { %v10780_v32 = vsel %vm27_vm1, %v10684_v6, 0.0  ;;  %v21488_v7 = vpop.f32.mrb[36].mxu1  ;;  %v32752_v6 = vld [vmem:[#allocation41_spill] sm:$0xff]  ;;  %23991 = vmatprep.subr.msk.bf16.mxu1 %vm537_vm0, %v27737_v14 }
 0x996   :  { %v10585_v46 = vadd.f32 %v10584_v31, %v10583_v60  ;;  %v27723_v44 = vadd.f32 %v21488_v7, %v32747_v39  ;;  %v10342_v37 = vpop.f32.mrb[37].mxu1  ;;  %v10781_v30 = vadd.f32 %v10780_v32, %v10779_v20  ;;  %v10784_v31 = vsel %vm27_vm1, %v10686_v27, 0.0 }
 0x997   :  { %v27728_v22 = vadd.f32 %v10342_v37, %v32749_v47  ;;  %v21489_v0 = vpop.f32.mrb[38].mxu1 }
 0x998   :  { %32748 = vst [vmem:[#allocation5_spill] sm:$0xff] %v27723_v44  ;;  %v10587_v43 = vadd.f32 %v10586_v5, %v10585_v46  ;;  %v27732_v21 = vadd.f32 %v21489_v0, %v32750_v13  ;;  %v10345_v50 = vpop.f32.mrb[39].mxu1  ;;  %v10783_v8 = vadd.f32 %v10782_v26, %v10781_v30  ;;  %v10689_v39 = vmul.f32 %v27723_v44, %v27723_v44  ;;  %v32753_v13 = vld [vmem:[#allocation42_spill] sm:$0xff] }
 0x999   :  { %v10588_v3 = vsel %vm27_vm1, %v27728_v22, 0.0  ;;  %v10687_v61 = vmul.f32 %v27728_v22, %v27728_v22  ;;  %v27744_v60 = vadd.f32 %v10345_v50, %v32752_v6  ;;  %v12080_v5 = vpack.c.bf16 %v12017_v56, %v12016_v38  ;;  %v32755_v6 = vld [vmem:[#allocation43_spill] sm:$0xff] }
 0x99a   :  { %32751 = vst [vmem:[#allocation37_spill] sm:$0xff] %v27732_v21  ;;  %v10589_v20 = vadd.f32 %v10588_v3, %v10587_v43  ;;  %v10785_v32 = vadd.f32 %v10784_v31, %v10783_v8  ;;  %v10592_v30 = vsel %vm27_vm1, %v27723_v44, 0.0  ;;  %v10690_v26 = vmul.f32 %v27732_v21, %v27732_v21 }
 0x99b   :  { %v10786_v7 = vsel %vm27_vm1, %v10687_v61, 0.0  ;;  %v10590_v33 = vsel %vm27_vm1, %v27744_v60, 0.0  ;;  %v10688_v46 = vmul.f32 %v27744_v60, %v27744_v60  ;;  %21648 = vmatprep.mubr.msk.bf16.mxu1 %vm27_vm1, %v12080_v5  ;;  %v10594_v3 = vsel %vm27_vm1, %v27732_v21, 0.0 }
 0x99c   :  { %v10591_v37 = vadd.f32 %v10590_v33, %v10589_v20  ;;  %v10787_v47 = vadd.f32 %v10786_v7, %v10785_v32  ;;  %v10790_v31 = vsel %vm27_vm1, %v10689_v39, 0.0  ;;  %v32757_v32 = vld [vmem:[#allocation44_spill] sm:$0xff] }
 0x99d   :  { %v10788_v27 = vsel %vm27_vm1, %v10688_v46, 0.0  ;;  %v21492_v0 = vpop.f32.mrb[40].mxu1 }
 0x99e   :  { %v10593_v43 = vadd.f32 %v10592_v30, %v10591_v37  ;;  %v27762_v50 = vadd.f32 %v21492_v0, %v32753_v13  ;;  %v10358_v8 = vpop.f32.mrb[41].mxu1  ;;  %v10789_v61 = vadd.f32 %v10788_v27, %v10787_v47  ;;  %v32759_v30 = vld [vmem:[#allocation45_spill] sm:$0xff]  ;;  %v10792_v27 = vsel %vm27_vm1, %v10690_v26, 0.0 }
 0x99f   :  { %v27768_v38 = vadd.f32 %v10358_v8, %v32755_v6  ;;  %v21493_v56 = vpop.f32.mrb[42].mxu1 }
 0x9a0   :  { %32754 = vst [vmem:[#allocation36_spill] sm:$0xff] %v27762_v50  ;;  %v10595_v20 = vadd.f32 %v10594_v3, %v10593_v43  ;;  %v27772_v7 = vadd.f32 %v21493_v56, %v32757_v32  ;;  %v10361_v33 = vpop.f32.mrb[43].mxu1  ;;  %v10791_v46 = vadd.f32 %v10790_v31, %v10789_v61  ;;  %v10693_v3 = vmul.f32 %v27762_v50, %v27762_v50 }
 0x9a1   :  { %32756 = vst [vmem:[#allocation39_spill] sm:$0xff] %v27768_v38  ;;  %v10596_v37 = vsel %vm27_vm1, %v27768_v38, 0.0  ;;  %v10691_v5 = vmul.f32 %v27768_v38, %v27768_v38  ;;  %v27779_v47 = vadd.f32 %v10361_v33, %v32759_v30  ;;  %v10600_v6 = vsel %vm27_vm1, %v27762_v50, 0.0  ;;  %v32761_v33 = vld [vmem:[#allocation46_spill] sm:$0xff] }
 0x9a2   :  { %32758 = vst [vmem:[#allocation38_spill] sm:$0xff] %v27772_v7  ;;  %v10597_v0 = vadd.f32 %v10596_v37, %v10595_v20  ;;  %v10793_v13 = vadd.f32 %v10792_v27, %v10791_v46  ;;  %v10694_v20 = vmul.f32 %v27772_v7, %v27772_v7  ;;  %v32763_v27 = vld [vmem:[#allocation47_spill] sm:$0xff] }
 0x9a3   :  { %32760 = vst [vmem:[#allocation40_spill] sm:$0xff] %v27779_v47  ;;  %v10794_v39 = vsel %vm27_vm1, %v10691_v5, 0.0  ;;  %v10598_v43 = vsel %vm27_vm1, %v27779_v47, 0.0  ;;  %v10692_v8 = vmul.f32 %v27779_v47, %v27779_v47  ;;  %v10602_v5 = vsel %vm27_vm1, %v27772_v7, 0.0 }
 0x9a4   :  { %v10599_v61 = vadd.f32 %v10598_v43, %v10597_v0  ;;  %v10795_v56 = vadd.f32 %v10794_v39, %v10793_v13  ;;  %v10798_v13 = vsel %vm27_vm1, %v10693_v3, 0.0 }
 0x9a5   :  { %v10796_v26 = vsel %vm27_vm1, %v10692_v8, 0.0  ;;  %v21496_v31 = vpop.f32.mrb[44].mxu1  ;;  %v32765_v8 = vld [vmem:[#allocation48_spill] sm:$0xff] }
 0x9a6   :  { %v10601_v32 = vadd.f32 %v10600_v6, %v10599_v61  ;;  %v27795_v46 = vadd.f32 %v21496_v31, %v32761_v33  ;;  %v10374_v37 = vpop.f32.mrb[45].mxu1  ;;  %v10797_v30 = vadd.f32 %v10796_v26, %v10795_v56  ;;  %v32767_v33 = vld [vmem:[#allocation49_spill] sm:$0xff]  ;;  %v10800_v26 = vsel %vm27_vm1, %v10694_v20, 0.0 }
 0x9a7   :  { %v27800_v0 = vadd.f32 %v10374_v37, %v32763_v27  ;;  %v21497_v43 = vpop.f32.mrb[46].mxu1 }
 0x9a8   :  { %32762 = vst [vmem:[#allocation41_spill] sm:$0xff] %v27795_v46  ;;  %v10603_v39 = vadd.f32 %v10602_v5, %v10601_v32  ;;  %v27804_v50 = vadd.f32 %v21497_v43, %v32765_v8  ;;  %v10377_v47 = vpop.f32.mrb[47].mxu1  ;;  %v10799_v61 = vadd.f32 %v10798_v13, %v10797_v30  ;;  %v10697_v30 = vmul.f32 %v27795_v46, %v27795_v46 }
 0x9a9   :  { %32764 = vst [vmem:[#allocation42_spill] sm:$0xff] %v27800_v0  ;;  %v10604_v6 = vsel %vm27_vm1, %v27800_v0, 0.0  ;;  %v10695_v31 = vmul.f32 %v27800_v0, %v27800_v0  ;;  %v27811_v56 = vadd.f32 %v10377_v47, %v32767_v33  ;;  %v10608_v47 = vsel %vm27_vm1, %v27795_v46, 0.0 }
 0x9aa   :  { %32766 = vst [vmem:[#allocation43_spill] sm:$0xff] %v27804_v50  ;;  %v10605_v37 = vadd.f32 %v10604_v6, %v10603_v39  ;;  %v10801_v27 = vadd.f32 %v10800_v26, %v10799_v61  ;;  %v10698_v8 = vmul.f32 %v27804_v50, %v27804_v50  ;;  %v32769_v6 = vld [vmem:[#allocation50_spill] sm:$0xff]  ;;  %v10610_v26 = vsel %vm27_vm1, %v27804_v50, 0.0 }
 0x9ab   :  { %32768 = vst [vmem:[#allocation44_spill] sm:$0xff] %v27811_v56  ;;  %v10802_v3 = vsel %vm27_vm1, %v10695_v31, 0.0  ;;  %v10606_v32 = vsel %vm27_vm1, %v27811_v56, 0.0  ;;  %v10696_v5 = vmul.f32 %v27811_v56, %v27811_v56 }
 0x9ac   :  { %v10607_v43 = vadd.f32 %v10606_v32, %v10605_v37  ;;  %v10803_v13 = vadd.f32 %v10802_v3, %v10801_v27  ;;  %v32771_v37 = vld [vmem:[#allocation51_spill] sm:$0xff]  ;;  %v10806_v27 = vsel %vm27_vm1, %v10697_v30, 0.0 }
 0x9ad   :  { %v10804_v20 = vsel %vm27_vm1, %v10696_v5, 0.0  ;;  %v21500_v39 = vpop.f32.mrb[48].mxu1  ;;  %v32773_v5 = vld [vmem:[#allocation52_spill] sm:$0xff] }
 0x9ae   :  { %v10609_v61 = vadd.f32 %v10608_v47, %v10607_v43  ;;  %v27827_v31 = vadd.f32 %v21500_v39, %v32769_v6  ;;  %v10390_v33 = vpop.f32.mrb[49].mxu1  ;;  %v10805_v56 = vadd.f32 %v10804_v20, %v10803_v13  ;;  %v32775_v6 = vld [vmem:[#allocation53_spill] sm:$0xff]  ;;  %v10808_v20 = vsel %vm27_vm1, %v10698_v8, 0.0 }
 0x9af   :  { %v27832_v32 = vadd.f32 %v10390_v33, %v32771_v37  ;;  %v21501_v46 = vpop.f32.mrb[50].mxu1 }
 0x9b0   :  { %32770 = vst [vmem:[#allocation45_spill] sm:$0xff] %v27827_v31  ;;  %v10611_v3 = vadd.f32 %v10610_v26, %v10609_v61  ;;  %v27836_v0 = vadd.f32 %v21501_v46, %v32773_v5  ;;  %v10393_v7 = vpop.f32.mrb[51].mxu1  ;;  %v10807_v43 = vadd.f32 %v10806_v27, %v10805_v56  ;;  %v10701_v61 = vmul.f32 %v27827_v31, %v27827_v31 }
 0x9b1   :  { %32772 = vst [vmem:[#allocation46_spill] sm:$0xff] %v27832_v32  ;;  %v10612_v47 = vsel %vm27_vm1, %v27832_v32, 0.0  ;;  %v10699_v39 = vmul.f32 %v27832_v32, %v27832_v32  ;;  %v27843_v13 = vadd.f32 %v10393_v7, %v32775_v6  ;;  %v10616_v7 = vsel %vm27_vm1, %v27827_v31, 0.0 }
 0x9b2   :  { %32774 = vst [vmem:[#allocation47_spill] sm:$0xff] %v27836_v0  ;;  %v10613_v33 = vadd.f32 %v10612_v47, %v10611_v3  ;;  %v10809_v37 = vadd.f32 %v10808_v20, %v10807_v43  ;;  %v10702_v5 = vmul.f32 %v27836_v0, %v27836_v0  ;;  %v32777_v47 = vld [vmem:[#allocation54_spill] sm:$0xff]  ;;  %v10618_v20 = vsel %vm27_vm1, %v27836_v0, 0.0 }
 0x9b3   :  { %32776 = vst [vmem:[#allocation48_spill] sm:$0xff] %v27843_v13  ;;  %v10810_v30 = vsel %vm27_vm1, %v10699_v39, 0.0  ;;  %v10614_v46 = vsel %vm27_vm1, %v27843_v13, 0.0  ;;  %v10700_v56 = vmul.f32 %v27843_v13, %v27843_v13 }
 0x9b4   :  { %v10615_v26 = vadd.f32 %v10614_v46, %v10613_v33  ;;  %v10811_v27 = vadd.f32 %v10810_v30, %v10809_v37  ;;  %v32779_v33 = vld [vmem:[#allocation55_spill] sm:$0xff]  ;;  %v10814_v37 = vsel %vm27_vm1, %v10701_v61, 0.0 }
 0x9b5   :  { %v10812_v8 = vsel %vm27_vm1, %v10700_v56, 0.0  ;;  %v21504_v3 = vpop.f32.mrb[52].mxu1  ;;  %v32781_v56 = vld [vmem:[#allocation56_spill] sm:$0xff] }
 0x9b6   :  { %v10617_v43 = vadd.f32 %v10616_v7, %v10615_v26  ;;  %v27859_v39 = vadd.f32 %v21504_v3, %v32777_v47  ;;  %v10406_v6 = vpop.f32.mrb[53].mxu1  ;;  %v10813_v50 = vadd.f32 %v10812_v8, %v10811_v27  ;;  %v32783_v47 = vld [vmem:[#allocation57_spill] sm:$0xff]  ;;  %v10816_v8 = vsel %vm27_vm1, %v10702_v5, 0.0 }
 0x9b7   :  { %v27864_v46 = vadd.f32 %v10406_v6, %v32779_v33  ;;  %v21505_v38 = vpop.f32.mrb[54].mxu1 }
 0x9b8   :  { %32778 = vst [vmem:[#allocation49_spill] sm:$0xff] %v27859_v39  ;;  %v10619_v30 = vadd.f32 %v10618_v20, %v10617_v43  ;;  %v27868_v21 = vadd.f32 %v21505_v38, %v32781_v56  ;;  %v10409_v44 = vpop.f32.mrb[55].mxu1  ;;  %v10815_v26 = vadd.f32 %v10814_v37, %v10813_v50  ;;  %v10705_v43 = vmul.f32 %v27859_v39, %v27859_v39 }
 0x9b9   :  { %32780 = vst [vmem:[#allocation50_spill] sm:$0xff] %v27864_v46  ;;  %v10620_v7 = vsel %vm27_vm1, %v27864_v46, 0.0  ;;  %v10703_v3 = vmul.f32 %v27864_v46, %v27864_v46  ;;  %v27875_v27 = vadd.f32 %v10409_v44, %v32783_v47  ;;  %v10624_v44 = vsel %vm27_vm1, %v27859_v39, 0.0 }
 0x9ba   :  { %32782 = vst [vmem:[#allocation51_spill] sm:$0xff] %v27868_v21  ;;  %v10621_v6 = vadd.f32 %v10620_v7, %v10619_v30  ;;  %v10817_v33 = vadd.f32 %v10816_v8, %v10815_v26  ;;  %v10706_v56 = vmul.f32 %v27868_v21, %v27868_v21  ;;  %v32785_v7 = vld [vmem:[#allocation58_spill] sm:$0xff]  ;;  %v10626_v8 = vsel %vm27_vm1, %v27868_v21, 0.0 }
 0x9bb   :  { %32784 = vst [vmem:[#allocation52_spill] sm:$0xff] %v27875_v27  ;;  %v10818_v61 = vsel %vm27_vm1, %v10703_v3, 0.0  ;;  %v10622_v38 = vsel %vm27_vm1, %v27875_v27, 0.0  ;;  %v10704_v50 = vmul.f32 %v27875_v27, %v27875_v27 }
 0x9bc   :  { %v10623_v20 = vadd.f32 %v10622_v38, %v10621_v6  ;;  %v10819_v37 = vadd.f32 %v10818_v61, %v10817_v33  ;;  %v32787_v6 = vld [vmem:[#allocation59_spill] sm:$0xff]  ;;  %v10822_v33 = vsel %vm27_vm1, %v10705_v43, 0.0 }
 0x9bd   :  { %v10820_v5 = vsel %vm27_vm1, %v10704_v50, 0.0  ;;  %v21508_v30 = vpop.f32.mrb[56].mxu1  ;;  %v32789_v50 = vld [vmem:[#allocation60_spill] sm:$0xff] }
 0x9be   :  { %v10625_v26 = vadd.f32 %v10624_v44, %v10623_v20  ;;  %v27891_v3 = vadd.f32 %v21508_v30, %v32785_v7  ;;  %v10422_v47 = vpop.f32.mrb[57].mxu1  ;;  %v10821_v27 = vadd.f32 %v10820_v5, %v10819_v37  ;;  %v32791_v7 = vld [vmem:[#allocation61_spill] sm:$0xff]  ;;  %v10824_v5 = vsel %vm27_vm1, %v10706_v56, 0.0 }
 0x9bf   :  { %v27896_v38 = vadd.f32 %v10422_v47, %v32787_v6  ;;  %v21509_v39 = vpop.f32.mrb[58].mxu1 }
 0x9c0   :  { %32786 = vst [vmem:[#allocation53_spill] sm:$0xff] %v27891_v3  ;;  %v10627_v61 = vadd.f32 %v10626_v8, %v10625_v26  ;;  %v27900_v46 = vadd.f32 %v21509_v39, %v32789_v50  ;;  %v10425_v0 = vpop.f32.mrb[59].mxu1  ;;  %v10823_v20 = vadd.f32 %v10822_v33, %v10821_v27  ;;  %v10709_v26 = vmul.f32 %v27891_v3, %v27891_v3 }
 0x9c1   :  { %32788 = vst [vmem:[#allocation54_spill] sm:$0xff] %v27896_v38  ;;  %v10628_v44 = vsel %vm27_vm1, %v27896_v38, 0.0  ;;  %v10707_v30 = vmul.f32 %v27896_v38, %v27896_v38  ;;  %v27907_v37 = vadd.f32 %v10425_v0, %v32791_v7  ;;  %v10632_v0 = vsel %vm27_vm1, %v27891_v3, 0.0 }
 0x9c2   :  { %32790 = vst [vmem:[#allocation55_spill] sm:$0xff] %v27900_v46  ;;  %v10629_v47 = vadd.f32 %v10628_v44, %v10627_v61  ;;  %v10825_v6 = vadd.f32 %v10824_v5, %v10823_v20  ;;  %v10710_v50 = vmul.f32 %v27900_v46, %v27900_v46  ;;  %v32793_v44 = vld [vmem:[#allocation62_spill] sm:$0xff]  ;;  %v10634_v5 = vsel %vm27_vm1, %v27900_v46, 0.0 }
 0x9c3   :  { %32792 = vst [vmem:[#allocation56_spill] sm:$0xff] %v27907_v37  ;;  %v10826_v43 = vsel %vm27_vm1, %v10707_v30, 0.0  ;;  %v10630_v39 = vsel %vm27_vm1, %v27907_v37, 0.0  ;;  %v10708_v27 = vmul.f32 %v27907_v37, %v27907_v37 }
 0x9c4   :  { %v10631_v8 = vadd.f32 %v10630_v39, %v10629_v47  ;;  %v10827_v33 = vadd.f32 %v10826_v43, %v10825_v6  ;;  %v32795_v47 = vld [vmem:[#allocation63_spill] sm:$0xff]  ;;  %v10830_v6 = vsel %vm27_vm1, %v10709_v26, 0.0 }
 0x9c5   :  { %v10828_v56 = vsel %vm27_vm1, %v10708_v27, 0.0  ;;  %v21512_v61 = vpop.f32.mrb[60].mxu1  ;;  %v32797_v27 = vld [vmem:[#allocation64_spill] sm:$0xff] }
 0x9c6   :  { %v10633_v20 = vadd.f32 %v10632_v0, %v10631_v8  ;;  %v27923_v30 = vadd.f32 %v21512_v61, %v32793_v44  ;;  %v10438_v7 = vpop.f32.mrb[61].mxu1  ;;  %v10829_v37 = vadd.f32 %v10828_v56, %v10827_v33  ;;  %v32799_v44 = vld [vmem:[#allocation65_spill] sm:$0xff]  ;;  %v10832_v56 = vsel %vm27_vm1, %v10710_v50, 0.0 }
 0x9c7   :  { %v27928_v39 = vadd.f32 %v10438_v7, %v32795_v47  ;;  %v21513_v3 = vpop.f32.mrb[62].mxu1 }
 0x9c8   :  { %32794 = vst [vmem:[#allocation57_spill] sm:$0xff] %v27923_v30  ;;  %v10635_v43 = vadd.f32 %v10634_v5, %v10633_v20  ;;  %v27932_v38 = vadd.f32 %v21513_v3, %v32797_v27  ;;  %v10441_v21 = vpop.f32.mrb[63].mxu1  ;;  %v10831_v8 = vadd.f32 %v10830_v6, %v10829_v37  ;;  %v10713_v20 = vmul.f32 %v27923_v30, %v27923_v30 }
 0x9c9   :  { %32796 = vst [vmem:[#allocation58_spill] sm:$0xff] %v27928_v39  ;;  %v10636_v0 = vsel %vm27_vm1, %v27928_v39, 0.0  ;;  %v10711_v61 = vmul.f32 %v27928_v39, %v27928_v39  ;;  %v27939_v33 = vadd.f32 %v10441_v21, %v32799_v44  ;;  %v10640_v21 = vsel %vm27_vm1, %v27923_v30, 0.0 }
 0x9ca   :  { %32798 = vst [vmem:[#allocation59_spill] sm:$0xff] %v27932_v38  ;;  %v10637_v7 = vadd.f32 %v10636_v0, %v10635_v43  ;;  %v10833_v47 = vadd.f32 %v10832_v56, %v10831_v8  ;;  %v10714_v43 = vmul.f32 %v27932_v38, %v27932_v38  ;;  %v10642_v8 = vsel %vm27_vm1, %v27932_v38, 0.0 }
 0x9cb   :  { %v10834_v26 = vsel %vm27_vm1, %v10711_v61, 0.0  ;;  %v10638_v3 = vsel %vm27_vm1, %v27939_v33, 0.0  ;;  %v10712_v37 = vmul.f32 %v27939_v33, %v27939_v33  ;;  %v10838_v61 = vsel %vm27_vm1, %v10713_v20, 0.0 }
 0x9cc   :  { %v10639_v5 = vadd.f32 %v10638_v3, %v10637_v7  ;;  %v10835_v6 = vadd.f32 %v10834_v26, %v10833_v47  ;;  %v10840_v7 = vsel %vm27_vm1, %v10714_v43, 0.0 }
 0x9cd   :  { %v10836_v50 = vsel %vm27_vm1, %v10712_v37, 0.0 }
 0x9ce   :  { %v10641_v27 = vadd.f32 %v10640_v21, %v10639_v5  ;;  %v10837_v0 = vadd.f32 %v10836_v50, %v10835_v6 }
 0x9d0   :  { %v10643_v44 = vadd.f32 %v10642_v8, %v10641_v27  ;;  %v10839_v56 = vadd.f32 %v10838_v61, %v10837_v0  ;;  %v32823_v61 = vld [vmem:[#allocation44_spill] sm:$0xff]  ;;  %v32824_v8 = vld [vmem:[#allocation41_spill] sm:$0xff] }
 0x9d2   :  { %v10644_v3 = vrot.slane %v10643_v44, 4  ;;  %v10841_v39 = vadd.f32 %v10840_v7, %v10839_v56 }
 0x9d4   :  { %v10645_v30 = vadd.f32 %v10644_v3, %v10643_v44  ;;  %v10842_v47 = vrot.slane %v10841_v39, 4  ;;  %v32814_v44 = vld [vmem:[#allocation5_spill] sm:$0xff] }
 0x9d6   :  { %v10646_v26 = vrot.slane %v10645_v30, 2  ;;  %v10843_v37 = vadd.f32 %v10842_v47, %v10841_v39 }
 0x9d8   :  { %v10647_v46 = vadd.f32 %v10646_v26, %v10645_v30  ;;  %v10844_v31 = vrot.slane %v10843_v37, 2 }
 0x9da   :  { %v10648_v13 = vrot.slane %v10647_v46, 1  ;;  %v10845_v5 = vadd.f32 %v10844_v31, %v10843_v37  ;;  %v27970_v31 = vsel %vm537_vm0, %v27737_v14, 0  ;;  %v32815_v14 = vld [vmem:[#allocation37_spill] sm:$0xff] }
 0x9db   :  { %32800 = vst [vmem:[#allocation60_spill] sm:$0xff] %v27970_v31 }
 0x9dc   :  { %v10649_v21 = vadd.f32 %v10648_v13, %v10647_v46  ;;  %v10846_v32 = vrot.slane %v10845_v5, 1  ;;  %v32818_v46 = vld [vmem:[#allocation39_spill] sm:$0xff]  ;;  %v32819_v13 = vld [vmem:[#allocation40_spill] sm:$0xff] }
 0x9de   :  { %v27958_v38 = vmul.f32 0.001953125, %v10649_v21  ;;  %v10847_v6 = vadd.f32 %v10846_v32, %v10845_v5  ;;  %v32805_v5 = vld [vmem:[#allocation50_spill] sm:$0xff]  ;;  %v32806_v21 = vld [vmem:[#allocation52_spill] sm:$0xff] }
 0x9df   :  { %v32820_v32 = vld [vmem:[#allocation36_spill] sm:$0xff] }
 0x9e0   :  { %v10849_v20 = vmul.f32 %v27958_v38, %v27958_v38  ;;  %v10848_v43 = vmul.f32 0.001953125, %v10847_v6  ;;  %v10890_v30 = vsub.f32 %v32814_v44, %v27958_v38  ;;  %v10891_v39 = vsub.f32 %v32815_v14, %v27958_v38  ;;  %v32821_v44 = vld [vmem:[#allocation38_spill] sm:$0xff] }
 0x9e1   :  { %v10892_v3 = vsub.f32 %v32818_v46, %v27958_v38  ;;  %v10893_v7 = vsub.f32 %v32819_v13, %v27958_v38  ;;  %v10894_v56 = vsub.f32 %v32820_v32, %v27958_v38  ;;  %v10895_v47 = vsub.f32 %v32821_v44, %v27958_v38  ;;  %v32822_v14 = vld [vmem:[#allocation42_spill] sm:$0xff] }
 0x9e2   :  { %v10850_v27 = vsub.f32 %v10848_v43, %v10849_v20  ;;  %v32801_v20 = vld [vmem:[#allocation46_spill] sm:$0xff]  ;;  %v32802_v43 = vld [vmem:[#allocation48_spill] sm:$0xff]  ;;  %v10896_v50 = vsub.f32 %v32822_v14, %v27958_v38  ;;  %v10897_v31 = vsub.f32 %v32823_v61, %v27958_v38  ;;  %v10898_v46 = vsub.f32 %v32824_v8, %v27958_v38 }
 0x9e3   :  { %v32826_v32 = vsub.f32 %v27939_v33, %v27958_v38  ;;  %v32828_v44 = vsub.f32 %v27437_v55, %v27958_v38  ;;  %v32829_v61 = vsub.f32 %v27445_v1, %v27958_v38 }
 0x9e4   :  { %v10851_v0 = vmax.f32 %v10850_v27, 0.0  ;;  %v32825_v27 = vld [vmem:[#allocation43_spill] sm:$0xff] }
 0x9e5   :  { %v10899_v13 = vsub.f32 %v32825_v27, %v27958_v38  ;;  %v32830_v27 = vsub.f32 %v27434_v15, %v27958_v38 }
 0x9e6   :  { %v10916_v26 = vadd.f32 1e-05, %v10851_v0  ;;  %v32804_v0 = vld [vmem:[#allocation47_spill] sm:$0xff] }
 0x9e8   :  { %24003 = vrsqrt.f32 %v10916_v26  ;;  %v32803_v26 = vld [vmem:[#allocation45_spill] sm:$0xff] }
 0x9f2   :  { %v28086_v37 = vpop.eup %24003 }
 0x9f3   :  { %v28100_v6 = vmul.f32 %v28086_v37, %v32826_v32  ;;  %v28106_v14 = vmul.f32 %v28086_v37, %v32828_v44  ;;  %v28112_v8 = vmul.f32 %v28086_v37, %v32829_v61  ;;  %v28118_v33 = vmul.f32 %v28086_v37, %v32830_v27 }
 0x9f4   :  { %v32831_v32 = vsub.f32 %v27440_v58, %v27958_v38  ;;  %v32832_v44 = vsub.f32 %v27468_v54, %v27958_v38  ;;  %v32833_v61 = vsub.f32 %v27479_v45, %v27958_v38  ;;  %v32834_v27 = vsub.f32 %v27462_v23, %v27958_v38 }
 0x9f5   :  { %32827 = vst [vmem:[#allocation61_spill] sm:$0xff] %v28100_v6  ;;  %v32835_v54 = vsub.f32 %v27476_v18, %v27958_v38  ;;  %v32836_v45 = vsub.f32 %v27499_v11, %v27958_v38  ;;  %v32837_v23 = vsub.f32 %v27510_v49, %v27958_v38 }
 0x9f6   :  { %v28124_v55 = vmul.f32 %v28086_v37, %v32831_v32  ;;  %v28130_v1 = vmul.f32 %v28086_v37, %v32832_v44  ;;  %v28136_v15 = vmul.f32 %v28086_v37, %v32833_v61  ;;  %v28142_v58 = vmul.f32 %v28086_v37, %v32834_v27 }
 0x9f7   :  { %v28149_v44 = vmul.f32 %v28086_v37, %v32835_v54  ;;  %v28155_v61 = vmul.f32 %v28086_v37, %v32836_v45  ;;  %v28161_v27 = vmul.f32 %v28086_v37, %v32837_v23  ;;  %v32838_v32 = vsub.f32 %v27494_v25, %v27958_v38 }
 0x9f8   :  { %v32839_v54 = vsub.f32 %v27503_v17, %v27958_v38  ;;  %v32840_v45 = vsub.f32 %v27531_v42, %v27958_v38  ;;  %v32841_v23 = vsub.f32 %v27542_v34, %v27958_v38  ;;  %v32843_v17 = vsub.f32 %v27526_v63, %v27958_v38 }
 0x9f9   :  { %v28167_v18 = vmul.f32 %v28086_v37, %v32838_v32  ;;  %v32842_v32 = vmax.f32 %v28100_v6, 0.0  ;;  %v32844_v42 = vsub.f32 %v27535_v4, %v27958_v38  ;;  %v32845_v34 = vsub.f32 %v27563_v28, %v27958_v38 }
 0x9fa   :  { %v28173_v11 = vmul.f32 %v28086_v37, %v32839_v54  ;;  %v28179_v49 = vmul.f32 %v28086_v37, %v32840_v45  ;;  %v28185_v25 = vmul.f32 %v28086_v37, %v32841_v23  ;;  %v28194_v54 = vmul.f32 %v28086_v37, %v32843_v17 }
 0x9fb   :  { %11916 = vst.msk [vmem:[#allocation2 + $0x430] sm:$0xff] %vm27_vm1, %v32842_v32  ;;  %v28200_v45 = vmul.f32 %v28086_v37, %v32844_v42  ;;  %v28206_v23 = vmul.f32 %v28086_v37, %v32845_v34  ;;  %v32846_v32 = vsub.f32 %v27574_v24, %v27958_v38  ;;  %v32847_v17 = vsub.f32 %v27558_v10, %v27958_v38 }
 0x9fc   :  { %v32848_v42 = vsub.f32 %v27567_v51, %v27958_v38  ;;  %v32849_v34 = vsub.f32 %v27595_v29, %v27958_v38 }
 0x9fd   :  { %v28212_v63 = vmul.f32 %v28086_v37, %v32846_v32  ;;  %v28218_v4 = vmul.f32 %v28086_v37, %v32847_v17  ;;  %v32850_v32 = vsub.f32 %v27606_v41, %v27958_v38  ;;  %v32851_v17 = vsub.f32 %v27590_v2, %v27958_v38 }
 0x9fe   :  { %v28224_v28 = vmul.f32 %v28086_v37, %v32848_v42  ;;  %v28230_v24 = vmul.f32 %v28086_v37, %v32849_v34  ;;  %v32852_v42 = vsub.f32 %v27599_v16, %v27958_v38  ;;  %v32853_v34 = vsub.f32 %v27627_v62, %v27958_v38 }
 0x9ff   :  { %v28236_v10 = vmul.f32 %v28086_v37, %v32850_v32  ;;  %v28242_v51 = vmul.f32 %v28086_v37, %v32851_v17  ;;  %v32854_v32 = vsub.f32 %v27638_v36, %v27958_v38  ;;  %v32855_v17 = vsub.f32 %v27622_v48, %v27958_v38 }
 0xa00   :  { %v28248_v29 = vmul.f32 %v28086_v37, %v32852_v42  ;;  %v28254_v41 = vmul.f32 %v28086_v37, %v32853_v34  ;;  %v32856_v42 = vsub.f32 %v27631_v40, %v27958_v38  ;;  %v32857_v34 = vsub.f32 %v27659_v9, %v27958_v38 }
 0xa01   :  { %v28260_v2 = vmul.f32 %v28086_v37, %v32854_v32  ;;  %v28266_v16 = vmul.f32 %v28086_v37, %v32855_v17  ;;  %v32858_v32 = vsub.f32 %v27670_v53, %v27958_v38  ;;  %v32859_v17 = vsub.f32 %v27654_v57, %v27958_v38 }
 0xa02   :  { %v28272_v62 = vmul.f32 %v28086_v37, %v32856_v42  ;;  %v28278_v36 = vmul.f32 %v28086_v37, %v32857_v34  ;;  %v32860_v42 = vsub.f32 %v27663_v52, %v27958_v38  ;;  %v32861_v34 = vsub.f32 %v27691_v19, %v27958_v38 }
 0xa03   :  { %v28284_v48 = vmul.f32 %v28086_v37, %v32858_v32  ;;  %v28290_v40 = vmul.f32 %v28086_v37, %v32859_v17  ;;  %v32862_v32 = vsub.f32 %v27702_v59, %v27958_v38  ;;  %v32863_v17 = vsub.f32 %v27686_v12, %v27958_v38 }
 0xa04   :  { %v28296_v9 = vmul.f32 %v28086_v37, %v32860_v42  ;;  %v28302_v53 = vmul.f32 %v28086_v37, %v32861_v34  ;;  %v32864_v42 = vsub.f32 %v27695_v35, %v27958_v38  ;;  %v32865_v34 = vsub.f32 %v27728_v22, %v27958_v38 }
 0xa05   :  { %v28308_v57 = vmul.f32 %v28086_v37, %v32862_v32  ;;  %v28314_v52 = vmul.f32 %v28086_v37, %v32863_v17  ;;  %v32866_v32 = vsub.f32 %v27744_v60, %v27958_v38  ;;  %v28335_v17 = vmul.f32 %v28086_v37, %v10890_v30 }
 0xa06   :  { %v28320_v19 = vmul.f32 %v28086_v37, %v32864_v42  ;;  %v28326_v59 = vmul.f32 %v28086_v37, %v32865_v34  ;;  %v28338_v35 = vmul.f32 %v28086_v37, %v10891_v39  ;;  %v28341_v42 = vmul.f32 %v28086_v37, %v10892_v3 }
 0xa07   :  { %v28332_v12 = vmul.f32 %v28086_v37, %v32866_v32  ;;  %v28344_v22 = vmul.f32 %v28086_v37, %v10893_v7  ;;  %v28347_v34 = vmul.f32 %v28086_v37, %v10894_v56  ;;  %v28350_v60 = vmul.f32 %v28086_v37, %v10895_v47 }
 0xa08   :  { %32867 = vst [vmem:[#allocation62_spill] sm:$0xff] %v28338_v35  ;;  %32868 = vst [vmem:[#allocation63_spill] sm:$0xff] %v28341_v42  ;;  %v28353_v32 = vmul.f32 %v28086_v37, %v10896_v50  ;;  %v28356_v30 = vmul.f32 %v28086_v37, %v10897_v31  ;;  %v28359_v39 = vmul.f32 %v28086_v37, %v10898_v46 }
 0xa09   :  { %32869 = vst [vmem:[#allocation64_spill] sm:$0xff] %v28344_v22  ;;  %32870 = vst [vmem:[#allocation65_spill] sm:$0xff] %v28347_v34  ;;  %v28362_v3 = vmul.f32 %v28086_v37, %v10899_v13  ;;  %v32876_v7 = vsub.f32 %v32801_v20, %v27958_v38  ;;  %v32878_v47 = vsub.f32 %v32802_v43, %v27958_v38 }
 0xa0a   :  { %32871 = vst [vmem:[#allocation46_spill] sm:$0xff] %v28350_v60  ;;  %32872 = vst [vmem:[#allocation48_spill] sm:$0xff] %v28353_v32  ;;  %v32879_v31 = vsub.f32 %v32803_v26, %v27958_v38  ;;  %v32880_v13 = vsub.f32 %v32804_v0, %v27958_v38 }
 0xa0b   :  { %32873 = vst [vmem:[#allocation45_spill] sm:$0xff] %v28356_v30  ;;  %32874 = vst [vmem:[#allocation47_spill] sm:$0xff] %v28359_v39  ;;  %v28368_v56 = vmul.f32 %v28086_v37, %v32876_v7  ;;  %v28374_v50 = vmul.f32 %v28086_v37, %v32878_v47  ;;  %v32882_v7 = vsub.f32 %v32805_v5, %v27958_v38 }
 0xa0c   :  { %32875 = vst [vmem:[#allocation50_spill] sm:$0xff] %v28362_v3  ;;  %v28380_v46 = vmul.f32 %v28086_v37, %v32879_v31  ;;  %v28386_v20 = vmul.f32 %v28086_v37, %v32880_v13  ;;  %v32884_v47 = vsub.f32 %v32806_v21, %v27958_v38  ;;  %v32886_v31 = vld [vmem:[#allocation49_spill] sm:$0xff]  ;;  %v32889_v13 = vld [vmem:[#allocation51_spill] sm:$0xff] }
 0xa0d   :  { %32877 = vst [vmem:[#allocation52_spill] sm:$0xff] %v28368_v56  ;;  %v28392_v43 = vmul.f32 %v28086_v37, %v32882_v7  ;;  %v32887_v6 = vsub.f32 %v32886_v31, %v27958_v38  ;;  %v32892_v7 = vld [vmem:[#allocation54_spill] sm:$0xff] }
 0xa0e   :  { %32881 = vst [vmem:[#allocation5_spill] sm:$0xff] %v28386_v20  ;;  %v28398_v26 = vmul.f32 %v28086_v37, %v32884_v47  ;;  %v32890_v20 = vsub.f32 %v32889_v13, %v27958_v38  ;;  %v32895_v47 = vld [vmem:[#allocation56_spill] sm:$0xff] }
 0xa0f   :  { %32883 = vst [vmem:[#allocation37_spill] sm:$0xff] %v28392_v43  ;;  %v28404_v0 = vmul.f32 %v28086_v37, %v32887_v6  ;;  %v32893_v43 = vsub.f32 %v32892_v7, %v27958_v38  ;;  %v32898_v6 = vld [vmem:[#allocation53_spill] sm:$0xff] }
 0xa10   :  { %32885 = vst [vmem:[#allocation39_spill] sm:$0xff] %v28398_v26  ;;  %v28410_v5 = vmul.f32 %v28086_v37, %v32890_v20  ;;  %v32896_v26 = vsub.f32 %v32895_v47, %v27958_v38  ;;  %v32901_v20 = vld [vmem:[#allocation55_spill] sm:$0xff] }
 0xa11   :  { %32888 = vst [vmem:[#allocation40_spill] sm:$0xff] %v28404_v0  ;;  %v28416_v21 = vmul.f32 %v28086_v37, %v32893_v43  ;;  %v32899_v0 = vsub.f32 %v32898_v6, %v27958_v38  ;;  %v32904_v43 = vld [vmem:[#allocation58_spill] sm:$0xff] }
 0xa12   :  { %32891 = vst [vmem:[#allocation36_spill] sm:$0xff] %v28410_v5  ;;  %v28422_v31 = vmul.f32 %v28086_v37, %v32896_v26  ;;  %v32902_v5 = vsub.f32 %v32901_v20, %v27958_v38  ;;  %v32907_v26 = vld [vmem:[#allocation57_spill] sm:$0xff] }
 0xa13   :  { %32894 = vst [vmem:[#allocation38_spill] sm:$0xff] %v28416_v21  ;;  %v28428_v13 = vmul.f32 %v28086_v37, %v32899_v0  ;;  %v32905_v21 = vsub.f32 %v32904_v43, %v27958_v38  ;;  %v32910_v0 = vld [vmem:[#allocation59_spill] sm:$0xff]  ;;  %v32247_v43 = vmax.f32 %v28118_v33, 0.0 }
 0xa14   :  { %32897 = vst [vmem:[#allocation42_spill] sm:$0xff] %v28422_v31  ;;  %v28434_v7 = vmul.f32 %v28086_v37, %v32902_v5  ;;  %v32908_v31 = vsub.f32 %v32907_v26, %v27958_v38  ;;  %v32246_v5 = vmax.f32 %v28106_v14, 0.0  ;;  %v32250_v26 = vmax.f32 %v28136_v15, 0.0 }
 0xa15   :  { %32900 = vst [vmem:[#allocation44_spill] sm:$0xff] %v28428_v13  ;;  %v28440_v47 = vmul.f32 %v28086_v37, %v32905_v21  ;;  %v32911_v13 = vsub.f32 %v32910_v0, %v27958_v38  ;;  %v32248_v21 = vmax.f32 %v28124_v55, 0.0  ;;  %11857 = vst.msk [vmem:[#allocation2 + $0x48] sm:$0xff] %vm27_vm1, %v32247_v43  ;;  %v32253_v0 = vmax.f32 %v28173_v11, 0.0 }
 0xa16   :  { %32903 = vst [vmem:[#allocation41_spill] sm:$0xff] %v28434_v7  ;;  %v28446_v6 = vmul.f32 %v28086_v37, %v32908_v31  ;;  %v32245_v7 = vmax.f32 %v28112_v8, 0.0  ;;  %v32251_v31 = vmax.f32 %v28142_v58, 0.0  ;;  %11855 = vst.msk [vmem:[#allocation2 + $0x28] sm:$0xff] %vm27_vm1, %v32246_v5  ;;  %v32254_v38 = vmax.f32 %v28179_v49, 0.0 }
 0xa17   :  { %32906 = vst [vmem:[#allocation43_spill] sm:$0xff] %v28440_v47  ;;  %v28452_v20 = vmul.f32 %v28086_v37, %v32911_v13  ;;  %v32249_v47 = vmax.f32 %v28130_v1, 0.0  ;;  %v32255_v37 = vmax.f32 %v28185_v25, 0.0  ;;  %v32256_v13 = vmax.f32 %v28194_v54, 0.0  ;;  %11858 = vst.msk [vmem:[#allocation2 + $0x50] sm:$0xff] %vm27_vm1, %v32248_v21 }
 0xa18   :  { %32909 = vst [vmem:[#allocation49_spill] sm:$0xff] %v28446_v6  ;;  %v32252_v6 = vmax.f32 %v28149_v44, 0.0  ;;  %11856 = vst.msk [vmem:[#allocation2 + $0x30] sm:$0xff] %vm27_vm1, %v32245_v7  ;;  %v32257_v7 = vmax.f32 %v28200_v45, 0.0  ;;  %v32258_v43 = vmax.f32 %v28224_v28, 0.0  ;;  %v32259_v21 = vmax.f32 %v28230_v24, 0.0 }
 0xa19   :  { %11859 = vst.msk [vmem:[#allocation2 + $0x68] sm:$0xff] %vm27_vm1, %v32249_v47  ;;  %11860 = vst.msk [vmem:[#allocation2 + $0x70] sm:$0xff] %vm27_vm1, %v32250_v26  ;;  %v32912_v47 = vmax.f32 %v28155_v61, 0.0  ;;  %v32913_v26 = vmax.f32 %v28161_v27, 0.0  ;;  %v32260_v5 = vmax.f32 %v28236_v10, 0.0 }
 0xa1a   :  { %11861 = vst.msk [vmem:[#allocation2 + $0x88] sm:$0xff] %vm27_vm1, %v32251_v31  ;;  %11862 = vst.msk [vmem:[#allocation2 + $0x90] sm:$0xff] %vm27_vm1, %v32252_v6  ;;  %v32914_v31 = vmax.f32 %v28167_v18, 0.0  ;;  %v32261_v6 = vmax.f32 %v28242_v51, 0.0 }
 0xa1b   :  { %11863 = vst.msk [vmem:[#allocation2 + $0xa8] sm:$0xff] %vm27_vm1, %v32912_v47  ;;  %11864 = vst.msk [vmem:[#allocation2 + $0xb0] sm:$0xff] %vm27_vm1, %v32913_v26  ;;  %v32262_v47 = vmax.f32 %v28248_v29, 0.0  ;;  %v32265_v26 = vmax.f32 %v28284_v48, 0.0 }
 0xa1c   :  { %11865 = vst.msk [vmem:[#allocation2 + $0xc8] sm:$0xff] %vm27_vm1, %v32914_v31  ;;  %11866 = vst.msk [vmem:[#allocation2 + $0xd0] sm:$0xff] %vm27_vm1, %v32253_v0  ;;  %v32263_v31 = vmax.f32 %v28272_v62, 0.0  ;;  %v32264_v0 = vmax.f32 %v28278_v36, 0.0 }
 0xa1d   :  { %11867 = vst.msk [vmem:[#allocation2 + $0xe8] sm:$0xff] %vm27_vm1, %v32254_v38  ;;  %11868 = vst.msk [vmem:[#allocation2 + $0xf0] sm:$0xff] %vm27_vm1, %v32255_v37  ;;  %v32915_v38 = vmax.f32 %v28206_v23, 0.0  ;;  %v32916_v37 = vmax.f32 %v28212_v63, 0.0 }
 0xa1e   :  { %11869 = vst.msk [vmem:[#allocation2 + $0x108] sm:$0xff] %vm27_vm1, %v32256_v13  ;;  %11870 = vst.msk [vmem:[#allocation2 + $0x110] sm:$0xff] %vm27_vm1, %v32257_v7  ;;  %v32917_v13 = vmax.f32 %v28218_v4, 0.0  ;;  %v32266_v7 = vmax.f32 %v28290_v40, 0.0 }
 0xa1f   :  { %11871 = vst.msk [vmem:[#allocation2 + $0x128] sm:$0xff] %vm27_vm1, %v32915_v38  ;;  %11872 = vst.msk [vmem:[#allocation2 + $0x130] sm:$0xff] %vm27_vm1, %v32916_v37  ;;  %v32267_v38 = vmax.f32 %v28296_v9, 0.0  ;;  %v32270_v37 = vmax.f32 %v28332_v12, 0.0 }
 0xa20   :  { %11873 = vst.msk [vmem:[#allocation2 + $0x148] sm:$0xff] %vm27_vm1, %v32917_v13  ;;  %11874 = vst.msk [vmem:[#allocation2 + $0x150] sm:$0xff] %vm27_vm1, %v32258_v43  ;;  %v32268_v13 = vmax.f32 %v28320_v19, 0.0  ;;  %v32269_v43 = vmax.f32 %v28326_v59, 0.0 }
 0xa21   :  { %11875 = vst.msk [vmem:[#allocation2 + $0x168] sm:$0xff] %vm27_vm1, %v32259_v21  ;;  %11876 = vst.msk [vmem:[#allocation2 + $0x170] sm:$0xff] %vm27_vm1, %v32260_v5  ;;  %v32918_v21 = vmax.f32 %v28254_v41, 0.0  ;;  %v32919_v5 = vmax.f32 %v28260_v2, 0.0 }
 0xa22   :  { %11877 = vst.msk [vmem:[#allocation2 + $0x188] sm:$0xff] %vm27_vm1, %v32261_v6  ;;  %11878 = vst.msk [vmem:[#allocation2 + $0x190] sm:$0xff] %vm27_vm1, %v32262_v47  ;;  %v32920_v6 = vmax.f32 %v28266_v16, 0.0  ;;  %v32271_v47 = vmax.f32 %v28335_v17, 0.0 }
 0xa23   :  { %11879 = vst.msk [vmem:[#allocation2 + $0x1a8] sm:$0xff] %vm27_vm1, %v32918_v21  ;;  %11880 = vst.msk [vmem:[#allocation2 + $0x1b0] sm:$0xff] %vm27_vm1, %v32919_v5  ;;  %v32276_v21 = vmax.f32 %v28350_v60, 0.0  ;;  %v12019_v5 = vld [vmem:[#allocation2 + $0x30] sm:$0xff]  ;;  %v12020_v60 = vld [vmem:[#allocation2 + $0x48] sm:$0xff] }
 0xa24   :  { %11881 = vst.msk [vmem:[#allocation2 + $0x1c8] sm:$0xff] %vm27_vm1, %v32920_v6  ;;  %11882 = vst.msk [vmem:[#allocation2 + $0x1d0] sm:$0xff] %vm27_vm1, %v32263_v31  ;;  %v32272_v6 = vmax.f32 %v28338_v35, 0.0  ;;  %v32930_v31 = vld [vmem:[#allocation40_spill] sm:$0xff]  ;;  %v32944_v35 = vld [vmem:[#allocation49_spill] sm:$0xff] }
 0xa25   :  { %11883 = vst.msk [vmem:[#allocation2 + $0x1e8] sm:$0xff] %vm27_vm1, %v32264_v0  ;;  %11884 = vst.msk [vmem:[#allocation2 + $0x1f0] sm:$0xff] %vm27_vm1, %v32265_v26  ;;  %v32921_v0 = vmax.f32 %v28302_v53, 0.0  ;;  %v32922_v26 = vmax.f32 %v28308_v57, 0.0 }
 0xa26   :  { %11885 = vst.msk [vmem:[#allocation2 + $0x208] sm:$0xff] %vm27_vm1, %v32266_v7  ;;  %11886 = vst.msk [vmem:[#allocation2 + $0x210] sm:$0xff] %vm27_vm1, %v32267_v38  ;;  %v32923_v7 = vmax.f32 %v28314_v52, 0.0  ;;  %v32929_v38 = vld [vmem:[#allocation39_spill] sm:$0xff] }
 0xa27   :  { %11887 = vst.msk [vmem:[#allocation2 + $0x268] sm:$0xff] %vm27_vm1, %v32921_v0  ;;  %11888 = vst.msk [vmem:[#allocation2 + $0x270] sm:$0xff] %vm27_vm1, %v32922_v26  ;;  %v32927_v0 = vld [vmem:[#allocation5_spill] sm:$0xff]  ;;  %v32934_v26 = vld [vmem:[#allocation36_spill] sm:$0xff] }
 0xa28   :  { %11889 = vst.msk [vmem:[#allocation2 + $0x288] sm:$0xff] %vm27_vm1, %v32923_v7  ;;  %11890 = vst.msk [vmem:[#allocation2 + $0x290] sm:$0xff] %vm27_vm1, %v32268_v13  ;;  %v32928_v7 = vld [vmem:[#allocation37_spill] sm:$0xff]  ;;  %v12018_v13 = vld [vmem:[#allocation2 + $0x28] sm:$0xff] }
 0xa29   :  { %11891 = vst.msk [vmem:[#allocation2 + $0x2a8] sm:$0xff] %vm27_vm1, %v32269_v43  ;;  %11892 = vst.msk [vmem:[#allocation2 + $0x2b0] sm:$0xff] %vm27_vm1, %v32270_v37  ;;  %v32924_v43 = vmax.f32 %v28341_v42, 0.0  ;;  %v32925_v37 = vmax.f32 %v28344_v22, 0.0  ;;  %v32936_v22 = vld [vmem:[#allocation42_spill] sm:$0xff]  ;;  %v32937_v42 = vld [vmem:[#allocation44_spill] sm:$0xff] }
 0xa2a   :  { %11893 = vst.msk [vmem:[#allocation2 + $0x2c8] sm:$0xff] %vm27_vm1, %v32271_v47  ;;  %11894 = vst.msk [vmem:[#allocation2 + $0x2d0] sm:$0xff] %vm27_vm1, %v32272_v6  ;;  %v32926_v47 = vmax.f32 %v28347_v34, 0.0  ;;  %v32935_v34 = vld [vmem:[#allocation38_spill] sm:$0xff]  ;;  %v32941_v6 = vmax.f32 %v28380_v46, 0.0 }
 0xa2b   :  { %11895 = vst.msk [vmem:[#allocation2 + $0x2e8] sm:$0xff] %vm27_vm1, %v32924_v43  ;;  %11896 = vst.msk [vmem:[#allocation2 + $0x2f0] sm:$0xff] %vm27_vm1, %v32925_v37  ;;  %v32931_v43 = vmax.f32 %v28353_v32, 0.0  ;;  %v32932_v37 = vmax.f32 %v28356_v30, 0.0  ;;  %v32943_v30 = vld [vmem:[#allocation43_spill] sm:$0xff]  ;;  %v32948_v32 = vmax.f32 %v32930_v31, 0.0 }
 0xa2c   :  { %11897 = vst.msk [vmem:[#allocation2 + $0x308] sm:$0xff] %vm27_vm1, %v32926_v47  ;;  %11898 = vst.msk [vmem:[#allocation2 + $0x310] sm:$0xff] %vm27_vm1, %v32276_v21  ;;  %v32933_v47 = vmax.f32 %v28359_v39, 0.0  ;;  %v12021_v21 = vld [vmem:[#allocation2 + $0x50] sm:$0xff] }
 0xa2d   :  { %11899 = vst.msk [vmem:[#allocation2 + $0x328] sm:$0xff] %vm27_vm1, %v32931_v43  ;;  %11900 = vst.msk [vmem:[#allocation2 + $0x330] sm:$0xff] %vm27_vm1, %v32932_v37  ;;  %v32938_v43 = vmax.f32 %v28362_v3, 0.0  ;;  %v32939_v37 = vmax.f32 %v28368_v56, 0.0  ;;  %v32942_v39 = vld [vmem:[#allocation41_spill] sm:$0xff]  ;;  %v32950_v56 = vmax.f32 %v28124_v55, 0.0 }
 0xa2e   :  { %11901 = vst.msk [vmem:[#allocation2 + $0x348] sm:$0xff] %vm27_vm1, %v32933_v47  ;;  %v32940_v47 = vmax.f32 %v28374_v50, 0.0  ;;  %11905 = vst.msk [vmem:[#allocation2 + $0x388] sm:$0xff] %vm27_vm1, %v32941_v6  ;;  %v32947_v6 = vmax.f32 %v32929_v38, 0.0  ;;  %v32956_v55 = vmax.f32 %v28112_v8, 0.0  ;;  %v32963_v8 = vmax.f32 %v28142_v58, 0.0 }
 0xa2f   :  { %11902 = vst.msk [vmem:[#allocation2 + $0x350] sm:$0xff] %vm27_vm1, %v32938_v43  ;;  %11903 = vst.msk [vmem:[#allocation2 + $0x368] sm:$0xff] %vm27_vm1, %v32939_v37  ;;  %v32945_v37 = vmax.f32 %v32927_v0, 0.0  ;;  %v32949_v43 = vmax.f32 %v28118_v33, 0.0  ;;  %v32951_v0 = vmax.f32 %v32934_v26, 0.0  ;;  %v32955_v33 = vmax.f32 %v28106_v14, 0.0 }
 0xa30   :  { %11904 = vst.msk [vmem:[#allocation2 + $0x370] sm:$0xff] %vm27_vm1, %v32940_v47  ;;  %v32946_v47 = vmax.f32 %v32928_v7, 0.0  ;;  %11908 = vst.msk [vmem:[#allocation2 + $0x3b0] sm:$0xff] %vm27_vm1, %v32947_v6  ;;  %v32954_v6 = vmax.f32 %v32937_v42, 0.0  ;;  %v32962_v14 = vmax.f32 %v28452_v20, 0.0  ;;  %v32969_v58 = vmax.f32 %v28179_v49, 0.0 }
 0xa31   :  { %11906 = vst.msk [vmem:[#allocation2 + $0x390] sm:$0xff] %vm27_vm1, %v32945_v37  ;;  %11909 = vst.msk [vmem:[#allocation2 + $0x3c8] sm:$0xff] %vm27_vm1, %v32948_v32  ;;  %v11047_v3 = vpack.c.bf16 %v32950_v56, %v32949_v43  ;;  %v32952_v37 = vmax.f32 %v32935_v34, 0.0  ;;  %v11046_v32 = vpack.c.bf16 %v32956_v55, %v32955_v33  ;;  %v32957_v56 = vmax.f32 %v28130_v1, 0.0 }
 0xa32   :  { %11907 = vst.msk [vmem:[#allocation2 + $0x3a8] sm:$0xff] %vm27_vm1, %v32946_v47  ;;  %11910 = vst.msk [vmem:[#allocation2 + $0x3d0] sm:$0xff] %vm27_vm1, %v32951_v0  ;;  %v32953_v47 = vmax.f32 %v32936_v22, 0.0  ;;  %v32958_v0 = vmax.f32 %v28136_v15, 0.0  ;;  %v12081_v34 = vpack.c.bf16 %v12019_v5, %v12018_v13  ;;  %v32964_v1 = vmax.f32 %v28149_v44, 0.0 }
 0xa33   :  { %11911 = vst.msk [vmem:[#allocation2 + $0x3e8] sm:$0xff] %vm27_vm1, %v32952_v37  ;;  %11913 = vst.msk [vmem:[#allocation2 + $0x408] sm:$0xff] %vm27_vm1, %v32954_v6  ;;  %v32959_v37 = vmax.f32 %v32942_v39, 0.0  ;;  %v32961_v6 = vmax.f32 %v32944_v35, 0.0  ;;  %v12082_v13 = vpack.c.bf16 %v12021_v21, %v12020_v60  ;;  %v32965_v5 = vmax.f32 %v28155_v61, 0.0  ;;  %21516 = vmatprep.mubr.msk.bf16.mxu0 %vm27_vm1, %v11046_v32  ;;  %v32971_v61 = vld [vmem:[#allocation60_spill] sm:$0xff] }
 0xa34   :  { %11912 = vst.msk [vmem:[#allocation2 + $0x3f0] sm:$0xff] %vm27_vm1, %v32953_v47  ;;  %v11048_v43 = vpack.c.bf16 %v32958_v0, %v32957_v56  ;;  %v32960_v47 = vmax.f32 %v32943_v30, 0.0  ;;  %11918 = vst.msk [vmem:[#allocation2 + $0x450] sm:$0xff] %vm27_vm1, %v32962_v14  ;;  %v11049_v15 = vpack.c.bf16 %v32964_v1, %v32963_v8  ;;  %v32966_v33 = vmax.f32 %v28161_v27, 0.0  ;;  %21649 = vmatmul.mubr.msk.bf16.vlgmr.msra.gmra.mrb[64].mxu1 %vm27_vm1, %v12081_v34  ;;  %v12022_v32 = vld [vmem:[#allocation2 + $0x68] sm:$0xff] }
 0xa35   :  { %11914 = vst.msk [vmem:[#allocation2 + $0x410] sm:$0xff] %vm27_vm1, %v32959_v37  ;;  %11917 = vst.msk [vmem:[#allocation2 + $0x448] sm:$0xff] %vm27_vm1, %v32961_v6  ;;  %v32967_v56 = vmax.f32 %v28167_v18, 0.0  ;;  %v32968_v0 = vmax.f32 %v28173_v11, 0.0  ;;  %v32970_v44 = vmax.f32 %v28185_v25, 0.0  ;;  %21517 = vmatmul.mubr.msk.bf16.vlgmr.msra.gmra.mrb[128].mxu0 %vm27_vm1, %v11047_v3  ;;  %21713 = vmatpush3.bf16.msra.mxu1 %v32971_v61  ;;  %v32972_v27 = vmax.f32 %v28194_v54, 0.0 }
 0xa36   :  { %11915 = vst.msk [vmem:[#allocation2 + $0x428] sm:$0xff] %vm27_vm1, %v32960_v47  ;;  %v11050_v55 = vpack.c.bf16 %v32966_v33, %v32965_v5  ;;  %v32973_v60 = vmax.f32 %v28200_v45, 0.0  ;;  %21520 = vmatprep.mubr.msk.bf16.mxu0 %vm27_vm1, %v11048_v43  ;;  %21652 = vmatprep.mubr.msk.bf16.mxu1 %vm27_vm1, %v12082_v13  ;;  %v32974_v18 = vmax.f32 %v28206_v23, 0.0  ;;  %v32975_v11 = vmax.f32 %v28212_v63, 0.0  ;;  %v12023_v54 = vld [vmem:[#allocation2 + $0x70] sm:$0xff]  ;;  %v12024_v8 = vld [vmem:[#allocation2 + $0x88] sm:$0xff] }
 0xa37   :  { %v11051_v37 = vpack.c.bf16 %v32968_v0, %v32967_v56  ;;  %v11052_v47 = vpack.c.bf16 %v32970_v44, %v32969_v58  ;;  %v32976_v25 = vmax.f32 %v28218_v4, 0.0  ;;  %v32977_v34 = vmax.f32 %v28224_v28, 0.0  ;;  %v12025_v4 = vld [vmem:[#allocation2 + $0x90] sm:$0xff] }
 0xa38   :  { %v11053_v21 = vpack.c.bf16 %v32973_v60, %v32972_v27  ;;  %v11054_v49 = vpack.c.bf16 %v32975_v11, %v32974_v18  ;;  %v32978_v45 = vmax.f32 %v28230_v24, 0.0  ;;  %v32979_v6 = vmax.f32 %v28236_v10, 0.0 }
 0xa39   :  { %v28752_v3 = vpack.c.bf16 %v32977_v34, %v32976_v25  ;;  %v32980_v14 = vmax.f32 %v28242_v51, 0.0  ;;  %v32981_v23 = vmax.f32 %v28248_v29, 0.0  ;;  %v32982_v28 = vmax.f32 %v28254_v41, 0.0 }
 0xa3a   :  { %v28758_v43 = vpack.c.bf16 %v32979_v6, %v32978_v45  ;;  %v32983_v1 = vmax.f32 %v28260_v2, 0.0  ;;  %v32984_v24 = vmax.f32 %v28266_v16, 0.0  ;;  %v32985_v10 = vmax.f32 %v28272_v62, 0.0 }
 0xa3b   :  { %v28764_v63 = vpack.c.bf16 %v32981_v23, %v32980_v14  ;;  %v32986_v51 = vmax.f32 %v28278_v36, 0.0  ;;  %v32987_v29 = vmax.f32 %v28284_v48, 0.0  ;;  %v32988_v56 = vmax.f32 %v28290_v40, 0.0  ;;  %v33009_v14 = vld [vmem:[#allocation45_spill] sm:$0xff] }
 0xa3c   :  { %v28770_v13 = vpack.c.bf16 %v32983_v1, %v32982_v28  ;;  %v28776_v5 = vpack.c.bf16 %v32985_v10, %v32984_v24  ;;  %v32989_v41 = vmax.f32 %v28296_v9, 0.0  ;;  %v12083_v2 = vpack.c.bf16 %v12023_v54, %v12022_v32  ;;  %v33003_v32 = vld [vmem:[#allocation65_spill] sm:$0xff]  ;;  %v33005_v54 = vld [vmem:[#allocation46_spill] sm:$0xff] }
 0xa3d   :  { %v28782_v33 = vpack.c.bf16 %v32987_v29, %v32986_v51  ;;  %v32990_v58 = vmax.f32 %v28302_v53, 0.0  ;;  %v32991_v16 = vmax.f32 %v28308_v57, 0.0  ;;  %v32992_v44 = vmax.f32 %v28314_v52, 0.0  ;;  %v32997_v53 = vld [vmem:[#allocation62_spill] sm:$0xff]  ;;  %v32999_v52 = vld [vmem:[#allocation63_spill] sm:$0xff]  ;;  %21521 = vmatmul.mubr.msk.bf16.gmra.mrb[132].mxu0 %vm27_vm1, %v11049_v15  ;;  %v33015_v51 = vld [vmem:[#allocation52_spill] sm:$0xff] }
 0xa3e   :  { %v28788_v0 = vpack.c.bf16 %v32989_v41, %v32988_v56  ;;  %v32993_v36 = vmax.f32 %v28320_v19, 0.0  ;;  %v12084_v61 = vpack.c.bf16 %v12025_v4, %v12024_v8  ;;  %v32994_v40 = vmax.f32 %v28326_v59, 0.0  ;;  %21653 = vmatmul.mubr.msk.bf16.gmra.mrb[68].mxu1 %vm27_vm1, %v12083_v2  ;;  %v33001_v19 = vld [vmem:[#allocation64_spill] sm:$0xff]  ;;  %v33011_v4 = vld [vmem:[#allocation47_spill] sm:$0xff]  ;;  %v33013_v1 = vld [vmem:[#allocation50_spill] sm:$0xff]  ;;  %21524 = vmatprep.mubr.msk.bf16.mxu0 %vm27_vm1, %v11050_v55 }
 0xa3f   :  { %v28794_v62 = vpack.c.bf16 %v32991_v16, %v32990_v58  ;;  %v32995_v9 = vmax.f32 %v28332_v12, 0.0  ;;  %v32996_v60 = vmax.f32 %v28335_v17, 0.0  ;;  %v32998_v18 = vmax.f32 %v32997_v53, 0.0  ;;  %v33007_v17 = vld [vmem:[#allocation48_spill] sm:$0xff]  ;;  %v33019_v2 = vld [vmem:[#allocation5_spill] sm:$0xff] }
 0xa40   :  { %v28800_v48 = vpack.c.bf16 %v32993_v36, %v32992_v44  ;;  %v33000_v11 = vmax.f32 %v32999_v52, 0.0  ;;  %v33002_v25 = vmax.f32 %v33001_v19, 0.0  ;;  %v33004_v59 = vmax.f32 %v33003_v32, 0.0  ;;  %21656 = vmatprep.mubr.msk.bf16.mxu1 %vm27_vm1, %v12084_v61  ;;  %v12026_v44 = vld [vmem:[#allocation2 + $0xa8] sm:$0xff]  ;;  %v12027_v36 = vld [vmem:[#allocation2 + $0xb0] sm:$0xff] }
 0xa41   :  { %v28806_v27 = vpack.c.bf16 %v32995_v9, %v32994_v40  ;;  %v28812_v57 = vpack.c.bf16 %v32998_v18, %v32996_v60  ;;  %v33006_v12 = vmax.f32 %v33005_v54, 0.0  ;;  %v33008_v6 = vmax.f32 %v33007_v17, 0.0  ;;  %v12028_v53 = vld [vmem:[#allocation2 + $0xc8] sm:$0xff]  ;;  %v33025_v18 = vld [vmem:[#allocation38_spill] sm:$0xff]  ;;  %v33031_v32 = vld [vmem:[#allocation61_spill] sm:$0xff] }
 0xa42   :  { %v28819_v34 = vpack.c.bf16 %v33002_v25, %v33000_v11  ;;  %v33010_v23 = vmax.f32 %v33009_v14, 0.0  ;;  %v33012_v28 = vmax.f32 %v33011_v4, 0.0  ;;  %v33014_v24 = vmax.f32 %v33013_v1, 0.0  ;;  %v12032_v14 = vld [vmem:[#allocation2 + $0x108] sm:$0xff] }
 0xa43   :  { %v28825_v45 = vpack.c.bf16 %v33006_v12, %v33004_v59  ;;  %v33016_v29 = vmax.f32 %v33015_v51, 0.0  ;;  %v33017_v15 = vmax.f32 %v28374_v50, 0.0  ;;  %v33018_v41 = vmax.f32 %v28380_v46, 0.0  ;;  %v12029_v46 = vld [vmem:[#allocation2 + $0xd0] sm:$0xff]  ;;  %v12034_v1 = vld [vmem:[#allocation2 + $0x128] sm:$0xff] }
 0xa44   :  { %v28833_v8 = vpack.c.bf16 %v33010_v23, %v33008_v6  ;;  %v28839_v10 = vpack.c.bf16 %v33014_v24, %v33012_v28  ;;  %v33020_v58 = vmax.f32 %v33019_v2, 0.0  ;;  %v33021_v61 = vmax.f32 %v32928_v7, 0.0  ;;  %v28898_v6 = vld [vmem:[%s32076_s3 + $0x4] sm:$0x3]  ;;  %v12033_v23 = vld [vmem:[#allocation2 + $0x110] sm:$0xff]  ;;  %v12036_v24 = vld [vmem:[#allocation2 + $0x148] sm:$0xff] }
 0xa45   :  { %v28846_v56 = vpack.c.bf16 %v33017_v15, %v33016_v29  ;;  %v33022_v40 = vmax.f32 %v32929_v38, 0.0  ;;  %v33023_v55 = vmax.f32 %v32930_v31, 0.0  ;;  %v33024_v50 = vmax.f32 %v32934_v26, 0.0  ;;  %v5631_v31 = vld [vmem:[%s32078_s4] sm:$0x3]  ;;  %23992 = vmatprep.subr.msk.bf16.mxu1 %vm537_vm0, %v28898_v6  ;;  %21525 = vmatmul.mubr.msk.bf16.gmra.mrb[136].mxu0 %vm27_vm1, %v11051_v37  ;;  %v12035_v37 = vld [vmem:[#allocation2 + $0x130] sm:$0xff] }
 0xa46   :  { %v28852_v16 = vpack.c.bf16 %v33020_v58, %v33018_v41  ;;  %v33026_v52 = vmax.f32 %v33025_v18, 0.0  ;;  %v33027_v11 = vmax.f32 %v32936_v22, 0.0  ;;  %v33028_v7 = vmax.f32 %v32937_v42, 0.0  ;;  %23989 = vmatprep.subr.msk.bf16.mxu0 %vm537_vm0, %v5631_v31  ;;  %21528 = vmatprep.mubr.msk.bf16.mxu0 %vm27_vm1, %v11052_v47  ;;  %v12037_v51 = vld [vmem:[#allocation2 + $0x150] sm:$0xff]  ;;  %v12040_v41 = vld [vmem:[#allocation2 + $0x188] sm:$0xff] }
 0xa47   :  { %v28858_v9 = vpack.c.bf16 %v33022_v40, %v33021_v61  ;;  %v28864_v60 = vpack.c.bf16 %v33024_v50, %v33023_v55  ;;  %v33029_v38 = vmax.f32 %v32942_v39, 0.0  ;;  %v33030_v26 = vmax.f32 %v32943_v30, 0.0  ;;  %v12039_v15 = vld [vmem:[#allocation2 + $0x170] sm:$0xff]  ;;  %v12046_v50 = vld [vmem:[#allocation2 + $0x1e8] sm:$0xff] }
 0xa48   :  { %v28870_v19 = vpack.c.bf16 %v33027_v11, %v33026_v52  ;;  %v33032_v59 = vmax.f32 %v33031_v32, 0.0  ;;  %v33033_v22 = vmax.f32 %v32944_v35, 0.0  ;;  %v33034_v12 = vmax.f32 %v28452_v20, 0.0  ;;  %v12030_v35 = vld [vmem:[#allocation2 + $0xe8] sm:$0xff]  ;;  %v12031_v20 = vld [vmem:[#allocation2 + $0xf0] sm:$0xff] }
 0xa49   :  { %v28876_v25 = vpack.c.bf16 %v33029_v38, %v33028_v7  ;;  %v12085_v42 = vpack.c.bf16 %v12027_v36, %v12026_v44  ;;  %v11564_v39 = vsel %vm537_vm0, %v5631_v31, 0  ;;  %v12086_v30 = vpack.c.bf16 %v12029_v46, %v12028_v53  ;;  %v12043_v44 = vld [vmem:[#allocation2 + $0x1b0] sm:$0xff]  ;;  %v12044_v36 = vld [vmem:[#allocation2 + $0x1c8] sm:$0xff] }
 0xa4a   :  { %v28885_v54 = vpack.c.bf16 %v33032_v59, %v33030_v26  ;;  %v28891_v17 = vpack.c.bf16 %v33034_v12, %v33033_v22  ;;  %21581 = vmatpush3.bf16.msra.mxu0 %v11564_v39  ;;  %v12087_v4 = vpack.c.bf16 %v12031_v20, %v12030_v35  ;;  %v12088_v28 = vpack.c.bf16 %v12033_v23, %v12032_v14  ;;  %v12049_v55 = vld [vmem:[#allocation2 + $0x250] sm:$0xff]  ;;  %v12052_v52 = vld [vmem:[#allocation2 + $0x288] sm:$0xff] }
 0xa4b   :  { %21657 = vmatmul.mubr.msk.bf16.gmra.mrb[72].mxu1 %vm27_vm1, %v12085_v42  ;;  %v12089_v29 = vpack.c.bf16 %v12035_v37, %v12034_v1  ;;  %v12090_v47 = vpack.c.bf16 %v12037_v51, %v12036_v24  ;;  %v12051_v18 = vld [vmem:[#allocation2 + $0x270] sm:$0xff]  ;;  %v12056_v31 = vld [vmem:[#allocation2 + $0x2c8] sm:$0xff] }
 0xa4c   :  { %21660 = vmatprep.mubr.msk.bf16.mxu1 %vm27_vm1, %v12086_v30  ;;  %v12055_v38 = vld [vmem:[#allocation2 + $0x2b0] sm:$0xff]  ;;  %v12060_v22 = vld [vmem:[#allocation2 + $0x308] sm:$0xff] }
 0xa4d   :  { %21529 = vmatmul.mubr.msk.bf16.gmra.mrb[140].mxu0 %vm27_vm1, %v11053_v21  ;;  %v12038_v21 = vld [vmem:[#allocation2 + $0x168] sm:$0xff]  ;;  %v12059_v59 = vld [vmem:[#allocation2 + $0x2f0] sm:$0xff] }
 0xa4e   :  { %21532 = vmatprep.mubr.msk.bf16.mxu0 %vm27_vm1, %v11054_v49  ;;  %v12041_v49 = vld [vmem:[#allocation2 + $0x190] sm:$0xff]  ;;  %v12091_v2 = vpack.c.bf16 %v12039_v15, %v12038_v21  ;;  %v12064_v30 = vld [vmem:[#allocation2 + $0x348] sm:$0xff] }
 0xa4f   :  { %v12092_v58 = vpack.c.bf16 %v12041_v49, %v12040_v41  ;;  %v12063_v39 = vld [vmem:[#allocation2 + $0x330] sm:$0xff]  ;;  %v12068_v23 = vld [vmem:[#allocation2 + $0x388] sm:$0xff] }
 0xa50   :  { %v12067_v14 = vld [vmem:[#allocation2 + $0x370] sm:$0xff]  ;;  %v12072_v37 = vld [vmem:[#allocation2 + $0x3c8] sm:$0xff] }
 0xa51   :  { %v12071_v1 = vld [vmem:[#allocation2 + $0x3b0] sm:$0xff]  ;;  %v12078_v49 = vld [vmem:[#allocation2 + $0x428] sm:$0xff] }
 0xa52   :  { %v11920_v41 = vld [vmem:[#allocation2 + $0xf] sm:$0xff] }
 0xa53   :  { %21661 = vmatmul.mubr.msk.bf16.gmra.mrb[76].mxu1 %vm27_vm1, %v12087_v4 }
 0xa54   :  { %21664 = vmatprep.mubr.msk.bf16.mxu1 %vm27_vm1, %v12088_v28 }
 0xa55   :  { %21533 = vmatmul.mubr.msk.bf16.gmra.mrb[144].mxu0 %vm27_vm1, %v28752_v3  ;;  %v12042_v3 = vld [vmem:[#allocation2 + $0x1a8] sm:$0xff] }
 0xa56   :  { %21536 = vmatprep.mubr.msk.bf16.mxu0 %vm27_vm1, %v28758_v43  ;;  %v12045_v43 = vld [vmem:[#allocation2 + $0x1d0] sm:$0xff]  ;;  %v12093_v61 = vpack.c.bf16 %v12043_v44, %v12042_v3  ;;  %v33035_v3 = vld [vmem:[#allocation18_spill] sm:$0xff] }
 0xa57   :  { %v12094_v40 = vpack.c.bf16 %v12045_v43, %v12044_v36  ;;  %v11922_v44 = vld [vmem:[#allocation2 + $0x2f] sm:$0xff]  ;;  %v11923_v36 = vld [vmem:[#allocation2 + $0x47] sm:$0xff] }
 0xa5b   :  { %21665 = vmatmul.mubr.msk.bf16.gmra.mrb[80].mxu1 %vm27_vm1, %v12089_v29  ;;  %v12075_v29 = vld [vmem:[#allocation2 + $0x3f0] sm:$0xff] }
 0xa5c   :  { %21668 = vmatprep.mubr.msk.bf16.mxu1 %vm27_vm1, %v12090_v47  ;;  %v12076_v47 = vld [vmem:[#allocation2 + $0x408] sm:$0xff] }
 0xa5d   :  { %21537 = vmatmul.mubr.msk.bf16.gmra.mrb[148].mxu0 %vm27_vm1, %v28764_v63  ;;  %v12048_v63 = vld [vmem:[#allocation2 + $0x248] sm:$0xff] }
 0xa5e   :  { %21540 = vmatprep.mubr.msk.bf16.mxu0 %vm27_vm1, %v28770_v13  ;;  %v12047_v13 = vld [vmem:[#allocation2 + $0x1f0] sm:$0xff]  ;;  %v12096_v53 = vpack.c.bf16 %v12049_v55, %v12048_v63  ;;  %v33036_v63 = vld [vmem:[#allocation16_spill] sm:$0xff] }
 0xa5f   :  { %v12095_v46 = vpack.c.bf16 %v12047_v13, %v12046_v50  ;;  %v33037_v55 = vld [vmem:[#allocation13_spill] sm:$0xff]  ;;  %v11927_v13 = vld [vmem:[#allocation2 + $0x87] sm:$0xff] }
 0xa60   :  { %v11926_v50 = vld [vmem:[#allocation2 + $0x6f] sm:$0xff] }
 0xa63   :  { %21669 = vmatmul.mubr.msk.bf16.gmra.mrb[84].mxu1 %vm27_vm1, %v12091_v2 }
 0xa64   :  { %21672 = vmatprep.mubr.msk.bf16.mxu1 %vm27_vm1, %v12092_v58 }
 0xa65   :  { %21541 = vmatmul.mubr.msk.bf16.gmra.mrb[152].mxu0 %vm27_vm1, %v28776_v5  ;;  %v12050_v5 = vld [vmem:[#allocation2 + $0x268] sm:$0xff] }
 0xa66   :  { %21544 = vmatprep.mubr.msk.bf16.mxu0 %vm27_vm1, %v28782_v33  ;;  %v12053_v33 = vld [vmem:[#allocation2 + $0x290] sm:$0xff]  ;;  %v12097_v11 = vpack.c.bf16 %v12051_v18, %v12050_v5  ;;  %v33038_v18 = vld [vmem:[#allocation14_spill] sm:$0xff] }
 0xa67   :  { %v12098_v7 = vpack.c.bf16 %v12053_v33, %v12052_v52  ;;  %v33039_v52 = vld [vmem:[#allocation17_spill] sm:$0xff]  ;;  %v11929_v33 = vld [vmem:[#allocation2 + $0xa7] sm:$0xff] }
 0xa6b   :  { %21673 = vmatmul.mubr.msk.bf16.gmra.mrb[88].mxu1 %vm27_vm1, %v12093_v61  ;;  %v13085_v61 = vsel %vm537_vm0, %v28898_v6, 0  ;;  %v11925_v6 = vld [vmem:[#allocation2 + $0x67] sm:$0xff] }
 0xa6c   :  { %21676 = vmatprep.mubr.msk.bf16.mxu1 %vm27_vm1, %v12094_v40 }
 0xa6d   :  { %21545 = vmatmul.mubr.msk.bf16.gmra.mrb[156].mxu0 %vm27_vm1, %v28788_v0  ;;  %v12054_v0 = vld [vmem:[#allocation2 + $0x2a8] sm:$0xff] }
 0xa6e   :  { %21548 = vmatprep.mubr.msk.bf16.mxu0 %vm27_vm1, %v28794_v62  ;;  %v12057_v62 = vld [vmem:[#allocation2 + $0x2d0] sm:$0xff]  ;;  %v12099_v26 = vpack.c.bf16 %v12055_v38, %v12054_v0 }
 0xa6f   :  { %v12100_v32 = vpack.c.bf16 %v12057_v62, %v12056_v31  ;;  %v11932_v0 = vld [vmem:[#allocation2 + $0xcf] sm:$0xff]  ;;  %v33040_v62 = vld [vmem:[#allocation19_spill] sm:$0xff] }
 0xa73   :  { %21677 = vmatmul.mubr.msk.bf16.gmra.mrb[92].mxu1 %vm27_vm1, %v12095_v46  ;;  %v29003_v46 = vpack.c.bf16 %v11926_v50, %v11925_v6  ;;  %v33052_v50 = vld [vmem:[#allocation4_spill] sm:$0xff] }
 0xa74   :  { %21680 = vmatprep.mubr.msk.bf16.mxu1 %vm27_vm1, %v12096_v53  ;;  %v11928_v53 = vld [vmem:[#allocation2 + $0x8f] sm:$0xff] }
 0xa75   :  { %21549 = vmatmul.mubr.msk.bf16.gmra.mrb[160].mxu0 %vm27_vm1, %v28800_v48  ;;  %v12058_v48 = vld [vmem:[#allocation2 + $0x2e8] sm:$0xff]  ;;  %v29005_v5 = vpack.c.bf16 %v11928_v53, %v11927_v13  ;;  %v33053_v13 = vld [vmem:[#allocation6_spill] sm:$0xff] }
 0xa76   :  { %21552 = vmatprep.mubr.msk.bf16.mxu0 %vm27_vm1, %v28806_v27  ;;  %v12061_v27 = vld [vmem:[#allocation2 + $0x310] sm:$0xff]  ;;  %v12101_v12 = vpack.c.bf16 %v12059_v59, %v12058_v48  ;;  %v11935_v59 = vld [vmem:[#allocation2 + $0x107] sm:$0xff] }
 0xa77   :  { %v12102_v42 = vpack.c.bf16 %v12061_v27, %v12060_v22  ;;  %v11934_v48 = vld [vmem:[#allocation2 + $0xef] sm:$0xff]  ;;  %v11957_v53 = vld [vmem:[#allocation2 + $0x2a7] sm:$0xff] }
 0xa78   :  { %v11936_v22 = vld [vmem:[#allocation2 + $0x10f] sm:$0xff] }
 0xa7b   :  { %21681 = vmatmul.mubr.msk.bf16.gmra.mrb[96].mxu1 %vm27_vm1, %v12097_v11  ;;  %v11930_v11 = vld [vmem:[#allocation2 + $0xaf] sm:$0xff] }
 0xa7c   :  { %21684 = vmatprep.mubr.msk.bf16.mxu1 %vm27_vm1, %v12098_v7  ;;  %v11931_v7 = vld [vmem:[#allocation2 + $0xc7] sm:$0xff]  ;;  %v29015_v38 = vpack.c.bf16 %v11930_v11, %v11929_v33  ;;  %v11960_v33 = vld [vmem:[#allocation2 + $0x2cf] sm:$0xff] }
 0xa7d   :  { %21553 = vmatmul.mubr.msk.bf16.gmra.mrb[164].mxu0 %vm27_vm1, %v28812_v57  ;;  %v12062_v57 = vld [vmem:[#allocation2 + $0x328] sm:$0xff]  ;;  %v29017_v31 = vpack.c.bf16 %v11932_v0, %v11931_v7  ;;  %v33054_v0 = vld [vmem:[#allocation9_spill] sm:$0xff] }
 0xa7e   :  { %21556 = vmatprep.mubr.msk.bf16.mxu0 %vm27_vm1, %v28819_v34  ;;  %v12065_v34 = vld [vmem:[#allocation2 + $0x350] sm:$0xff]  ;;  %v12103_v35 = vpack.c.bf16 %v12063_v39, %v12062_v57  ;;  %v33043_v57 = vld [vmem:[#allocation28_spill] sm:$0xff] }
 0xa7f   :  { %v12104_v20 = vpack.c.bf16 %v12065_v34, %v12064_v30  ;;  %v11937_v39 = vld [vmem:[#allocation2 + $0x127] sm:$0xff]  ;;  %v11938_v30 = vld [vmem:[#allocation2 + $0x12f] sm:$0xff] }
 0xa80   :  { %v11939_v34 = vld [vmem:[#allocation2 + $0x147] sm:$0xff] }
 0xa83   :  { %21685 = vmatmul.mubr.msk.bf16.gmra.mrb[100].mxu1 %vm27_vm1, %v12099_v26  ;;  %v33041_v26 = vld [vmem:[#allocation3_spill] sm:$0xff] }
 0xa84   :  { %21688 = vmatprep.mubr.msk.bf16.mxu1 %vm27_vm1, %v12100_v32  ;;  %v11933_v32 = vld [vmem:[#allocation2 + $0xe7] sm:$0xff] }
 0xa85   :  { %21557 = vmatmul.mubr.msk.bf16.gmra.mrb[168].mxu0 %vm27_vm1, %v28825_v45  ;;  %v12066_v45 = vld [vmem:[#allocation2 + $0x368] sm:$0xff]  ;;  %v29027_v27 = vpack.c.bf16 %v11934_v48, %v11933_v32 }
 0xa86   :  { %21560 = vmatprep.mubr.msk.bf16.mxu0 %vm27_vm1, %v28833_v8  ;;  %v12069_v8 = vld [vmem:[#allocation2 + $0x390] sm:$0xff]  ;;  %v12105_v4 = vpack.c.bf16 %v12067_v14, %v12066_v45  ;;  %v11963_v48 = vld [vmem:[#allocation2 + $0x307] sm:$0xff] }
 0xa87   :  { %v12106_v28 = vpack.c.bf16 %v12069_v8, %v12068_v23  ;;  %v33044_v14 = vld [vmem:[#allocation29_spill] sm:$0xff]  ;;  %v33045_v23 = vld [vmem:[#allocation30_spill] sm:$0xff]  ;;  %v11941_v8 = vld [vmem:[#allocation2 + $0x167] sm:$0xff] }
 0xa88   :  { %v11962_v32 = vld [vmem:[#allocation2 + $0x2ef] sm:$0xff] }
 0xa8b   :  { %21689 = vmatmul.mubr.msk.bf16.gmra.mrb[104].mxu1 %vm27_vm1, %v12101_v12  ;;  %v29029_v12 = vpack.c.bf16 %v11936_v22, %v11935_v59  ;;  %v11964_v59 = vld [vmem:[#allocation2 + $0x30f] sm:$0xff] }
 0xa8c   :  { %21692 = vmatprep.mubr.msk.bf16.mxu1 %vm27_vm1, %v12102_v42  ;;  %v33042_v42 = vld [vmem:[#allocation27_spill] sm:$0xff] }
 0xa8d   :  { %21561 = vmatmul.mubr.msk.bf16.gmra.mrb[172].mxu0 %vm27_vm1, %v28839_v10  ;;  %v12070_v10 = vld [vmem:[#allocation2 + $0x3a8] sm:$0xff] }
 0xa8e   :  { %21564 = vmatprep.mubr.msk.bf16.mxu0 %vm27_vm1, %v28846_v56  ;;  %v12073_v56 = vld [vmem:[#allocation2 + $0x3d0] sm:$0xff]  ;;  %v12107_v24 = vpack.c.bf16 %v12071_v1, %v12070_v10 }
 0xa8f   :  { %v12108_v51 = vpack.c.bf16 %v12073_v56, %v12072_v37  ;;  %v11944_v10 = vld [vmem:[#allocation2 + $0x18f] sm:$0xff]  ;;  %v33046_v56 = vld [vmem:[#allocation31_spill] sm:$0xff] }
 0xa93   :  { %21693 = vmatmul.mubr.msk.bf16.gmra.mrb[108].mxu1 %vm27_vm1, %v12103_v35  ;;  %v11940_v35 = vld [vmem:[#allocation2 + $0x14f] sm:$0xff] }
 0xa94   :  { %21696 = vmatprep.mubr.msk.bf16.mxu1 %vm27_vm1, %v12104_v20  ;;  %v29039_v20 = vpack.c.bf16 %v11938_v30, %v11937_v39  ;;  %v29041_v45 = vpack.c.bf16 %v11940_v35, %v11939_v34  ;;  %v33057_v39 = vld [vmem:[#allocation21_spill] sm:$0xff]  ;;  %v11965_v30 = vld [vmem:[#allocation2 + $0x327] sm:$0xff] }
 0xa95   :  { %21565 = vmatmul.mubr.msk.bf16.gmra.mrb[176].mxu0 %vm27_vm1, %v28852_v16  ;;  %v12074_v16 = vld [vmem:[#allocation2 + $0x3e8] sm:$0xff] }
 0xa96   :  { %21568 = vmatprep.mubr.msk.bf16.mxu0 %vm27_vm1, %v28858_v9  ;;  %v12077_v9 = vld [vmem:[#allocation2 + $0x410] sm:$0xff]  ;;  %v12109_v21 = vpack.c.bf16 %v12075_v29, %v12074_v16  ;;  %v11947_v29 = vld [vmem:[#allocation2 + $0x1c7] sm:$0xff] }
 0xa97   :  { %v12110_v15 = vpack.c.bf16 %v12077_v9, %v12076_v47  ;;  %v11946_v16 = vld [vmem:[#allocation2 + $0x1af] sm:$0xff]  ;;  %v11967_v35 = vld [vmem:[#allocation2 + $0x347] sm:$0xff] }
 0xa98   :  { %v11948_v47 = vld [vmem:[#allocation2 + $0x1cf] sm:$0xff] }
 0xa99   :  { %v11966_v34 = vld [vmem:[#allocation2 + $0x32f] sm:$0xff] }
 0xa9b   :  { %21697 = vmatmul.mubr.msk.bf16.gmra.mrb[112].mxu1 %vm27_vm1, %v12105_v4  ;;  %v11942_v4 = vld [vmem:[#allocation2 + $0x16f] sm:$0xff] }
 0xa9c   :  { %21700 = vmatprep.mubr.msk.bf16.mxu1 %vm27_vm1, %v12106_v28  ;;  %v11943_v28 = vld [vmem:[#allocation2 + $0x187] sm:$0xff]  ;;  %v29051_v1 = vpack.c.bf16 %v11942_v4, %v11941_v8 }
 0xa9d   :  { %21569 = vmatmul.mubr.msk.bf16.gmra.mrb[180].mxu0 %vm27_vm1, %v28864_v60  ;;  %v11919_v60 = vld [vmem:[#allocation2 + $0x7] sm:$0xff]  ;;  %v29053_v37 = vpack.c.bf16 %v11944_v10, %v11943_v28 }
 0xa9e   :  { %21572 = vmatprep.mubr.msk.bf16.mxu0 %vm27_vm1, %v28870_v19  ;;  %v12079_v19 = vld [vmem:[#allocation2 + $0x430] sm:$0xff]  ;;  %v11983_v2 = vpack.c.bf16 %v11920_v41, %v11919_v60  ;;  %v33049_v60 = vld [vmem:[#allocation34_spill] sm:$0xff]  ;;  %v11951_v41 = vld [vmem:[#allocation2 + $0x247] sm:$0xff] }
 0xa9f   :  { %v12111_v58 = vpack.c.bf16 %v12079_v19, %v12078_v49  ;;  %v11952_v49 = vld [vmem:[#allocation2 + $0x24f] sm:$0xff]  ;;  %v11949_v19 = vld [vmem:[#allocation2 + $0x1e7] sm:$0xff] }
 0xaa0   :  { %v33058_v4 = vld [vmem:[#allocation23_spill] sm:$0xff]  ;;  %v33059_v28 = vld [vmem:[#allocation20_spill] sm:$0xff] }
 0xaa1   :  { %v11969_v10 = vld [vmem:[#allocation2 + $0x367] sm:$0xff] }
 0xaa3   :  { %21701 = vmatmul.mubr.msk.bf16.gmra.mrb[116].mxu1 %vm27_vm1, %v12107_v24  ;;  %v33047_v24 = vld [vmem:[#allocation32_spill] sm:$0xff] }
 0xaa4   :  { %21704 = vmatprep.mubr.msk.bf16.mxu1 %vm27_vm1, %v12108_v51  ;;  %v11945_v51 = vld [vmem:[#allocation2 + $0x1a7] sm:$0xff] }
 0xaa5   :  { %21573 = vmatmul.mubr.msk.bf16.gmra.mrb[184].mxu0 %vm27_vm1, %v28876_v25  ;;  %v11921_v25 = vld [vmem:[#allocation2 + $0x27] sm:$0xff]  ;;  %v29063_v9 = vpack.c.bf16 %v11946_v16, %v11945_v51  ;;  %v11972_v51 = vld [vmem:[#allocation2 + $0x38f] sm:$0xff] }
 0xaa6   :  { %21576 = vmatprep.mubr.msk.bf16.mxu0 %vm27_vm1, %v28885_v54  ;;  %v11924_v54 = vld [vmem:[#allocation2 + $0x4f] sm:$0xff]  ;;  %v28982_v43 = vpack.c.bf16 %v11922_v44, %v11921_v25  ;;  %v33050_v25 = vld [vmem:[#allocation35_spill] sm:$0xff] }
 0xaa7   :  { %v28988_v40 = vpack.c.bf16 %v11924_v54, %v11923_v36  ;;  %v33051_v44 = vld [vmem:[#allocation7_spill] sm:$0xff]  ;;  %v11954_v54 = vld [vmem:[#allocation2 + $0x26f] sm:$0xff] }
 0xaa8   :  { %v11953_v36 = vld [vmem:[#allocation2 + $0x267] sm:$0xff] }
 0xaab   :  { %21705 = vmatmul.mubr.msk.bf16.gmra.mrb[120].mxu1 %vm27_vm1, %v12109_v21  ;;  %v29065_v21 = vpack.c.bf16 %v11948_v47, %v11947_v29  ;;  %v33060_v47 = vld [vmem:[#allocation22_spill] sm:$0xff] }
 0xaac   :  { %21708 = vmatprep.mubr.msk.bf16.mxu1 %vm27_vm1, %v12110_v15  ;;  %v33048_v15 = vld [vmem:[#allocation33_spill] sm:$0xff] }
 0xaad   :  { %21577 = vmatmul.mubr.msk.bf16.gmra.mrb[188].mxu0 %vm27_vm1, %v28891_v17  ;;  %v28993_v17 = vld [vmem:[%s32076_s3 + $0x6] sm:$0x3] }
 0xaae   :  { %21582 = vmatprep.mubr.msk.bf16.mxu0 %vm27_vm1, %v33035_v3 }
 0xab3   :  { %21709 = vmatmul.mubr.msk.bf16.gmra.mrb[124].mxu1 %vm27_vm1, %v12111_v58  ;;  %v11999_v58 = vpack.c.bf16 %v11952_v49, %v11951_v41  ;;  %v11974_v41 = vld [vmem:[#allocation2 + $0x3af] sm:$0xff]  ;;  %v11975_v49 = vld [vmem:[#allocation2 + $0x3c7] sm:$0xff] }
 0xab4   :  { %21714 = vmatprep.mubr.msk.bf16.mxu1 %vm27_vm1, %v11983_v2  ;;  %v11950_v2 = vld [vmem:[#allocation2 + $0x1ef] sm:$0xff] }
 0xab5   :  { %21583 = vmatmul.mubr.msk.bf16.vlgmr.msra.gmra.mrb[128].mxu0 %vm27_vm1, %v33036_v63  ;;  %v29075_v3 = vpack.c.bf16 %v11950_v2, %v11949_v19  ;;  %v11956_v63 = vld [vmem:[#allocation2 + $0x28f] sm:$0xff] }
 0xab6   :  { %21586 = vmatprep.mubr.msk.bf16.mxu0 %vm27_vm1, %v33037_v55  ;;  %v29084_v55 = vpack.c.bf16 %v11954_v54, %v11953_v36  ;;  %v11976_v19 = vld [vmem:[#allocation2 + $0x3cf] sm:$0xff]  ;;  %v11977_v36 = vld [vmem:[#allocation2 + $0x3e7] sm:$0xff] }
 0xab7   :  { %v11978_v54 = vld [vmem:[#allocation2 + $0x3ef] sm:$0xff] }
 0xabb   :  { %21715 = vmatmul.mubr.msk.bf16.vlgmr.msra.gmra.mrb[64].mxu1 %vm27_vm1, %v28982_v43 }
 0xabc   :  { %21779 = vmatpush3.bf16.msra.mxu1 %v13085_v61  ;;  %21718 = vmatprep.mubr.msk.bf16.mxu1 %vm27_vm1, %v28988_v40  ;;  %v11955_v61 = vld [vmem:[#allocation2 + $0x287] sm:$0xff] }
 0xabd   :  { %23993 = vmatprep.subr.msk.bf16.mxu1 %vm537_vm0, %v28993_v17  ;;  %21587 = vmatmul.mubr.msk.bf16.gmra.mrb[132].mxu0 %vm27_vm1, %v33038_v18  ;;  %v29086_v6 = vpack.c.bf16 %v11956_v63, %v11955_v61  ;;  %v11958_v18 = vld [vmem:[#allocation2 + $0x2af] sm:$0xff]  ;;  %v11979_v61 = vld [vmem:[#allocation2 + $0x407] sm:$0xff] }
 0xabe   :  { %21590 = vmatprep.mubr.msk.bf16.mxu0 %vm27_vm1, %v33039_v52  ;;  %v11959_v52 = vld [vmem:[#allocation2 + $0x2c7] sm:$0xff]  ;;  %v29096_v11 = vpack.c.bf16 %v11958_v18, %v11957_v53  ;;  %v11980_v63 = vld [vmem:[#allocation2 + $0x40f] sm:$0xff]  ;;  %v33064_v53 = vld [vmem:[#allocation10_spill] sm:$0xff] }
 0xabf   :  { %v29098_v7 = vpack.c.bf16 %v11960_v33, %v11959_v52  ;;  %v33065_v18 = vld [vmem:[#allocation15_spill] sm:$0xff]  ;;  %v12890_v52 = vld [vmem:[#allocation2 + $0x9] sm:$0xff]  ;;  %v12891_v33 = vld [vmem:[#allocation2 + $0x11] sm:$0xff] }
 0xac3   :  { %21719 = vmatmul.mubr.msk.bf16.gmra.mrb[68].mxu1 %vm27_vm1, %v29003_v46 }
 0xac4   :  { %21722 = vmatprep.mubr.msk.bf16.mxu1 %vm27_vm1, %v29005_v5 }
 0xac5   :  { %21591 = vmatmul.mubr.msk.bf16.gmra.mrb[136].mxu0 %vm27_vm1, %v33040_v62  ;;  %v33055_v62 = vld [vmem:[#allocation11_spill] sm:$0xff] }
 0xac6   :  { %21594 = vmatprep.mubr.msk.bf16.mxu0 %vm27_vm1, %v33041_v26  ;;  %v11961_v26 = vld [vmem:[#allocation2 + $0x2e7] sm:$0xff] }
 0xac7   :  { %v29108_v22 = vpack.c.bf16 %v11962_v32, %v11961_v26  ;;  %v12954_v26 = vpack.c.bf16 %v12891_v33, %v12890_v52  ;;  %v12910_v52 = vld [vmem:[#allocation2 + $0x149] sm:$0xff]  ;;  %v12911_v33 = vld [vmem:[#allocation2 + $0x151] sm:$0xff] }
 0xacb   :  { %21723 = vmatmul.mubr.msk.bf16.gmra.mrb[72].mxu1 %vm27_vm1, %v29015_v38 }
 0xacc   :  { %21726 = vmatprep.mubr.msk.bf16.mxu1 %vm27_vm1, %v29017_v31 }
 0xacd   :  { %21595 = vmatmul.mubr.msk.bf16.gmra.mrb[140].mxu0 %vm27_vm1, %v33042_v42  ;;  %v29110_v42 = vpack.c.bf16 %v11964_v59, %v11963_v48  ;;  %v33066_v48 = vld [vmem:[#allocation12_spill] sm:$0xff] }
 0xace   :  { %21598 = vmatprep.mubr.msk.bf16.mxu0 %vm27_vm1, %v33043_v57  ;;  %v33056_v57 = vld [vmem:[#allocation8_spill] sm:$0xff] }
 0xacf   :  { %v12892_v59 = vld [vmem:[#allocation2 + $0x29] sm:$0xff] }
 0xad3   :  { %21727 = vmatmul.mubr.msk.bf16.gmra.mrb[76].mxu1 %vm27_vm1, %v29027_v27 }
 0xad4   :  { %21730 = vmatprep.mubr.msk.bf16.mxu1 %vm27_vm1, %v29029_v12 }
 0xad5   :  { %21599 = vmatmul.mubr.msk.bf16.gmra.mrb[144].mxu0 %vm27_vm1, %v33044_v14  ;;  %v11968_v14 = vld [vmem:[#allocation2 + $0x34f] sm:$0xff] }
 0xad6   :  { %21602 = vmatprep.mubr.msk.bf16.mxu0 %vm27_vm1, %v33045_v23  ;;  %v29120_v23 = vpack.c.bf16 %v11966_v34, %v11965_v30  ;;  %v29122_v8 = vpack.c.bf16 %v11968_v14, %v11967_v35  ;;  %v12895_v30 = vld [vmem:[#allocation2 + $0x51] sm:$0xff]  ;;  %v13635_v35 = vsel %vm537_vm0, %v28993_v17, 0  ;;  %v12898_v17 = vld [vmem:[#allocation2 + $0x89] sm:$0xff] }
 0xadb   :  { %21731 = vmatmul.mubr.msk.bf16.gmra.mrb[80].mxu1 %vm27_vm1, %v29039_v20 }
 0xadc   :  { %21734 = vmatprep.mubr.msk.bf16.mxu1 %vm27_vm1, %v29041_v45 }
 0xadd   :  { %21603 = vmatmul.mubr.msk.bf16.gmra.mrb[148].mxu0 %vm27_vm1, %v33046_v56  ;;  %v11970_v56 = vld [vmem:[#allocation2 + $0x36f] sm:$0xff] }
 0xade   :  { %21606 = vmatprep.mubr.msk.bf16.mxu0 %vm27_vm1, %v33047_v24  ;;  %v11971_v24 = vld [vmem:[#allocation2 + $0x387] sm:$0xff]  ;;  %v29132_v16 = vpack.c.bf16 %v11970_v56, %v11969_v10  ;;  %v12897_v10 = vld [vmem:[#allocation2 + $0x71] sm:$0xff] }
 0xadf   :  { %v29134_v29 = vpack.c.bf16 %v11972_v51, %v11971_v24  ;;  %v12899_v56 = vld [vmem:[#allocation2 + $0x91] sm:$0xff] }
 0xae0   :  { %v29194_v51 = vpack.c.bf16 %v12899_v56, %v12898_v17  ;;  %v12919_v17 = vld [vmem:[#allocation2 + $0x1d1] sm:$0xff] }
 0xae3   :  { %21735 = vmatmul.mubr.msk.bf16.gmra.mrb[84].mxu1 %vm27_vm1, %v29051_v1 }
 0xae4   :  { %21738 = vmatprep.mubr.msk.bf16.mxu1 %vm27_vm1, %v29053_v37 }
 0xae5   :  { %21607 = vmatmul.mubr.msk.bf16.gmra.mrb[152].mxu0 %vm27_vm1, %v33048_v15  ;;  %v33061_v15 = vld [vmem:[#allocation25_spill] sm:$0xff] }
 0xae6   :  { %21610 = vmatprep.mubr.msk.bf16.mxu0 %vm27_vm1, %v33049_v60  ;;  %v11973_v60 = vld [vmem:[#allocation2 + $0x3a7] sm:$0xff] }
 0xae7   :  { %v29144_v2 = vpack.c.bf16 %v11974_v41, %v11973_v60  ;;  %v12902_v60 = vld [vmem:[#allocation2 + $0xc9] sm:$0xff]  ;;  %v12903_v41 = vld [vmem:[#allocation2 + $0xd1] sm:$0xff] }
 0xaeb   :  { %21739 = vmatmul.mubr.msk.bf16.gmra.mrb[88].mxu1 %vm27_vm1, %v29063_v9 }
 0xaec   :  { %21742 = vmatprep.mubr.msk.bf16.mxu1 %vm27_vm1, %v29065_v21 }
 0xaed   :  { %21611 = vmatmul.mubr.msk.bf16.gmra.mrb[156].mxu0 %vm27_vm1, %v33050_v25  ;;  %v33062_v25 = vld [vmem:[#allocation24_spill] sm:$0xff] }
 0xaee   :  { %21614 = vmatprep.mubr.msk.bf16.mxu0 %vm27_vm1, %v33051_v44  ;;  %v33063_v44 = vld [vmem:[#allocation26_spill] sm:$0xff] }
 0xaf3   :  { %21743 = vmatmul.mubr.msk.bf16.gmra.mrb[92].mxu1 %vm27_vm1, %v29075_v3 }
 0xaf4   :  { %21746 = vmatprep.mubr.msk.bf16.mxu1 %vm27_vm1, %v11999_v58  ;;  %v29146_v58 = vpack.c.bf16 %v11976_v19, %v11975_v49  ;;  %v29202_v19 = vpack.c.bf16 %v12903_v41, %v12902_v60  ;;  %v12923_v60 = vld [vmem:[#allocation2 + $0x251] sm:$0xff]  ;;  %v12920_v41 = vld [vmem:[#allocation2 + $0x1e9] sm:$0xff] }
 0xaf5   :  { %21615 = vmatmul.mubr.msk.bf16.gmra.mrb[160].mxu0 %vm27_vm1, %v33052_v50  ;;  %v29156_v50 = vpack.c.bf16 %v11978_v54, %v11977_v36  ;;  %v12906_v36 = vld [vmem:[#allocation2 + $0x109] sm:$0xff]  ;;  %v12907_v54 = vld [vmem:[#allocation2 + $0x111] sm:$0xff] }
 0xaf6   :  { %21618 = vmatprep.mubr.msk.bf16.mxu0 %vm27_vm1, %v33053_v13  ;;  %v29158_v13 = vpack.c.bf16 %v11980_v63, %v11979_v61  ;;  %v29210_v63 = vpack.c.bf16 %v12907_v54, %v12906_v36  ;;  %v12924_v54 = vld [vmem:[#allocation2 + $0x269] sm:$0xff] }
 0xafb   :  { %21747 = vmatmul.mubr.msk.bf16.gmra.mrb[96].mxu1 %vm27_vm1, %v29084_v55 }
 0xafc   :  { %21750 = vmatprep.mubr.msk.bf16.mxu1 %vm27_vm1, %v29086_v6 }
 0xafd   :  { %21619 = vmatmul.mubr.msk.bf16.gmra.mrb[164].mxu0 %vm27_vm1, %v33054_v0  ;;  %v11981_v0 = vld [vmem:[#allocation2 + $0x427] sm:$0xff] }
 0xafe   :  { %21622 = vmatprep.mubr.msk.bf16.mxu0 %vm27_vm1, %v33055_v62  ;;  %v11982_v62 = vld [vmem:[#allocation2 + $0x42f] sm:$0xff] }
 0xaff   :  { %v29168_v32 = vpack.c.bf16 %v11982_v62, %v11981_v0  ;;  %v29218_v62 = vpack.c.bf16 %v12911_v33, %v12910_v52  ;;  %v12927_v52 = vld [vmem:[#allocation2 + $0x291] sm:$0xff] }
 0xb03   :  { %21751 = vmatmul.mubr.msk.bf16.gmra.mrb[100].mxu1 %vm27_vm1, %v29096_v11 }
 0xb04   :  { %21754 = vmatprep.mubr.msk.bf16.mxu1 %vm27_vm1, %v29098_v7 }
 0xb05   :  { %21623 = vmatmul.mubr.msk.bf16.gmra.mrb[168].mxu0 %vm27_vm1, %v33056_v57  ;;  %v12893_v57 = vld [vmem:[#allocation2 + $0x31] sm:$0xff] }
 0xb06   :  { %21626 = vmatprep.mubr.msk.bf16.mxu0 %vm27_vm1, %v33057_v39  ;;  %v12894_v39 = vld [vmem:[#allocation2 + $0x49] sm:$0xff]  ;;  %v29175_v34 = vpack.c.bf16 %v12893_v57, %v12892_v59  ;;  %v12915_v57 = vld [vmem:[#allocation2 + $0x191] sm:$0xff] }
 0xb07   :  { %v29179_v14 = vpack.c.bf16 %v12895_v30, %v12894_v39  ;;  %v12914_v59 = vld [vmem:[#allocation2 + $0x189] sm:$0xff] }
 0xb08   :  { %v29226_v30 = vpack.c.bf16 %v12915_v57, %v12914_v59  ;;  %v12929_v59 = vld [vmem:[#allocation2 + $0x2b1] sm:$0xff]  ;;  %v12930_v57 = vld [vmem:[#allocation2 + $0x2c9] sm:$0xff] }
 0xb0b   :  { %21755 = vmatmul.mubr.msk.bf16.gmra.mrb[104].mxu1 %vm27_vm1, %v29108_v22 }
 0xb0c   :  { %21758 = vmatprep.mubr.msk.bf16.mxu1 %vm27_vm1, %v29110_v42 }
 0xb0d   :  { %21627 = vmatmul.mubr.msk.bf16.gmra.mrb[172].mxu0 %vm27_vm1, %v33058_v4  ;;  %v29184_v4 = vld [vmem:[%s32076_s3 + $0x8] sm:$0x3] }
 0xb0e   :  { %21630 = vmatprep.mubr.msk.bf16.mxu0 %vm27_vm1, %v33059_v28  ;;  %v12896_v28 = vld [vmem:[#allocation2 + $0x69] sm:$0xff] }
 0xb0f   :  { %v29192_v24 = vpack.c.bf16 %v12897_v10, %v12896_v28  ;;  %v12917_v28 = vld [vmem:[#allocation2 + $0x1b1] sm:$0xff]  ;;  %v12918_v10 = vld [vmem:[#allocation2 + $0x1c9] sm:$0xff] }
 0xb13   :  { %21759 = vmatmul.mubr.msk.bf16.gmra.mrb[108].mxu1 %vm27_vm1, %v29120_v23 }
 0xb14   :  { %21762 = vmatprep.mubr.msk.bf16.mxu1 %vm27_vm1, %v29122_v8 }
 0xb15   :  { %21631 = vmatmul.mubr.msk.bf16.gmra.mrb[176].mxu0 %vm27_vm1, %v33060_v47  ;;  %v12900_v47 = vld [vmem:[#allocation2 + $0xa9] sm:$0xff] }
 0xb16   :  { %21634 = vmatprep.mubr.msk.bf16.mxu0 %vm27_vm1, %v33061_v15  ;;  %v12901_v15 = vld [vmem:[#allocation2 + $0xb1] sm:$0xff] }
 0xb17   :  { %v29200_v49 = vpack.c.bf16 %v12901_v15, %v12900_v47  ;;  %v29234_v47 = vpack.c.bf16 %v12919_v17, %v12918_v10  ;;  %v12922_v15 = vld [vmem:[#allocation2 + $0x249] sm:$0xff] }
 0xb18   :  { %v12932_v17 = vld [vmem:[#allocation2 + $0x2e9] sm:$0xff] }
 0xb1b   :  { %21763 = vmatmul.mubr.msk.bf16.gmra.mrb[112].mxu1 %vm27_vm1, %v29132_v16 }
 0xb1c   :  { %21766 = vmatprep.mubr.msk.bf16.mxu1 %vm27_vm1, %v29134_v29 }
 0xb1d   :  { %21635 = vmatmul.mubr.msk.bf16.gmra.mrb[180].mxu0 %vm27_vm1, %v33062_v25  ;;  %v12904_v25 = vld [vmem:[#allocation2 + $0xe9] sm:$0xff] }
 0xb1e   :  { %21638 = vmatprep.mubr.msk.bf16.mxu0 %vm27_vm1, %v33063_v44  ;;  %v12905_v44 = vld [vmem:[#allocation2 + $0xf1] sm:$0xff] }
 0xb1f   :  { %v29208_v61 = vpack.c.bf16 %v12905_v44, %v12904_v25  ;;  %v12921_v25 = vld [vmem:[#allocation2 + $0x1f1] sm:$0xff]  ;;  %v12970_v44 = vpack.c.bf16 %v12923_v60, %v12922_v15  ;;  %v12934_v60 = vld [vmem:[#allocation2 + $0x309] sm:$0xff] }
 0xb20   :  { %v29240_v36 = vpack.c.bf16 %v12921_v25, %v12920_v41  ;;  %v12933_v15 = vld [vmem:[#allocation2 + $0x2f1] sm:$0xff] }
 0xb21   :  { %v12935_v41 = vld [vmem:[#allocation2 + $0x311] sm:$0xff]  ;;  %v29261_v25 = vpack.c.bf16 %v12933_v15, %v12932_v17  ;;  %v12942_v17 = vld [vmem:[#allocation2 + $0x389] sm:$0xff] }
 0xb22   :  { %v12943_v15 = vld [vmem:[#allocation2 + $0x391] sm:$0xff] }
 0xb23   :  { %21767 = vmatmul.mubr.msk.bf16.gmra.mrb[116].mxu1 %vm27_vm1, %v29144_v2 }
 0xb24   :  { %21770 = vmatprep.mubr.msk.bf16.mxu1 %vm27_vm1, %v29146_v58 }
 0xb25   :  { %21639 = vmatmul.mubr.msk.bf16.gmra.mrb[184].mxu0 %vm27_vm1, %v33064_v53  ;;  %v12908_v53 = vld [vmem:[#allocation2 + $0x129] sm:$0xff] }
 0xb26   :  { %21642 = vmatprep.mubr.msk.bf16.mxu0 %vm27_vm1, %v33065_v18  ;;  %v12909_v18 = vld [vmem:[#allocation2 + $0x131] sm:$0xff] }
 0xb27   :  { %v29216_v0 = vpack.c.bf16 %v12909_v18, %v12908_v53  ;;  %v12925_v53 = vld [vmem:[#allocation2 + $0x271] sm:$0xff]  ;;  %v12926_v18 = vld [vmem:[#allocation2 + $0x289] sm:$0xff] }
 0xb28   :  { %v29245_v33 = vpack.c.bf16 %v12925_v53, %v12924_v54  ;;  %v12936_v54 = vld [vmem:[#allocation2 + $0x329] sm:$0xff]  ;;  %v12937_v53 = vld [vmem:[#allocation2 + $0x331] sm:$0xff] }
 0xb2b   :  { %21771 = vmatmul.mubr.msk.bf16.gmra.mrb[120].mxu1 %vm27_vm1, %v29156_v50 }
 0xb2c   :  { %21774 = vmatprep.mubr.msk.bf16.mxu1 %vm27_vm1, %v29158_v13 }
 0xb2d   :  { %21643 = vmatmul.mubr.msk.bf16.gmra.mrb[188].mxu0 %vm27_vm1, %v33066_v48  ;;  %v12913_v48 = vld [vmem:[#allocation2 + $0x171] sm:$0xff] }
 0xb33   :  { %21775 = vmatmul.mubr.msk.bf16.gmra.mrb[124].mxu1 %vm27_vm1, %v29168_v32 }
 0xb34   :  { %21780 = vmatprep.mubr.msk.bf16.mxu1 %vm27_vm1, %v12954_v26  ;;  %v12912_v26 = vld [vmem:[#allocation2 + $0x169] sm:$0xff] }
 0xb35   :  { %v29224_v39 = vpack.c.bf16 %v12913_v48, %v12912_v26  ;;  %v29247_v26 = vpack.c.bf16 %v12927_v52, %v12926_v18  ;;  %v12928_v48 = vld [vmem:[#allocation2 + $0x2a9] sm:$0xff]  ;;  %v12939_v52 = vld [vmem:[#allocation2 + $0x351] sm:$0xff] }
 0xb36   :  { %v12938_v18 = vld [vmem:[#allocation2 + $0x349] sm:$0xff] }
 0xb3b   :  { %21781 = vmatmul.mubr.msk.bf16.vlgmr.msra.gmra.mrb[64].mxu1 %vm27_vm1, %v29175_v34 }
 0xb3c   :  { %21845 = vmatpush3.bf16.msra.mxu1 %v13635_v35  ;;  %21784 = vmatprep.mubr.msk.bf16.mxu1 %vm27_vm1, %v29179_v14  ;;  %v12916_v35 = vld [vmem:[#allocation2 + $0x1a9] sm:$0xff] }
 0xb3d   :  { %23994 = vmatprep.subr.msk.bf16.mxu1 %vm537_vm0, %v29184_v4  ;;  %v29232_v56 = vpack.c.bf16 %v12917_v28, %v12916_v35  ;;  %v12931_v35 = vld [vmem:[#allocation2 + $0x2d1] sm:$0xff]  ;;  %v29253_v28 = vpack.c.bf16 %v12929_v59, %v12928_v48  ;;  %v29269_v48 = vpack.c.bf16 %v12937_v53, %v12936_v54  ;;  %v29271_v59 = vpack.c.bf16 %v12939_v52, %v12938_v18  ;;  %v12944_v54 = vld [vmem:[#allocation2 + $0x3a9] sm:$0xff] }
 0xb3e   :  { %v29255_v10 = vpack.c.bf16 %v12931_v35, %v12930_v57  ;;  %v12940_v57 = vld [vmem:[#allocation2 + $0x369] sm:$0xff]  ;;  %v12941_v35 = vld [vmem:[#allocation2 + $0x371] sm:$0xff] }
 0xb3f   :  { %33067 = vst [vmem:[#allocation51_spill] sm:$0xff] %v29269_v48  ;;  %33068 = vst [vmem:[#allocation54_spill] sm:$0xff] %v29271_v59  ;;  %v12945_v53 = vld [vmem:[#allocation2 + $0x3b1] sm:$0xff]  ;;  %v12946_v18 = vld [vmem:[#allocation2 + $0x3c9] sm:$0xff] }
 0xb40   :  { %v12947_v52 = vld [vmem:[#allocation2 + $0x3d1] sm:$0xff] }
 0xb43   :  { %21785 = vmatmul.mubr.msk.bf16.gmra.mrb[68].mxu1 %vm27_vm1, %v29192_v24 }
 0xb44   :  { %21788 = vmatprep.mubr.msk.bf16.mxu1 %vm27_vm1, %v29194_v51 }
 0xb4b   :  { %21789 = vmatmul.mubr.msk.bf16.gmra.mrb[72].mxu1 %vm27_vm1, %v29200_v49 }
 0xb4c   :  { %21792 = vmatprep.mubr.msk.bf16.mxu1 %vm27_vm1, %v29202_v19 }
 0xb53   :  { %21793 = vmatmul.mubr.msk.bf16.gmra.mrb[76].mxu1 %vm27_vm1, %v29208_v61 }
 0xb54   :  { %21796 = vmatprep.mubr.msk.bf16.mxu1 %vm27_vm1, %v29210_v63 }
 0xb5b   :  { %21797 = vmatmul.mubr.msk.bf16.gmra.mrb[80].mxu1 %vm27_vm1, %v29216_v0 }
 0xb5c   :  { %21800 = vmatprep.mubr.msk.bf16.mxu1 %vm27_vm1, %v29218_v62 }
 0xb63   :  { %21801 = vmatmul.mubr.msk.bf16.gmra.mrb[84].mxu1 %vm27_vm1, %v29224_v39 }
 0xb64   :  { %21804 = vmatprep.mubr.msk.bf16.mxu1 %vm27_vm1, %v29226_v30 }
 0xb6b   :  { %21805 = vmatmul.mubr.msk.bf16.gmra.mrb[88].mxu1 %vm27_vm1, %v29232_v56 }
 0xb6c   :  { %21808 = vmatprep.mubr.msk.bf16.mxu1 %vm27_vm1, %v29234_v47 }
 0xb73   :  { %21809 = vmatmul.mubr.msk.bf16.gmra.mrb[92].mxu1 %vm27_vm1, %v29240_v36 }
 0xb74   :  { %21812 = vmatprep.mubr.msk.bf16.mxu1 %vm27_vm1, %v12970_v44  ;;  %v29263_v44 = vpack.c.bf16 %v12935_v41, %v12934_v60  ;;  %v29277_v60 = vpack.c.bf16 %v12941_v35, %v12940_v57  ;;  %v29279_v41 = vpack.c.bf16 %v12943_v15, %v12942_v17  ;;  %v12948_v57 = vld [vmem:[#allocation2 + $0x3e9] sm:$0xff]  ;;  %v12949_v35 = vld [vmem:[#allocation2 + $0x3f1] sm:$0xff] }
 0xb75   :  { %v12950_v17 = vld [vmem:[#allocation2 + $0x409] sm:$0xff]  ;;  %v12951_v15 = vld [vmem:[#allocation2 + $0x411] sm:$0xff] }
 0xb76   :  { %33069 = vst [vmem:[#allocation56_spill] sm:$0xff] %v29277_v60  ;;  %33070 = vst [vmem:[#allocation53_spill] sm:$0xff] %v29279_v41 }
 0xb7b   :  { %21813 = vmatmul.mubr.msk.bf16.gmra.mrb[96].mxu1 %vm27_vm1, %v29245_v33 }
 0xb7c   :  { %21816 = vmatprep.mubr.msk.bf16.mxu1 %vm27_vm1, %v29247_v26 }
 0xb83   :  { %21817 = vmatmul.mubr.msk.bf16.gmra.mrb[100].mxu1 %vm27_vm1, %v29253_v28 }
 0xb84   :  { %21820 = vmatprep.mubr.msk.bf16.mxu1 %vm27_vm1, %v29255_v10 }
 0xb8b   :  { %21821 = vmatmul.mubr.msk.bf16.gmra.mrb[104].mxu1 %vm27_vm1, %v29261_v25 }
 0xb8c   :  { %21824 = vmatprep.mubr.msk.bf16.mxu1 %vm27_vm1, %v29263_v44 }
 0xb93   :  { %21825 = vmatmul.mubr.msk.bf16.gmra.mrb[108].mxu1 %vm27_vm1, %v29269_v48  ;;  %v29285_v48 = vpack.c.bf16 %v12945_v53, %v12944_v54  ;;  %v12952_v54 = vld [vmem:[#allocation2 + $0x429] sm:$0xff]  ;;  %v12953_v53 = vld [vmem:[#allocation2 + $0x431] sm:$0xff] }
 0xb94   :  { %21828 = vmatprep.mubr.msk.bf16.mxu1 %vm27_vm1, %v29271_v59  ;;  %v29287_v59 = vpack.c.bf16 %v12947_v52, %v12946_v18  ;;  %v29301_v18 = vpack.c.bf16 %v12953_v53, %v12952_v54  ;;  %v14185_v52 = vsel %vm537_vm0, %v29184_v4, 0  ;;  %v14005_v4 = vld [vmem:[#allocation2 + $0x110] sm:$0xff]  ;;  %v14008_v53 = vld [vmem:[#allocation2 + $0x148] sm:$0xff] }
 0xb9b   :  { %21829 = vmatmul.mubr.msk.bf16.gmra.mrb[112].mxu1 %vm27_vm1, %v29277_v60  ;;  %v29293_v60 = vpack.c.bf16 %v12949_v35, %v12948_v57  ;;  %v19172_v57 = vld [vmem:[%s32076_s3 + $0xa] sm:$0x3] }
 0xb9c   :  { %21832 = vmatprep.mubr.msk.bf16.mxu1 %vm27_vm1, %v29279_v41  ;;  %v29295_v41 = vpack.c.bf16 %v12951_v15, %v12950_v17  ;;  %v14006_v35 = vld [vmem:[#allocation2 + $0x128] sm:$0xff]  ;;  %v14007_v17 = vld [vmem:[#allocation2 + $0x130] sm:$0xff] }
 0xb9d   :  { %v29414_v54 = vpack.c.bf16 %v14007_v17, %v14006_v35  ;;  %v14025_v35 = vld [vmem:[#allocation2 + $0x290] sm:$0xff]  ;;  %v14026_v17 = vld [vmem:[#allocation2 + $0x2a8] sm:$0xff] }
 0xba3   :  { %21833 = vmatmul.mubr.msk.bf16.gmra.mrb[116].mxu1 %vm27_vm1, %v29285_v48 }
 0xba4   :  { %21836 = vmatprep.mubr.msk.bf16.mxu1 %vm27_vm1, %v29287_v59 }
 0xbab   :  { %21837 = vmatmul.mubr.msk.bf16.gmra.mrb[120].mxu1 %vm27_vm1, %v29293_v60 }
 0xbac   :  { %21840 = vmatprep.mubr.msk.bf16.mxu1 %vm27_vm1, %v29295_v41 }
 0xbb3   :  { %21841 = vmatmul.mubr.msk.bf16.gmra.mrb[124].mxu1 %vm27_vm1, %v29301_v18 }
 0xbb4   :  { %21846 = vmatprep.mubr.msk.bf16.mxu1 %vm27_vm1, %v28982_v43  ;;  %v13470_v43 = vld [vmem:[#allocation2 + $0x207] sm:$0xff] }
 0xbbb   :  { %21847 = vmatmul.mubr.msk.bf16.vlgmr.msra.gmra.mrb[64].mxu1 %vm27_vm1, %v28988_v40  ;;  %v13471_v40 = vld [vmem:[#allocation2 + $0x20f] sm:$0xff] }
 0xbbc   :  { %21911 = vmatpush3.bf16.msra.mxu1 %v14185_v52  ;;  %21850 = vmatprep.mubr.msk.bf16.mxu1 %vm27_vm1, %v29003_v46  ;;  %v29341_v46 = vpack.c.bf16 %v13471_v40, %v13470_v43  ;;  %v14009_v52 = vld [vmem:[#allocation2 + $0x150] sm:$0xff] }
 0xbbd   :  { %23995 = vmatprep.subr.msk.bf16.mxu1 %vm537_vm0, %v19172_v57  ;;  %v14011_v43 = vld [vmem:[#allocation2 + $0x170] sm:$0xff]  ;;  %v29420_v40 = vpack.c.bf16 %v14009_v52, %v14008_v53 }
 0xbbe   :  { %v14027_v53 = vld [vmem:[#allocation2 + $0x2b0] sm:$0xff] }
 0xbc3   :  { %21851 = vmatmul.mubr.msk.bf16.gmra.mrb[68].mxu1 %vm27_vm1, %v29005_v5  ;;  %v13502_v5 = vld [vmem:[#allocation2 + $0x447] sm:$0xff] }
 0xbc4   :  { %21854 = vmatprep.mubr.msk.bf16.mxu1 %vm27_vm1, %v29015_v38  ;;  %v13503_v38 = vld [vmem:[#allocation2 + $0x44f] sm:$0xff] }
 0xbcb   :  { %21855 = vmatmul.mubr.msk.bf16.gmra.mrb[72].mxu1 %vm27_vm1, %v29017_v31  ;;  %v13990_v31 = vld [vmem:[#allocation2 + $0x28] sm:$0xff] }
 0xbcc   :  { %21858 = vmatprep.mubr.msk.bf16.mxu1 %vm27_vm1, %v29027_v27  ;;  %v13991_v27 = vld [vmem:[#allocation2 + $0x30] sm:$0xff] }
 0xbd3   :  { %21859 = vmatmul.mubr.msk.bf16.gmra.mrb[76].mxu1 %vm27_vm1, %v29029_v12  ;;  %v29375_v12 = vpack.c.bf16 %v13503_v38, %v13502_v5  ;;  %v14012_v38 = vld [vmem:[#allocation2 + $0x188] sm:$0xff] }
 0xbd4   :  { %21862 = vmatprep.mubr.msk.bf16.mxu1 %vm27_vm1, %v29039_v20  ;;  %v14054_v20 = vpack.c.bf16 %v13991_v27, %v13990_v31  ;;  %v14013_v31 = vld [vmem:[#allocation2 + $0x190] sm:$0xff]  ;;  %v14014_v27 = vld [vmem:[#allocation2 + $0x1a8] sm:$0xff] }
 0xbdb   :  { %21863 = vmatmul.mubr.msk.bf16.gmra.mrb[80].mxu1 %vm27_vm1, %v29041_v45  ;;  %v13992_v45 = vld [vmem:[#allocation2 + $0x48] sm:$0xff] }
 0xbdc   :  { %21866 = vmatprep.mubr.msk.bf16.mxu1 %vm27_vm1, %v29051_v1  ;;  %v13993_v1 = vld [vmem:[#allocation2 + $0x50] sm:$0xff] }
 0xbe3   :  { %21867 = vmatmul.mubr.msk.bf16.gmra.mrb[84].mxu1 %vm27_vm1, %v29053_v37  ;;  %v13994_v37 = vld [vmem:[#allocation2 + $0x68] sm:$0xff] }
 0xbe4   :  { %21870 = vmatprep.mubr.msk.bf16.mxu1 %vm27_vm1, %v29063_v9  ;;  %v13995_v9 = vld [vmem:[#allocation2 + $0x70] sm:$0xff] }
 0xbeb   :  { %21871 = vmatmul.mubr.msk.bf16.gmra.mrb[88].mxu1 %vm27_vm1, %v29065_v21  ;;  %v29380_v21 = vpack.c.bf16 %v13993_v1, %v13992_v45  ;;  %v29428_v45 = vpack.c.bf16 %v14013_v31, %v14012_v38  ;;  %v14029_v38 = vld [vmem:[#allocation2 + $0x2d0] sm:$0xff]  ;;  %v14030_v31 = vld [vmem:[#allocation2 + $0x2e8] sm:$0xff] }
 0xbec   :  { %21874 = vmatprep.mubr.msk.bf16.mxu1 %vm27_vm1, %v29075_v3  ;;  %v14735_v3 = vsel %vm537_vm0, %v19172_v57, 0  ;;  %v14010_v57 = vld [vmem:[#allocation2 + $0x168] sm:$0xff] }
 0xbed   :  { %v29422_v5 = vpack.c.bf16 %v14011_v43, %v14010_v57  ;;  %v29451_v57 = vpack.c.bf16 %v14027_v53, %v14026_v17  ;;  %v14028_v43 = vld [vmem:[#allocation2 + $0x2c8] sm:$0xff] }
 0xbf3   :  { %21875 = vmatmul.mubr.msk.bf16.gmra.mrb[92].mxu1 %vm27_vm1, %v29341_v46 }
 0xbf4   :  { %21878 = vmatprep.mubr.msk.bf16.mxu1 %vm27_vm1, %v29084_v55  ;;  %v29383_v55 = vpack.c.bf16 %v13995_v9, %v13994_v37  ;;  %v14016_v37 = vld [vmem:[#allocation2 + $0x1c8] sm:$0xff]  ;;  %v14017_v9 = vld [vmem:[#allocation2 + $0x1d0] sm:$0xff] }
 0xbfb   :  { %21879 = vmatmul.mubr.msk.bf16.gmra.mrb[96].mxu1 %vm27_vm1, %v29086_v6  ;;  %v29388_v6 = vld [vmem:[%s32076_s3 + $0xc] sm:$0x3] }
 0xbfc   :  { %21882 = vmatprep.mubr.msk.bf16.mxu1 %vm27_vm1, %v29096_v11  ;;  %v13996_v11 = vld [vmem:[#allocation2 + $0x88] sm:$0xff] }
 0xc03   :  { %21883 = vmatmul.mubr.msk.bf16.gmra.mrb[100].mxu1 %vm27_vm1, %v29098_v7  ;;  %v13997_v7 = vld [vmem:[#allocation2 + $0x90] sm:$0xff] }
 0xc04   :  { %21886 = vmatprep.mubr.msk.bf16.mxu1 %vm27_vm1, %v29108_v22  ;;  %v13998_v22 = vld [vmem:[#allocation2 + $0xa8] sm:$0xff] }
 0xc0b   :  { %21887 = vmatmul.mubr.msk.bf16.gmra.mrb[104].mxu1 %vm27_vm1, %v29110_v42  ;;  %v13999_v42 = vld [vmem:[#allocation2 + $0xb0] sm:$0xff] }
 0xc0c   :  { %21890 = vmatprep.mubr.msk.bf16.mxu1 %vm27_vm1, %v29120_v23  ;;  %v29396_v23 = vpack.c.bf16 %v13997_v7, %v13996_v11  ;;  %v14019_v11 = vld [vmem:[#allocation2 + $0x1f0] sm:$0xff]  ;;  %v29436_v7 = vpack.c.bf16 %v14017_v9, %v14016_v37  ;;  %v14032_v9 = vld [vmem:[#allocation2 + $0x308] sm:$0xff] }
 0xc13   :  { %21891 = vmatmul.mubr.msk.bf16.gmra.mrb[108].mxu1 %vm27_vm1, %v29122_v8  ;;  %v29398_v8 = vpack.c.bf16 %v13999_v42, %v13998_v22  ;;  %v14020_v42 = vld [vmem:[#allocation2 + $0x208] sm:$0xff] }
 0xc14   :  { %21894 = vmatprep.mubr.msk.bf16.mxu1 %vm27_vm1, %v29132_v16  ;;  %v14000_v16 = vld [vmem:[#allocation2 + $0xc8] sm:$0xff] }
 0xc1b   :  { %21895 = vmatmul.mubr.msk.bf16.gmra.mrb[112].mxu1 %vm27_vm1, %v29134_v29  ;;  %v14001_v29 = vld [vmem:[#allocation2 + $0xd0] sm:$0xff] }
 0xc1c   :  { %21898 = vmatprep.mubr.msk.bf16.mxu1 %vm27_vm1, %v29144_v2  ;;  %v14002_v2 = vld [vmem:[#allocation2 + $0xe8] sm:$0xff] }
 0xc23   :  { %21899 = vmatmul.mubr.msk.bf16.gmra.mrb[116].mxu1 %vm27_vm1, %v29146_v58  ;;  %v14003_v58 = vld [vmem:[#allocation2 + $0xf0] sm:$0xff] }
 0xc24   :  { %21902 = vmatprep.mubr.msk.bf16.mxu1 %vm27_vm1, %v29156_v50  ;;  %v29404_v50 = vpack.c.bf16 %v14001_v29, %v14000_v16  ;;  %v14021_v16 = vld [vmem:[#allocation2 + $0x210] sm:$0xff]  ;;  %v14022_v29 = vld [vmem:[#allocation2 + $0x268] sm:$0xff] }
 0xc2b   :  { %21903 = vmatmul.mubr.msk.bf16.gmra.mrb[120].mxu1 %vm27_vm1, %v29158_v13  ;;  %v29406_v13 = vpack.c.bf16 %v14003_v58, %v14002_v2  ;;  %v14023_v2 = vld [vmem:[#allocation2 + $0x270] sm:$0xff]  ;;  %v29444_v58 = vpack.c.bf16 %v14021_v16, %v14020_v42 }
 0xc2c   :  { %21906 = vmatprep.mubr.msk.bf16.mxu1 %vm27_vm1, %v29168_v32  ;;  %v14004_v32 = vld [vmem:[#allocation2 + $0x108] sm:$0xff]  ;;  %v14035_v42 = vld [vmem:[#allocation2 + $0x330] sm:$0xff] }
 0xc2d   :  { %v29412_v15 = vpack.c.bf16 %v14005_v4, %v14004_v32  ;;  %v14070_v32 = vpack.c.bf16 %v14023_v2, %v14022_v29  ;;  %v14024_v4 = vld [vmem:[#allocation2 + $0x288] sm:$0xff] }
 0xc2e   :  { %v29449_v52 = vpack.c.bf16 %v14025_v35, %v14024_v4  ;;  %v14036_v2 = vld [vmem:[#allocation2 + $0x348] sm:$0xff]  ;;  %v14039_v35 = vld [vmem:[#allocation2 + $0x370] sm:$0xff] }
 0xc2f   :  { %v14038_v4 = vld [vmem:[#allocation2 + $0x368] sm:$0xff] }
 0xc30   :  { %v29475_v53 = vpack.c.bf16 %v14039_v35, %v14038_v4 }
 0xc33   :  { %21907 = vmatmul.mubr.msk.bf16.gmra.mrb[124].mxu1 %vm27_vm1, %v29375_v12 }
 0xc34   :  { %21912 = vmatprep.mubr.msk.bf16.mxu1 %vm27_vm1, %v14054_v20  ;;  %v14015_v20 = vld [vmem:[#allocation2 + $0x1b0] sm:$0xff] }
 0xc35   :  { %v29430_v1 = vpack.c.bf16 %v14015_v20, %v14014_v27  ;;  %v14031_v27 = vld [vmem:[#allocation2 + $0x2f0] sm:$0xff]  ;;  %v29457_v20 = vpack.c.bf16 %v14029_v38, %v14028_v43  ;;  %v14040_v43 = vld [vmem:[#allocation2 + $0x388] sm:$0xff] }
 0xc36   :  { %v29459_v37 = vpack.c.bf16 %v14031_v27, %v14030_v31  ;;  %v14041_v38 = vld [vmem:[#allocation2 + $0x390] sm:$0xff]  ;;  %v14042_v31 = vld [vmem:[#allocation2 + $0x3a8] sm:$0xff] }
 0xc37   :  { %v14043_v27 = vld [vmem:[#allocation2 + $0x3b0] sm:$0xff] }
 0xc3b   :  { %21913 = vmatmul.mubr.msk.bf16.vlgmr.msra.gmra.mrb[64].mxu1 %vm27_vm1, %v29380_v21 }
 0xc3c   :  { %21977 = vmatpush3.bf16.msra.mxu1 %v14735_v3  ;;  %21916 = vmatprep.mubr.msk.bf16.mxu1 %vm27_vm1, %v29383_v55  ;;  %v14018_v3 = vld [vmem:[#allocation2 + $0x1e8] sm:$0xff] }
 0xc3d   :  { %23996 = vmatprep.subr.msk.bf16.mxu1 %vm537_vm0, %v29388_v6  ;;  %v29438_v22 = vpack.c.bf16 %v14019_v11, %v14018_v3  ;;  %v14033_v3 = vld [vmem:[#allocation2 + $0x310] sm:$0xff]  ;;  %v14034_v11 = vld [vmem:[#allocation2 + $0x328] sm:$0xff] }
 0xc3e   :  { %v29465_v16 = vpack.c.bf16 %v14033_v3, %v14032_v9  ;;  %v29467_v29 = vpack.c.bf16 %v14035_v42, %v14034_v11  ;;  %v29481_v9 = vpack.c.bf16 %v14041_v38, %v14040_v43  ;;  %v29483_v3 = vpack.c.bf16 %v14043_v27, %v14042_v31  ;;  %v14044_v11 = vld [vmem:[#allocation2 + $0x3c8] sm:$0xff]  ;;  %v14045_v42 = vld [vmem:[#allocation2 + $0x3d0] sm:$0xff] }
 0xc3f   :  { %v29489_v4 = vpack.c.bf16 %v14045_v42, %v14044_v11  ;;  %v14048_v43 = vld [vmem:[#allocation2 + $0x408] sm:$0xff]  ;;  %v14049_v38 = vld [vmem:[#allocation2 + $0x410] sm:$0xff] }
 0xc40   :  { %33071 = vst [vmem:[#allocation55_spill] sm:$0xff] %v29481_v9  ;;  %33072 = vst [vmem:[#allocation58_spill] sm:$0xff] %v29483_v3  ;;  %v14050_v31 = vld [vmem:[#allocation2 + $0x428] sm:$0xff]  ;;  %v14051_v27 = vld [vmem:[#allocation2 + $0x430] sm:$0xff] }
 0xc41   :  { %v14052_v11 = vld [vmem:[#allocation2 + $0x448] sm:$0xff]  ;;  %v14053_v42 = vld [vmem:[#allocation2 + $0x450] sm:$0xff] }
 0xc43   :  { %21917 = vmatmul.mubr.msk.bf16.gmra.mrb[68].mxu1 %vm27_vm1, %v29396_v23 }
 0xc44   :  { %21920 = vmatprep.mubr.msk.bf16.mxu1 %vm27_vm1, %v29398_v8 }
 0xc4b   :  { %21921 = vmatmul.mubr.msk.bf16.gmra.mrb[72].mxu1 %vm27_vm1, %v29404_v50 }
 0xc4c   :  { %21924 = vmatprep.mubr.msk.bf16.mxu1 %vm27_vm1, %v29406_v13 }
 0xc53   :  { %21925 = vmatmul.mubr.msk.bf16.gmra.mrb[76].mxu1 %vm27_vm1, %v29412_v15 }
 0xc54   :  { %21928 = vmatprep.mubr.msk.bf16.mxu1 %vm27_vm1, %v29414_v54 }
 0xc5b   :  { %21929 = vmatmul.mubr.msk.bf16.gmra.mrb[80].mxu1 %vm27_vm1, %v29420_v40 }
 0xc5c   :  { %21932 = vmatprep.mubr.msk.bf16.mxu1 %vm27_vm1, %v29422_v5 }
 0xc63   :  { %21933 = vmatmul.mubr.msk.bf16.gmra.mrb[84].mxu1 %vm27_vm1, %v29428_v45 }
 0xc64   :  { %21936 = vmatprep.mubr.msk.bf16.mxu1 %vm27_vm1, %v29430_v1 }
 0xc6b   :  { %21937 = vmatmul.mubr.msk.bf16.gmra.mrb[88].mxu1 %vm27_vm1, %v29436_v7 }
 0xc6c   :  { %21940 = vmatprep.mubr.msk.bf16.mxu1 %vm27_vm1, %v29438_v22 }
 0xc73   :  { %21941 = vmatmul.mubr.msk.bf16.gmra.mrb[92].mxu1 %vm27_vm1, %v29444_v58 }
 0xc74   :  { %21944 = vmatprep.mubr.msk.bf16.mxu1 %vm27_vm1, %v14070_v32  ;;  %v14037_v32 = vld [vmem:[#allocation2 + $0x350] sm:$0xff] }
 0xc75   :  { %v29473_v17 = vpack.c.bf16 %v14037_v32, %v14036_v2  ;;  %v14046_v2 = vld [vmem:[#allocation2 + $0x3e8] sm:$0xff]  ;;  %v14047_v32 = vld [vmem:[#allocation2 + $0x3f0] sm:$0xff] }
 0xc76   :  { %v29491_v35 = vpack.c.bf16 %v14047_v32, %v14046_v2  ;;  %v29505_v2 = vpack.c.bf16 %v14053_v42, %v14052_v11  ;;  %v15285_v32 = vsel %vm537_vm0, %v29388_v6, 0  ;;  %v15103_v11 = vld [vmem:[#allocation2 + $0x10f] sm:$0xff] }
 0xc7b   :  { %21945 = vmatmul.mubr.msk.bf16.gmra.mrb[96].mxu1 %vm27_vm1, %v29449_v52 }
 0xc7c   :  { %21948 = vmatprep.mubr.msk.bf16.mxu1 %vm27_vm1, %v29451_v57 }
 0xc83   :  { %21949 = vmatmul.mubr.msk.bf16.gmra.mrb[100].mxu1 %vm27_vm1, %v29457_v20 }
 0xc84   :  { %21952 = vmatprep.mubr.msk.bf16.mxu1 %vm27_vm1, %v29459_v37 }
 0xc8b   :  { %21953 = vmatmul.mubr.msk.bf16.gmra.mrb[104].mxu1 %vm27_vm1, %v29465_v16 }
 0xc8c   :  { %21956 = vmatprep.mubr.msk.bf16.mxu1 %vm27_vm1, %v29467_v29 }
 0xc93   :  { %21957 = vmatmul.mubr.msk.bf16.gmra.mrb[108].mxu1 %vm27_vm1, %v29473_v17 }
 0xc94   :  { %21960 = vmatprep.mubr.msk.bf16.mxu1 %vm27_vm1, %v29475_v53 }
 0xc9b   :  { %21961 = vmatmul.mubr.msk.bf16.gmra.mrb[112].mxu1 %vm27_vm1, %v29481_v9  ;;  %v29497_v9 = vpack.c.bf16 %v14049_v38, %v14048_v43  ;;  %v19238_v43 = vld [vmem:[%s32076_s3 + $0xe] sm:$0x3] }
 0xc9c   :  { %21964 = vmatprep.mubr.msk.bf16.mxu1 %vm27_vm1, %v29483_v3  ;;  %v29499_v3 = vpack.c.bf16 %v14051_v27, %v14050_v31  ;;  %v15100_v38 = vld [vmem:[#allocation2 + $0xe7] sm:$0xff]  ;;  %v15101_v31 = vld [vmem:[#allocation2 + $0xef] sm:$0xff] }
 0xc9d   :  { %v15102_v27 = vld [vmem:[#allocation2 + $0x107] sm:$0xff]  ;;  %v15159_v42 = vpack.c.bf16 %v15101_v31, %v15100_v38  ;;  %v15123_v38 = vld [vmem:[#allocation2 + $0x28f] sm:$0xff] }
 0xca3   :  { %21965 = vmatmul.mubr.msk.bf16.gmra.mrb[116].mxu1 %vm27_vm1, %v29489_v4 }
 0xca4   :  { %21968 = vmatprep.mubr.msk.bf16.mxu1 %vm27_vm1, %v29491_v35 }
 0xcab   :  { %21969 = vmatmul.mubr.msk.bf16.gmra.mrb[120].mxu1 %vm27_vm1, %v29497_v9 }
 0xcac   :  { %21972 = vmatprep.mubr.msk.bf16.mxu1 %vm27_vm1, %v29499_v3 }
 0xcb3   :  { %21973 = vmatmul.mubr.msk.bf16.gmra.mrb[124].mxu1 %vm27_vm1, %v29505_v2 }
 0xcb4   :  { %21978 = vmatprep.mubr.msk.bf16.mxu1 %vm27_vm1, %v29175_v34  ;;  %v14570_v34 = vld [vmem:[#allocation2 + $0x209] sm:$0xff] }
 0xcbb   :  { %21979 = vmatmul.mubr.msk.bf16.vlgmr.msra.gmra.mrb[64].mxu1 %vm27_vm1, %v29179_v14  ;;  %v14571_v14 = vld [vmem:[#allocation2 + $0x211] sm:$0xff] }
 0xcbc   :  { %22043 = vmatpush3.bf16.msra.mxu1 %v15285_v32  ;;  %21982 = vmatprep.mubr.msk.bf16.mxu1 %vm27_vm1, %v29192_v24  ;;  %v29545_v24 = vpack.c.bf16 %v14571_v14, %v14570_v34  ;;  %v15160_v32 = vpack.c.bf16 %v15103_v11, %v15102_v27  ;;  %v15105_v34 = vld [vmem:[#allocation2 + $0x12f] sm:$0xff]  ;;  %v15106_v14 = vld [vmem:[#allocation2 + $0x147] sm:$0xff] }
 0xcbd   :  { %23997 = vmatprep.subr.msk.bf16.mxu1 %vm537_vm0, %v19238_v43  ;;  %v15124_v27 = vld [vmem:[#allocation2 + $0x2a7] sm:$0xff]  ;;  %v15125_v11 = vld [vmem:[#allocation2 + $0x2af] sm:$0xff] }
 0xcc3   :  { %21983 = vmatmul.mubr.msk.bf16.gmra.mrb[68].mxu1 %vm27_vm1, %v29194_v51  ;;  %v33073_v51 = vld [vmem:[#allocation51_spill] sm:$0xff] }
 0xcc4   :  { %21986 = vmatprep.mubr.msk.bf16.mxu1 %vm27_vm1, %v29200_v49  ;;  %v33074_v49 = vld [vmem:[#allocation54_spill] sm:$0xff] }
 0xccb   :  { %21987 = vmatmul.mubr.msk.bf16.gmra.mrb[72].mxu1 %vm27_vm1, %v29202_v19  ;;  %v33075_v19 = vld [vmem:[#allocation56_spill] sm:$0xff] }
 0xccc   :  { %21990 = vmatprep.mubr.msk.bf16.mxu1 %vm27_vm1, %v29208_v61  ;;  %v33076_v61 = vld [vmem:[#allocation53_spill] sm:$0xff] }
 0xcd3   :  { %21991 = vmatmul.mubr.msk.bf16.gmra.mrb[76].mxu1 %vm27_vm1, %v29210_v63  ;;  %v14602_v63 = vld [vmem:[#allocation2 + $0x449] sm:$0xff] }
 0xcd4   :  { %21994 = vmatprep.mubr.msk.bf16.mxu1 %vm27_vm1, %v29216_v0  ;;  %v14603_v0 = vld [vmem:[#allocation2 + $0x451] sm:$0xff] }
 0xcdb   :  { %21995 = vmatmul.mubr.msk.bf16.gmra.mrb[80].mxu1 %vm27_vm1, %v29218_v62  ;;  %v15090_v62 = vld [vmem:[#allocation2 + $0x47] sm:$0xff] }
 0xcdc   :  { %21998 = vmatprep.mubr.msk.bf16.mxu1 %vm27_vm1, %v29224_v39  ;;  %v15091_v39 = vld [vmem:[#allocation2 + $0x4f] sm:$0xff] }
 0xce3   :  { %21999 = vmatmul.mubr.msk.bf16.gmra.mrb[84].mxu1 %vm27_vm1, %v29226_v30  ;;  %v29579_v30 = vpack.c.bf16 %v14603_v0, %v14602_v63  ;;  %v15109_v63 = vld [vmem:[#allocation2 + $0x16f] sm:$0xff]  ;;  %v15110_v0 = vld [vmem:[#allocation2 + $0x187] sm:$0xff] }
 0xce4   :  { %22002 = vmatprep.mubr.msk.bf16.mxu1 %vm27_vm1, %v29232_v56  ;;  %v15154_v56 = vpack.c.bf16 %v15091_v39, %v15090_v62  ;;  %v15111_v62 = vld [vmem:[#allocation2 + $0x18f] sm:$0xff] }
 0xceb   :  { %22003 = vmatmul.mubr.msk.bf16.gmra.mrb[88].mxu1 %vm27_vm1, %v29234_v47  ;;  %v15092_v47 = vld [vmem:[#allocation2 + $0x67] sm:$0xff] }
 0xcec   :  { %22006 = vmatprep.mubr.msk.bf16.mxu1 %vm27_vm1, %v29240_v36  ;;  %v15093_v36 = vld [vmem:[#allocation2 + $0x6f] sm:$0xff] }
 0xcf3   :  { %22007 = vmatmul.mubr.msk.bf16.gmra.mrb[92].mxu1 %vm27_vm1, %v29545_v24 }
 0xcf4   :  { %22010 = vmatprep.mubr.msk.bf16.mxu1 %vm27_vm1, %v29245_v33  ;;  %v15094_v33 = vld [vmem:[#allocation2 + $0x87] sm:$0xff] }
 0xcfb   :  { %22011 = vmatmul.mubr.msk.bf16.gmra.mrb[96].mxu1 %vm27_vm1, %v29247_v26  ;;  %v15095_v26 = vld [vmem:[#allocation2 + $0x8f] sm:$0xff] }
 0xcfc   :  { %22014 = vmatprep.mubr.msk.bf16.mxu1 %vm27_vm1, %v29253_v28  ;;  %v15155_v28 = vpack.c.bf16 %v15093_v36, %v15092_v47  ;;  %v15112_v47 = vld [vmem:[#allocation2 + $0x1a7] sm:$0xff]  ;;  %v15113_v36 = vld [vmem:[#allocation2 + $0x1af] sm:$0xff] }
 0xd03   :  { %22015 = vmatmul.mubr.msk.bf16.gmra.mrb[100].mxu1 %vm27_vm1, %v29255_v10  ;;  %v15835_v10 = vsel %vm537_vm0, %v19238_v43, 0  ;;  %v15104_v43 = vld [vmem:[#allocation2 + $0x127] sm:$0xff] }
 0xd04   :  { %22018 = vmatprep.mubr.msk.bf16.mxu1 %vm27_vm1, %v29261_v25  ;;  %v15156_v25 = vpack.c.bf16 %v15095_v26, %v15094_v33  ;;  %v15114_v33 = vld [vmem:[#allocation2 + $0x1c7] sm:$0xff]  ;;  %v15115_v26 = vld [vmem:[#allocation2 + $0x1cf] sm:$0xff] }
 0xd0b   :  { %22019 = vmatmul.mubr.msk.bf16.gmra.mrb[104].mxu1 %vm27_vm1, %v29263_v44  ;;  %v29588_v44 = vld [vmem:[%s32076_s3 + $0x10] sm:$0x3] }
 0xd0c   :  { %22022 = vmatprep.mubr.msk.bf16.mxu1 %vm27_vm1, %v33073_v51  ;;  %v15107_v51 = vld [vmem:[#allocation2 + $0x14f] sm:$0xff] }
 0xd13   :  { %22023 = vmatmul.mubr.msk.bf16.gmra.mrb[108].mxu1 %vm27_vm1, %v33074_v49  ;;  %v15161_v49 = vpack.c.bf16 %v15105_v34, %v15104_v43  ;;  %v15171_v43 = vpack.c.bf16 %v15125_v11, %v15124_v27  ;;  %v15146_v27 = vld [vmem:[#allocation2 + $0x407] sm:$0xff]  ;;  %v15147_v11 = vld [vmem:[#allocation2 + $0x40f] sm:$0xff] }
 0xd14   :  { %22026 = vmatprep.mubr.msk.bf16.mxu1 %vm27_vm1, %v33075_v19  ;;  %v15162_v19 = vpack.c.bf16 %v15107_v51, %v15106_v14  ;;  %v15129_v14 = vld [vmem:[#allocation2 + $0x2ef] sm:$0xff]  ;;  %v15130_v51 = vld [vmem:[#allocation2 + $0x307] sm:$0xff] }
 0xd1b   :  { %22027 = vmatmul.mubr.msk.bf16.gmra.mrb[112].mxu1 %vm27_vm1, %v33076_v61  ;;  %v15108_v61 = vld [vmem:[#allocation2 + $0x167] sm:$0xff] }
 0xd1c   :  { %22030 = vmatprep.mubr.msk.bf16.mxu1 %vm27_vm1, %v29285_v48  ;;  %v15096_v48 = vld [vmem:[#allocation2 + $0xa7] sm:$0xff]  ;;  %v15163_v39 = vpack.c.bf16 %v15109_v63, %v15108_v61 }
 0xd1d   :  { %v15132_v63 = vld [vmem:[#allocation2 + $0x327] sm:$0xff] }
 0xd23   :  { %22031 = vmatmul.mubr.msk.bf16.gmra.mrb[116].mxu1 %vm27_vm1, %v29287_v59  ;;  %v15097_v59 = vld [vmem:[#allocation2 + $0xaf] sm:$0xff] }
 0xd24   :  { %22034 = vmatprep.mubr.msk.bf16.mxu1 %vm27_vm1, %v29293_v60  ;;  %v15098_v60 = vld [vmem:[#allocation2 + $0xc7] sm:$0xff] }
 0xd2b   :  { %22035 = vmatmul.mubr.msk.bf16.gmra.mrb[120].mxu1 %vm27_vm1, %v29295_v41  ;;  %v15099_v41 = vld [vmem:[#allocation2 + $0xcf] sm:$0xff] }
 0xd2c   :  { %22038 = vmatprep.mubr.msk.bf16.mxu1 %vm27_vm1, %v29301_v18  ;;  %v15157_v18 = vpack.c.bf16 %v15097_v59, %v15096_v48  ;;  %v15158_v6 = vpack.c.bf16 %v15099_v41, %v15098_v60  ;;  %v15117_v48 = vld [vmem:[#allocation2 + $0x1ef] sm:$0xff]  ;;  %v15120_v60 = vld [vmem:[#allocation2 + $0x227] sm:$0xff] }
 0xd2d   :  { %v15121_v41 = vld [vmem:[#allocation2 + $0x22f] sm:$0xff] }
 0xd33   :  { %22039 = vmatmul.mubr.msk.bf16.gmra.mrb[124].mxu1 %vm27_vm1, %v29579_v30 }
 0xd34   :  { %22044 = vmatprep.mubr.msk.bf16.mxu1 %vm27_vm1, %v15154_v56  ;;  %v15164_v56 = vpack.c.bf16 %v15111_v62, %v15110_v0  ;;  %v15133_v0 = vld [vmem:[#allocation2 + $0x32f] sm:$0xff]  ;;  %v15134_v62 = vld [vmem:[#allocation2 + $0x347] sm:$0xff] }
 0xd3b   :  { %22045 = vmatmul.mubr.msk.bf16.vlgmr.msra.gmra.mrb[64].mxu1 %vm27_vm1, %v15155_v28  ;;  %v15165_v28 = vpack.c.bf16 %v15113_v36, %v15112_v47  ;;  %v15136_v36 = vld [vmem:[#allocation2 + $0x367] sm:$0xff] }
 0xd3c   :  { %22109 = vmatpush3.bf16.msra.mxu1 %v15835_v10  ;;  %22048 = vmatprep.mubr.msk.bf16.mxu1 %vm27_vm1, %v15156_v25  ;;  %v15166_v10 = vpack.c.bf16 %v15115_v26, %v15114_v33  ;;  %v15116_v25 = vld [vmem:[#allocation2 + $0x1e7] sm:$0xff]  ;;  %v15137_v33 = vld [vmem:[#allocation2 + $0x36f] sm:$0xff] }
 0xd3d   :  { %23998 = vmatprep.subr.msk.bf16.mxu1 %vm537_vm0, %v29588_v44  ;;  %v15167_v59 = vpack.c.bf16 %v15117_v48, %v15116_v25  ;;  %v15138_v26 = vld [vmem:[#allocation2 + $0x387] sm:$0xff] }
 0xd3e   :  { %v15140_v48 = vld [vmem:[#allocation2 + $0x3a7] sm:$0xff] }
 0xd43   :  { %22049 = vmatmul.mubr.msk.bf16.gmra.mrb[68].mxu1 %vm27_vm1, %v15157_v18  ;;  %v15169_v18 = vpack.c.bf16 %v15121_v41, %v15120_v60  ;;  %v15142_v60 = vld [vmem:[#allocation2 + $0x3c7] sm:$0xff]  ;;  %v15143_v41 = vld [vmem:[#allocation2 + $0x3cf] sm:$0xff] }
 0xd44   :  { %22052 = vmatprep.mubr.msk.bf16.mxu1 %vm27_vm1, %v15158_v6  ;;  %v15122_v6 = vld [vmem:[#allocation2 + $0x287] sm:$0xff] }
 0xd45   :  { %v15170_v31 = vpack.c.bf16 %v15123_v38, %v15122_v6  ;;  %v15180_v6 = vpack.c.bf16 %v15143_v41, %v15142_v60  ;;  %v15144_v38 = vld [vmem:[#allocation2 + $0x3e7] sm:$0xff] }
 0xd4b   :  { %22053 = vmatmul.mubr.msk.bf16.gmra.mrb[72].mxu1 %vm27_vm1, %v15159_v42  ;;  %v15126_v42 = vld [vmem:[#allocation2 + $0x2c7] sm:$0xff] }
 0xd4c   :  { %22056 = vmatprep.mubr.msk.bf16.mxu1 %vm27_vm1, %v15160_v32  ;;  %v15127_v32 = vld [vmem:[#allocation2 + $0x2cf] sm:$0xff] }
 0xd4d   :  { %v15172_v34 = vpack.c.bf16 %v15127_v32, %v15126_v42  ;;  %v15182_v32 = vpack.c.bf16 %v15147_v11, %v15146_v27  ;;  %v16221_v27 = vld [vmem:[#allocation2 + $0x231] sm:$0xff] }
 0xd53   :  { %22057 = vmatmul.mubr.msk.bf16.gmra.mrb[76].mxu1 %vm27_vm1, %v15161_v49  ;;  %v15131_v49 = vld [vmem:[#allocation2 + $0x30f] sm:$0xff] }
 0xd54   :  { %22060 = vmatprep.mubr.msk.bf16.mxu1 %vm27_vm1, %v15162_v19  ;;  %v15174_v61 = vpack.c.bf16 %v15131_v49, %v15130_v51  ;;  %v15153_v51 = vld [vmem:[#allocation2 + $0x46f] sm:$0xff] }
 0xd5b   :  { %22061 = vmatmul.mubr.msk.bf16.gmra.mrb[80].mxu1 %vm27_vm1, %v15163_v39  ;;  %v15135_v39 = vld [vmem:[#allocation2 + $0x34f] sm:$0xff] }
 0xd5c   :  { %22064 = vmatprep.mubr.msk.bf16.mxu1 %vm27_vm1, %v15164_v56  ;;  %v15175_v56 = vpack.c.bf16 %v15133_v0, %v15132_v63  ;;  %v15176_v47 = vpack.c.bf16 %v15135_v39, %v15134_v62  ;;  %v16206_v63 = vld [vmem:[#allocation2 + $0x149] sm:$0xff]  ;;  %v16207_v0 = vld [vmem:[#allocation2 + $0x151] sm:$0xff] }
 0xd5d   :  { %v16262_v39 = vpack.c.bf16 %v16207_v0, %v16206_v63  ;;  %v16252_v0 = vld [vmem:[#allocation2 + $0x469] sm:$0xff] }
 0xd63   :  { %22065 = vmatmul.mubr.msk.bf16.gmra.mrb[84].mxu1 %vm27_vm1, %v15165_v28  ;;  %v15139_v28 = vld [vmem:[#allocation2 + $0x38f] sm:$0xff] }
 0xd64   :  { %22068 = vmatprep.mubr.msk.bf16.mxu1 %vm27_vm1, %v15166_v10  ;;  %v15177_v10 = vpack.c.bf16 %v15137_v33, %v15136_v36  ;;  %v15178_v25 = vpack.c.bf16 %v15139_v28, %v15138_v26  ;;  %v16210_v36 = vld [vmem:[#allocation2 + $0x189] sm:$0xff]  ;;  %v16211_v33 = vld [vmem:[#allocation2 + $0x191] sm:$0xff] }
 0xd65   :  { %v16264_v28 = vpack.c.bf16 %v16211_v33, %v16210_v36 }
 0xd6b   :  { %22069 = vmatmul.mubr.msk.bf16.gmra.mrb[88].mxu1 %vm27_vm1, %v15167_v59  ;;  %v15141_v59 = vld [vmem:[#allocation2 + $0x3af] sm:$0xff] }
 0xd6c   :  { %22072 = vmatprep.mubr.msk.bf16.mxu1 %vm27_vm1, %v29341_v46  ;;  %v15128_v46 = vld [vmem:[#allocation2 + $0x2e7] sm:$0xff] }
 0xd6d   :  { %v15173_v19 = vpack.c.bf16 %v15129_v14, %v15128_v46  ;;  %v15152_v14 = vld [vmem:[#allocation2 + $0x467] sm:$0xff] }
 0xd6e   :  { %v15185_v49 = vpack.c.bf16 %v15153_v51, %v15152_v14  ;;  %v16226_v14 = vld [vmem:[#allocation2 + $0x2c9] sm:$0xff]  ;;  %v16227_v51 = vld [vmem:[#allocation2 + $0x2d1] sm:$0xff] }
 0xd73   :  { %22073 = vmatmul.mubr.msk.bf16.gmra.mrb[92].mxu1 %vm27_vm1, %v15169_v18  ;;  %v15179_v18 = vpack.c.bf16 %v15141_v59, %v15140_v48  ;;  %v16214_v48 = vld [vmem:[#allocation2 + $0x1c9] sm:$0xff]  ;;  %v16215_v59 = vld [vmem:[#allocation2 + $0x1d1] sm:$0xff] }
 0xd74   :  { %22076 = vmatprep.mubr.msk.bf16.mxu1 %vm27_vm1, %v15170_v31  ;;  %v15145_v31 = vld [vmem:[#allocation2 + $0x3ef] sm:$0xff]  ;;  %v16266_v41 = vpack.c.bf16 %v16215_v59, %v16214_v48 }
 0xd75   :  { %v15181_v42 = vpack.c.bf16 %v15145_v31, %v15144_v38  ;;  %v16220_v31 = vld [vmem:[#allocation2 + $0x229] sm:$0xff] }
 0xd76   :  { %v16269_v11 = vpack.c.bf16 %v16221_v27, %v16220_v31 }
 0xd7b   :  { %22077 = vmatmul.mubr.msk.bf16.gmra.mrb[96].mxu1 %vm27_vm1, %v15171_v43  ;;  %v15148_v43 = vld [vmem:[#allocation2 + $0x427] sm:$0xff] }
 0xd7c   :  { %22080 = vmatprep.mubr.msk.bf16.mxu1 %vm27_vm1, %v15172_v34  ;;  %v15149_v34 = vld [vmem:[#allocation2 + $0x42f] sm:$0xff] }
 0xd7d   :  { %v15183_v46 = vpack.c.bf16 %v15149_v34, %v15148_v43  ;;  %v16224_v34 = vld [vmem:[#allocation2 + $0x2a9] sm:$0xff] }
 0xd83   :  { %22081 = vmatmul.mubr.msk.bf16.gmra.mrb[100].mxu1 %vm27_vm1, %v15173_v19  ;;  %v16385_v19 = vsel %vm537_vm0, %v29588_v44, 0  ;;  %v16204_v44 = vld [vmem:[#allocation2 + $0x129] sm:$0xff] }
 0xd84   :  { %22084 = vmatprep.mubr.msk.bf16.mxu1 %vm27_vm1, %v15174_v61  ;;  %v16205_v61 = vld [vmem:[#allocation2 + $0x131] sm:$0xff] }
 0xd85   :  { %v16261_v62 = vpack.c.bf16 %v16205_v61, %v16204_v44  ;;  %v16248_v44 = vld [vmem:[#allocation2 + $0x429] sm:$0xff]  ;;  %v16249_v61 = vld [vmem:[#allocation2 + $0x431] sm:$0xff] }
 0xd86   :  { %v16283_v63 = vpack.c.bf16 %v16249_v61, %v16248_v44 }
 0xd8b   :  { %22085 = vmatmul.mubr.msk.bf16.gmra.mrb[104].mxu1 %vm27_vm1, %v15175_v56  ;;  %v16208_v56 = vld [vmem:[#allocation2 + $0x169] sm:$0xff] }
 0xd8c   :  { %22088 = vmatprep.mubr.msk.bf16.mxu1 %vm27_vm1, %v15176_v47  ;;  %v16209_v47 = vld [vmem:[#allocation2 + $0x171] sm:$0xff] }
 0xd8d   :  { %v16263_v26 = vpack.c.bf16 %v16209_v47, %v16208_v56  ;;  %v17301_v56 = vld [vmem:[%s32079_s6] sm:$0x3] }
 0xd8e   :  { %23999 = vmatprep.subr.msk.bf16.mxu0 %vm537_vm0, %v17301_v56  ;;  %v17399_v47 = vsel %vm537_vm0, %v17301_v56, 0 }
 0xd8f   :  { %22241 = vmatpush3.bf16.msra.mxu0 %v17399_v47 }
 0xd93   :  { %22089 = vmatmul.mubr.msk.bf16.gmra.mrb[108].mxu1 %vm27_vm1, %v15177_v10  ;;  %v16212_v10 = vld [vmem:[#allocation2 + $0x1a9] sm:$0xff] }
 0xd94   :  { %22092 = vmatprep.mubr.msk.bf16.mxu1 %vm27_vm1, %v15178_v25  ;;  %v16213_v25 = vld [vmem:[#allocation2 + $0x1b1] sm:$0xff] }
 0xd95   :  { %v16265_v60 = vpack.c.bf16 %v16213_v25, %v16212_v10 }
 0xd9b   :  { %22093 = vmatmul.mubr.msk.bf16.gmra.mrb[112].mxu1 %vm27_vm1, %v15179_v18  ;;  %v16216_v18 = vld [vmem:[#allocation2 + $0x1e9] sm:$0xff] }
 0xd9c   :  { %22096 = vmatprep.mubr.msk.bf16.mxu1 %vm27_vm1, %v15180_v6  ;;  %v16217_v6 = vld [vmem:[#allocation2 + $0x1f1] sm:$0xff] }
 0xd9d   :  { %v16267_v38 = vpack.c.bf16 %v16217_v6, %v16216_v18 }
 0xda3   :  { %22097 = vmatmul.mubr.msk.bf16.gmra.mrb[116].mxu1 %vm27_vm1, %v15181_v42  ;;  %v16222_v42 = vld [vmem:[#allocation2 + $0x289] sm:$0xff] }
 0xda4   :  { %22100 = vmatprep.mubr.msk.bf16.mxu1 %vm27_vm1, %v15182_v32  ;;  %v16223_v32 = vld [vmem:[#allocation2 + $0x291] sm:$0xff] }
 0xda5   :  { %v16270_v43 = vpack.c.bf16 %v16223_v32, %v16222_v42 }
 0xdab   :  { %22101 = vmatmul.mubr.msk.bf16.gmra.mrb[120].mxu1 %vm27_vm1, %v15183_v46  ;;  %v16225_v46 = vld [vmem:[#allocation2 + $0x2b1] sm:$0xff] }
 0xdac   :  { %22104 = vmatprep.mubr.msk.bf16.mxu1 %vm27_vm1, %v29375_v12  ;;  %v15670_v12 = vld [vmem:[#allocation2 + $0x228] sm:$0xff] }
 0xdb3   :  { %22105 = vmatmul.mubr.msk.bf16.gmra.mrb[124].mxu1 %vm27_vm1, %v15185_v49  ;;  %v16271_v49 = vpack.c.bf16 %v16225_v46, %v16224_v34 }
 0xdb4   :  { %22110 = vmatprep.mubr.msk.bf16.mxu1 %vm27_vm1, %v29380_v21  ;;  %v15671_v21 = vld [vmem:[#allocation2 + $0x230] sm:$0xff] }
 0xdbb   :  { %22111 = vmatmul.mubr.msk.bf16.vlgmr.msra.gmra.mrb[64].mxu1 %vm27_vm1, %v29383_v55  ;;  %v15719_v55 = vpack.c.bf16 %v15671_v21, %v15670_v12  ;;  %v16229_v12 = vld [vmem:[#allocation2 + $0x2f1] sm:$0xff]  ;;  %v16230_v21 = vld [vmem:[#allocation2 + $0x309] sm:$0xff] }
 0xdbc   :  { %22175 = vmatpush3.bf16.msra.mxu1 %v16385_v19  ;;  %22114 = vmatprep.mubr.msk.bf16.mxu1 %vm27_vm1, %v29396_v23  ;;  %v33077_v23 = vld [vmem:[#allocation55_spill] sm:$0xff]  ;;  %v16272_v19 = vpack.c.bf16 %v16227_v51, %v16226_v14 }
 0xdc3   :  { %22115 = vmatmul.mubr.msk.bf16.gmra.mrb[68].mxu1 %vm27_vm1, %v29398_v8  ;;  %v33078_v8 = vld [vmem:[#allocation58_spill] sm:$0xff] }
 0xdc4   :  { %22118 = vmatprep.mubr.msk.bf16.mxu1 %vm27_vm1, %v29404_v50  ;;  %v15702_v50 = vld [vmem:[#allocation2 + $0x468] sm:$0xff] }
 0xdcb   :  { %22119 = vmatmul.mubr.msk.bf16.gmra.mrb[72].mxu1 %vm27_vm1, %v29406_v13  ;;  %v15703_v13 = vld [vmem:[#allocation2 + $0x470] sm:$0xff] }
 0xdcc   :  { %22122 = vmatprep.mubr.msk.bf16.mxu1 %vm27_vm1, %v29412_v15  ;;  %v15735_v15 = vpack.c.bf16 %v15703_v13, %v15702_v50  ;;  %v16232_v50 = vld [vmem:[#allocation2 + $0x329] sm:$0xff]  ;;  %v16233_v13 = vld [vmem:[#allocation2 + $0x331] sm:$0xff] }
 0xdd3   :  { %22123 = vmatmul.mubr.msk.bf16.gmra.mrb[76].mxu1 %vm27_vm1, %v29414_v54  ;;  %v16190_v54 = vld [vmem:[#allocation2 + $0x49] sm:$0xff] }
 0xdd4   :  { %22126 = vmatprep.mubr.msk.bf16.mxu1 %vm27_vm1, %v29420_v40  ;;  %v16191_v40 = vld [vmem:[#allocation2 + $0x51] sm:$0xff] }
 0xddb   :  { %22127 = vmatmul.mubr.msk.bf16.gmra.mrb[80].mxu1 %vm27_vm1, %v29422_v5  ;;  %v16254_v5 = vpack.c.bf16 %v16191_v40, %v16190_v54  ;;  %v16235_v54 = vld [vmem:[#allocation2 + $0x351] sm:$0xff]  ;;  %v16275_v40 = vpack.c.bf16 %v16233_v13, %v16232_v50 }
 0xddc   :  { %22130 = vmatprep.mubr.msk.bf16.mxu1 %vm27_vm1, %v29428_v45  ;;  %v16192_v45 = vld [vmem:[#allocation2 + $0x69] sm:$0xff] }
 0xde3   :  { %22131 = vmatmul.mubr.msk.bf16.gmra.mrb[84].mxu1 %vm27_vm1, %v29430_v1  ;;  %v16193_v1 = vld [vmem:[#allocation2 + $0x71] sm:$0xff] }
 0xde4   :  { %22134 = vmatprep.mubr.msk.bf16.mxu1 %vm27_vm1, %v29436_v7  ;;  %v16194_v7 = vld [vmem:[#allocation2 + $0x89] sm:$0xff] }
 0xdeb   :  { %22135 = vmatmul.mubr.msk.bf16.gmra.mrb[88].mxu1 %vm27_vm1, %v29438_v22  ;;  %v16195_v22 = vld [vmem:[#allocation2 + $0x91] sm:$0xff] }
 0xdec   :  { %22138 = vmatprep.mubr.msk.bf16.mxu1 %vm27_vm1, %v29444_v58  ;;  %v16255_v58 = vpack.c.bf16 %v16193_v1, %v16192_v45  ;;  %v16236_v45 = vld [vmem:[#allocation2 + $0x369] sm:$0xff]  ;;  %v16237_v1 = vld [vmem:[#allocation2 + $0x371] sm:$0xff] }
 0xdf3   :  { %22139 = vmatmul.mubr.msk.bf16.gmra.mrb[92].mxu1 %vm27_vm1, %v15719_v55  ;;  %v16231_v55 = vld [vmem:[#allocation2 + $0x311] sm:$0xff] }
 0xdf4   :  { %22142 = vmatprep.mubr.msk.bf16.mxu1 %vm27_vm1, %v29449_v52  ;;  %v16256_v52 = vpack.c.bf16 %v16195_v22, %v16194_v7  ;;  %v16238_v7 = vld [vmem:[#allocation2 + $0x389] sm:$0xff]  ;;  %v16239_v22 = vld [vmem:[#allocation2 + $0x391] sm:$0xff] }
 0xdfb   :  { %22143 = vmatmul.mubr.msk.bf16.gmra.mrb[96].mxu1 %vm27_vm1, %v29451_v57  ;;  %v16196_v57 = vld [vmem:[#allocation2 + $0xa9] sm:$0xff] }
 0xdfc   :  { %22146 = vmatprep.mubr.msk.bf16.mxu1 %vm27_vm1, %v29457_v20  ;;  %v16197_v20 = vld [vmem:[#allocation2 + $0xb1] sm:$0xff] }
 0xe03   :  { %22147 = vmatmul.mubr.msk.bf16.gmra.mrb[100].mxu1 %vm27_vm1, %v29459_v37  ;;  %v16198_v37 = vld [vmem:[#allocation2 + $0xc9] sm:$0xff] }
 0xe04   :  { %22150 = vmatprep.mubr.msk.bf16.mxu1 %vm27_vm1, %v29465_v16  ;;  %v16199_v16 = vld [vmem:[#allocation2 + $0xd1] sm:$0xff] }
 0xe0b   :  { %22151 = vmatmul.mubr.msk.bf16.gmra.mrb[104].mxu1 %vm27_vm1, %v29467_v29  ;;  %v16257_v29 = vpack.c.bf16 %v16197_v20, %v16196_v57  ;;  %v16240_v57 = vld [vmem:[#allocation2 + $0x3a9] sm:$0xff]  ;;  %v16241_v20 = vld [vmem:[#allocation2 + $0x3b1] sm:$0xff] }
 0xe0c   :  { %22154 = vmatprep.mubr.msk.bf16.mxu1 %vm27_vm1, %v29473_v17  ;;  %v16258_v17 = vpack.c.bf16 %v16199_v16, %v16198_v37  ;;  %v16242_v37 = vld [vmem:[#allocation2 + $0x3c9] sm:$0xff]  ;;  %v16243_v16 = vld [vmem:[#allocation2 + $0x3d1] sm:$0xff] }
 0xe13   :  { %22155 = vmatmul.mubr.msk.bf16.gmra.mrb[108].mxu1 %vm27_vm1, %v29475_v53  ;;  %v16200_v53 = vld [vmem:[#allocation2 + $0xe9] sm:$0xff] }
 0xe14   :  { %22158 = vmatprep.mubr.msk.bf16.mxu1 %vm27_vm1, %v33077_v23 }
 0xe1b   :  { %22159 = vmatmul.mubr.msk.bf16.gmra.mrb[112].mxu1 %vm27_vm1, %v33078_v8  ;;  %v16274_v8 = vpack.c.bf16 %v16231_v55, %v16230_v21 }
 0xe1c   :  { %22162 = vmatprep.mubr.msk.bf16.mxu1 %vm27_vm1, %v29489_v4  ;;  %v16203_v4 = vld [vmem:[#allocation2 + $0x111] sm:$0xff] }
 0xe23   :  { %22163 = vmatmul.mubr.msk.bf16.gmra.mrb[116].mxu1 %vm27_vm1, %v29491_v35 }
 0xe24   :  { %22166 = vmatprep.mubr.msk.bf16.mxu1 %vm27_vm1, %v29497_v9  ;;  %v16201_v9 = vld [vmem:[#allocation2 + $0xf1] sm:$0xff] }
 0xe25   :  { %v16259_v35 = vpack.c.bf16 %v16201_v9, %v16200_v53  ;;  %v16244_v53 = vld [vmem:[#allocation2 + $0x3e9] sm:$0xff]  ;;  %v16245_v9 = vld [vmem:[#allocation2 + $0x3f1] sm:$0xff] }
 0xe2b   :  { %22167 = vmatmul.mubr.msk.bf16.gmra.mrb[120].mxu1 %vm27_vm1, %v29499_v3  ;;  %v16202_v3 = vld [vmem:[#allocation2 + $0x109] sm:$0xff] }
 0xe2c   :  { %22170 = vmatprep.mubr.msk.bf16.mxu1 %vm27_vm1, %v29505_v2  ;;  %v16260_v2 = vpack.c.bf16 %v16203_v4, %v16202_v3  ;;  %v16246_v3 = vld [vmem:[#allocation2 + $0x409] sm:$0xff]  ;;  %v16247_v4 = vld [vmem:[#allocation2 + $0x411] sm:$0xff] }
 0xe33   :  { %22171 = vmatmul.mubr.msk.bf16.gmra.mrb[124].mxu1 %vm27_vm1, %v15735_v15  ;;  %v16234_v15 = vld [vmem:[#allocation2 + $0x349] sm:$0xff] }
 0xe34   :  { %22176 = vmatprep.mubr.msk.bf16.mxu1 %vm27_vm1, %v16254_v5  ;;  %v16276_v5 = vpack.c.bf16 %v16235_v54, %v16234_v15 }
 0xe3b   :  { %22177 = vmatmul.mubr.msk.bf16.vlgmr.msra.gmra.mrb[64].mxu1 %vm27_vm1, %v16255_v58  ;;  %v16277_v58 = vpack.c.bf16 %v16237_v1, %v16236_v45 }
 0xe3c   :  { %22180 = vmatprep.mubr.msk.bf16.mxu1 %vm27_vm1, %v16256_v52  ;;  %v16278_v52 = vpack.c.bf16 %v16239_v22, %v16238_v7 }
 0xe43   :  { %22181 = vmatmul.mubr.msk.bf16.gmra.mrb[68].mxu1 %vm27_vm1, %v16257_v29  ;;  %v16279_v29 = vpack.c.bf16 %v16241_v20, %v16240_v57 }
 0xe44   :  { %22184 = vmatprep.mubr.msk.bf16.mxu1 %vm27_vm1, %v16258_v17  ;;  %v16280_v17 = vpack.c.bf16 %v16243_v16, %v16242_v37 }
 0xe4b   :  { %22185 = vmatmul.mubr.msk.bf16.gmra.mrb[72].mxu1 %vm27_vm1, %v16259_v35  ;;  %v16281_v35 = vpack.c.bf16 %v16245_v9, %v16244_v53 }
 0xe4c   :  { %22188 = vmatprep.mubr.msk.bf16.mxu1 %vm27_vm1, %v16260_v2  ;;  %v16282_v2 = vpack.c.bf16 %v16247_v4, %v16246_v3 }
 0xe53   :  { %22189 = vmatmul.mubr.msk.bf16.gmra.mrb[76].mxu1 %vm27_vm1, %v16261_v62  ;;  %v16253_v62 = vld [vmem:[#allocation2 + $0x471] sm:$0xff] }
 0xe54   :  { %22192 = vmatprep.mubr.msk.bf16.mxu1 %vm27_vm1, %v16262_v39  ;;  %v16285_v39 = vpack.c.bf16 %v16253_v62, %v16252_v0 }
 0xe5b   :  { %22193 = vmatmul.mubr.msk.bf16.gmra.mrb[80].mxu1 %vm27_vm1, %v16263_v26 }
 0xe5c   :  { %22196 = vmatprep.mubr.msk.bf16.mxu1 %vm27_vm1, %v16264_v28 }
 0xe63   :  { %22197 = vmatmul.mubr.msk.bf16.gmra.mrb[84].mxu1 %vm27_vm1, %v16265_v60 }
 0xe64   :  { %22200 = vmatprep.mubr.msk.bf16.mxu1 %vm27_vm1, %v16266_v41 }
 0xe6b   :  { %22201 = vmatmul.mubr.msk.bf16.gmra.mrb[88].mxu1 %vm27_vm1, %v16267_v38 }
 0xe6c   :  { %22204 = vmatprep.mubr.msk.bf16.mxu1 %vm27_vm1, %v29545_v24  ;;  %v16228_v24 = vld [vmem:[#allocation2 + $0x2e9] sm:$0xff] }
 0xe6d   :  { %v16273_v23 = vpack.c.bf16 %v16229_v12, %v16228_v24 }
 0xe73   :  { %22205 = vmatmul.mubr.msk.bf16.gmra.mrb[92].mxu1 %vm27_vm1, %v16269_v11 }
 0xe74   :  { %22208 = vmatprep.mubr.msk.bf16.mxu1 %vm27_vm1, %v16270_v43 }
 0xe7b   :  { %22209 = vmatmul.mubr.msk.bf16.gmra.mrb[96].mxu1 %vm27_vm1, %v16271_v49 }
 0xe7c   :  { %22212 = vmatprep.mubr.msk.bf16.mxu1 %vm27_vm1, %v16272_v19 }
 0xe83   :  { %22213 = vmatmul.mubr.msk.bf16.gmra.mrb[100].mxu1 %vm27_vm1, %v16273_v23 }
 0xe84   :  { %22216 = vmatprep.mubr.msk.bf16.mxu1 %vm27_vm1, %v16274_v8 }
 0xe8b   :  { %22217 = vmatmul.mubr.msk.bf16.gmra.mrb[104].mxu1 %vm27_vm1, %v16275_v40 }
 0xe8c   :  { %22220 = vmatprep.mubr.msk.bf16.mxu1 %vm27_vm1, %v16276_v5 }
 0xe93   :  { %22221 = vmatmul.mubr.msk.bf16.gmra.mrb[108].mxu1 %vm27_vm1, %v16277_v58 }
 0xe94   :  { %22224 = vmatprep.mubr.msk.bf16.mxu1 %vm27_vm1, %v16278_v52 }
 0xe9b   :  { %22225 = vmatmul.mubr.msk.bf16.gmra.mrb[112].mxu1 %vm27_vm1, %v16279_v29 }
 0xe9c   :  { %22228 = vmatprep.mubr.msk.bf16.mxu1 %vm27_vm1, %v16280_v17 }
 0xea3   :  { %22229 = vmatmul.mubr.msk.bf16.gmra.mrb[116].mxu1 %vm27_vm1, %v16281_v35 }
 0xea4   :  { %22232 = vmatprep.mubr.msk.bf16.mxu1 %vm27_vm1, %v16282_v2 }
 0xeab   :  { %22233 = vmatmul.mubr.msk.bf16.gmra.mrb[120].mxu1 %vm27_vm1, %v16283_v63 }
 0xeac   :  { %22236 = vmatprep.mubr.msk.bf16.mxu1 %vm27_vm1, %v29579_v30 }
 0xeb3   :  { %22237 = vmatmul.mubr.msk.bf16.gmra.mrb[124].mxu1 %vm27_vm1, %v16285_v39 }
 0xf0e   :  { %v29728_v36 = vpop.f32.mrb[64].mxu1 }
 0xf0f   :  { %v29730_v33 = vpop.f32.mrb[65].mxu1  ;;  %v16876_v10 = vmul.f32 %v29728_v36, %v29728_v36  ;;  %v16743_v41 = vsel %vm27_vm1, %v29728_v36, 0.0 }
 0xf10   :  { %v16874_v30 = vmul.f32 %v29730_v33, %v29730_v33  ;;  %v29734_v26 = vpop.f32.mrb[66].mxu1  ;;  %v16740_v25 = vsel %vm27_vm1, %v29730_v33, 0.0 }
 0xf11   :  { %v29736_v28 = vpop.f32.mrb[67].mxu1  ;;  %v16877_v6 = vmul.f32 %v29734_v26, %v29734_v26  ;;  %v16941_v11 = vsel %vm27_vm1, %v16876_v10, 0.0  ;;  %v16745_v42 = vsel %vm27_vm1, %v29734_v26, 0.0 }
 0xf12   :  { %v16741_v48 = vsel %vm27_vm1, %v29736_v28, 0.0  ;;  %v16875_v59 = vmul.f32 %v29736_v28, %v29736_v28  ;;  %v16938_v18 = vsel %vm27_vm1, %v16874_v30, 0.0 }
 0xf13   :  { %v16742_v60 = vadd.f32 %v16741_v48, %v16740_v25  ;;  %v16943_v14 = vsel %vm27_vm1, %v16877_v6, 0.0 }
 0xf14   :  { %v16939_v38 = vsel %vm27_vm1, %v16875_v59, 0.0 }
 0xf15   :  { %v16744_v31 = vadd.f32 %v16743_v41, %v16742_v60  ;;  %v16940_v27 = vadd.f32 %v16939_v38, %v16938_v18 }
 0xf16   :  { %v29755_v32 = vpop.f32.mrb[68].mxu1 }
 0xf17   :  { %v16942_v43 = vadd.f32 %v16941_v11, %v16940_v27  ;;  %v29757_v34 = vpop.f32.mrb[69].mxu1  ;;  %v16746_v46 = vadd.f32 %v16745_v42, %v16744_v31  ;;  %v16880_v55 = vmul.f32 %v29755_v32, %v29755_v32  ;;  %v16751_v54 = vsel %vm27_vm1, %v29755_v32, 0.0 }
 0xf18   :  { %v16747_v51 = vsel %vm27_vm1, %v29757_v34, 0.0  ;;  %v16878_v49 = vmul.f32 %v29757_v34, %v29757_v34  ;;  %v29764_v19 = vpop.f32.mrb[70].mxu1 }
 0xf19   :  { %v16748_v24 = vadd.f32 %v16747_v51, %v16746_v46  ;;  %v16944_v12 = vadd.f32 %v16943_v14, %v16942_v43  ;;  %v29766_v21 = vpop.f32.mrb[71].mxu1  ;;  %v16881_v40 = vmul.f32 %v29764_v19, %v29764_v19  ;;  %v16949_v7 = vsel %vm27_vm1, %v16880_v55, 0.0 }
 0xf1a   :  { %v16945_v23 = vsel %vm27_vm1, %v16878_v49, 0.0  ;;  %v16749_v8 = vsel %vm27_vm1, %v29766_v21, 0.0  ;;  %v16879_v50 = vmul.f32 %v29766_v21, %v29766_v21  ;;  %v16753_v22 = vsel %vm27_vm1, %v29764_v19, 0.0 }
 0xf1b   :  { %v16946_v13 = vadd.f32 %v16945_v23, %v16944_v12  ;;  %v16750_v15 = vadd.f32 %v16749_v8, %v16748_v24  ;;  %v16951_v37 = vsel %vm27_vm1, %v16881_v40, 0.0 }
 0xf1c   :  { %v16947_v5 = vsel %vm27_vm1, %v16879_v50, 0.0 }
 0xf1d   :  { %v16752_v45 = vadd.f32 %v16751_v54, %v16750_v15  ;;  %v16948_v1 = vadd.f32 %v16947_v5, %v16946_v13 }
 0xf1e   :  { %v29783_v58 = vpop.f32.mrb[72].mxu1 }
 0xf1f   :  { %v16950_v52 = vadd.f32 %v16949_v7, %v16948_v1  ;;  %v29785_v57 = vpop.f32.mrb[73].mxu1  ;;  %v16754_v20 = vadd.f32 %v16753_v22, %v16752_v45  ;;  %v16884_v4 = vmul.f32 %v29783_v58, %v29783_v58  ;;  %v16759_v0 = vsel %vm27_vm1, %v29783_v58, 0.0 }
 0xf20   :  { %v16755_v16 = vsel %vm27_vm1, %v29785_v57, 0.0  ;;  %v16882_v29 = vmul.f32 %v29785_v57, %v29785_v57  ;;  %v29792_v17 = vpop.f32.mrb[74].mxu1 }
 0xf21   :  { %v16756_v53 = vadd.f32 %v16755_v16, %v16754_v20  ;;  %v16952_v9 = vadd.f32 %v16951_v37, %v16950_v52  ;;  %v29794_v3 = vpop.f32.mrb[75].mxu1  ;;  %v16885_v62 = vmul.f32 %v29792_v17, %v29792_v17  ;;  %v16957_v30 = vsel %vm27_vm1, %v16884_v4, 0.0 }
 0xf22   :  { %v16953_v35 = vsel %vm27_vm1, %v16882_v29, 0.0  ;;  %v16757_v2 = vsel %vm27_vm1, %v29794_v3, 0.0  ;;  %v16883_v44 = vmul.f32 %v29794_v3, %v29794_v3  ;;  %v16761_v10 = vsel %vm27_vm1, %v29792_v17, 0.0 }
 0xf23   :  { %v16954_v61 = vadd.f32 %v16953_v35, %v16952_v9  ;;  %v16758_v63 = vadd.f32 %v16757_v2, %v16756_v53  ;;  %v16959_v41 = vsel %vm27_vm1, %v16885_v62, 0.0 }
 0xf24   :  { %v16955_v39 = vsel %vm27_vm1, %v16883_v44, 0.0 }
 0xf25   :  { %v16760_v56 = vadd.f32 %v16759_v0, %v16758_v63  ;;  %v16956_v47 = vadd.f32 %v16955_v39, %v16954_v61 }
 0xf26   :  { %v29811_v25 = vpop.f32.mrb[76].mxu1 }
 0xf27   :  { %v16958_v48 = vadd.f32 %v16957_v30, %v16956_v47  ;;  %v29813_v59 = vpop.f32.mrb[77].mxu1  ;;  %v16762_v60 = vadd.f32 %v16761_v10, %v16760_v56  ;;  %v16888_v42 = vmul.f32 %v29811_v25, %v29811_v25  ;;  %v16767_v24 = vsel %vm27_vm1, %v29811_v25, 0.0 }
 0xf28   :  { %v16763_v18 = vsel %vm27_vm1, %v29813_v59, 0.0  ;;  %v16886_v6 = vmul.f32 %v29813_v59, %v29813_v59  ;;  %v29820_v38 = vpop.f32.mrb[78].mxu1 }
 0xf29   :  { %v16764_v31 = vadd.f32 %v16763_v18, %v16762_v60  ;;  %v16960_v27 = vadd.f32 %v16959_v41, %v16958_v48  ;;  %v29822_v11 = vpop.f32.mrb[79].mxu1  ;;  %v16889_v12 = vmul.f32 %v29820_v38, %v29820_v38  ;;  %v16965_v50 = vsel %vm27_vm1, %v16888_v42, 0.0 }
 0xf2a   :  { %v16961_v43 = vsel %vm27_vm1, %v16886_v6, 0.0  ;;  %v16765_v46 = vsel %vm27_vm1, %v29822_v11, 0.0  ;;  %v16887_v14 = vmul.f32 %v29822_v11, %v29822_v11  ;;  %v16769_v13 = vsel %vm27_vm1, %v29820_v38, 0.0 }
 0xf2b   :  { %v16962_v51 = vadd.f32 %v16961_v43, %v16960_v27  ;;  %v16766_v49 = vadd.f32 %v16765_v46, %v16764_v31  ;;  %v16967_v45 = vsel %vm27_vm1, %v16889_v12, 0.0 }
 0xf2c   :  { %v16963_v55 = vsel %vm27_vm1, %v16887_v14, 0.0 }
 0xf2d   :  { %v16768_v23 = vadd.f32 %v16767_v24, %v16766_v49  ;;  %v16964_v8 = vadd.f32 %v16963_v55, %v16962_v51 }
 0xf2e   :  { %v29839_v15 = vpop.f32.mrb[80].mxu1 }
 0xf2f   :  { %v16966_v54 = vadd.f32 %v16965_v50, %v16964_v8  ;;  %v29841_v40 = vpop.f32.mrb[81].mxu1  ;;  %v16770_v5 = vadd.f32 %v16769_v13, %v16768_v23  ;;  %v16892_v16 = vmul.f32 %v29839_v15, %v29839_v15  ;;  %v16775_v2 = vsel %vm27_vm1, %v29839_v15, 0.0 }
 0xf30   :  { %v16771_v1 = vsel %vm27_vm1, %v29841_v40, 0.0  ;;  %v16890_v7 = vmul.f32 %v29841_v40, %v29841_v40  ;;  %v29848_v22 = vpop.f32.mrb[82].mxu1 }
 0xf31   :  { %v16772_v52 = vadd.f32 %v16771_v1, %v16770_v5  ;;  %v16968_v20 = vadd.f32 %v16967_v45, %v16966_v54  ;;  %v29850_v37 = vpop.f32.mrb[83].mxu1  ;;  %v16893_v44 = vmul.f32 %v29848_v22, %v29848_v22  ;;  %v16973_v62 = vsel %vm27_vm1, %v16892_v16, 0.0 }
 0xf32   :  { %v16969_v29 = vsel %vm27_vm1, %v16890_v7, 0.0  ;;  %v16773_v53 = vsel %vm27_vm1, %v29850_v37, 0.0  ;;  %v16891_v9 = vmul.f32 %v29850_v37, %v29850_v37  ;;  %v16777_v39 = vsel %vm27_vm1, %v29848_v22, 0.0 }
 0xf33   :  { %v16970_v4 = vadd.f32 %v16969_v29, %v16968_v20  ;;  %v16774_v35 = vadd.f32 %v16773_v53, %v16772_v52  ;;  %v16975_v48 = vsel %vm27_vm1, %v16893_v44, 0.0 }
 0xf34   :  { %v16971_v61 = vsel %vm27_vm1, %v16891_v9, 0.0 }
 0xf35   :  { %v16776_v63 = vadd.f32 %v16775_v2, %v16774_v35  ;;  %v16972_v0 = vadd.f32 %v16971_v61, %v16970_v4 }
 0xf36   :  { %v29867_v56 = vpop.f32.mrb[84].mxu1 }
 0xf37   :  { %v16974_v47 = vadd.f32 %v16973_v62, %v16972_v0  ;;  %v29869_v30 = vpop.f32.mrb[85].mxu1  ;;  %v16778_v10 = vadd.f32 %v16777_v39, %v16776_v63  ;;  %v16896_v42 = vmul.f32 %v29867_v56, %v29867_v56  ;;  %v16783_v24 = vsel %vm27_vm1, %v29867_v56, 0.0 }
 0xf38   :  { %v16779_v60 = vsel %vm27_vm1, %v29869_v30, 0.0  ;;  %v16894_v41 = vmul.f32 %v29869_v30, %v29869_v30  ;;  %v29876_v18 = vpop.f32.mrb[86].mxu1 }
 0xf39   :  { %v16780_v6 = vadd.f32 %v16779_v60, %v16778_v10  ;;  %v16976_v31 = vadd.f32 %v16975_v48, %v16974_v47  ;;  %v29878_v27 = vpop.f32.mrb[87].mxu1  ;;  %v16897_v12 = vmul.f32 %v29876_v18, %v29876_v18  ;;  %v16981_v50 = vsel %vm27_vm1, %v16896_v42, 0.0 }
 0xf3a   :  { %v16977_v43 = vsel %vm27_vm1, %v16894_v41, 0.0  ;;  %v16781_v46 = vsel %vm27_vm1, %v29878_v27, 0.0  ;;  %v16895_v14 = vmul.f32 %v29878_v27, %v29878_v27  ;;  %v16785_v13 = vsel %vm27_vm1, %v29876_v18, 0.0 }
 0xf3b   :  { %v16978_v51 = vadd.f32 %v16977_v43, %v16976_v31  ;;  %v16782_v49 = vadd.f32 %v16781_v46, %v16780_v6  ;;  %v16983_v7 = vsel %vm27_vm1, %v16897_v12, 0.0 }
 0xf3c   :  { %v16979_v55 = vsel %vm27_vm1, %v16895_v14, 0.0 }
 0xf3d   :  { %v16784_v23 = vadd.f32 %v16783_v24, %v16782_v49  ;;  %v16980_v8 = vadd.f32 %v16979_v55, %v16978_v51 }
 0xf3e   :  { %v29895_v54 = vpop.f32.mrb[88].mxu1 }
 0xf3f   :  { %v16982_v5 = vadd.f32 %v16981_v50, %v16980_v8  ;;  %v29897_v45 = vpop.f32.mrb[89].mxu1  ;;  %v16786_v1 = vadd.f32 %v16785_v13, %v16784_v23  ;;  %v16900_v4 = vmul.f32 %v29895_v54, %v29895_v54  ;;  %v16791_v0 = vsel %vm27_vm1, %v29895_v54, 0.0 }
 0xf40   :  { %v16787_v52 = vsel %vm27_vm1, %v29897_v45, 0.0  ;;  %v16898_v20 = vmul.f32 %v29897_v45, %v29897_v45  ;;  %v29904_v16 = vpop.f32.mrb[90].mxu1 }
 0xf41   :  { %v16788_v29 = vadd.f32 %v16787_v52, %v16786_v1  ;;  %v16984_v53 = vadd.f32 %v16983_v7, %v16982_v5  ;;  %v29906_v9 = vpop.f32.mrb[91].mxu1  ;;  %v16901_v62 = vmul.f32 %v29904_v16, %v29904_v16  ;;  %v16989_v48 = vsel %vm27_vm1, %v16900_v4, 0.0 }
 0xf42   :  { %v16985_v35 = vsel %vm27_vm1, %v16898_v20, 0.0  ;;  %v16789_v2 = vsel %vm27_vm1, %v29906_v9, 0.0  ;;  %v16899_v44 = vmul.f32 %v29906_v9, %v29906_v9  ;;  %v16793_v60 = vsel %vm27_vm1, %v29904_v16, 0.0 }
 0xf43   :  { %v16986_v61 = vadd.f32 %v16985_v35, %v16984_v53  ;;  %v16790_v63 = vadd.f32 %v16789_v2, %v16788_v29  ;;  %v16991_v43 = vsel %vm27_vm1, %v16901_v62, 0.0 }
 0xf44   :  { %v16987_v39 = vsel %vm27_vm1, %v16899_v44, 0.0 }
 0xf45   :  { %v16792_v47 = vadd.f32 %v16791_v0, %v16790_v63  ;;  %v16988_v10 = vadd.f32 %v16987_v39, %v16986_v61 }
 0xf46   :  { %v29923_v41 = vpop.f32.mrb[92].mxu1 }
 0xf47   :  { %v16990_v6 = vadd.f32 %v16989_v48, %v16988_v10  ;;  %v29925_v31 = vpop.f32.mrb[93].mxu1  ;;  %v16794_v42 = vadd.f32 %v16793_v60, %v16792_v47  ;;  %v16904_v55 = vmul.f32 %v29923_v41, %v29923_v41  ;;  %v16799_v1 = vsel %vm27_vm1, %v29923_v41, 0.0 }
 0xf48   :  { %v16795_v46 = vsel %vm27_vm1, %v29925_v31, 0.0  ;;  %v16902_v14 = vmul.f32 %v29925_v31, %v29925_v31  ;;  %v29932_v51 = vpop.f32.mrb[94].mxu1 }
 0xf49   :  { %v16796_v49 = vadd.f32 %v16795_v46, %v16794_v42  ;;  %v16992_v24 = vadd.f32 %v16991_v43, %v16990_v6  ;;  %v29934_v12 = vpop.f32.mrb[95].mxu1  ;;  %v16905_v7 = vmul.f32 %v29932_v51, %v29932_v51  ;;  %v16997_v53 = vsel %vm27_vm1, %v16904_v55, 0.0 }
 0xf4a   :  { %v16993_v23 = vsel %vm27_vm1, %v16902_v14, 0.0  ;;  %v16797_v8 = vsel %vm27_vm1, %v29934_v12, 0.0  ;;  %v16903_v50 = vmul.f32 %v29934_v12, %v29934_v12  ;;  %v16801_v4 = vsel %vm27_vm1, %v29932_v51, 0.0 }
 0xf4b   :  { %v16994_v13 = vadd.f32 %v16993_v23, %v16992_v24  ;;  %v16798_v5 = vadd.f32 %v16797_v8, %v16796_v49  ;;  %v16999_v63 = vsel %vm27_vm1, %v16905_v7, 0.0 }
 0xf4c   :  { %v16995_v52 = vsel %vm27_vm1, %v16903_v50, 0.0 }
 0xf4d   :  { %v16800_v20 = vadd.f32 %v16799_v1, %v16798_v5  ;;  %v16996_v29 = vadd.f32 %v16995_v52, %v16994_v13 }
 0xf4e   :  { %v29951_v35 = vpop.f32.mrb[96].mxu1 }
 0xf4f   :  { %v16998_v2 = vadd.f32 %v16997_v53, %v16996_v29  ;;  %v29953_v44 = vpop.f32.mrb[97].mxu1  ;;  %v16802_v61 = vadd.f32 %v16801_v4, %v16800_v20  ;;  %v16908_v60 = vmul.f32 %v29951_v35, %v29951_v35  ;;  %v16807_v49 = vsel %vm27_vm1, %v29951_v35, 0.0 }
 0xf50   :  { %v16803_v0 = vsel %vm27_vm1, %v29953_v44, 0.0  ;;  %v16906_v62 = vmul.f32 %v29953_v44, %v29953_v44  ;;  %v29960_v39 = vpop.f32.mrb[98].mxu1 }
 0xf51   :  { %v16804_v47 = vadd.f32 %v16803_v0, %v16802_v61  ;;  %v17000_v10 = vadd.f32 %v16999_v63, %v16998_v2  ;;  %v29962_v48 = vpop.f32.mrb[99].mxu1  ;;  %v16909_v24 = vmul.f32 %v29960_v39, %v29960_v39  ;;  %v17005_v50 = vsel %vm27_vm1, %v16908_v60, 0.0 }
 0xf52   :  { %v17001_v6 = vsel %vm27_vm1, %v16906_v62, 0.0  ;;  %v16805_v42 = vsel %vm27_vm1, %v29962_v48, 0.0  ;;  %v16907_v43 = vmul.f32 %v29962_v48, %v29962_v48  ;;  %v16809_v13 = vsel %vm27_vm1, %v29960_v39, 0.0 }
 0xf53   :  { %v17002_v46 = vadd.f32 %v17001_v6, %v17000_v10  ;;  %v16806_v14 = vadd.f32 %v16805_v42, %v16804_v47  ;;  %v17007_v20 = vsel %vm27_vm1, %v16909_v24, 0.0 }
 0xf54   :  { %v17003_v55 = vsel %vm27_vm1, %v16907_v43, 0.0 }
 0xf55   :  { %v16808_v23 = vadd.f32 %v16807_v49, %v16806_v14  ;;  %v17004_v8 = vadd.f32 %v17003_v55, %v17002_v46 }
 0xf56   :  { %v29979_v5 = vpop.f32.mrb[100].mxu1 }
 0xf57   :  { %v17006_v1 = vadd.f32 %v17005_v50, %v17004_v8  ;;  %v29981_v7 = vpop.f32.mrb[101].mxu1  ;;  %v16810_v52 = vadd.f32 %v16809_v13, %v16808_v23  ;;  %v16912_v0 = vmul.f32 %v29979_v5, %v29979_v5  ;;  %v16815_v42 = vsel %vm27_vm1, %v29979_v5, 0.0 }
 0xf58   :  { %v16811_v29 = vsel %vm27_vm1, %v29981_v7, 0.0  ;;  %v16910_v53 = vmul.f32 %v29981_v7, %v29981_v7  ;;  %v29988_v4 = vpop.f32.mrb[102].mxu1 }
 0xf59   :  { %33079 = vst [vmem:[#allocation57_spill] sm:$0xff] %v29988_v4  ;;  %v16812_v2 = vadd.f32 %v16811_v29, %v16810_v52  ;;  %v17008_v61 = vadd.f32 %v17007_v20, %v17006_v1  ;;  %v29990_v63 = vpop.f32.mrb[103].mxu1  ;;  %v16913_v43 = vmul.f32 %v29988_v4, %v29988_v4  ;;  %v17013_v24 = vsel %vm27_vm1, %v16912_v0, 0.0 }
 0xf5a   :  { %v17009_v62 = vsel %vm27_vm1, %v16910_v53, 0.0  ;;  %v16813_v47 = vsel %vm27_vm1, %v29990_v63, 0.0  ;;  %v16911_v10 = vmul.f32 %v29990_v63, %v29990_v63  ;;  %v16817_v55 = vsel %vm27_vm1, %v29988_v4, 0.0 }
 0xf5b   :  { %v17010_v60 = vadd.f32 %v17009_v62, %v17008_v61  ;;  %v16814_v6 = vadd.f32 %v16813_v47, %v16812_v2  ;;  %v17015_v1 = vsel %vm27_vm1, %v16913_v43, 0.0 }
 0xf5c   :  { %v17011_v46 = vsel %vm27_vm1, %v16911_v10, 0.0 }
 0xf5d   :  { %v16816_v14 = vadd.f32 %v16815_v42, %v16814_v6  ;;  %v17012_v49 = vadd.f32 %v17011_v46, %v17010_v60 }
 0xf5e   :  { %v30007_v23 = vpop.f32.mrb[104].mxu1 }
 0xf5f   :  { %33080 = vst [vmem:[#allocation59_spill] sm:$0xff] %v30007_v23  ;;  %v17014_v8 = vadd.f32 %v17013_v24, %v17012_v49  ;;  %v30009_v50 = vpop.f32.mrb[105].mxu1  ;;  %v16818_v13 = vadd.f32 %v16817_v55, %v16816_v14  ;;  %v16916_v0 = vmul.f32 %v30007_v23, %v30007_v23  ;;  %v16823_v42 = vsel %vm27_vm1, %v30007_v23, 0.0 }
 0xf60   :  { %33081 = vst [vmem:[#allocation37_spill] sm:$0xff] %v30009_v50  ;;  %v16819_v52 = vsel %vm27_vm1, %v30009_v50, 0.0  ;;  %v16914_v20 = vmul.f32 %v30009_v50, %v30009_v50  ;;  %v30016_v29 = vpop.f32.mrb[106].mxu1 }
 0xf61   :  { %33082 = vst [vmem:[#allocation39_spill] sm:$0xff] %v30016_v29  ;;  %v16820_v53 = vadd.f32 %v16819_v52, %v16818_v13  ;;  %v17016_v2 = vadd.f32 %v17015_v1, %v17014_v8  ;;  %v30018_v61 = vpop.f32.mrb[107].mxu1  ;;  %v16917_v43 = vmul.f32 %v30016_v29, %v30016_v29  ;;  %v17021_v24 = vsel %vm27_vm1, %v16916_v0, 0.0 }
 0xf62   :  { %33083 = vst [vmem:[#allocation40_spill] sm:$0xff] %v30018_v61  ;;  %v17017_v62 = vsel %vm27_vm1, %v16914_v20, 0.0  ;;  %v16821_v47 = vsel %vm27_vm1, %v30018_v61, 0.0  ;;  %v16915_v10 = vmul.f32 %v30018_v61, %v30018_v61  ;;  %v16825_v55 = vsel %vm27_vm1, %v30016_v29, 0.0 }
 0xf63   :  { %v17018_v60 = vadd.f32 %v17017_v62, %v17016_v2  ;;  %v16822_v6 = vadd.f32 %v16821_v47, %v16820_v53  ;;  %v17023_v20 = vsel %vm27_vm1, %v16917_v43, 0.0 }
 0xf64   :  { %v17019_v46 = vsel %vm27_vm1, %v16915_v10, 0.0 }
 0xf65   :  { %v16824_v14 = vadd.f32 %v16823_v42, %v16822_v6  ;;  %v17020_v49 = vadd.f32 %v17019_v46, %v17018_v60 }
 0xf66   :  { %v30035_v8 = vpop.f32.mrb[108].mxu1 }
 0xf67   :  { %33084 = vst [vmem:[#allocation36_spill] sm:$0xff] %v30035_v8  ;;  %v17022_v13 = vadd.f32 %v17021_v24, %v17020_v49  ;;  %v30037_v1 = vpop.f32.mrb[109].mxu1  ;;  %v16826_v52 = vadd.f32 %v16825_v55, %v16824_v14  ;;  %v16920_v60 = vmul.f32 %v30035_v8, %v30035_v8  ;;  %v16831_v49 = vsel %vm27_vm1, %v30035_v8, 0.0 }
 0xf68   :  { %33085 = vst [vmem:[#allocation42_spill] sm:$0xff] %v30037_v1  ;;  %v16827_v53 = vsel %vm27_vm1, %v30037_v1, 0.0  ;;  %v16918_v2 = vmul.f32 %v30037_v1, %v30037_v1  ;;  %v30044_v62 = vpop.f32.mrb[110].mxu1 }
 0xf69   :  { %33086 = vst [vmem:[#allocation44_spill] sm:$0xff] %v30044_v62  ;;  %v16828_v0 = vadd.f32 %v16827_v53, %v16826_v52  ;;  %v17024_v47 = vadd.f32 %v17023_v20, %v17022_v13  ;;  %v30046_v10 = vpop.f32.mrb[111].mxu1  ;;  %v16921_v24 = vmul.f32 %v30044_v62, %v30044_v62  ;;  %v17029_v20 = vsel %vm27_vm1, %v16920_v60, 0.0 }
 0xf6a   :  { %33087 = vst [vmem:[#allocation41_spill] sm:$0xff] %v30046_v10  ;;  %v17025_v6 = vsel %vm27_vm1, %v16918_v2, 0.0  ;;  %v16829_v42 = vsel %vm27_vm1, %v30046_v10, 0.0  ;;  %v16919_v43 = vmul.f32 %v30046_v10, %v30046_v10  ;;  %v16833_v53 = vsel %vm27_vm1, %v30044_v62, 0.0 }
 0xf6b   :  { %v17026_v46 = vadd.f32 %v17025_v6, %v17024_v47  ;;  %v16830_v14 = vadd.f32 %v16829_v42, %v16828_v0  ;;  %v17031_v6 = vsel %vm27_vm1, %v16921_v24, 0.0 }
 0xf6c   :  { %v17027_v55 = vsel %vm27_vm1, %v16919_v43, 0.0 }
 0xf6d   :  { %v16832_v13 = vadd.f32 %v16831_v49, %v16830_v14  ;;  %v17028_v52 = vadd.f32 %v17027_v55, %v17026_v46 }
 0xf6e   :  { %v30063_v2 = vpop.f32.mrb[112].mxu1 }
 0xf6f   :  { %33088 = vst [vmem:[#allocation43_spill] sm:$0xff] %v30063_v2  ;;  %v17030_v10 = vadd.f32 %v17029_v20, %v17028_v52  ;;  %v30065_v47 = vpop.f32.mrb[113].mxu1  ;;  %v16834_v0 = vadd.f32 %v16833_v53, %v16832_v13  ;;  %v16924_v55 = vmul.f32 %v30063_v2, %v30063_v2 }
 0xf70   :  { %33089 = vst [vmem:[#allocation49_spill] sm:$0xff] %v30065_v47  ;;  %v16835_v42 = vsel %vm27_vm1, %v30065_v47, 0.0  ;;  %v16922_v43 = vmul.f32 %v30065_v47, %v30065_v47  ;;  %v30072_v46 = vpop.f32.mrb[114].mxu1  ;;  %v16839_v47 = vsel %vm27_vm1, %v30063_v2, 0.0 }
 0xf71   :  { %33090 = vst [vmem:[#allocation60_spill] sm:$0xff] %v30072_v46  ;;  %v16836_v60 = vadd.f32 %v16835_v42, %v16834_v0  ;;  %v17032_v14 = vadd.f32 %v17031_v6, %v17030_v10  ;;  %v30074_v49 = vpop.f32.mrb[115].mxu1  ;;  %v16925_v10 = vmul.f32 %v30072_v46, %v30072_v46  ;;  %v16841_v62 = vsel %vm27_vm1, %v30072_v46, 0.0 }
 0xf72   :  { %33091 = vst [vmem:[#allocation62_spill] sm:$0xff] %v30074_v49  ;;  %v17033_v52 = vsel %vm27_vm1, %v16922_v43, 0.0  ;;  %v16837_v24 = vsel %vm27_vm1, %v30074_v49, 0.0  ;;  %v16923_v13 = vmul.f32 %v30074_v49, %v30074_v49  ;;  %v17037_v43 = vsel %vm27_vm1, %v16924_v55, 0.0 }
 0xf73   :  { %v17034_v20 = vadd.f32 %v17033_v52, %v17032_v14  ;;  %v16838_v53 = vadd.f32 %v16837_v24, %v16836_v60  ;;  %v17039_v52 = vsel %vm27_vm1, %v16925_v10, 0.0 }
 0xf74   :  { %v17035_v0 = vsel %vm27_vm1, %v16923_v13, 0.0 }
 0xf75   :  { %v16840_v6 = vadd.f32 %v16839_v47, %v16838_v53  ;;  %v17036_v42 = vadd.f32 %v17035_v0, %v17034_v20 }
 0xf76   :  { %v30091_v8 = vpop.f32.mrb[116].mxu1 }
 0xf77   :  { %33092 = vst [vmem:[#allocation63_spill] sm:$0xff] %v30091_v8  ;;  %v17038_v49 = vadd.f32 %v17037_v43, %v17036_v42  ;;  %v30093_v14 = vpop.f32.mrb[117].mxu1  ;;  %v16842_v60 = vadd.f32 %v16841_v62, %v16840_v6  ;;  %v16928_v0 = vmul.f32 %v30091_v8, %v30091_v8 }
 0xf78   :  { %33093 = vst [vmem:[#allocation64_spill] sm:$0xff] %v30093_v14  ;;  %v16843_v24 = vsel %vm27_vm1, %v30093_v14, 0.0  ;;  %v16926_v47 = vmul.f32 %v30093_v14, %v30093_v14  ;;  %v30100_v13 = vpop.f32.mrb[118].mxu1  ;;  %v16847_v14 = vsel %vm27_vm1, %v30091_v8, 0.0 }
 0xf79   :  { %33094 = vst [vmem:[#allocation65_spill] sm:$0xff] %v30100_v13  ;;  %v16844_v55 = vadd.f32 %v16843_v24, %v16842_v60  ;;  %v17040_v20 = vadd.f32 %v17039_v52, %v17038_v49  ;;  %v30102_v53 = vpop.f32.mrb[119].mxu1  ;;  %v16929_v49 = vmul.f32 %v30100_v13, %v30100_v13  ;;  %v16849_v46 = vsel %vm27_vm1, %v30100_v13, 0.0 }
 0xf7a   :  { %33095 = vst [vmem:[#allocation46_spill] sm:$0xff] %v30102_v53  ;;  %v17041_v42 = vsel %vm27_vm1, %v16926_v47, 0.0  ;;  %v16845_v62 = vsel %vm27_vm1, %v30102_v53, 0.0  ;;  %v16927_v10 = vmul.f32 %v30102_v53, %v30102_v53  ;;  %v17045_v47 = vsel %vm27_vm1, %v16928_v0, 0.0 }
 0xf7b   :  { %v17042_v6 = vadd.f32 %v17041_v42, %v17040_v20  ;;  %v16846_v43 = vadd.f32 %v16845_v62, %v16844_v55  ;;  %v17047_v42 = vsel %vm27_vm1, %v16929_v49, 0.0 }
 0xf7c   :  { %v17043_v60 = vsel %vm27_vm1, %v16927_v10, 0.0 }
 0xf7d   :  { %v16848_v52 = vadd.f32 %v16847_v14, %v16846_v43  ;;  %v17044_v24 = vadd.f32 %v17043_v60, %v17042_v6 }
 0xf7e   :  { %v30119_v2 = vpop.f32.mrb[120].mxu1 }
 0xf7f   :  { %33096 = vst [vmem:[#allocation48_spill] sm:$0xff] %v30119_v2  ;;  %v17046_v53 = vadd.f32 %v17045_v47, %v17044_v24  ;;  %v30121_v20 = vpop.f32.mrb[121].mxu1  ;;  %v16850_v55 = vadd.f32 %v16849_v46, %v16848_v52  ;;  %v16932_v60 = vmul.f32 %v30119_v2, %v30119_v2 }
 0xf80   :  { %33097 = vst [vmem:[#allocation45_spill] sm:$0xff] %v30121_v20  ;;  %v16851_v62 = vsel %vm27_vm1, %v30121_v20, 0.0  ;;  %v16930_v14 = vmul.f32 %v30121_v20, %v30121_v20  ;;  %v30128_v10 = vpop.f32.mrb[122].mxu1  ;;  %v16855_v20 = vsel %vm27_vm1, %v30119_v2, 0.0 }
 0xf81   :  { %33098 = vst [vmem:[#allocation47_spill] sm:$0xff] %v30128_v10  ;;  %v16852_v0 = vadd.f32 %v16851_v62, %v16850_v55  ;;  %v17048_v6 = vadd.f32 %v17047_v42, %v17046_v53  ;;  %v30130_v43 = vpop.f32.mrb[123].mxu1  ;;  %v16933_v53 = vmul.f32 %v30128_v10, %v30128_v10  ;;  %v16857_v13 = vsel %vm27_vm1, %v30128_v10, 0.0 }
 0xf82   :  { %33099 = vst [vmem:[#allocation50_spill] sm:$0xff] %v30130_v43  ;;  %v17049_v24 = vsel %vm27_vm1, %v16930_v14, 0.0  ;;  %v16853_v46 = vsel %vm27_vm1, %v30130_v43, 0.0  ;;  %v16931_v49 = vmul.f32 %v30130_v43, %v30130_v43  ;;  %v17053_v14 = vsel %vm27_vm1, %v16932_v60, 0.0 }
 0xf83   :  { %v17050_v52 = vadd.f32 %v17049_v24, %v17048_v6  ;;  %v16854_v47 = vadd.f32 %v16853_v46, %v16852_v0  ;;  %v17055_v24 = vsel %vm27_vm1, %v16933_v53, 0.0 }
 0xf84   :  { %v17051_v55 = vsel %vm27_vm1, %v16931_v49, 0.0 }
 0xf85   :  { %v16856_v42 = vadd.f32 %v16855_v20, %v16854_v47  ;;  %v17052_v62 = vadd.f32 %v17051_v55, %v17050_v52 }
 0xf86   :  { %v30147_v8 = vpop.f32.mrb[124].mxu1 }
 0xf87   :  { %33100 = vst [vmem:[#allocation52_spill] sm:$0xff] %v30147_v8  ;;  %v17054_v43 = vadd.f32 %v17053_v14, %v17052_v62  ;;  %v30149_v6 = vpop.f32.mrb[125].mxu1  ;;  %v16858_v0 = vadd.f32 %v16857_v13, %v16856_v42  ;;  %v16936_v55 = vmul.f32 %v30147_v8, %v30147_v8  ;;  %v16863_v10 = vsel %vm27_vm1, %v30147_v8, 0.0 }
 0xf88   :  { %v16859_v46 = vsel %vm27_vm1, %v30149_v6, 0.0  ;;  %v16934_v20 = vmul.f32 %v30149_v6, %v30149_v6  ;;  %v30156_v49 = vpop.f32.mrb[126].mxu1 }
 0xf89   :  { %33101 = vst [vmem:[#allocation5_spill] sm:$0xff] %v30156_v49  ;;  %v16860_v60 = vadd.f32 %v16859_v46, %v16858_v0  ;;  %v17056_v52 = vadd.f32 %v17055_v24, %v17054_v43  ;;  %v30158_v47 = vpop.f32.mrb[127].mxu1  ;;  %v16937_v43 = vmul.f32 %v30156_v49, %v30156_v49  ;;  %v16865_v2 = vsel %vm27_vm1, %v30156_v49, 0.0 }
 0xf8a   :  { %v17057_v62 = vsel %vm27_vm1, %v16934_v20, 0.0  ;;  %v16861_v13 = vsel %vm27_vm1, %v30158_v47, 0.0  ;;  %v16935_v53 = vmul.f32 %v30158_v47, %v30158_v47  ;;  %v17061_v20 = vsel %vm27_vm1, %v16936_v55, 0.0 }
 0xf8b   :  { %v17058_v42 = vadd.f32 %v17057_v62, %v17056_v52  ;;  %v16862_v14 = vadd.f32 %v16861_v13, %v16860_v60  ;;  %v17063_v52 = vsel %vm27_vm1, %v16937_v43, 0.0 }
 0xf8c   :  { %v17059_v0 = vsel %vm27_vm1, %v16935_v53, 0.0 }
 0xf8d   :  { %v16864_v24 = vadd.f32 %v16863_v10, %v16862_v14  ;;  %v17060_v46 = vadd.f32 %v17059_v0, %v17058_v42 }
 0xf8f   :  { %v16866_v1 = vadd.f32 %v16865_v2, %v16864_v24  ;;  %v17062_v29 = vadd.f32 %v17061_v20, %v17060_v46 }
 0xf91   :  { %v16867_v60 = vrot.slane %v16866_v1, 4  ;;  %v17064_v62 = vadd.f32 %v17063_v52, %v17062_v29  ;;  %v33123_v29 = vld [vmem:[#allocation52_spill] sm:$0xff] }
 0xf93   :  { %v16868_v13 = vadd.f32 %v16867_v60, %v16866_v1  ;;  %v17065_v8 = vrot.slane %v17064_v62, 4  ;;  %v33122_v1 = vld [vmem:[#allocation47_spill] sm:$0xff] }
 0xf95   :  { %v16869_v23 = vrot.slane %v16868_v13, 2  ;;  %v17066_v61 = vadd.f32 %v17065_v8, %v17064_v62 }
 0xf97   :  { %v16870_v50 = vadd.f32 %v16869_v23, %v16868_v13  ;;  %v17067_v4 = vrot.slane %v17066_v61, 2  ;;  %v33102_v13 = vld [vmem:[#allocation57_spill] sm:$0xff]  ;;  %v33121_v23 = vld [vmem:[#allocation48_spill] sm:$0xff] }
 0xf99   :  { %v16871_v53 = vrot.slane %v16870_v50, 1  ;;  %v17068_v10 = vadd.f32 %v17067_v4, %v17066_v61  ;;  %v33118_v61 = vld [vmem:[#allocation65_spill] sm:$0xff]  ;;  %v33120_v4 = vld [vmem:[#allocation50_spill] sm:$0xff] }
 0xf9b   :  { %v16872_v42 = vadd.f32 %v16871_v53, %v16870_v50  ;;  %v17069_v14 = vrot.slane %v17068_v10, 1  ;;  %v33103_v53 = vld [vmem:[#allocation37_spill] sm:$0xff] }
 0xf9c   :  { %v33119_v50 = vld [vmem:[#allocation45_spill] sm:$0xff] }
 0xf9d   :  { %v30176_v55 = vmul.f32 0.001953125, %v16872_v42  ;;  %v17070_v0 = vadd.f32 %v17069_v14, %v17068_v10  ;;  %v33104_v10 = vld [vmem:[#allocation40_spill] sm:$0xff]  ;;  %v33105_v42 = vld [vmem:[#allocation59_spill] sm:$0xff] }
 0xf9e   :  { %v33106_v14 = vld [vmem:[#allocation39_spill] sm:$0xff] }
 0xf9f   :  { %v17071_v49 = vmul.f32 0.001953125, %v17070_v0  ;;  %v17072_v2 = vmul.f32 %v30176_v55, %v30176_v55  ;;  %v33107_v0 = vld [vmem:[#allocation42_spill] sm:$0xff]  ;;  %v33125_v60 = vsub.f32 %v30149_v6, %v30176_v55  ;;  %v33126_v52 = vsub.f32 %v30158_v47, %v30176_v55 }
 0xfa0   :  { %v33127_v46 = vsub.f32 %v29730_v33, %v30176_v55  ;;  %v33128_v43 = vsub.f32 %v29736_v28, %v30176_v55  ;;  %v33129_v6 = vsub.f32 %v29728_v36, %v30176_v55  ;;  %v33130_v47 = vsub.f32 %v29734_v26, %v30176_v55 }
 0xfa1   :  { %v17073_v8 = vsub.f32 %v17071_v49, %v17072_v2  ;;  %v33133_v26 = vsub.f32 %v29755_v32, %v30176_v55 }
 0xfa3   :  { %v17074_v62 = vmax.f32 %v17073_v8, 0.0 }
 0xfa5   :  { %v17139_v8 = vadd.f32 1e-05, %v17074_v62 }
 0xfa7   :  { %24005 = vrsqrt.f32 %v17139_v8  ;;  %v33108_v8 = vld [vmem:[#allocation41_spill] sm:$0xff] }
 0xfb1   :  { %v30308_v62 = vpop.eup %24005 }
 0xfb2   :  { %v17201_v49 = vmul.f32 %v30308_v62, %v33125_v60  ;;  %v17202_v20 = vmul.f32 %v30308_v62, %v33126_v52  ;;  %v30322_v24 = vmul.f32 %v30308_v62, %v33127_v46  ;;  %v30328_v2 = vmul.f32 %v30308_v62, %v33128_v43 }
 0xfb3   :  { %v30334_v60 = vmul.f32 %v30308_v62, %v33129_v6  ;;  %v30340_v33 = vmul.f32 %v30308_v62, %v33130_v47  ;;  %v33131_v46 = vsub.f32 %v29757_v34, %v30176_v55  ;;  %v33132_v43 = vsub.f32 %v29766_v21, %v30176_v55 }
 0xfb4   :  { %v17265_v52 = vmax.f32 %v17201_v49, 0.0  ;;  %v17266_v6 = vmax.f32 %v17202_v20, 0.0  ;;  %v30358_v47 = vmul.f32 %v30308_v62, %v33133_v26  ;;  %v33134_v34 = vsub.f32 %v29764_v19, %v30176_v55 }
 0xfb5   :  { %v30346_v28 = vmul.f32 %v30308_v62, %v33131_v46  ;;  %v30352_v36 = vmul.f32 %v30308_v62, %v33132_v43  ;;  %v33135_v21 = vsub.f32 %v29785_v57, %v30176_v55  ;;  %v33136_v20 = vsub.f32 %v29794_v3, %v30176_v55 }
 0xfb6   :  { %v30364_v46 = vmul.f32 %v30308_v62, %v33134_v34  ;;  %v33137_v49 = vsub.f32 %v29783_v58, %v30176_v55  ;;  %v33138_v26 = vsub.f32 %v29792_v17, %v30176_v55  ;;  %v30390_v34 = vpack.c.bf16 %v17266_v6, %v17265_v52 }
 0xfb7   :  { %v30370_v43 = vmul.f32 %v30308_v62, %v33135_v21  ;;  %v30376_v32 = vmul.f32 %v30308_v62, %v33136_v20  ;;  %v33140_v3 = vsub.f32 %v29813_v59, %v30176_v55  ;;  %v33141_v58 = vsub.f32 %v29822_v11, %v30176_v55 }
 0xfb8   :  { %v30382_v19 = vmul.f32 %v30308_v62, %v33137_v49  ;;  %v30388_v57 = vmul.f32 %v30308_v62, %v33138_v26  ;;  %33139 = vst [vmem:[#allocation38_spill] sm:$0xff] %v30390_v34  ;;  %v33142_v17 = vsub.f32 %v29811_v25, %v30176_v55  ;;  %v33143_v52 = vsub.f32 %v29820_v38, %v30176_v55 }
 0xfb9   :  { %v30396_v21 = vmul.f32 %v30308_v62, %v33140_v3  ;;  %v30402_v20 = vmul.f32 %v30308_v62, %v33141_v58  ;;  %v33144_v6 = vsub.f32 %v29841_v40, %v30176_v55  ;;  %v33145_v26 = vsub.f32 %v29850_v37, %v30176_v55 }
 0xfba   :  { %v30408_v49 = vmul.f32 %v30308_v62, %v33142_v17  ;;  %v30414_v59 = vmul.f32 %v30308_v62, %v33143_v52  ;;  %v33146_v3 = vsub.f32 %v29839_v15, %v30176_v55  ;;  %v33147_v58 = vsub.f32 %v29848_v22, %v30176_v55 }
 0xfbb   :  { %v30420_v11 = vmul.f32 %v30308_v62, %v33144_v6  ;;  %v30426_v25 = vmul.f32 %v30308_v62, %v33145_v26  ;;  %v33148_v17 = vsub.f32 %v29869_v30, %v30176_v55  ;;  %v33149_v52 = vsub.f32 %v29878_v27, %v30176_v55 }
 0xfbc   :  { %v30432_v38 = vmul.f32 %v30308_v62, %v33146_v3  ;;  %v30438_v40 = vmul.f32 %v30308_v62, %v33147_v58  ;;  %v33150_v6 = vsub.f32 %v29867_v56, %v30176_v55  ;;  %v33151_v26 = vsub.f32 %v29876_v18, %v30176_v55 }
 0xfbd   :  { %v30444_v37 = vmul.f32 %v30308_v62, %v33148_v17  ;;  %v30450_v15 = vmul.f32 %v30308_v62, %v33149_v52  ;;  %v33152_v3 = vsub.f32 %v29897_v45, %v30176_v55  ;;  %v33153_v58 = vsub.f32 %v29906_v9, %v30176_v55 }
 0xfbe   :  { %v30456_v22 = vmul.f32 %v30308_v62, %v33150_v6  ;;  %v30462_v30 = vmul.f32 %v30308_v62, %v33151_v26  ;;  %v33154_v17 = vsub.f32 %v29895_v54, %v30176_v55  ;;  %v33155_v52 = vsub.f32 %v29904_v16, %v30176_v55 }
 0xfbf   :  { %v30468_v27 = vmul.f32 %v30308_v62, %v33152_v3  ;;  %v30474_v56 = vmul.f32 %v30308_v62, %v33153_v58  ;;  %v33156_v6 = vsub.f32 %v29925_v31, %v30176_v55  ;;  %v33157_v26 = vsub.f32 %v29934_v12, %v30176_v55 }
 0xfc0   :  { %v30480_v18 = vmul.f32 %v30308_v62, %v33154_v17  ;;  %v30486_v45 = vmul.f32 %v30308_v62, %v33155_v52  ;;  %v33158_v3 = vsub.f32 %v29923_v41, %v30176_v55  ;;  %v33159_v58 = vsub.f32 %v29932_v51, %v30176_v55 }
 0xfc1   :  { %v30492_v9 = vmul.f32 %v30308_v62, %v33156_v6  ;;  %v30498_v54 = vmul.f32 %v30308_v62, %v33157_v26  ;;  %v33160_v17 = vsub.f32 %v29953_v44, %v30176_v55  ;;  %v33161_v52 = vsub.f32 %v29962_v48, %v30176_v55 }
 0xfc2   :  { %v30504_v16 = vmul.f32 %v30308_v62, %v33158_v3  ;;  %v30510_v31 = vmul.f32 %v30308_v62, %v33159_v58  ;;  %v33162_v6 = vsub.f32 %v29951_v35, %v30176_v55  ;;  %v33163_v26 = vsub.f32 %v29960_v39, %v30176_v55 }
 0xfc3   :  { %v30516_v12 = vmul.f32 %v30308_v62, %v33160_v17  ;;  %v30522_v41 = vmul.f32 %v30308_v62, %v33161_v52  ;;  %v33164_v3 = vsub.f32 %v29981_v7, %v30176_v55  ;;  %v33165_v58 = vsub.f32 %v29990_v63, %v30176_v55 }
 0xfc4   :  { %v30528_v51 = vmul.f32 %v30308_v62, %v33162_v6  ;;  %v30534_v44 = vmul.f32 %v30308_v62, %v33163_v26  ;;  %v33166_v17 = vsub.f32 %v29979_v5, %v30176_v55  ;;  %v33167_v52 = vsub.f32 %v33102_v13, %v30176_v55 }
 0xfc5   :  { %v30540_v48 = vmul.f32 %v30308_v62, %v33164_v3  ;;  %v30546_v35 = vmul.f32 %v30308_v62, %v33165_v58  ;;  %v33168_v6 = vsub.f32 %v33103_v53, %v30176_v55  ;;  %v33169_v26 = vsub.f32 %v33104_v10, %v30176_v55 }
 0xfc6   :  { %v30552_v39 = vmul.f32 %v30308_v62, %v33166_v17  ;;  %v30558_v7 = vmul.f32 %v30308_v62, %v33167_v52  ;;  %v33170_v3 = vsub.f32 %v33105_v42, %v30176_v55  ;;  %v33171_v58 = vsub.f32 %v33106_v14, %v30176_v55 }
 0xfc7   :  { %v30564_v63 = vmul.f32 %v30308_v62, %v33168_v6  ;;  %v30570_v5 = vmul.f32 %v30308_v62, %v33169_v26  ;;  %v33172_v17 = vsub.f32 %v33107_v0, %v30176_v55  ;;  %v33173_v52 = vsub.f32 %v33108_v8, %v30176_v55  ;;  %v33175_v6 = vld [vmem:[#allocation36_spill] sm:$0xff] }
 0xfc8   :  { %v30576_v13 = vmul.f32 %v30308_v62, %v33170_v3  ;;  %v30582_v53 = vmul.f32 %v30308_v62, %v33171_v58  ;;  %v33176_v26 = vsub.f32 %v33175_v6, %v30176_v55  ;;  %v33178_v3 = vld [vmem:[#allocation44_spill] sm:$0xff] }
 0xfc9   :  { %v30588_v10 = vmul.f32 %v30308_v62, %v33172_v17  ;;  %v30594_v42 = vmul.f32 %v30308_v62, %v33173_v52  ;;  %v33179_v58 = vsub.f32 %v33178_v3, %v30176_v55  ;;  %v33181_v17 = vld [vmem:[#allocation49_spill] sm:$0xff]  ;;  %v33184_v52 = vld [vmem:[#allocation62_spill] sm:$0xff] }
 0xfca   :  { %v30600_v14 = vmul.f32 %v30308_v62, %v33176_v26  ;;  %v33182_v34 = vsub.f32 %v33181_v17, %v30176_v55  ;;  %v33187_v26 = vld [vmem:[#allocation43_spill] sm:$0xff] }
 0xfcb   :  { %33174 = vst [vmem:[#allocation61_spill] sm:$0xff] %v30594_v42  ;;  %v30606_v0 = vmul.f32 %v30308_v62, %v33179_v58  ;;  %v33185_v42 = vsub.f32 %v33184_v52, %v30176_v55  ;;  %v33190_v58 = vld [vmem:[#allocation60_spill] sm:$0xff] }
 0xfcc   :  { %33177 = vst [vmem:[#allocation18_spill] sm:$0xff] %v30600_v14  ;;  %v30612_v8 = vmul.f32 %v30308_v62, %v33182_v34  ;;  %v33188_v14 = vsub.f32 %v33187_v26, %v30176_v55  ;;  %v33192_v34 = vld [vmem:[#allocation64_spill] sm:$0xff] }
 0xfcd   :  { %33180 = vst [vmem:[#allocation16_spill] sm:$0xff] %v30606_v0  ;;  %v30618_v6 = vmul.f32 %v30308_v62, %v33185_v42  ;;  %v33191_v0 = vsub.f32 %v33190_v58, %v30176_v55  ;;  %v33194_v42 = vld [vmem:[#allocation46_spill] sm:$0xff] }
 0xfce   :  { %33183 = vst [vmem:[#allocation13_spill] sm:$0xff] %v30612_v8  ;;  %v30624_v3 = vmul.f32 %v30308_v62, %v33188_v14  ;;  %v33193_v8 = vsub.f32 %v33192_v34, %v30176_v55  ;;  %v33196_v14 = vld [vmem:[#allocation63_spill] sm:$0xff] }
 0xfcf   :  { %33186 = vst [vmem:[#allocation14_spill] sm:$0xff] %v30618_v6  ;;  %v30630_v17 = vmul.f32 %v30308_v62, %v33191_v0  ;;  %v33195_v6 = vsub.f32 %v33194_v42, %v30176_v55  ;;  %v33199_v0 = vsub.f32 %v33118_v61, %v30176_v55 }
 0xfd0   :  { %33189 = vst [vmem:[#allocation17_spill] sm:$0xff] %v30624_v3  ;;  %v30636_v52 = vmul.f32 %v30308_v62, %v33193_v8  ;;  %v33197_v3 = vsub.f32 %v33196_v14, %v30176_v55  ;;  %v33201_v8 = vsub.f32 %v33119_v50, %v30176_v55 }
 0xfd1   :  { %v30642_v26 = vmul.f32 %v30308_v62, %v33195_v6  ;;  %v30654_v34 = vmul.f32 %v30308_v62, %v33199_v0  ;;  %v33203_v6 = vsub.f32 %v33120_v4, %v30176_v55  ;;  %v33207_v0 = vsub.f32 %v33122_v1, %v30176_v55 }
 0xfd2   :  { %v30648_v58 = vmul.f32 %v30308_v62, %v33197_v3  ;;  %v30660_v42 = vmul.f32 %v30308_v62, %v33201_v8  ;;  %v33205_v3 = vsub.f32 %v33121_v23, %v30176_v55  ;;  %v33209_v8 = vsub.f32 %v33123_v29, %v30176_v55 }
 0xfd3   :  { %33200 = vst [vmem:[#allocation3_spill] sm:$0xff] %v30654_v34  ;;  %v30666_v14 = vmul.f32 %v30308_v62, %v33203_v6  ;;  %v30678_v50 = vmul.f32 %v30308_v62, %v33207_v0  ;;  %v33211_v6 = vld [vmem:[#allocation5_spill] sm:$0xff]  ;;  %v17207_v1 = vmax.f32 %v30334_v60, 0.0  ;;  %v17208_v0 = vmax.f32 %v30340_v33, 0.0 }
 0xfd4   :  { %33198 = vst [vmem:[#allocation19_spill] sm:$0xff] %v30648_v58  ;;  %33202 = vst [vmem:[#allocation27_spill] sm:$0xff] %v30660_v42  ;;  %v30672_v61 = vmul.f32 %v30308_v62, %v33205_v3  ;;  %v30684_v4 = vmul.f32 %v30308_v62, %v33209_v8  ;;  %v17205_v3 = vmax.f32 %v30322_v24, 0.0  ;;  %v17210_v29 = vmax.f32 %v30352_v36, 0.0 }
 0xfd5   :  { %33204 = vst [vmem:[#allocation28_spill] sm:$0xff] %v30666_v14  ;;  %33208 = vst [vmem:[#allocation30_spill] sm:$0xff] %v30678_v50  ;;  %v33212_v14 = vsub.f32 %v33211_v6, %v30176_v55  ;;  %v17209_v50 = vmax.f32 %v30346_v28, 0.0  ;;  %v17211_v8 = vmax.f32 %v30358_v47, 0.0  ;;  %v17213_v55 = vmax.f32 %v30370_v43, 0.0  ;;  %v33215_v6 = vld [vmem:[#allocation18_spill] sm:$0xff] }
 0xfd6   :  { %33206 = vst [vmem:[#allocation29_spill] sm:$0xff] %v30672_v61  ;;  %33210 = vst [vmem:[#allocation31_spill] sm:$0xff] %v30684_v4  ;;  %v17206_v61 = vmax.f32 %v30328_v2, 0.0  ;;  %v17212_v4 = vmax.f32 %v30364_v46, 0.0  ;;  %v17215_v24 = vmax.f32 %v30382_v19, 0.0  ;;  %v17216_v2 = vmax.f32 %v30388_v57, 0.0 }
 0xfd7   :  { %v30690_v23 = vmul.f32 %v30308_v62, %v33212_v14  ;;  %v17214_v62 = vmax.f32 %v30376_v32, 0.0  ;;  %v17217_v60 = vmax.f32 %v30396_v21, 0.0  ;;  %v17218_v33 = vmax.f32 %v30402_v20, 0.0  ;;  %v33214_v14 = vld [vmem:[#allocation61_spill] sm:$0xff]  ;;  %v33218_v34 = vld [vmem:[#allocation14_spill] sm:$0xff] }
 0xfd8   :  { %v17219_v28 = vmax.f32 %v30408_v49, 0.0  ;;  %v17220_v36 = vmax.f32 %v30414_v59, 0.0  ;;  %v17221_v47 = vmax.f32 %v30420_v11, 0.0  ;;  %v17222_v46 = vmax.f32 %v30426_v25, 0.0  ;;  %v33217_v42 = vld [vmem:[#allocation13_spill] sm:$0xff] }
 0xfd9   :  { %33213 = vst [vmem:[#allocation32_spill] sm:$0xff] %v30690_v23  ;;  %v17223_v43 = vmax.f32 %v30432_v38, 0.0  ;;  %v17224_v32 = vmax.f32 %v30438_v40, 0.0  ;;  %v17225_v19 = vmax.f32 %v30444_v37, 0.0  ;;  %v17226_v57 = vmax.f32 %v30450_v15, 0.0  ;;  %v33216_v23 = vld [vmem:[#allocation16_spill] sm:$0xff] }
 0xfda   :  { %v17227_v21 = vmax.f32 %v30456_v22, 0.0  ;;  %v17228_v20 = vmax.f32 %v30462_v30, 0.0  ;;  %v17229_v49 = vmax.f32 %v30468_v27, 0.0  ;;  %v17230_v59 = vmax.f32 %v30474_v56, 0.0  ;;  %v33219_v58 = vld [vmem:[#allocation17_spill] sm:$0xff] }
 0xfdb   :  { %v17231_v11 = vmax.f32 %v30480_v18, 0.0  ;;  %v17232_v25 = vmax.f32 %v30486_v45, 0.0  ;;  %v17233_v38 = vmax.f32 %v30492_v9, 0.0  ;;  %v17234_v40 = vmax.f32 %v30498_v54, 0.0 }
 0xfdc   :  { %v17235_v37 = vmax.f32 %v30504_v16, 0.0  ;;  %v17236_v15 = vmax.f32 %v30510_v31, 0.0  ;;  %v17237_v22 = vmax.f32 %v30516_v12, 0.0  ;;  %v17238_v30 = vmax.f32 %v30522_v41, 0.0 }
 0xfdd   :  { %v17239_v27 = vmax.f32 %v30528_v51, 0.0  ;;  %v17240_v56 = vmax.f32 %v30534_v44, 0.0  ;;  %v17241_v18 = vmax.f32 %v30540_v48, 0.0  ;;  %v17242_v45 = vmax.f32 %v30546_v35, 0.0 }
 0xfde   :  { %v17243_v9 = vmax.f32 %v30552_v39, 0.0  ;;  %v17244_v54 = vmax.f32 %v30558_v7, 0.0  ;;  %v17245_v16 = vmax.f32 %v30564_v63, 0.0  ;;  %v17246_v31 = vmax.f32 %v30570_v5, 0.0 }
 0xfdf   :  { %v17247_v12 = vmax.f32 %v30576_v13, 0.0  ;;  %v17248_v41 = vmax.f32 %v30582_v53, 0.0  ;;  %v17249_v51 = vmax.f32 %v30588_v10, 0.0  ;;  %v17250_v44 = vmax.f32 %v33214_v14, 0.0  ;;  %v33220_v10 = vld [vmem:[#allocation19_spill] sm:$0xff] }
 0xfe0   :  { %v17251_v48 = vmax.f32 %v33215_v6, 0.0  ;;  %v17252_v35 = vmax.f32 %v33216_v23, 0.0  ;;  %v17253_v39 = vmax.f32 %v33217_v42, 0.0  ;;  %v17254_v7 = vmax.f32 %v33218_v34, 0.0  ;;  %v33221_v6 = vld [vmem:[#allocation3_spill] sm:$0xff] }
 0xfe1   :  { %v17255_v63 = vmax.f32 %v33219_v58, 0.0  ;;  %v17256_v5 = vmax.f32 %v30630_v17, 0.0  ;;  %v17257_v13 = vmax.f32 %v30636_v52, 0.0  ;;  %v17258_v53 = vmax.f32 %v30642_v26, 0.0  ;;  %v33222_v42 = vld [vmem:[#allocation27_spill] sm:$0xff]  ;;  %v33223_v58 = vld [vmem:[#allocation28_spill] sm:$0xff] }
 0xfe2   :  { %v17259_v14 = vmax.f32 %v33220_v10, 0.0  ;;  %v17260_v23 = vmax.f32 %v33221_v6, 0.0  ;;  %v17261_v34 = vmax.f32 %v33222_v42, 0.0  ;;  %v17262_v17 = vmax.f32 %v33223_v58, 0.0  ;;  %v33224_v52 = vld [vmem:[#allocation29_spill] sm:$0xff]  ;;  %v33225_v10 = vld [vmem:[#allocation30_spill] sm:$0xff] }
 0xfe3   :  { %v17263_v26 = vmax.f32 %v33224_v52, 0.0  ;;  %v17264_v6 = vmax.f32 %v33225_v10, 0.0  ;;  %v33226_v42 = vld [vmem:[#allocation31_spill] sm:$0xff]  ;;  %v33227_v52 = vld [vmem:[#allocation32_spill] sm:$0xff] }
 0xfe4   :  { %v17267_v58 = vmax.f32 %v33226_v42, 0.0  ;;  %v17268_v10 = vmax.f32 %v33227_v52, 0.0  ;;  %v17269_v42 = vpack.c.bf16 %v17206_v61, %v17205_v3  ;;  %v17270_v52 = vpack.c.bf16 %v17208_v0, %v17207_v1 }
 0xfe5   :  { %v17271_v3 = vpack.c.bf16 %v17210_v29, %v17209_v50  ;;  %v17272_v61 = vpack.c.bf16 %v17212_v4, %v17211_v8  ;;  %v17273_v0 = vpack.c.bf16 %v17214_v62, %v17213_v55  ;;  %v17274_v1 = vpack.c.bf16 %v17216_v2, %v17215_v24 }
 0xfe6   :  { %v17275_v29 = vpack.c.bf16 %v17218_v33, %v17217_v60  ;;  %22242 = vmatprep.mubr.msk.bf16.mxu0 %vm27_vm1, %v17269_v42  ;;  %v17276_v50 = vpack.c.bf16 %v17220_v36, %v17219_v28  ;;  %v17277_v4 = vpack.c.bf16 %v17222_v46, %v17221_v47  ;;  %v17278_v8 = vpack.c.bf16 %v17224_v32, %v17223_v43 }
 0xfe7   :  { %v17279_v55 = vpack.c.bf16 %v17226_v57, %v17225_v19  ;;  %22243 = vmatmul.mubr.msk.bf16.vlgmr.msra.gmra.mrb[128].mxu0 %vm27_vm1, %v17270_v52  ;;  %v17280_v62 = vpack.c.bf16 %v17228_v20, %v17227_v21  ;;  %v17281_v2 = vpack.c.bf16 %v17230_v59, %v17229_v49  ;;  %v17282_v24 = vpack.c.bf16 %v17232_v25, %v17231_v11  ;;  %v33228_v25 = vld [vmem:[#allocation38_spill] sm:$0xff] }
 0xfe8   :  { %v17283_v33 = vpack.c.bf16 %v17234_v40, %v17233_v38  ;;  %22246 = vmatprep.mubr.msk.bf16.mxu0 %vm27_vm1, %v17271_v3  ;;  %v17284_v60 = vpack.c.bf16 %v17236_v15, %v17235_v37  ;;  %v17285_v42 = vpack.c.bf16 %v17238_v30, %v17237_v22  ;;  %v17286_v28 = vpack.c.bf16 %v17240_v56, %v17239_v27 }
 0xfe9   :  { %v17287_v36 = vpack.c.bf16 %v17242_v45, %v17241_v18  ;;  %v17288_v46 = vpack.c.bf16 %v17244_v54, %v17243_v9  ;;  %v17289_v47 = vpack.c.bf16 %v17246_v31, %v17245_v16  ;;  %v17290_v32 = vpack.c.bf16 %v17248_v41, %v17247_v12 }
 0xfea   :  { %v17291_v43 = vpack.c.bf16 %v17250_v44, %v17249_v51  ;;  %v17292_v19 = vpack.c.bf16 %v17252_v35, %v17251_v48  ;;  %v17293_v57 = vpack.c.bf16 %v17254_v7, %v17253_v39  ;;  %v17294_v52 = vpack.c.bf16 %v17256_v5, %v17255_v63 }
 0xfeb   :  { %v17295_v20 = vpack.c.bf16 %v17258_v53, %v17257_v13  ;;  %v17296_v21 = vpack.c.bf16 %v17260_v23, %v17259_v14  ;;  %v17297_v49 = vpack.c.bf16 %v17262_v17, %v17261_v34  ;;  %v17298_v59 = vpack.c.bf16 %v17264_v6, %v17263_v26 }
 0xfec   :  { %v17300_v11 = vpack.c.bf16 %v17268_v10, %v17267_v58 }
 0xfef   :  { %22247 = vmatmul.mubr.msk.bf16.gmra.mrb[132].mxu0 %vm27_vm1, %v17272_v61 }
 0xff0   :  { %22250 = vmatprep.mubr.msk.bf16.mxu0 %vm27_vm1, %v17273_v0 }
 0xff7   :  { %22251 = vmatmul.mubr.msk.bf16.gmra.mrb[136].mxu0 %vm27_vm1, %v17274_v1 }
 0xff8   :  { %22254 = vmatprep.mubr.msk.bf16.mxu0 %vm27_vm1, %v17275_v29 }
 0xfff   :  { %22255 = vmatmul.mubr.msk.bf16.gmra.mrb[140].mxu0 %vm27_vm1, %v17276_v50 }
0x1000   :  { %22258 = vmatprep.mubr.msk.bf16.mxu0 %vm27_vm1, %v17277_v4 }
0x1007   :  { %22259 = vmatmul.mubr.msk.bf16.gmra.mrb[144].mxu0 %vm27_vm1, %v17278_v8 }
0x1008   :  { %22262 = vmatprep.mubr.msk.bf16.mxu0 %vm27_vm1, %v17279_v55 }
0x100f   :  { %22263 = vmatmul.mubr.msk.bf16.gmra.mrb[148].mxu0 %vm27_vm1, %v17280_v62 }
0x1010   :  { %22266 = vmatprep.mubr.msk.bf16.mxu0 %vm27_vm1, %v17281_v2 }
0x1017   :  { %22267 = vmatmul.mubr.msk.bf16.gmra.mrb[152].mxu0 %vm27_vm1, %v17282_v24 }
0x1018   :  { %22270 = vmatprep.mubr.msk.bf16.mxu0 %vm27_vm1, %v17283_v33 }
0x101f   :  { %22271 = vmatmul.mubr.msk.bf16.gmra.mrb[156].mxu0 %vm27_vm1, %v17284_v60 }
0x1020   :  { %22274 = vmatprep.mubr.msk.bf16.mxu0 %vm27_vm1, %v17285_v42 }
0x1027   :  { %22275 = vmatmul.mubr.msk.bf16.gmra.mrb[160].mxu0 %vm27_vm1, %v17286_v28 }
0x1028   :  { %22278 = vmatprep.mubr.msk.bf16.mxu0 %vm27_vm1, %v17287_v36 }
0x102f   :  { %22279 = vmatmul.mubr.msk.bf16.gmra.mrb[164].mxu0 %vm27_vm1, %v17288_v46 }
0x1030   :  { %22282 = vmatprep.mubr.msk.bf16.mxu0 %vm27_vm1, %v17289_v47 }
0x1037   :  { %22283 = vmatmul.mubr.msk.bf16.gmra.mrb[168].mxu0 %vm27_vm1, %v17290_v32 }
0x1038   :  { %22286 = vmatprep.mubr.msk.bf16.mxu0 %vm27_vm1, %v17291_v43 }
0x103f   :  { %22287 = vmatmul.mubr.msk.bf16.gmra.mrb[172].mxu0 %vm27_vm1, %v17292_v19 }
0x1040   :  { %22290 = vmatprep.mubr.msk.bf16.mxu0 %vm27_vm1, %v17293_v57 }
0x1047   :  { %22291 = vmatmul.mubr.msk.bf16.gmra.mrb[176].mxu0 %vm27_vm1, %v17294_v52 }
0x1048   :  { %22294 = vmatprep.mubr.msk.bf16.mxu0 %vm27_vm1, %v17295_v20 }
0x104f   :  { %22295 = vmatmul.mubr.msk.bf16.gmra.mrb[180].mxu0 %vm27_vm1, %v17296_v21 }
0x1050   :  { %22298 = vmatprep.mubr.msk.bf16.mxu0 %vm27_vm1, %v17297_v49 }
0x1057   :  { %22299 = vmatmul.mubr.msk.bf16.gmra.mrb[184].mxu0 %vm27_vm1, %v17298_v59 }
0x1058   :  { %22302 = vmatprep.mubr.msk.bf16.mxu0 %vm27_vm1, %v33228_v25 }
0x105f   :  { %22303 = vmatmul.mubr.msk.bf16.gmra.mrb[188].mxu0 %vm27_vm1, %v17300_v11 }
0x10ba   :  { %v30787_v38 = vpop.f32.mrb[128].mxu0 }
0x10bb   :  { %v30789_v40 = vpop.f32.mrb[129].mxu0  ;;  %v17891_v30 = vmul.f32 %v30787_v38, %v30787_v38  ;;  %v17758_v9 = vsel %vm17754_vm2, %v30787_v38, 0.0 }
0x10bc   :  { %v17889_v37 = vmul.f32 %v30789_v40, %v30789_v40  ;;  %v30793_v15 = vpop.f32.mrb[130].mxu0  ;;  %v17755_v27 = vsel %vm17754_vm2, %v30789_v40, 0.0 }
0x10bd   :  { %v30795_v22 = vpop.f32.mrb[131].mxu0  ;;  %v17892_v16 = vmul.f32 %v30793_v15, %v30793_v15  ;;  %v17956_v51 = vsel %vm17754_vm2, %v17891_v30, 0.0  ;;  %v17760_v44 = vsel %vm17754_vm2, %v30793_v15, 0.0 }
0x10be   :  { %v17756_v56 = vsel %vm17754_vm2, %v30795_v22, 0.0  ;;  %v17890_v18 = vmul.f32 %v30795_v22, %v30795_v22  ;;  %v17953_v54 = vsel %vm17754_vm2, %v17889_v37, 0.0 }
0x10bf   :  { %v17757_v45 = vadd.f32 %v17756_v56, %v17755_v27  ;;  %v17958_v63 = vsel %vm17754_vm2, %v17892_v16, 0.0 }
0x10c0   :  { %v17954_v31 = vsel %vm17754_vm2, %v17890_v18, 0.0 }
0x10c1   :  { %v17759_v12 = vadd.f32 %v17758_v9, %v17757_v45  ;;  %v17955_v41 = vadd.f32 %v17954_v31, %v17953_v54 }
0x10c2   :  { %v30814_v48 = vpop.f32.mrb[132].mxu0 }
0x10c3   :  { %v17957_v35 = vadd.f32 %v17956_v51, %v17955_v41  ;;  %v30816_v39 = vpop.f32.mrb[133].mxu0  ;;  %v17761_v7 = vadd.f32 %v17760_v44, %v17759_v12  ;;  %v17895_v17 = vmul.f32 %v30814_v48, %v30814_v48  ;;  %v17766_v61 = vsel %vm17754_vm2, %v30814_v48, 0.0 }
0x10c4   :  { %v17762_v5 = vsel %vm17754_vm2, %v30816_v39, 0.0  ;;  %v17893_v13 = vmul.f32 %v30816_v39, %v30816_v39  ;;  %v30823_v53 = vpop.f32.mrb[134].mxu0 }
0x10c5   :  { %v17763_v14 = vadd.f32 %v17762_v5, %v17761_v7  ;;  %v17959_v23 = vadd.f32 %v17958_v63, %v17957_v35  ;;  %v30825_v34 = vpop.f32.mrb[135].mxu0  ;;  %v17896_v0 = vmul.f32 %v30823_v53, %v30823_v53  ;;  %v17964_v4 = vsel %vm17754_vm2, %v17895_v17, 0.0 }
0x10c6   :  { %v17960_v26 = vsel %vm17754_vm2, %v17893_v13, 0.0  ;;  %v17764_v6 = vsel %vm17754_vm2, %v30825_v34, 0.0  ;;  %v17894_v58 = vmul.f32 %v30825_v34, %v30825_v34  ;;  %v17768_v8 = vsel %vm17754_vm2, %v30823_v53, 0.0 }
0x10c7   :  { %v17961_v10 = vadd.f32 %v17960_v26, %v17959_v23  ;;  %v17765_v3 = vadd.f32 %v17764_v6, %v17763_v14  ;;  %v17966_v33 = vsel %vm17754_vm2, %v17896_v0, 0.0 }
0x10c8   :  { %v17962_v1 = vsel %vm17754_vm2, %v17894_v58, 0.0 }
0x10c9   :  { %v17767_v29 = vadd.f32 %v17766_v61, %v17765_v3  ;;  %v17963_v50 = vadd.f32 %v17962_v1, %v17961_v10 }
0x10ca   :  { %v30842_v55 = vpop.f32.mrb[136].mxu0 }
0x10cb   :  { %v17965_v62 = vadd.f32 %v17964_v4, %v17963_v50  ;;  %v30844_v2 = vpop.f32.mrb[137].mxu0  ;;  %v17769_v24 = vadd.f32 %v17768_v8, %v17767_v29  ;;  %v17899_v32 = vmul.f32 %v30842_v55, %v30842_v55  ;;  %v17774_v21 = vsel %vm17754_vm2, %v30842_v55, 0.0 }
0x10cc   :  { %v17770_v60 = vsel %vm17754_vm2, %v30844_v2, 0.0  ;;  %v17897_v42 = vmul.f32 %v30844_v2, %v30844_v2  ;;  %v30851_v28 = vpop.f32.mrb[138].mxu0 }
0x10cd   :  { %v17771_v36 = vadd.f32 %v17770_v60, %v17769_v24  ;;  %v17967_v46 = vadd.f32 %v17966_v33, %v17965_v62  ;;  %v30853_v47 = vpop.f32.mrb[139].mxu0  ;;  %v17900_v49 = vmul.f32 %v30851_v28, %v30851_v28  ;;  %v17972_v37 = vsel %vm17754_vm2, %v17899_v32, 0.0 }
0x10ce   :  { %v17968_v43 = vsel %vm17754_vm2, %v17897_v42, 0.0  ;;  %v17772_v19 = vsel %vm17754_vm2, %v30853_v47, 0.0  ;;  %v17898_v57 = vmul.f32 %v30853_v47, %v30853_v47  ;;  %v17776_v30 = vsel %vm17754_vm2, %v30851_v28, 0.0 }
0x10cf   :  { %v17969_v52 = vadd.f32 %v17968_v43, %v17967_v46  ;;  %v17773_v20 = vadd.f32 %v17772_v19, %v17771_v36  ;;  %v17974_v9 = vsel %vm17754_vm2, %v17900_v49, 0.0 }
0x10d0   :  { %v17970_v59 = vsel %vm17754_vm2, %v17898_v57, 0.0 }
0x10d1   :  { %v17775_v11 = vadd.f32 %v17774_v21, %v17773_v20  ;;  %v17971_v25 = vadd.f32 %v17970_v59, %v17969_v52 }
0x10d2   :  { %v30870_v27 = vpop.f32.mrb[140].mxu0 }
0x10d3   :  { %v17973_v56 = vadd.f32 %v17972_v37, %v17971_v25  ;;  %v30872_v18 = vpop.f32.mrb[141].mxu0  ;;  %v17777_v45 = vadd.f32 %v17776_v30, %v17775_v11  ;;  %v17903_v44 = vmul.f32 %v30870_v27, %v30870_v27  ;;  %v17782_v14 = vsel %vm17754_vm2, %v30870_v27, 0.0 }
0x10d4   :  { %v17778_v54 = vsel %vm17754_vm2, %v30872_v18, 0.0  ;;  %v17901_v16 = vmul.f32 %v30872_v18, %v30872_v18  ;;  %v30879_v31 = vpop.f32.mrb[142].mxu0 }
0x10d5   :  { %v17779_v12 = vadd.f32 %v17778_v54, %v17777_v45  ;;  %v17975_v41 = vadd.f32 %v17974_v9, %v17973_v56  ;;  %v30881_v51 = vpop.f32.mrb[143].mxu0  ;;  %v17904_v23 = vmul.f32 %v30879_v31, %v30879_v31  ;;  %v17980_v58 = vsel %vm17754_vm2, %v17903_v44, 0.0 }
0x10d6   :  { %v17976_v35 = vsel %vm17754_vm2, %v17901_v16, 0.0  ;;  %v17780_v7 = vsel %vm17754_vm2, %v30881_v51, 0.0  ;;  %v17902_v63 = vmul.f32 %v30881_v51, %v30881_v51  ;;  %v17784_v10 = vsel %vm17754_vm2, %v30879_v31, 0.0 }
0x10d7   :  { %v17977_v5 = vadd.f32 %v17976_v35, %v17975_v41  ;;  %v17781_v13 = vadd.f32 %v17780_v7, %v17779_v12  ;;  %v17982_v29 = vsel %vm17754_vm2, %v17904_v23, 0.0 }
0x10d8   :  { %v17978_v17 = vsel %vm17754_vm2, %v17902_v63, 0.0 }
0x10d9   :  { %v17783_v26 = vadd.f32 %v17782_v14, %v17781_v13  ;;  %v17979_v6 = vadd.f32 %v17978_v17, %v17977_v5 }
0x10da   :  { %v30898_v3 = vpop.f32.mrb[144].mxu0 }
0x10db   :  { %v17981_v61 = vadd.f32 %v17980_v58, %v17979_v6  ;;  %v30900_v0 = vpop.f32.mrb[145].mxu0  ;;  %v17785_v1 = vadd.f32 %v17784_v10, %v17783_v26  ;;  %v17907_v60 = vmul.f32 %v30898_v3, %v30898_v3  ;;  %v17790_v19 = vsel %vm17754_vm2, %v30898_v3, 0.0 }
0x10dc   :  { %v17786_v50 = vsel %vm17754_vm2, %v30900_v0, 0.0  ;;  %v17905_v4 = vmul.f32 %v30900_v0, %v30900_v0  ;;  %v30907_v8 = vpop.f32.mrb[146].mxu0 }
0x10dd   :  { %v17787_v62 = vadd.f32 %v17786_v50, %v17785_v1  ;;  %v17983_v24 = vadd.f32 %v17982_v29, %v17981_v61  ;;  %v30909_v33 = vpop.f32.mrb[147].mxu0  ;;  %v17908_v57 = vmul.f32 %v30907_v8, %v30907_v8  ;;  %v17988_v49 = vsel %vm17754_vm2, %v17907_v60, 0.0 }
0x10de   :  { %v17984_v42 = vsel %vm17754_vm2, %v17905_v4, 0.0  ;;  %v17788_v36 = vsel %vm17754_vm2, %v30909_v33, 0.0  ;;  %v17906_v46 = vmul.f32 %v30909_v33, %v30909_v33  ;;  %v17792_v59 = vsel %vm17754_vm2, %v30907_v8, 0.0 }
0x10df   :  { %v17985_v32 = vadd.f32 %v17984_v42, %v17983_v24  ;;  %v17789_v43 = vadd.f32 %v17788_v36, %v17787_v62  ;;  %v17990_v56 = vsel %vm17754_vm2, %v17908_v57, 0.0 }
0x10e0   :  { %v17986_v52 = vsel %vm17754_vm2, %v17906_v46, 0.0 }
0x10e1   :  { %v17791_v20 = vadd.f32 %v17790_v19, %v17789_v43  ;;  %v17987_v21 = vadd.f32 %v17986_v52, %v17985_v32 }
0x10e2   :  { %v30926_v11 = vpop.f32.mrb[148].mxu0 }
0x10e3   :  { %v17989_v25 = vadd.f32 %v17988_v49, %v17987_v21  ;;  %v30928_v37 = vpop.f32.mrb[149].mxu0  ;;  %v17793_v30 = vadd.f32 %v17792_v59, %v17791_v20  ;;  %v17911_v44 = vmul.f32 %v30926_v11, %v30926_v11  ;;  %v17798_v14 = vsel %vm17754_vm2, %v30926_v11, 0.0 }
0x10e4   :  { %v17794_v45 = vsel %vm17754_vm2, %v30928_v37, 0.0  ;;  %v17909_v9 = vmul.f32 %v30928_v37, %v30928_v37  ;;  %v30935_v54 = vpop.f32.mrb[150].mxu0 }
0x10e5   :  { %v17795_v16 = vadd.f32 %v17794_v45, %v17793_v30  ;;  %v17991_v12 = vadd.f32 %v17990_v56, %v17989_v25  ;;  %v30937_v41 = vpop.f32.mrb[151].mxu0  ;;  %v17912_v23 = vmul.f32 %v30935_v54, %v30935_v54  ;;  %v17996_v58 = vsel %vm17754_vm2, %v17911_v44, 0.0 }
0x10e6   :  { %v17992_v35 = vsel %vm17754_vm2, %v17909_v9, 0.0  ;;  %v17796_v7 = vsel %vm17754_vm2, %v30937_v41, 0.0  ;;  %v17910_v63 = vmul.f32 %v30937_v41, %v30937_v41  ;;  %v17800_v10 = vsel %vm17754_vm2, %v30935_v54, 0.0 }
0x10e7   :  { %v17993_v5 = vadd.f32 %v17992_v35, %v17991_v12  ;;  %v17797_v13 = vadd.f32 %v17796_v7, %v17795_v16  ;;  %v17998_v4 = vsel %vm17754_vm2, %v17912_v23, 0.0 }
0x10e8   :  { %v17994_v17 = vsel %vm17754_vm2, %v17910_v63, 0.0 }
0x10e9   :  { %v17799_v26 = vadd.f32 %v17798_v14, %v17797_v13  ;;  %v17995_v6 = vadd.f32 %v17994_v17, %v17993_v5 }
0x10ea   :  { %v30954_v61 = vpop.f32.mrb[152].mxu0 }
0x10eb   :  { %v17997_v1 = vadd.f32 %v17996_v58, %v17995_v6  ;;  %v30956_v29 = vpop.f32.mrb[153].mxu0  ;;  %v17801_v50 = vadd.f32 %v17800_v10, %v17799_v26  ;;  %v17915_v32 = vmul.f32 %v30954_v61, %v30954_v61  ;;  %v17806_v21 = vsel %vm17754_vm2, %v30954_v61, 0.0 }
0x10ec   :  { %v17802_v62 = vsel %vm17754_vm2, %v30956_v29, 0.0  ;;  %v17913_v24 = vmul.f32 %v30956_v29, %v30956_v29  ;;  %v30963_v60 = vpop.f32.mrb[154].mxu0 }
0x10ed   :  { %v17803_v42 = vadd.f32 %v17802_v62, %v17801_v50  ;;  %v17999_v36 = vadd.f32 %v17998_v4, %v17997_v1  ;;  %v30965_v46 = vpop.f32.mrb[155].mxu0  ;;  %v17916_v49 = vmul.f32 %v30963_v60, %v30963_v60  ;;  %v18004_v56 = vsel %vm17754_vm2, %v17915_v32, 0.0 }
0x10ee   :  { %v18000_v43 = vsel %vm17754_vm2, %v17913_v24, 0.0  ;;  %v17804_v19 = vsel %vm17754_vm2, %v30965_v46, 0.0  ;;  %v17914_v57 = vmul.f32 %v30965_v46, %v30965_v46  ;;  %v17808_v45 = vsel %vm17754_vm2, %v30963_v60, 0.0 }
0x10ef   :  { %v18001_v52 = vadd.f32 %v18000_v43, %v17999_v36  ;;  %v17805_v20 = vadd.f32 %v17804_v19, %v17803_v42  ;;  %v18006_v35 = vsel %vm17754_vm2, %v17916_v49, 0.0 }
0x10f0   :  { %v18002_v59 = vsel %vm17754_vm2, %v17914_v57, 0.0 }
0x10f1   :  { %v17807_v25 = vadd.f32 %v17806_v21, %v17805_v20  ;;  %v18003_v30 = vadd.f32 %v18002_v59, %v18001_v52 }
0x10f2   :  { %v30982_v9 = vpop.f32.mrb[156].mxu0 }
0x10f3   :  { %v18005_v16 = vadd.f32 %v18004_v56, %v18003_v30  ;;  %v30984_v12 = vpop.f32.mrb[157].mxu0  ;;  %v17809_v44 = vadd.f32 %v17808_v45, %v17807_v25  ;;  %v17919_v17 = vmul.f32 %v30982_v9, %v30982_v9  ;;  %v17814_v50 = vsel %vm17754_vm2, %v30982_v9, 0.0 }
0x10f4   :  { %v17810_v7 = vsel %vm17754_vm2, %v30984_v12, 0.0  ;;  %v17917_v63 = vmul.f32 %v30984_v12, %v30984_v12  ;;  %v30991_v5 = vpop.f32.mrb[158].mxu0 }
0x10f5   :  { %v17811_v13 = vadd.f32 %v17810_v7, %v17809_v44  ;;  %v18007_v14 = vadd.f32 %v18006_v35, %v18005_v16  ;;  %v30993_v23 = vpop.f32.mrb[159].mxu0  ;;  %v17920_v4 = vmul.f32 %v30991_v5, %v30991_v5  ;;  %v18012_v36 = vsel %vm17754_vm2, %v17919_v17, 0.0 }
0x10f6   :  { %v18008_v26 = vsel %vm17754_vm2, %v17917_v63, 0.0  ;;  %v17812_v6 = vsel %vm17754_vm2, %v30993_v23, 0.0  ;;  %v17918_v58 = vmul.f32 %v30993_v23, %v30993_v23  ;;  %v17816_v32 = vsel %vm17754_vm2, %v30991_v5, 0.0 }
0x10f7   :  { %v18009_v10 = vadd.f32 %v18008_v26, %v18007_v14  ;;  %v17813_v1 = vadd.f32 %v17812_v6, %v17811_v13  ;;  %v18014_v20 = vsel %vm17754_vm2, %v17920_v4, 0.0 }
0x10f8   :  { %v18010_v62 = vsel %vm17754_vm2, %v17918_v58, 0.0 }
0x10f9   :  { %v17815_v24 = vadd.f32 %v17814_v50, %v17813_v1  ;;  %v18011_v42 = vadd.f32 %v18010_v62, %v18009_v10 }
0x10fa   :  { %v31010_v43 = vpop.f32.mrb[160].mxu0 }
0x10fb   :  { %v18013_v19 = vadd.f32 %v18012_v36, %v18011_v42  ;;  %v31012_v57 = vpop.f32.mrb[161].mxu0  ;;  %v17817_v52 = vadd.f32 %v17816_v32, %v17815_v24  ;;  %v17923_v45 = vmul.f32 %v31010_v43, %v31010_v43  ;;  %v17822_v13 = vsel %vm17754_vm2, %v31010_v43, 0.0 }
0x10fc   :  { %v17818_v21 = vsel %vm17754_vm2, %v31012_v57, 0.0  ;;  %v17921_v49 = vmul.f32 %v31012_v57, %v31012_v57  ;;  %v31019_v59 = vpop.f32.mrb[162].mxu0 }
0x10fd   :  { %v17819_v25 = vadd.f32 %v17818_v21, %v17817_v52  ;;  %v18015_v30 = vadd.f32 %v18014_v20, %v18013_v19  ;;  %v31021_v56 = vpop.f32.mrb[163].mxu0  ;;  %v17924_v14 = vmul.f32 %v31019_v59, %v31019_v59  ;;  %v18020_v58 = vsel %vm17754_vm2, %v17923_v45, 0.0 }
0x10fe   :  { %v18016_v16 = vsel %vm17754_vm2, %v17921_v49, 0.0  ;;  %v17820_v44 = vsel %vm17754_vm2, %v31021_v56, 0.0  ;;  %v17922_v35 = vmul.f32 %v31021_v56, %v31021_v56  ;;  %v17824_v10 = vsel %vm17754_vm2, %v31019_v59, 0.0 }
0x10ff   :  { %v18017_v7 = vadd.f32 %v18016_v16, %v18015_v30  ;;  %v17821_v63 = vadd.f32 %v17820_v44, %v17819_v25  ;;  %v18022_v24 = vsel %vm17754_vm2, %v17924_v14, 0.0 }
0x1100   :  { %v18018_v17 = vsel %vm17754_vm2, %v17922_v35, 0.0 }
0x1101   :  { %v17823_v26 = vadd.f32 %v17822_v13, %v17821_v63  ;;  %v18019_v6 = vadd.f32 %v18018_v17, %v18017_v7 }
0x1102   :  { %v31038_v1 = vpop.f32.mrb[164].mxu0 }
0x1103   :  { %v18021_v50 = vadd.f32 %v18020_v58, %v18019_v6  ;;  %v31040_v4 = vpop.f32.mrb[165].mxu0  ;;  %v17825_v62 = vadd.f32 %v17824_v10, %v17823_v26  ;;  %v17927_v21 = vmul.f32 %v31038_v1, %v31038_v1  ;;  %v17830_v44 = vsel %vm17754_vm2, %v31038_v1, 0.0 }
0x1104   :  { %v17826_v42 = vsel %vm17754_vm2, %v31040_v4, 0.0  ;;  %v17925_v36 = vmul.f32 %v31040_v4, %v31040_v4  ;;  %v31047_v32 = vpop.f32.mrb[166].mxu0 }
0x1105   :  { %v17827_v19 = vadd.f32 %v17826_v42, %v17825_v62  ;;  %v18023_v52 = vadd.f32 %v18022_v24, %v18021_v50  ;;  %v31049_v20 = vpop.f32.mrb[167].mxu0  ;;  %v17928_v35 = vmul.f32 %v31047_v32, %v31047_v32  ;;  %v18028_v14 = vsel %vm17754_vm2, %v17927_v21, 0.0 }
0x1106   :  { %v18024_v49 = vsel %vm17754_vm2, %v17925_v36, 0.0  ;;  %v17828_v25 = vsel %vm17754_vm2, %v31049_v20, 0.0  ;;  %v17926_v30 = vmul.f32 %v31049_v20, %v31049_v20  ;;  %v17832_v17 = vsel %vm17754_vm2, %v31047_v32, 0.0 }
0x1107   :  { %v18025_v45 = vadd.f32 %v18024_v49, %v18023_v52  ;;  %v17829_v16 = vadd.f32 %v17828_v25, %v17827_v19  ;;  %v18030_v50 = vsel %vm17754_vm2, %v17928_v35, 0.0 }
0x1108   :  { %v18026_v7 = vsel %vm17754_vm2, %v17926_v30, 0.0 }
0x1109   :  { %v17831_v63 = vadd.f32 %v17830_v44, %v17829_v16  ;;  %v18027_v13 = vadd.f32 %v18026_v7, %v18025_v45 }
0x110a   :  { %v31066_v26 = vpop.f32.mrb[168].mxu0 }
0x110b   :  { %33229 = vst [vmem:[#allocation33_spill] sm:$0xff] %v31066_v26  ;;  %v18029_v6 = vadd.f32 %v18028_v14, %v18027_v13  ;;  %v31068_v58 = vpop.f32.mrb[169].mxu0  ;;  %v17833_v10 = vadd.f32 %v17832_v17, %v17831_v63  ;;  %v17931_v21 = vmul.f32 %v31066_v26, %v31066_v26  ;;  %v17838_v44 = vsel %vm17754_vm2, %v31066_v26, 0.0 }
0x110c   :  { %v17834_v62 = vsel %vm17754_vm2, %v31068_v58, 0.0  ;;  %v17929_v24 = vmul.f32 %v31068_v58, %v31068_v58  ;;  %v31075_v42 = vpop.f32.mrb[170].mxu0 }
0x110d   :  { %33230 = vst [vmem:[#allocation34_spill] sm:$0xff] %v31075_v42  ;;  %v17835_v36 = vadd.f32 %v17834_v62, %v17833_v10  ;;  %v18031_v19 = vadd.f32 %v18030_v50, %v18029_v6  ;;  %v31077_v52 = vpop.f32.mrb[171].mxu0  ;;  %v17932_v35 = vmul.f32 %v31075_v42, %v31075_v42  ;;  %v18036_v14 = vsel %vm17754_vm2, %v17931_v21, 0.0 }
0x110e   :  { %33231 = vst [vmem:[#allocation35_spill] sm:$0xff] %v31077_v52  ;;  %v18032_v49 = vsel %vm17754_vm2, %v17929_v24, 0.0  ;;  %v17836_v25 = vsel %vm17754_vm2, %v31077_v52, 0.0  ;;  %v17930_v30 = vmul.f32 %v31077_v52, %v31077_v52  ;;  %v17840_v17 = vsel %vm17754_vm2, %v31075_v42, 0.0 }
0x110f   :  { %v18033_v45 = vadd.f32 %v18032_v49, %v18031_v19  ;;  %v17837_v16 = vadd.f32 %v17836_v25, %v17835_v36  ;;  %v18038_v24 = vsel %vm17754_vm2, %v17932_v35, 0.0 }
0x1110   :  { %v18034_v7 = vsel %vm17754_vm2, %v17930_v30, 0.0 }
0x1111   :  { %v17839_v63 = vadd.f32 %v17838_v44, %v17837_v16  ;;  %v18035_v13 = vadd.f32 %v18034_v7, %v18033_v45 }
0x1112   :  { %v31094_v6 = vpop.f32.mrb[172].mxu0 }
0x1113   :  { %33232 = vst [vmem:[#allocation7_spill] sm:$0xff] %v31094_v6  ;;  %v18037_v10 = vadd.f32 %v18036_v14, %v18035_v13  ;;  %v31096_v50 = vpop.f32.mrb[173].mxu0  ;;  %v17841_v62 = vadd.f32 %v17840_v17, %v17839_v63  ;;  %v17935_v45 = vmul.f32 %v31094_v6, %v31094_v6  ;;  %v17846_v13 = vsel %vm17754_vm2, %v31094_v6, 0.0 }
0x1114   :  { %33233 = vst [vmem:[#allocation4_spill] sm:$0xff] %v31096_v50  ;;  %v17842_v36 = vsel %vm17754_vm2, %v31096_v50, 0.0  ;;  %v17933_v19 = vmul.f32 %v31096_v50, %v31096_v50  ;;  %v31103_v49 = vpop.f32.mrb[174].mxu0 }
0x1115   :  { %33234 = vst [vmem:[#allocation6_spill] sm:$0xff] %v31103_v49  ;;  %v17843_v21 = vadd.f32 %v17842_v36, %v17841_v62  ;;  %v18039_v25 = vadd.f32 %v18038_v24, %v18037_v10  ;;  %v31105_v30 = vpop.f32.mrb[175].mxu0  ;;  %v17936_v14 = vmul.f32 %v31103_v49, %v31103_v49  ;;  %v18044_v24 = vsel %vm17754_vm2, %v17935_v45, 0.0 }
0x1116   :  { %33235 = vst [vmem:[#allocation9_spill] sm:$0xff] %v31105_v30  ;;  %v18040_v16 = vsel %vm17754_vm2, %v17933_v19, 0.0  ;;  %v17844_v44 = vsel %vm17754_vm2, %v31105_v30, 0.0  ;;  %v17934_v35 = vmul.f32 %v31105_v30, %v31105_v30  ;;  %v17848_v36 = vsel %vm17754_vm2, %v31103_v49, 0.0 }
0x1117   :  { %v18041_v7 = vadd.f32 %v18040_v16, %v18039_v25  ;;  %v17845_v63 = vadd.f32 %v17844_v44, %v17843_v21  ;;  %v18046_v16 = vsel %vm17754_vm2, %v17936_v14, 0.0 }
0x1118   :  { %v18042_v17 = vsel %vm17754_vm2, %v17934_v35, 0.0 }
0x1119   :  { %v17847_v10 = vadd.f32 %v17846_v13, %v17845_v63  ;;  %v18043_v62 = vadd.f32 %v18042_v17, %v18041_v7 }
0x111a   :  { %v31122_v19 = vpop.f32.mrb[176].mxu0 }
0x111b   :  { %33236 = vst [vmem:[#allocation11_spill] sm:$0xff] %v31122_v19  ;;  %v18045_v30 = vadd.f32 %v18044_v24, %v18043_v62  ;;  %v31124_v25 = vpop.f32.mrb[177].mxu0  ;;  %v17849_v21 = vadd.f32 %v17848_v36, %v17847_v10  ;;  %v17939_v17 = vmul.f32 %v31122_v19, %v31122_v19 }
0x111c   :  { %33237 = vst [vmem:[#allocation8_spill] sm:$0xff] %v31124_v25  ;;  %v17850_v44 = vsel %vm17754_vm2, %v31124_v25, 0.0  ;;  %v17937_v35 = vmul.f32 %v31124_v25, %v31124_v25  ;;  %v31131_v7 = vpop.f32.mrb[178].mxu0  ;;  %v17854_v25 = vsel %vm17754_vm2, %v31122_v19, 0.0 }
0x111d   :  { %33238 = vst [vmem:[#allocation21_spill] sm:$0xff] %v31131_v7  ;;  %v17851_v45 = vadd.f32 %v17850_v44, %v17849_v21  ;;  %v18047_v63 = vadd.f32 %v18046_v16, %v18045_v30  ;;  %v31133_v13 = vpop.f32.mrb[179].mxu0  ;;  %v17940_v30 = vmul.f32 %v31131_v7, %v31131_v7  ;;  %v17856_v49 = vsel %vm17754_vm2, %v31131_v7, 0.0 }
0x111e   :  { %33239 = vst [vmem:[#allocation23_spill] sm:$0xff] %v31133_v13  ;;  %v18048_v62 = vsel %vm17754_vm2, %v17937_v35, 0.0  ;;  %v17852_v14 = vsel %vm17754_vm2, %v31133_v13, 0.0  ;;  %v17938_v10 = vmul.f32 %v31133_v13, %v31133_v13  ;;  %v18052_v35 = vsel %vm17754_vm2, %v17939_v17, 0.0 }
0x111f   :  { %v18049_v24 = vadd.f32 %v18048_v62, %v18047_v63  ;;  %v17853_v36 = vadd.f32 %v17852_v14, %v17851_v45  ;;  %v18054_v62 = vsel %vm17754_vm2, %v17940_v30, 0.0 }
0x1120   :  { %v18050_v21 = vsel %vm17754_vm2, %v17938_v10, 0.0 }
0x1121   :  { %v17855_v16 = vadd.f32 %v17854_v25, %v17853_v36  ;;  %v18051_v44 = vadd.f32 %v18050_v21, %v18049_v24 }
0x1122   :  { %v31150_v6 = vpop.f32.mrb[180].mxu0 }
0x1123   :  { %33240 = vst [vmem:[#allocation20_spill] sm:$0xff] %v31150_v6  ;;  %v18053_v13 = vadd.f32 %v18052_v35, %v18051_v44  ;;  %v31152_v63 = vpop.f32.mrb[181].mxu0  ;;  %v17857_v45 = vadd.f32 %v17856_v49, %v17855_v16  ;;  %v17943_v21 = vmul.f32 %v31150_v6, %v31150_v6 }
0x1124   :  { %33241 = vst [vmem:[#allocation22_spill] sm:$0xff] %v31152_v63  ;;  %v17858_v14 = vsel %vm17754_vm2, %v31152_v63, 0.0  ;;  %v17941_v25 = vmul.f32 %v31152_v63, %v31152_v63  ;;  %v31159_v10 = vpop.f32.mrb[182].mxu0  ;;  %v17862_v63 = vsel %vm17754_vm2, %v31150_v6, 0.0 }
0x1125   :  { %33242 = vst [vmem:[#allocation25_spill] sm:$0xff] %v31159_v10  ;;  %v17859_v17 = vadd.f32 %v17858_v14, %v17857_v45  ;;  %v18055_v24 = vadd.f32 %v18054_v62, %v18053_v13  ;;  %v31161_v36 = vpop.f32.mrb[183].mxu0  ;;  %v17944_v13 = vmul.f32 %v31159_v10, %v31159_v10  ;;  %v17864_v7 = vsel %vm17754_vm2, %v31159_v10, 0.0 }
0x1126   :  { %33243 = vst [vmem:[#allocation24_spill] sm:$0xff] %v31161_v36  ;;  %v18056_v44 = vsel %vm17754_vm2, %v17941_v25, 0.0  ;;  %v17860_v49 = vsel %vm17754_vm2, %v31161_v36, 0.0  ;;  %v17942_v30 = vmul.f32 %v31161_v36, %v31161_v36  ;;  %v18060_v25 = vsel %vm17754_vm2, %v17943_v21, 0.0 }
0x1127   :  { %v18057_v16 = vadd.f32 %v18056_v44, %v18055_v24  ;;  %v17861_v35 = vadd.f32 %v17860_v49, %v17859_v17  ;;  %v18062_v44 = vsel %vm17754_vm2, %v17944_v13, 0.0 }
0x1128   :  { %v18058_v45 = vsel %vm17754_vm2, %v17942_v30, 0.0 }
0x1129   :  { %v17863_v62 = vadd.f32 %v17862_v63, %v17861_v35  ;;  %v18059_v14 = vadd.f32 %v18058_v45, %v18057_v16 }
0x112a   :  { %v31178_v19 = vpop.f32.mrb[184].mxu0 }
0x112b   :  { %33244 = vst [vmem:[#allocation26_spill] sm:$0xff] %v31178_v19  ;;  %v18061_v36 = vadd.f32 %v18060_v25, %v18059_v14  ;;  %v31180_v24 = vpop.f32.mrb[185].mxu0  ;;  %v17865_v17 = vadd.f32 %v17864_v7, %v17863_v62  ;;  %v17947_v45 = vmul.f32 %v31178_v19, %v31178_v19 }
0x112c   :  { %33245 = vst [vmem:[#allocation10_spill] sm:$0xff] %v31180_v24  ;;  %v17866_v49 = vsel %vm17754_vm2, %v31180_v24, 0.0  ;;  %v17945_v63 = vmul.f32 %v31180_v24, %v31180_v24  ;;  %v31187_v30 = vpop.f32.mrb[186].mxu0  ;;  %v17870_v24 = vsel %vm17754_vm2, %v31178_v19, 0.0 }
0x112d   :  { %33246 = vst [vmem:[#allocation15_spill] sm:$0xff] %v31187_v30  ;;  %v17867_v21 = vadd.f32 %v17866_v49, %v17865_v17  ;;  %v18063_v16 = vadd.f32 %v18062_v44, %v18061_v36  ;;  %v31189_v35 = vpop.f32.mrb[187].mxu0  ;;  %v17948_v36 = vmul.f32 %v31187_v30, %v31187_v30  ;;  %v17872_v10 = vsel %vm17754_vm2, %v31187_v30, 0.0 }
0x112e   :  { %33247 = vst [vmem:[#allocation12_spill] sm:$0xff] %v31189_v35  ;;  %v18064_v14 = vsel %vm17754_vm2, %v17945_v63, 0.0  ;;  %v17868_v7 = vsel %vm17754_vm2, %v31189_v35, 0.0  ;;  %v17946_v13 = vmul.f32 %v31189_v35, %v31189_v35  ;;  %v18068_v63 = vsel %vm17754_vm2, %v17947_v45, 0.0 }
0x112f   :  { %v18065_v62 = vadd.f32 %v18064_v14, %v18063_v16  ;;  %v17869_v25 = vadd.f32 %v17868_v7, %v17867_v21  ;;  %v18070_v14 = vsel %vm17754_vm2, %v17948_v36, 0.0 }
0x1130   :  { %v18066_v17 = vsel %vm17754_vm2, %v17946_v13, 0.0 }
0x1131   :  { %v17871_v44 = vadd.f32 %v17870_v24, %v17869_v25  ;;  %v18067_v49 = vadd.f32 %v18066_v17, %v18065_v62 }
0x1132   :  { %v31206_v6 = vpop.f32.mrb[188].mxu0 }
0x1133   :  { %33248 = vst [vmem:[#allocation51_spill] sm:$0xff] %v31206_v6  ;;  %v18069_v35 = vadd.f32 %v18068_v63, %v18067_v49  ;;  %v31208_v16 = vpop.f32.mrb[189].mxu0  ;;  %v17873_v21 = vadd.f32 %v17872_v10, %v17871_v44  ;;  %v17951_v17 = vmul.f32 %v31206_v6, %v31206_v6 }
0x1134   :  { %33249 = vst [vmem:[#allocation54_spill] sm:$0xff] %v31208_v16  ;;  %v17874_v7 = vsel %vm17754_vm2, %v31208_v16, 0.0  ;;  %v17949_v24 = vmul.f32 %v31208_v16, %v31208_v16  ;;  %v31215_v13 = vpop.f32.mrb[190].mxu0  ;;  %v17878_v16 = vsel %vm17754_vm2, %v31206_v6, 0.0 }
0x1135   :  { %33250 = vst [vmem:[#allocation56_spill] sm:$0xff] %v31215_v13  ;;  %v17875_v45 = vadd.f32 %v17874_v7, %v17873_v21  ;;  %v18071_v62 = vadd.f32 %v18070_v14, %v18069_v35  ;;  %v31217_v25 = vpop.f32.mrb[191].mxu0  ;;  %v17952_v35 = vmul.f32 %v31215_v13, %v31215_v13  ;;  %v17880_v30 = vsel %vm17754_vm2, %v31215_v13, 0.0 }
0x1136   :  { %33251 = vst [vmem:[#allocation53_spill] sm:$0xff] %v31217_v25  ;;  %v18072_v49 = vsel %vm17754_vm2, %v17949_v24, 0.0  ;;  %v17876_v10 = vsel %vm17754_vm2, %v31217_v25, 0.0  ;;  %v17950_v36 = vmul.f32 %v31217_v25, %v31217_v25  ;;  %v18076_v24 = vsel %vm17754_vm2, %v17951_v17, 0.0 }
0x1137   :  { %v18073_v44 = vadd.f32 %v18072_v49, %v18071_v62  ;;  %v17877_v63 = vadd.f32 %v17876_v10, %v17875_v45  ;;  %v18078_v62 = vsel %vm17754_vm2, %v17952_v35, 0.0 }
0x1138   :  { %v18074_v21 = vsel %vm17754_vm2, %v17950_v36, 0.0 }
0x1139   :  { %v17879_v14 = vadd.f32 %v17878_v16, %v17877_v63  ;;  %v18075_v7 = vadd.f32 %v18074_v21, %v18073_v44 }
0x113b   :  { %v17881_v19 = vadd.f32 %v17880_v30, %v17879_v14  ;;  %v18077_v50 = vadd.f32 %v18076_v24, %v18075_v7 }
0x113d   :  { %v17882_v45 = vrot.slane %v17881_v19, 4  ;;  %v18079_v49 = vadd.f32 %v18078_v62, %v18077_v50  ;;  %v33272_v50 = vld [vmem:[#allocation53_spill] sm:$0xff] }
0x113f   :  { %v17883_v10 = vadd.f32 %v17882_v45, %v17881_v19  ;;  %v18080_v6 = vrot.slane %v18079_v49, 4  ;;  %v33271_v19 = vld [vmem:[#allocation54_spill] sm:$0xff] }
0x1141   :  { %v17884_v25 = vrot.slane %v17883_v10, 2  ;;  %v18081_v42 = vadd.f32 %v18080_v6, %v18079_v49  ;;  %v33270_v6 = vld [vmem:[#allocation15_spill] sm:$0xff] }
0x1143   :  { %v17885_v26 = vadd.f32 %v17884_v25, %v17883_v10  ;;  %v18082_v52 = vrot.slane %v18081_v42, 2  ;;  %v33273_v10 = vld [vmem:[#allocation51_spill] sm:$0xff] }
0x1145   :  { %v17886_v36 = vrot.slane %v17885_v26, 1  ;;  %v18083_v16 = vadd.f32 %v18082_v52, %v18081_v42  ;;  %v33268_v42 = vld [vmem:[#allocation12_spill] sm:$0xff] }
0x1147   :  { %v17887_v44 = vadd.f32 %v17886_v36, %v17885_v26  ;;  %v18084_v63 = vrot.slane %v18083_v16, 1  ;;  %v33253_v36 = vld [vmem:[#allocation33_spill] sm:$0xff]  ;;  %v33269_v26 = vld [vmem:[#allocation26_spill] sm:$0xff] }
0x1149   :  { %v31235_v17 = vmul.f32 0.001953125, %v17887_v44  ;;  %v18085_v21 = vadd.f32 %v18084_v63, %v18083_v16  ;;  %v33254_v16 = vld [vmem:[#allocation34_spill] sm:$0xff]  ;;  %v33255_v44 = vld [vmem:[#allocation4_spill] sm:$0xff]  ;;  %v33256_v63 = vld [vmem:[#allocation9_spill] sm:$0xff] }
0x114b   :  { %v18086_v13 = vmul.f32 0.001953125, %v18085_v21  ;;  %v18087_v30 = vmul.f32 %v31235_v17, %v31235_v17  ;;  %v33257_v21 = vld [vmem:[#allocation7_spill] sm:$0xff]  ;;  %v33275_v62 = vsub.f32 %v30789_v40, %v31235_v17  ;;  %v33276_v7 = vsub.f32 %v30795_v22, %v31235_v17 }
0x114c   :  { %v33277_v35 = vsub.f32 %v30787_v38, %v31235_v17 }
0x114d   :  { %v18088_v25 = vsub.f32 %v18086_v13, %v18087_v30  ;;  %v33274_v13 = vld [vmem:[#allocation56_spill] sm:$0xff] }
0x114f   :  { %v18089_v49 = vmax.f32 %v18088_v25, 0.0  ;;  %v33252_v25 = vld [vmem:[#allocation35_spill] sm:$0xff] }
0x1151   :  { %v18154_v30 = vadd.f32 1e-05, %v18089_v49 }
0x1153   :  { %24007 = vrsqrt.f32 %v18154_v30  ;;  %v33278_v30 = vsub.f32 %v30793_v15, %v31235_v17 }
0x115d   :  { %v31367_v45 = vpop.eup %24007 }
0x115e   :  { %v31373_v24 = vmul.f32 %v31367_v45, %v33275_v62  ;;  %v31379_v14 = vmul.f32 %v31367_v45, %v33276_v7  ;;  %v31385_v49 = vmul.f32 %v31367_v45, %v33277_v35  ;;  %v31391_v40 = vmul.f32 %v31367_v45, %v33278_v30 }
0x115f   :  { %v33279_v62 = vsub.f32 %v30816_v39, %v31235_v17  ;;  %v33280_v7 = vsub.f32 %v30825_v34, %v31235_v17  ;;  %v33281_v35 = vsub.f32 %v30814_v48, %v31235_v17  ;;  %v33282_v30 = vsub.f32 %v30823_v53, %v31235_v17 }
0x1161   :  { %v31397_v22 = vmul.f32 %v31367_v45, %v33279_v62  ;;  %v31403_v38 = vmul.f32 %v31367_v45, %v33280_v7  ;;  %v31409_v15 = vmul.f32 %v31367_v45, %v33281_v35  ;;  %v31415_v39 = vmul.f32 %v31367_v45, %v33282_v30 }
0x1162   :  { %v33283_v62 = vsub.f32 %v30844_v2, %v31235_v17  ;;  %v33284_v7 = vsub.f32 %v30853_v47, %v31235_v17  ;;  %v33285_v35 = vsub.f32 %v30842_v55, %v31235_v17  ;;  %v33286_v30 = vsub.f32 %v30851_v28, %v31235_v17 }
0x1164   :  { %v31421_v34 = vmul.f32 %v31367_v45, %v33283_v62  ;;  %v31427_v48 = vmul.f32 %v31367_v45, %v33284_v7  ;;  %v31433_v53 = vmul.f32 %v31367_v45, %v33285_v35  ;;  %v31439_v2 = vmul.f32 %v31367_v45, %v33286_v30 }
0x1165   :  { %v33287_v62 = vsub.f32 %v30872_v18, %v31235_v17  ;;  %v33288_v7 = vsub.f32 %v30881_v51, %v31235_v17  ;;  %v33289_v35 = vsub.f32 %v30870_v27, %v31235_v17  ;;  %v33290_v30 = vsub.f32 %v30879_v31, %v31235_v17 }
0x1167   :  { %v31445_v47 = vmul.f32 %v31367_v45, %v33287_v62  ;;  %v31451_v55 = vmul.f32 %v31367_v45, %v33288_v7  ;;  %v31457_v28 = vmul.f32 %v31367_v45, %v33289_v35  ;;  %v31463_v18 = vmul.f32 %v31367_v45, %v33290_v30 }
0x1168   :  { %v33291_v62 = vsub.f32 %v30900_v0, %v31235_v17  ;;  %v33292_v7 = vsub.f32 %v30909_v33, %v31235_v17  ;;  %v33293_v35 = vsub.f32 %v30898_v3, %v31235_v17  ;;  %v33294_v30 = vsub.f32 %v30907_v8, %v31235_v17 }
0x116a   :  { %v31469_v51 = vmul.f32 %v31367_v45, %v33291_v62  ;;  %v31475_v27 = vmul.f32 %v31367_v45, %v33292_v7  ;;  %v31481_v31 = vmul.f32 %v31367_v45, %v33293_v35  ;;  %v31487_v0 = vmul.f32 %v31367_v45, %v33294_v30 }
0x116b   :  { %v33295_v62 = vsub.f32 %v30928_v37, %v31235_v17  ;;  %v33296_v7 = vsub.f32 %v30937_v41, %v31235_v17  ;;  %v33297_v35 = vsub.f32 %v30926_v11, %v31235_v17  ;;  %v33298_v30 = vsub.f32 %v30935_v54, %v31235_v17 }
0x116d   :  { %v31493_v33 = vmul.f32 %v31367_v45, %v33295_v62  ;;  %v31499_v3 = vmul.f32 %v31367_v45, %v33296_v7  ;;  %v31505_v8 = vmul.f32 %v31367_v45, %v33297_v35  ;;  %v31511_v37 = vmul.f32 %v31367_v45, %v33298_v30 }
0x116e   :  { %v33299_v62 = vsub.f32 %v30956_v29, %v31235_v17  ;;  %v33300_v7 = vsub.f32 %v30965_v46, %v31235_v17  ;;  %v33301_v35 = vsub.f32 %v30954_v61, %v31235_v17  ;;  %v33302_v30 = vsub.f32 %v30963_v60, %v31235_v17 }
0x1170   :  { %v31517_v41 = vmul.f32 %v31367_v45, %v33299_v62  ;;  %v31523_v11 = vmul.f32 %v31367_v45, %v33300_v7  ;;  %v31529_v54 = vmul.f32 %v31367_v45, %v33301_v35  ;;  %v31535_v29 = vmul.f32 %v31367_v45, %v33302_v30 }
0x1171   :  { %v33303_v62 = vsub.f32 %v30984_v12, %v31235_v17  ;;  %v33304_v7 = vsub.f32 %v30993_v23, %v31235_v17  ;;  %v33305_v35 = vsub.f32 %v30982_v9, %v31235_v17  ;;  %v33306_v30 = vsub.f32 %v30991_v5, %v31235_v17 }
0x1173   :  { %v31541_v46 = vmul.f32 %v31367_v45, %v33303_v62  ;;  %v31547_v61 = vmul.f32 %v31367_v45, %v33304_v7  ;;  %v31553_v60 = vmul.f32 %v31367_v45, %v33305_v35  ;;  %v31559_v12 = vmul.f32 %v31367_v45, %v33306_v30 }
0x1174   :  { %v33307_v62 = vsub.f32 %v31012_v57, %v31235_v17  ;;  %v33308_v7 = vsub.f32 %v31021_v56, %v31235_v17  ;;  %v33309_v35 = vsub.f32 %v31010_v43, %v31235_v17  ;;  %v33310_v30 = vsub.f32 %v31019_v59, %v31235_v17 }
0x1176   :  { %v31565_v23 = vmul.f32 %v31367_v45, %v33307_v62  ;;  %v31571_v9 = vmul.f32 %v31367_v45, %v33308_v7  ;;  %v31577_v5 = vmul.f32 %v31367_v45, %v33309_v35  ;;  %v31583_v57 = vmul.f32 %v31367_v45, %v33310_v30 }
0x1177   :  { %v33311_v62 = vsub.f32 %v31040_v4, %v31235_v17  ;;  %v33312_v7 = vsub.f32 %v31049_v20, %v31235_v17  ;;  %v33313_v35 = vsub.f32 %v31038_v1, %v31235_v17  ;;  %v33314_v30 = vsub.f32 %v31047_v32, %v31235_v17 }
0x1179   :  { %v31589_v56 = vmul.f32 %v31367_v45, %v33311_v62  ;;  %v31595_v43 = vmul.f32 %v31367_v45, %v33312_v7  ;;  %v31601_v59 = vmul.f32 %v31367_v45, %v33313_v35  ;;  %v31607_v4 = vmul.f32 %v31367_v45, %v33314_v30 }
0x117a   :  { %v33315_v62 = vsub.f32 %v31068_v58, %v31235_v17  ;;  %v33316_v7 = vsub.f32 %v33252_v25, %v31235_v17  ;;  %v33317_v35 = vsub.f32 %v33253_v36, %v31235_v17  ;;  %v33318_v30 = vsub.f32 %v33254_v16, %v31235_v17 }
0x117c   :  { %v31613_v20 = vmul.f32 %v31367_v45, %v33315_v62  ;;  %v31619_v1 = vmul.f32 %v31367_v45, %v33316_v7  ;;  %v31625_v32 = vmul.f32 %v31367_v45, %v33317_v35  ;;  %v31631_v58 = vmul.f32 %v31367_v45, %v33318_v30  ;;  %v33325_v30 = vld [vmem:[#allocation6_spill] sm:$0xff] }
0x117d   :  { %v33319_v62 = vsub.f32 %v33255_v44, %v31235_v17  ;;  %v33321_v7 = vsub.f32 %v33256_v63, %v31235_v17  ;;  %v33323_v35 = vsub.f32 %v33257_v21, %v31235_v17  ;;  %v33326_v52 = vsub.f32 %v33325_v30, %v31235_v17 }
0x117f   :  { %v31637_v25 = vmul.f32 %v31367_v45, %v33319_v62  ;;  %v31643_v36 = vmul.f32 %v31367_v45, %v33321_v7  ;;  %v31649_v16 = vmul.f32 %v31367_v45, %v33323_v35  ;;  %v31655_v44 = vmul.f32 %v31367_v45, %v33326_v52  ;;  %v33328_v62 = vld [vmem:[#allocation8_spill] sm:$0xff]  ;;  %v33331_v7 = vld [vmem:[#allocation23_spill] sm:$0xff]  ;;  %v33337_v52 = vld [vmem:[#allocation21_spill] sm:$0xff] }
0x1180   :  { %v33334_v35 = vld [vmem:[#allocation11_spill] sm:$0xff] }
0x1181   :  { %33320 = vst [vmem:[#allocation55_spill] sm:$0xff] %v31637_v25  ;;  %33322 = vst [vmem:[#allocation58_spill] sm:$0xff] %v31643_v36  ;;  %v33329_v25 = vsub.f32 %v33328_v62, %v31235_v17  ;;  %v33332_v36 = vsub.f32 %v33331_v7, %v31235_v17 }
0x1182   :  { %33324 = vst [vmem:[#allocation57_spill] sm:$0xff] %v31649_v16  ;;  %33327 = vst [vmem:[#allocation37_spill] sm:$0xff] %v31655_v44  ;;  %v33335_v16 = vsub.f32 %v33334_v35, %v31235_v17  ;;  %v33338_v44 = vsub.f32 %v33337_v52, %v31235_v17 }
0x1183   :  { %v31661_v63 = vmul.f32 %v31367_v45, %v33329_v25  ;;  %v31667_v21 = vmul.f32 %v31367_v45, %v33332_v36  ;;  %v33340_v25 = vld [vmem:[#allocation22_spill] sm:$0xff]  ;;  %v33343_v36 = vld [vmem:[#allocation24_spill] sm:$0xff] }
0x1184   :  { %v31673_v30 = vmul.f32 %v31367_v45, %v33335_v16  ;;  %v31679_v62 = vmul.f32 %v31367_v45, %v33338_v44  ;;  %v33345_v16 = vld [vmem:[#allocation20_spill] sm:$0xff]  ;;  %v33347_v44 = vld [vmem:[#allocation25_spill] sm:$0xff] }
0x1185   :  { %33330 = vst [vmem:[#allocation40_spill] sm:$0xff] %v31661_v63  ;;  %33333 = vst [vmem:[#allocation59_spill] sm:$0xff] %v31667_v21  ;;  %v33341_v63 = vsub.f32 %v33340_v25, %v31235_v17  ;;  %v33344_v21 = vsub.f32 %v33343_v36, %v31235_v17 }
0x1186   :  { %33336 = vst [vmem:[#allocation39_spill] sm:$0xff] %v31673_v30  ;;  %33339 = vst [vmem:[#allocation42_spill] sm:$0xff] %v31679_v62  ;;  %v33346_v30 = vsub.f32 %v33345_v16, %v31235_v17  ;;  %v33348_v62 = vsub.f32 %v33347_v44, %v31235_v17 }
0x1187   :  { %v31685_v7 = vmul.f32 %v31367_v45, %v33341_v63  ;;  %v31691_v35 = vmul.f32 %v31367_v45, %v33344_v21  ;;  %v33349_v63 = vld [vmem:[#allocation10_spill] sm:$0xff]  ;;  %v33351_v21 = vsub.f32 %v33268_v42, %v31235_v17 }
0x1188   :  { %v31697_v52 = vmul.f32 %v31367_v45, %v33346_v30  ;;  %v31703_v25 = vmul.f32 %v31367_v45, %v33348_v62  ;;  %v33352_v30 = vsub.f32 %v33269_v26, %v31235_v17  ;;  %v33353_v62 = vsub.f32 %v33270_v6, %v31235_v17 }
0x1189   :  { %33342 = vst [vmem:[#allocation41_spill] sm:$0xff] %v31685_v7  ;;  %v33350_v7 = vsub.f32 %v33349_v63, %v31235_v17  ;;  %v31715_v16 = vmul.f32 %v31367_v45, %v33351_v21  ;;  %v33356_v21 = vsub.f32 %v33272_v50, %v31235_v17  ;;  %v18222_v50 = vmax.f32 %v31385_v49, 0.0 }
0x118a   :  { %v31721_v44 = vmul.f32 %v31367_v45, %v33352_v30  ;;  %v31727_v63 = vmul.f32 %v31367_v45, %v33353_v62  ;;  %v33358_v30 = vsub.f32 %v33273_v10, %v31235_v17  ;;  %v33360_v62 = vsub.f32 %v33274_v13, %v31235_v17 }
0x118b   :  { %v31709_v36 = vmul.f32 %v31367_v45, %v33350_v7  ;;  %v33354_v7 = vsub.f32 %v33271_v19, %v31235_v17  ;;  %v31739_v26 = vmul.f32 %v31367_v45, %v33356_v21  ;;  %v18223_v21 = vmax.f32 %v31391_v40, 0.0  ;;  %18286 = vst.msk [vmem:[%s32080_s7 + $0x10] sm:$0xff] %vm17754_vm2, %v18222_v50 }
0x118c   :  { %v31745_v6 = vmul.f32 %v31367_v45, %v33358_v30  ;;  %v31751_v19 = vmul.f32 %v31367_v45, %v33360_v62  ;;  %v18225_v10 = vmax.f32 %v31403_v38, 0.0  ;;  %v18226_v30 = vmax.f32 %v31409_v15, 0.0 }
0x118d   :  { %v31733_v42 = vmul.f32 %v31367_v45, %v33354_v7  ;;  %33357 = vst [vmem:[#allocation45_spill] sm:$0xff] %v31739_v26  ;;  %v18220_v7 = vmax.f32 %v31373_v24, 0.0  ;;  %v18224_v26 = vmax.f32 %v31397_v22, 0.0  ;;  %v18228_v17 = vmax.f32 %v31421_v34, 0.0  ;;  %18287 = vst.msk [vmem:[%s32080_s7 + $0x18] sm:$0xff] %vm17754_vm2, %v18223_v21  ;;  %v33368_v62 = vld [vmem:[#allocation42_spill] sm:$0xff] }
0x118e   :  { %33359 = vst [vmem:[#allocation50_spill] sm:$0xff] %v31745_v6  ;;  %v18227_v6 = vmax.f32 %v31415_v39, 0.0  ;;  %v18229_v45 = vmax.f32 %v31427_v48, 0.0  ;;  %v18230_v24 = vmax.f32 %v31433_v53, 0.0  ;;  %v18232_v13 = vmax.f32 %v31445_v47, 0.0  ;;  %18289 = vst.msk [vmem:[%s32080_s7 + $0x28] sm:$0xff] %vm17754_vm2, %v18225_v10 }
0x118f   :  { %33355 = vst [vmem:[#allocation65_spill] sm:$0xff] %v31733_v42  ;;  %v18221_v42 = vmax.f32 %v31379_v14, 0.0  ;;  %v18231_v14 = vmax.f32 %v31439_v2, 0.0  ;;  %18284 = vst.msk [vmem:[%s32080_s7] sm:$0xff] %vm17754_vm2, %v18220_v7  ;;  %v18233_v49 = vmax.f32 %v31451_v55, 0.0  ;;  %v18234_v40 = vmax.f32 %v31457_v28, 0.0 }
0x1190   :  { %v18235_v22 = vmax.f32 %v31463_v18, 0.0  ;;  %18288 = vst.msk [vmem:[%s32080_s7 + $0x20] sm:$0xff] %vm17754_vm2, %v18224_v26  ;;  %18290 = vst.msk [vmem:[%s32080_s7 + $0x30] sm:$0xff] %vm17754_vm2, %v18226_v30  ;;  %v18236_v38 = vmax.f32 %v31469_v51, 0.0  ;;  %v18237_v15 = vmax.f32 %v31475_v27, 0.0  ;;  %v18238_v39 = vmax.f32 %v31481_v31, 0.0 }
0x1191   :  { %18285 = vst.msk [vmem:[%s32080_s7 + $0x8] sm:$0xff] %vm17754_vm2, %v18221_v42  ;;  %18291 = vst.msk [vmem:[%s32080_s7 + $0x38] sm:$0xff] %vm17754_vm2, %v18227_v6  ;;  %v18239_v34 = vmax.f32 %v31487_v0, 0.0  ;;  %v18240_v48 = vmax.f32 %v31493_v33, 0.0  ;;  %v18241_v53 = vmax.f32 %v31499_v3, 0.0  ;;  %v18242_v2 = vmax.f32 %v31505_v8, 0.0 }
0x1192   :  { %18292 = vst.msk [vmem:[%s32080_s7 + $0x40] sm:$0xff] %vm17754_vm2, %v18228_v17  ;;  %18293 = vst.msk [vmem:[%s32080_s7 + $0x48] sm:$0xff] %vm17754_vm2, %v18229_v45  ;;  %v18243_v47 = vmax.f32 %v31511_v37, 0.0  ;;  %v18244_v55 = vmax.f32 %v31517_v41, 0.0  ;;  %v18245_v28 = vmax.f32 %v31523_v11, 0.0  ;;  %v18246_v18 = vmax.f32 %v31529_v54, 0.0 }
0x1193   :  { %18294 = vst.msk [vmem:[%s32080_s7 + $0x50] sm:$0xff] %vm17754_vm2, %v18230_v24  ;;  %18295 = vst.msk [vmem:[%s32080_s7 + $0x58] sm:$0xff] %vm17754_vm2, %v18231_v14  ;;  %v18247_v51 = vmax.f32 %v31535_v29, 0.0  ;;  %v18248_v27 = vmax.f32 %v31541_v46, 0.0  ;;  %v18249_v31 = vmax.f32 %v31547_v61, 0.0  ;;  %v18250_v0 = vmax.f32 %v31553_v60, 0.0 }
0x1194   :  { %18296 = vst.msk [vmem:[%s32080_s7 + $0x60] sm:$0xff] %vm17754_vm2, %v18232_v13  ;;  %18297 = vst.msk [vmem:[%s32080_s7 + $0x68] sm:$0xff] %vm17754_vm2, %v18233_v49  ;;  %v18251_v33 = vmax.f32 %v31559_v12, 0.0  ;;  %v18252_v3 = vmax.f32 %v31565_v23, 0.0  ;;  %v18253_v8 = vmax.f32 %v31571_v9, 0.0  ;;  %v18254_v37 = vmax.f32 %v31577_v5, 0.0 }
0x1195   :  { %18298 = vst.msk [vmem:[%s32080_s7 + $0x70] sm:$0xff] %vm17754_vm2, %v18234_v40  ;;  %18299 = vst.msk [vmem:[%s32080_s7 + $0x78] sm:$0xff] %vm17754_vm2, %v18235_v22  ;;  %v18255_v41 = vmax.f32 %v31583_v57, 0.0  ;;  %v18256_v11 = vmax.f32 %v31589_v56, 0.0  ;;  %v18257_v54 = vmax.f32 %v31595_v43, 0.0  ;;  %v18258_v29 = vmax.f32 %v31601_v59, 0.0 }
0x1196   :  { %18300 = vst.msk [vmem:[%s32080_s7 + $0x80] sm:$0xff] %vm17754_vm2, %v18236_v38  ;;  %18301 = vst.msk [vmem:[%s32080_s7 + $0x88] sm:$0xff] %vm17754_vm2, %v18237_v15  ;;  %v18259_v46 = vmax.f32 %v31607_v4, 0.0  ;;  %v18260_v61 = vmax.f32 %v31613_v20, 0.0  ;;  %v18261_v60 = vmax.f32 %v31619_v1, 0.0  ;;  %v18262_v12 = vmax.f32 %v31625_v32, 0.0 }
0x1197   :  { %18302 = vst.msk [vmem:[%s32080_s7 + $0x90] sm:$0xff] %vm17754_vm2, %v18238_v39  ;;  %18303 = vst.msk [vmem:[%s32080_s7 + $0x98] sm:$0xff] %vm17754_vm2, %v18239_v34  ;;  %v18263_v23 = vmax.f32 %v31631_v58, 0.0  ;;  %v33361_v9 = vld [vmem:[#allocation55_spill] sm:$0xff]  ;;  %v33362_v57 = vld [vmem:[#allocation58_spill] sm:$0xff]  ;;  %v18271_v7 = vmax.f32 %v33368_v62, 0.0 }
0x1198   :  { %18304 = vst.msk [vmem:[%s32080_s7 + $0xa0] sm:$0xff] %vm17754_vm2, %v18240_v48  ;;  %18305 = vst.msk [vmem:[%s32080_s7 + $0xa8] sm:$0xff] %vm17754_vm2, %v18241_v53  ;;  %v18264_v5 = vmax.f32 %v33361_v9, 0.0  ;;  %v18265_v56 = vmax.f32 %v33362_v57, 0.0  ;;  %v33363_v43 = vld [vmem:[#allocation57_spill] sm:$0xff]  ;;  %v33365_v1 = vld [vmem:[#allocation40_spill] sm:$0xff] }
0x1199   :  { %18306 = vst.msk [vmem:[%s32080_s7 + $0xb0] sm:$0xff] %vm17754_vm2, %v18242_v2  ;;  %18307 = vst.msk [vmem:[%s32080_s7 + $0xb8] sm:$0xff] %vm17754_vm2, %v18243_v47  ;;  %v18266_v59 = vmax.f32 %v33363_v43, 0.0  ;;  %v33364_v4 = vld [vmem:[#allocation37_spill] sm:$0xff]  ;;  %v18268_v32 = vmax.f32 %v33365_v1, 0.0  ;;  %v33366_v58 = vld [vmem:[#allocation59_spill] sm:$0xff] }
0x119a   :  { %18308 = vst.msk [vmem:[%s32080_s7 + $0xc0] sm:$0xff] %vm17754_vm2, %v18244_v55  ;;  %18309 = vst.msk [vmem:[%s32080_s7 + $0xc8] sm:$0xff] %vm17754_vm2, %v18245_v28  ;;  %v18267_v20 = vmax.f32 %v33364_v4, 0.0  ;;  %v18269_v42 = vmax.f32 %v33366_v58, 0.0  ;;  %v33367_v26 = vld [vmem:[#allocation39_spill] sm:$0xff]  ;;  %v33369_v50 = vld [vmem:[#allocation41_spill] sm:$0xff] }
0x119b   :  { %18310 = vst.msk [vmem:[%s32080_s7 + $0xd0] sm:$0xff] %vm17754_vm2, %v18246_v18  ;;  %18311 = vst.msk [vmem:[%s32080_s7 + $0xd8] sm:$0xff] %vm17754_vm2, %v18247_v51  ;;  %v18270_v6 = vmax.f32 %v33367_v26, 0.0  ;;  %v18272_v21 = vmax.f32 %v33369_v50, 0.0  ;;  %v18273_v10 = vmax.f32 %v31691_v35, 0.0  ;;  %v18274_v30 = vmax.f32 %v31697_v52, 0.0 }
0x119c   :  { %18312 = vst.msk [vmem:[%s32080_s7 + $0xe0] sm:$0xff] %vm17754_vm2, %v18248_v27  ;;  %18313 = vst.msk [vmem:[%s32080_s7 + $0xe8] sm:$0xff] %vm17754_vm2, %v18249_v31  ;;  %v18275_v17 = vmax.f32 %v31703_v25, 0.0  ;;  %v18276_v35 = vmax.f32 %v31709_v36, 0.0  ;;  %v18277_v52 = vmax.f32 %v31715_v16, 0.0  ;;  %v18278_v25 = vmax.f32 %v31721_v44, 0.0 }
0x119d   :  { %18314 = vst.msk [vmem:[%s32080_s7 + $0xf0] sm:$0xff] %vm17754_vm2, %v18250_v0  ;;  %18315 = vst.msk [vmem:[%s32080_s7 + $0xf8] sm:$0xff] %vm17754_vm2, %v18251_v33  ;;  %v18279_v45 = vmax.f32 %v31727_v63, 0.0  ;;  %v33370_v36 = vld [vmem:[#allocation65_spill] sm:$0xff]  ;;  %v33372_v24 = vld [vmem:[#allocation50_spill] sm:$0xff]  ;;  %v18283_v13 = vmax.f32 %v31751_v19, 0.0 }
0x119e   :  { %18316 = vst.msk [vmem:[%s32080_s7 + $0x100] sm:$0xff] %vm17754_vm2, %v18252_v3  ;;  %18317 = vst.msk [vmem:[%s32080_s7 + $0x108] sm:$0xff] %vm17754_vm2, %v18253_v8  ;;  %v18280_v16 = vmax.f32 %v33370_v36, 0.0  ;;  %v33371_v44 = vld [vmem:[#allocation45_spill] sm:$0xff]  ;;  %v18282_v14 = vmax.f32 %v33372_v24, 0.0 }
0x119f   :  { %18318 = vst.msk [vmem:[%s32080_s7 + $0x110] sm:$0xff] %vm17754_vm2, %v18254_v37  ;;  %18319 = vst.msk [vmem:[%s32080_s7 + $0x118] sm:$0xff] %vm17754_vm2, %v18255_v41  ;;  %v18281_v63 = vmax.f32 %v33371_v44, 0.0 }
0x11a0   :  { %18320 = vst.msk [vmem:[%s32080_s7 + $0x120] sm:$0xff] %vm17754_vm2, %v18256_v11  ;;  %18321 = vst.msk [vmem:[%s32080_s7 + $0x128] sm:$0xff] %vm17754_vm2, %v18257_v54 }
0x11a1   :  { %18322 = vst.msk [vmem:[%s32080_s7 + $0x130] sm:$0xff] %vm17754_vm2, %v18258_v29  ;;  %18323 = vst.msk [vmem:[%s32080_s7 + $0x138] sm:$0xff] %vm17754_vm2, %v18259_v46 }
0x11a2   :  { %18324 = vst.msk [vmem:[%s32080_s7 + $0x140] sm:$0xff] %vm17754_vm2, %v18260_v61  ;;  %18325 = vst.msk [vmem:[%s32080_s7 + $0x148] sm:$0xff] %vm17754_vm2, %v18261_v60 }
0x11a3   :  { %18326 = vst.msk [vmem:[%s32080_s7 + $0x150] sm:$0xff] %vm17754_vm2, %v18262_v12  ;;  %18327 = vst.msk [vmem:[%s32080_s7 + $0x158] sm:$0xff] %vm17754_vm2, %v18263_v23 }
0x11a4   :  { %18328 = vst.msk [vmem:[%s32080_s7 + $0x160] sm:$0xff] %vm17754_vm2, %v18264_v5  ;;  %18329 = vst.msk [vmem:[%s32080_s7 + $0x168] sm:$0xff] %vm17754_vm2, %v18265_v56 }
0x11a5   :  { %18330 = vst.msk [vmem:[%s32080_s7 + $0x170] sm:$0xff] %vm17754_vm2, %v18266_v59  ;;  %18331 = vst.msk [vmem:[%s32080_s7 + $0x178] sm:$0xff] %vm17754_vm2, %v18267_v20 }
0x11a6   :  { %18332 = vst.msk [vmem:[%s32080_s7 + $0x180] sm:$0xff] %vm17754_vm2, %v18268_v32  ;;  %18333 = vst.msk [vmem:[%s32080_s7 + $0x188] sm:$0xff] %vm17754_vm2, %v18269_v42 }
0x11a7   :  { %18334 = vst.msk [vmem:[%s32080_s7 + $0x190] sm:$0xff] %vm17754_vm2, %v18270_v6  ;;  %18335 = vst.msk [vmem:[%s32080_s7 + $0x198] sm:$0xff] %vm17754_vm2, %v18271_v7 }
0x11a8   :  { %18336 = vst.msk [vmem:[%s32080_s7 + $0x1a0] sm:$0xff] %vm17754_vm2, %v18272_v21  ;;  %18337 = vst.msk [vmem:[%s32080_s7 + $0x1a8] sm:$0xff] %vm17754_vm2, %v18273_v10 }
0x11a9   :  { %18338 = vst.msk [vmem:[%s32080_s7 + $0x1b0] sm:$0xff] %vm17754_vm2, %v18274_v30  ;;  %18339 = vst.msk [vmem:[%s32080_s7 + $0x1b8] sm:$0xff] %vm17754_vm2, %v18275_v17 }
0x11aa   :  { %18340 = vst.msk [vmem:[%s32080_s7 + $0x1c0] sm:$0xff] %vm17754_vm2, %v18276_v35  ;;  %18341 = vst.msk [vmem:[%s32080_s7 + $0x1c8] sm:$0xff] %vm17754_vm2, %v18277_v52 }
0x11ab   :  { %18342 = vst.msk [vmem:[%s32080_s7 + $0x1d0] sm:$0xff] %vm17754_vm2, %v18278_v25  ;;  %18343 = vst.msk [vmem:[%s32080_s7 + $0x1d8] sm:$0xff] %vm17754_vm2, %v18279_v45 }
0x11ac   :  { %18344 = vst.msk [vmem:[%s32080_s7 + $0x1e0] sm:$0xff] %vm17754_vm2, %v18280_v16  ;;  %18345 = vst.msk [vmem:[%s32080_s7 + $0x1e8] sm:$0xff] %vm17754_vm2, %v18281_v63 }
0x11ad   :  { %18346 = vst.msk [vmem:[%s32080_s7 + $0x1f0] sm:$0xff] %vm17754_vm2, %v18282_v14  ;;  %18347 = vst.msk [vmem:[%s32080_s7 + $0x1f8] sm:$0xff] %vm17754_vm2, %v18283_v13 }

</bundles_post_ra>
